<compile_context>
chip_gen: v7x
topology: tpu7x:2x2x1
jax: 0.10.0
libtpu: 0.0.40
codegen_flags: <defaults>
</compile_context>

<pallas_src>
import functools

import jax
import jax.numpy as jnp
from jax.experimental import pallas as pl
from jax.experimental.pallas import tpu as pltpu


# ----------------------------------------------------------------------------
# Kernels
# ----------------------------------------------------------------------------

def _conv_fwd_kernel(*args, K, pool_input, has_skip):
    """Causal Conv1d (left pad K-1) over a (batch, time-tile) grid.

    Fused options:
      * pool_input : x block is (1, TL, 2, Cx) raw rows; MaxPool1d(2) is applied
                     in-kernel before the conv (pooled tensor never hits HBM).
      * has_skip   : second input + split weights implement the channel concat
                     conv(cat([x, skip])) == x @ w_x + skip @ w_s.

    The K-1 rows of causal left context are carried across time tiles in VMEM
    scratch (cx_ref / cs_ref), zero-initialised at the first tile of each batch
    element (== zero left padding).  Time axis must therefore be 'arbitrary'.
    """
    if has_skip:
        x_ref, s_ref, wx_ref, ws_ref, b_ref, o_ref, cx_ref, cs_ref = args
    else:
        x_ref, wx_ref, b_ref, o_ref, cx_ref = args
        s_ref = ws_ref = cs_ref = None

    t = pl.program_id(1)

    @pl.when(t == 0)
    def _init_carry():                                   # causal zero left-pad
        cx_ref[...] = jnp.zeros_like(cx_ref)
        if has_skip:
            cs_ref[...] = jnp.zeros_like(cs_ref)

    if pool_input:
        x4 = x_ref[0]                                    # (TL, 2, Cx) raw rows
        xt = jnp.maximum(x4[:, 0, :], x4[:, 1, :])       # fused MaxPool1d(2)
    else:
        xt = x_ref[0]                                    # (TL, Cx)
    TL = xt.shape[0]

    # xp[m] == x[t*TL - (K-1) + m]; the carry supplies the cross-tile halo.
    xp = jnp.concatenate([cx_ref[...], xt], axis=0)      # (TL + K - 1, Cx)
    acc = jnp.dot(xp[0:TL], wx_ref[0], preferred_element_type=jnp.float32)
    for k in range(1, K):                                # static tap unroll
        acc = acc + jnp.dot(xp[k:k + TL], wx_ref[k],
                            preferred_element_type=jnp.float32)

    if has_skip:
        st = s_ref[0]                                    # (TL, Cs)
        sp = jnp.concatenate([cs_ref[...], st], axis=0)
        for k in range(K):
            acc = acc + jnp.dot(sp[k:k + TL], ws_ref[k],
                                preferred_element_type=jnp.float32)
        cs_ref[...] = st[TL - (K - 1):TL, :]             # skip halo for next tile

    cx_ref[...] = xt[TL - (K - 1):TL, :]                 # x halo for next tile

    o_ref[0] = (acc + b_ref[...]).astype(o_ref.dtype)


def _deconv_up2_kernel(x_ref, xnext_ref, w_ref, b_ref, o_ref):
    """ConvTranspose1d(k=3, stride=2, padding=1, output_padding=1).

        out[2j]   = x[j]   @ w[1] + b
        out[2j+1] = x[j+1] @ w[0] + x[j] @ w[2] + b        (x[L] := 0)

    Both phases are written lane-paired into a (1, TL, 2*Cout) block; the time
    interleave to (N, 2L, Cout) is a free row-major reshape in the wrapper.
    xnext_ref is the (clamped) next time tile; only its first row is used, and
    it is zeroed on the last tile so that x[L] == 0.
    """
    t = pl.program_id(1)
    x = x_ref[0]                                         # (TL, Cin)
    TL = x.shape[0]
    nxt = xnext_ref[0, 0:1, :]                           # (1, Cin)
    is_last = t == pl.num_programs(1) - 1
    nxt = jnp.where(is_last, jnp.zeros_like(nxt), nxt)
    x_shift = jnp.concatenate([x[1:TL], nxt], axis=0)    # x[j+1] inside the tile
    b = b_ref[...]
    even = jnp.dot(x, w_ref[1], preferred_element_type=jnp.float32) + b
    odd = (jnp.dot(x_shift, w_ref[0], preferred_element_type=jnp.float32)
           + jnp.dot(x, w_ref[2], preferred_element_type=jnp.float32) + b)
    o_ref[0] = jnp.concatenate([even, odd], axis=-1)     # lane-paired (TL, 2*Cout)


# ----------------------------------------------------------------------------
# Wrappers
# ----------------------------------------------------------------------------

def _time_tile(length, cap):
    """Time tile: the whole (short) sequence, or `cap` rows when tiling."""
    if length <= cap:
        return length
    if length % cap:
        raise ValueError(f"sequence length {length} not a multiple of tile cap {cap}")
    return cap


def conv_block(x, w, b, *, skip=None, w_skip=None, pool_input=False, tile_cap=2048):
    """Fused causal Conv1d == torch Conv1d(padding=K-1) followed by [:, :, :-(K-1)].

    x: (N, Lx, Cx); skip: (N, Lout, Cs); w: (K, Cx, Cout); w_skip: (K, Cs, Cout);
    b: (1, Cout).  Returns (N, Lout, Cout), Lout = Lx // 2 if pool_input else Lx.
    """
    N, Lx, Cx = x.shape
    K, _, Cout = w.shape
    Lout = Lx // 2 if pool_input else Lx
    TL = _time_tile(Lout, tile_cap)
    T = Lout // TL

    operands, in_specs = [], []
    if pool_input:
        xr = x.reshape(N, Lout, 2, Cx)          # free row-major view: adjacent pairs
        operands.append(xr)
        in_specs.append(pl.BlockSpec((1, TL, 2, Cx), lambda n, t: (n, t, 0, 0)))
    else:
        operands.append(x)
        in_specs.append(pl.BlockSpec((1, TL, Cx), lambda n, t: (n, t, 0)))

    has_skip = skip is not None
    if has_skip:
        Cs = skip.shape[-1]
        assert skip.shape == (N, Lout, Cs), (skip.shape, (N, Lout, Cs))
        operands.append(skip)
        in_specs.append(pl.BlockSpec((1, TL, Cs), lambda n, t: (n, t, 0)))

    operands.append(w)
    in_specs.append(pl.BlockSpec((K, Cx, Cout), lambda n, t: (0, 0, 0)))
    if has_skip:
        operands.append(w_skip)
        in_specs.append(pl.BlockSpec((K, Cs, Cout), lambda n, t: (0, 0, 0)))
    operands.append(b)
    in_specs.append(pl.BlockSpec((1, Cout), lambda n, t: (0, 0)))

    scratch = [pltpu.VMEM((K - 1, Cx), jnp.float32)]      # causal halo carry (x)
    if has_skip:
        scratch.append(pltpu.VMEM((K - 1, Cs), jnp.float32))  # halo carry (skip)

    kernel = functools.partial(_conv_fwd_kernel, K=K,
                               pool_input=pool_input, has_skip=has_skip)
    return pl.pallas_call(
        kernel,
        out_shape=jax.ShapeDtypeStruct((N, Lout, Cout), jnp.float32),
        grid=(N, T),
        in_specs=in_specs,
        out_specs=pl.BlockSpec((1, TL, Cout), lambda n, t: (n, t, 0)),
        scratch_shapes=scratch,
        compiler_params=pltpu.CompilerParams(
            # batch tiles are independent (megacore-shardable); the time axis
            # carries the K-1-row halo in scratch, so it must stay sequential.
            dimension_semantics=("parallel", "arbitrary")),
    )(*operands)


def deconv_up2_block(x, w, b, *, tile_cap=2048):
    """ConvTranspose1d(k=3, stride=2, padding=1, output_padding=1), channel-last.

    x: (N, L, Cin); w: (K=3, Cin, Cout); b: (1, Cout).  Returns (N, 2L, Cout).
    """
    N, L, Cin = x.shape
    K, _, Cout = w.shape
    TL = _time_tile(L, tile_cap)
    T = L // TL
    out = pl.pallas_call(
        _deconv_up2_kernel,
        out_shape=jax.ShapeDtypeStruct((N, L, 2 * Cout), jnp.float32),
        grid=(N, T),
        in_specs=[
            pl.BlockSpec((1, TL, Cin), lambda n, t: (n, t, 0)),
            # one-tile lookahead (clamped at the last tile; its head row is
            # zeroed in-kernel to realise x[L] == 0)
            pl.BlockSpec((1, TL, Cin), lambda n, t: (n, jnp.minimum(t + 1, T - 1), 0)),
            pl.BlockSpec((K, Cin, Cout), lambda n, t: (0, 0, 0)),
            pl.BlockSpec((1, Cout), lambda n, t: (0, 0)),
        ],
        out_specs=pl.BlockSpec((1, TL, 2 * Cout), lambda n, t: (n, t, 0)),
        compiler_params=pltpu.CompilerParams(
            dimension_semantics=("parallel", "parallel")),
    )(x, x, w, b)
    # lane-paired (N, L, 2*Cout) -> interleaved (N, 2L, Cout): zero-copy view.
    return out.reshape(N, 2 * L, Cout)


# ----------------------------------------------------------------------------
# Parameter preparation (layout transforms + algebraic / skip fusions)
# ----------------------------------------------------------------------------

def _prepare_params(tp):
    """Torch-layout params -> kernel layouts:
       conv w (Cout, Cin, K) -> (K, Cin, Cout); deconv w (Cin, Cout, K) -> (K, Cin, Cout);
       skip-channel splits for conv6-9; exact conv9+conv10 fusion."""
    f32 = jnp.float32
    p = {}
    for i, cout, split in [(1, 32, None), (2, 128, None), (3, 64, None),
                           (4, 64, None), (5, 64, None),
                           (6, 64, 64), (7, 128, 64), (8, 128, 128)]:
        wk = jnp.transpose(tp[f'conv{i}_w'], (2, 1, 0)).astype(f32)   # (K, Cin, Cout)
        p[f'c{i}_b'] = tp[f'conv{i}_b'].astype(f32).reshape(1, cout)
        if split is None:
            p[f'c{i}_w'] = wk
        else:                      # decoder: cat([x_up, skip]) order matches Cin order
            p[f'c{i}_wx'] = wk[:, :split, :]
            p[f'c{i}_ws'] = wk[:, split:, :]
    # conv9 (160->40, k=3) + conv10 (40->2, k=1, pointwise) fuse exactly.
    wk9 = jnp.transpose(tp['conv9_w'], (2, 1, 0)).astype(f32)          # (3, 160, 40)
    m10 = tp['conv10_w'][:, :, 0].astype(f32).T                        # (40, 2)
    w910 = jnp.einsum('kio,oc->kic', wk9, m10)                         # (3, 160, 2)
    b910 = tp['conv9_b'].astype(f32) @ m10 + tp['conv10_b'].astype(f32)
    p['c910_wx'] = w910[:, :128, :]      # channels from upsample4 output
    p['c910_ws'] = w910[:, 128:, :]      # channels from skip1
    p['c910_b'] = b910.reshape(1, 2)
    for j, cout in [(1, 64), (2, 64), (3, 128), (4, 128)]:
        p[f'u{j}_w'] = jnp.transpose(tp[f'up{j}_w'], (2, 0, 1)).astype(f32)  # (K, Cin, Cout)
        p[f'u{j}_b'] = tp[f'up{j}_b'].astype(f32).reshape(1, cout)
    return p


# ----------------------------------------------------------------------------
# CnnMusic forward
# ----------------------------------------------------------------------------

def cnn_music_forward(x_ncw, params, *, tile_cap=2048):
    """x_ncw: (N, 3, L) float32 in PyTorch NCW. Returns (N, 2, L)."""
    N, C, L = x_ncw.shape
    if C != 3:
        raise ValueError(f"expected 3 input channels, got {C}")
    if L % 16 or L < 32:
        raise ValueError("L must be a multiple of 16 and >= 32 for the 4 pools")
    if tile_cap % 16:
        raise ValueError("tile_cap must be a multiple of 16")

    p = _prepare_params(params)
    x = jnp.transpose(x_ncw, (0, 2, 1))                                   # (N, L, 3)

    # Encoder: conv1-4 outputs (full rate) are the skips; the pools are fused
    # into the input stage of the following conv (conv2-5).
    skip1 = conv_block(x,     p['c1_w'], p['c1_b'], tile_cap=tile_cap)                  # (N, L,    32)
    skip2 = conv_block(skip1, p['c2_w'], p['c2_b'], pool_input=True, tile_cap=tile_cap)  # (N, L/2, 128)
    skip3 = conv_block(skip2, p['c3_w'], p['c3_b'], pool_input=True, tile_cap=tile_cap)  # (N, L/4,  64)
    skip4 = conv_block(skip3, p['c4_w'], p['c4_b'], pool_input=True, tile_cap=tile_cap)  # (N, L/8,  64)
    x5    = conv_block(skip4, p['c5_w'], p['c5_b'], pool_input=True, tile_cap=tile_cap)  # (N, L/16, 64)

    # Decoder: skip concats are fused into the convs via split weights.
    u1 = deconv_up2_block(x5, p['u1_w'], p['u1_b'], tile_cap=tile_cap)                  # (N, L/8,  64)
    x6 = conv_block(u1, p['c6_wx'], p['c6_b'], skip=skip4, w_skip=p['c6_ws'],
                    tile_cap=tile_cap)                                                  # (N, L/8,  64)

    u2 = deconv_up2_block(x6, p['u2_w'], p['u2_b'], tile_cap=tile_cap)                  # (N, L/4,  64)
    x7 = conv_block(u2, p['c7_wx'], p['c7_b'], skip=skip3, w_skip=p['c7_ws'],
                    tile_cap=tile_cap)                                                  # (N, L/4, 128)

    u3 = deconv_up2_block(x7, p['u3_w'], p['u3_b'], tile_cap=tile_cap)                  # (N, L/2, 128)
    x8 = conv_block(u3, p['c8_wx'], p['c8_b'], skip=skip2, w_skip=p['c8_ws'],
                    tile_cap=tile_cap)                                                  # (N, L/2, 128)

    u4 = deconv_up2_block(x8, p['u4_w'], p['u4_b'], tile_cap=tile_cap)                  # (N, L,   128)
    # conv9 + conv10 fused into a single causal K=3 conv 160->2 (skip1 fused in).
    y = conv_block(u4, p['c910_wx'], p['c910_b'], skip=skip1, w_skip=p['c910_ws'],
                   tile_cap=tile_cap)                                                   # (N, L, 2)

    return jnp.transpose(y, (0, 2, 1))                                                  # (N, 2, L)


# ----------------------------------------------------------------------------
# Deterministic parameter init (shapes from the PyTorch __init__)
# ----------------------------------------------------------------------------

def init_params(seed=0):
    conv_shapes = {   # (Cout, Cin, K) — torch Conv1d weight layout
        'conv1': (32, 3, 3),    'conv2': (128, 32, 3),  'conv3': (64, 128, 3),
        'conv4': (64, 64, 3),   'conv5': (64, 64, 3),   'conv6': (64, 128, 3),
        'conv7': (128, 128, 3), 'conv8': (128, 256, 3), 'conv9': (40, 160, 3),
        'conv10': (2, 40, 1),
    }
    deconv_shapes = {  # (Cin, Cout, K) — torch ConvTranspose1d weight layout
        'up1': (64, 64, 3), 'up2': (64, 64, 3), 'up3': (128, 128, 3), 'up4': (128, 128, 3),
    }
    params = {}
    key = jax.random.PRNGKey(seed)
    for name, shp in {**conv_shapes, **deconv_shapes}.items():
        key, kw, kb = jax.random.split(key, 3)
        if name.startswith('conv'):
            fan_in, bias_dim = shp[1] * shp[2], shp[0]
        else:
            fan_in, bias_dim = shp[0] * shp[2], shp[1]
        bound = 1.0 / (fan_in ** 0.5)
        params[name + '_w'] = jax.random.uniform(kw, shp, jnp.float32, -bound, bound)
        params[name + '_b'] = jax.random.uniform(kb, (bias_dim,), jnp.float32, -bound, bound)
    return params


if __name__ == "__main__":
    N, Cin, L = 2, 3, 64            # L must be a multiple of 16 (4 pool stages)
    params = init_params(seed=0)
    x = jax.random.normal(jax.random.PRNGKey(0), (N, Cin, L), jnp.float32)

    # Default tile cap (single time tile at this small L).
    fwd = jax.jit(functools.partial(cnn_music_forward, tile_cap=2048))
    out = jax.block_until_ready(fwd(x, params))
    assert out.shape == (N, 2, L), out.shape

    # Exercise the multi-tile path (carried causal halo, cross-tile deconv
    # lookahead) with a tiny time tile and check it matches the single-tile run.
    fwd_tiled = jax.jit(functools.partial(cnn_music_forward, tile_cap=16))
    out_tiled = jax.block_until_ready(fwd_tiled(x, params))
    max_diff = float(jnp.max(jnp.abs(out - out_tiled)))
    assert max_diff < 1e-3, f"tiled vs single-tile mismatch: {max_diff}"

    print("KERNEL_OK")
</pallas_src>

<mosaic_0001>
module attributes {stable_mosaic.version = 11 : i64} {
  func.func @_conv_fwd_kernel(%arg0: i32, %arg1: i32, %arg2: memref<1x32x2x32xf32, #tpu.memory_space<vmem>>, %arg3: memref<3x32x128xf32, #tpu.memory_space<vmem>>, %arg4: memref<1x128xf32, #tpu.memory_space<vmem>>, %arg5: memref<1x32x128xf32, #tpu.memory_space<vmem>>, %arg6: memref<2x32xf32, #tpu.memory_space<vmem>>) attributes {dimension_semantics = [#tpu.dimension_semantics<parallel>, #tpu.dimension_semantics<arbitrary>], iteration_bounds = array<i64: 2, 1>, scalar_prefetch = 0 : i64, scratch_operands = 1 : i64, tpu.core_type = #tpu.core_type<tc>, window_params = [{transform_indices = @transform_0, window_bounds = array<i64: 1, 32, 2, 32>}, {pipeline_mode = #tpu.pipeline_mode<synchronous>, transform_indices = @transform_1, window_bounds = array<i64: 3, 32, 128>}, {pipeline_mode = #tpu.pipeline_mode<synchronous>, transform_indices = @transform_2, window_bounds = array<i64: 1, 128>}, {transform_indices = @transform_3, window_bounds = array<i64: 1, 32, 128>}]} {
    %c0_i32 = arith.constant 0 : i32
    %0 = arith.cmpi eq, %arg1, %c0_i32 : i32
    %1 = arith.extui %0 : i1 to i32
    %c0_i32_0 = arith.constant 0 : i32
    %2 = arith.cmpi ne, %1, %c0_i32_0 : i32
    scf.if %2 {
      %cst_22 = arith.constant 0.000000e+00 : f32
      %34 = vector.broadcast %cst_22 : f32 to vector<2x32xf32>
      %c0_23 = arith.constant 0 : index
      %c0_24 = arith.constant 0 : index
      %35 = vector.load %arg6[%c0_23, %c0_24] : memref<2x32xf32, #tpu.memory_space<vmem>>, vector<2x32xf32>
      tpu.vector_store %arg6[%c0_23, %c0_24], %34 {strides = array<i32>} : memref<2x32xf32, #tpu.memory_space<vmem>>, vector<2x32xf32>,
    } else {
    }
    %c0 = arith.constant 0 : index
    %c0_1 = arith.constant 0 : index
    %c0_2 = arith.constant 0 : index
    %c0_3 = arith.constant 0 : index
    %3 = vector.load %arg2[%c0, %c0_1, %c0_2, %c0_3] : memref<1x32x2x32xf32, #tpu.memory_space<vmem>>, vector<1x32x2x32xf32>
    %4 = vector.shape_cast %3 : vector<1x32x2x32xf32> to vector<32x2x32xf32>
    %5 = vector.extract_strided_slice %4 {offsets = [0, 0, 0], sizes = [32, 1, 32], strides = [1, 1, 1]} : vector<32x2x32xf32> to vector<32x1x32xf32>
    %6 = vector.shape_cast %5 : vector<32x1x32xf32> to vector<32x32xf32>
    %7 = vector.extract_strided_slice %4 {offsets = [0, 1, 0], sizes = [32, 1, 32], strides = [1, 1, 1]} : vector<32x2x32xf32> to vector<32x1x32xf32>
    %8 = vector.shape_cast %7 : vector<32x1x32xf32> to vector<32x32xf32>
    %9 = arith.maximumf %6, %8 : vector<32x32xf32>
    %c0_4 = arith.constant 0 : index
    %c0_5 = arith.constant 0 : index
    %10 = vector.load %arg6[%c0_4, %c0_5] : memref<2x32xf32, #tpu.memory_space<vmem>>, vector<2x32xf32>
    %11 = tpu.concatenate %10, %9 in 0 : vector<2x32xf32>, vector<32x32xf32> -> vector<34x32xf32>
    %12 = vector.extract_strided_slice %11 {offsets = [0, 0], sizes = [32, 32], strides = [1, 1]} : vector<34x32xf32> to vector<32x32xf32>
    %c0_6 = arith.constant 0 : index
    %c0_7 = arith.constant 0 : index
    %c0_8 = arith.constant 0 : index
    %13 = vector.load %arg3[%c0_6, %c0_7, %c0_8] : memref<3x32x128xf32, #tpu.memory_space<vmem>>, vector<1x32x128xf32>
    %14 = vector.shape_cast %13 : vector<1x32x128xf32> to vector<32x128xf32>
    %cst = arith.constant dense<0.000000e+00> : vector<32x128xf32>
    %15 = tpu.matmul %12, %14, %cst {dimension_numbers = #tpu.dot_dimension_numbers<[1], [0], [0], [1], [0, 0, 1, 1], [], []>} : vector<32x32xf32>, vector<32x128xf32>, vector<32x128xf32> -> vector<32x128xf32>
    %16 = vector.extract_strided_slice %11 {offsets = [1, 0], sizes = [32, 32], strides = [1, 1]} : vector<34x32xf32> to vector<32x32xf32>
    %c1 = arith.constant 1 : index
    %c0_9 = arith.constant 0 : index
    %c0_10 = arith.constant 0 : index
    %17 = vector.load %arg3[%c1, %c0_9, %c0_10] : memref<3x32x128xf32, #tpu.memory_space<vmem>>, vector<1x32x128xf32>
    %18 = vector.shape_cast %17 : vector<1x32x128xf32> to vector<32x128xf32>
    %cst_11 = arith.constant dense<0.000000e+00> : vector<32x128xf32>
    %19 = tpu.matmul %16, %18, %cst_11 {dimension_numbers = #tpu.dot_dimension_numbers<[1], [0], [0], [1], [0, 0, 1, 1], [], []>} : vector<32x32xf32>, vector<32x128xf32>, vector<32x128xf32> -> vector<32x128xf32>
    %20 = arith.addf %15, %19 : vector<32x128xf32>
    %21 = vector.extract_strided_slice %11 {offsets = [2, 0], sizes = [32, 32], strides = [1, 1]} : vector<34x32xf32> to vector<32x32xf32>
    %c2 = arith.constant 2 : index
    %c0_12 = arith.constant 0 : index
    %c0_13 = arith.constant 0 : index
    %22 = vector.load %arg3[%c2, %c0_12, %c0_13] : memref<3x32x128xf32, #tpu.memory_space<vmem>>, vector<1x32x128xf32>
    %23 = vector.shape_cast %22 : vector<1x32x128xf32> to vector<32x128xf32>
    %cst_14 = arith.constant dense<0.000000e+00> : vector<32x128xf32>
    %24 = tpu.matmul %21, %23, %cst_14 {dimension_numbers = #tpu.dot_dimension_numbers<[1], [0], [0], [1], [0, 0, 1, 1], [], []>} : vector<32x32xf32>, vector<32x128xf32>, vector<32x128xf32> -> vector<32x128xf32>
    %25 = arith.addf %20, %24 : vector<32x128xf32>
    %26 = vector.extract_strided_slice %9 {offsets = [30, 0], sizes = [2, 32], strides = [1, 1]} : vector<32x32xf32> to vector<2x32xf32>
    %c0_15 = arith.constant 0 : index
    %c0_16 = arith.constant 0 : index
    %27 = vector.load %arg6[%c0_15, %c0_16] : memref<2x32xf32, #tpu.memory_space<vmem>>, vector<2x32xf32>
    tpu.vector_store %arg6[%c0_15, %c0_16], %26 {strides = array<i32>} : memref<2x32xf32, #tpu.memory_space<vmem>>, vector<2x32xf32>,
    %c0_17 = arith.constant 0 : index
    %c0_18 = arith.constant 0 : index
    %28 = vector.load %arg4[%c0_17, %c0_18] : memref<1x128xf32, #tpu.memory_space<vmem>>, vector<1x128xf32>
    %29 = vector.broadcast %28 : vector<1x128xf32> to vector<32x128xf32>
    %30 = arith.addf %25, %29 : vector<32x128xf32>
    %c0_19 = arith.constant 0 : index
    %c0_20 = arith.constant 0 : index
    %c0_21 = arith.constant 0 : index
    %31 = vector.load %arg5[%c0_19, %c0_20, %c0_21] : memref<1x32x128xf32, #tpu.memory_space<vmem>>, vector<1x32x128xf32>
    %32 = vector.shape_cast %31 : vector<1x32x128xf32> to vector<32x128xf32>
    %33 = vector.shape_cast %30 : vector<32x128xf32> to vector<1x32x128xf32>
    tpu.vector_store %arg5[%c0_19, %c0_20, %c0_21], %33 {strides = array<i32>} : memref<1x32x128xf32, #tpu.memory_space<vmem>>, vector<1x32x128xf32>,
    return
  }
  func.func @transform_0(%arg0: i32, %arg1: i32) -> (i32, i32, i32, i32) {
    %c0_i32 = arith.constant 0 : i32
    %c0_i32_0 = arith.constant 0 : i32
    %c0_i32_1 = arith.constant 0 : i32
    return %arg0, %arg1, %c0_i32, %c0_i32_0 : i32, i32, i32, i32
  }
  func.func @transform_1(%arg0: i32, %arg1: i32) -> (i32, i32, i32) {
    %c0_i32 = arith.constant 0 : i32
    %c0_i32_0 = arith.constant 0 : i32
    %c0_i32_1 = arith.constant 0 : i32
    %c0_i32_2 = arith.constant 0 : i32
    return %c0_i32, %c0_i32_0, %c0_i32_1 : i32, i32, i32
  }
  func.func @transform_2(%arg0: i32, %arg1: i32) -> (i32, i32) {
    %c0_i32 = arith.constant 0 : i32
    %c0_i32_0 = arith.constant 0 : i32
    %c0_i32_1 = arith.constant 0 : i32
    return %c0_i32, %c0_i32_0 : i32, i32
  }
  func.func @transform_3(%arg0: i32, %arg1: i32) -> (i32, i32, i32) {
    %c0_i32 = arith.constant 0 : i32
    %c0_i32_0 = arith.constant 0 : i32
    return %arg0, %arg1, %c0_i32 : i32, i32, i32
  }
}

module attributes {stable_mosaic.version = 11 : i64} {
  func.func @_conv_fwd_kernel(%arg0: i32, %arg1: i32, %arg2: memref<1x64x3xf32, #tpu.memory_space<vmem>>, %arg3: memref<3x3x32xf32, #tpu.memory_space<vmem>>, %arg4: memref<1x32xf32, #tpu.memory_space<vmem>>, %arg5: memref<1x64x32xf32, #tpu.memory_space<vmem>>, %arg6: memref<2x3xf32, #tpu.memory_space<vmem>>) attributes {dimension_semantics = [#tpu.dimension_semantics<parallel>, #tpu.dimension_semantics<arbitrary>], iteration_bounds = array<i64: 2, 1>, scalar_prefetch = 0 : i64, scratch_operands = 1 : i64, tpu.core_type = #tpu.core_type<tc>, window_params = [{transform_indices = @transform_0, window_bounds = array<i64: 1, 64, 3>}, {pipeline_mode = #tpu.pipeline_mode<synchronous>, transform_indices = @transform_1, window_bounds = array<i64: 3, 3, 32>}, {pipeline_mode = #tpu.pipeline_mode<synchronous>, transform_indices = @transform_2, window_bounds = array<i64: 1, 32>}, {transform_indices = @transform_3, window_bounds = array<i64: 1, 64, 32>}]} {
    %c0_i32 = arith.constant 0 : i32
    %0 = arith.cmpi eq, %arg1, %c0_i32 : i32
    %1 = arith.extui %0 : i1 to i32
    %c0_i32_0 = arith.constant 0 : i32
    %2 = arith.cmpi ne, %1, %c0_i32_0 : i32
    scf.if %2 {
      %cst_21 = arith.constant 0.000000e+00 : f32
      %29 = vector.broadcast %cst_21 : f32 to vector<2x3xf32>
      %c0_22 = arith.constant 0 : index
      %c0_23 = arith.constant 0 : index
      %30 = vector.load %arg6[%c0_22, %c0_23] : memref<2x3xf32, #tpu.memory_space<vmem>>, vector<2x3xf32>
      tpu.vector_store %arg6[%c0_22, %c0_23], %29 {strides = array<i32>} : memref<2x3xf32, #tpu.memory_space<vmem>>, vector<2x3xf32>,
    } else {
    }
    %c0 = arith.constant 0 : index
    %c0_1 = arith.constant 0 : index
    %c0_2 = arith.constant 0 : index
    %3 = vector.load %arg2[%c0, %c0_1, %c0_2] : memref<1x64x3xf32, #tpu.memory_space<vmem>>, vector<1x64x3xf32>
    %4 = vector.shape_cast %3 : vector<1x64x3xf32> to vector<64x3xf32>
    %c0_3 = arith.constant 0 : index
    %c0_4 = arith.constant 0 : index
    %5 = vector.load %arg6[%c0_3, %c0_4] : memref<2x3xf32, #tpu.memory_space<vmem>>, vector<2x3xf32>
    %6 = tpu.concatenate %5, %4 in 0 : vector<2x3xf32>, vector<64x3xf32> -> vector<66x3xf32>
    %7 = vector.extract_strided_slice %6 {offsets = [0, 0], sizes = [64, 3], strides = [1, 1]} : vector<66x3xf32> to vector<64x3xf32>
    %c0_5 = arith.constant 0 : index
    %c0_6 = arith.constant 0 : index
    %c0_7 = arith.constant 0 : index
    %8 = vector.load %arg3[%c0_5, %c0_6, %c0_7] : memref<3x3x32xf32, #tpu.memory_space<vmem>>, vector<1x3x32xf32>
    %9 = vector.shape_cast %8 : vector<1x3x32xf32> to vector<3x32xf32>
    %cst = arith.constant dense<0.000000e+00> : vector<64x32xf32>
    %10 = tpu.matmul %7, %9, %cst {dimension_numbers = #tpu.dot_dimension_numbers<[1], [0], [0], [1], [0, 0, 1, 1], [], []>} : vector<64x3xf32>, vector<3x32xf32>, vector<64x32xf32> -> vector<64x32xf32>
    %11 = vector.extract_strided_slice %6 {offsets = [1, 0], sizes = [64, 3], strides = [1, 1]} : vector<66x3xf32> to vector<64x3xf32>
    %c1 = arith.constant 1 : index
    %c0_8 = arith.constant 0 : index
    %c0_9 = arith.constant 0 : index
    %12 = vector.load %arg3[%c1, %c0_8, %c0_9] : memref<3x3x32xf32, #tpu.memory_space<vmem>>, vector<1x3x32xf32>
    %13 = vector.shape_cast %12 : vector<1x3x32xf32> to vector<3x32xf32>
    %cst_10 = arith.constant dense<0.000000e+00> : vector<64x32xf32>
    %14 = tpu.matmul %11, %13, %cst_10 {dimension_numbers = #tpu.dot_dimension_numbers<[1], [0], [0], [1], [0, 0, 1, 1], [], []>} : vector<64x3xf32>, vector<3x32xf32>, vector<64x32xf32> -> vector<64x32xf32>
    %15 = arith.addf %10, %14 : vector<64x32xf32>
    %16 = vector.extract_strided_slice %6 {offsets = [2, 0], sizes = [64, 3], strides = [1, 1]} : vector<66x3xf32> to vector<64x3xf32>
    %c2 = arith.constant 2 : index
    %c0_11 = arith.constant 0 : index
    %c0_12 = arith.constant 0 : index
    %17 = vector.load %arg3[%c2, %c0_11, %c0_12] : memref<3x3x32xf32, #tpu.memory_space<vmem>>, vector<1x3x32xf32>
    %18 = vector.shape_cast %17 : vector<1x3x32xf32> to vector<3x32xf32>
    %cst_13 = arith.constant dense<0.000000e+00> : vector<64x32xf32>
    %19 = tpu.matmul %16, %18, %cst_13 {dimension_numbers = #tpu.dot_dimension_numbers<[1], [0], [0], [1], [0, 0, 1, 1], [], []>} : vector<64x3xf32>, vector<3x32xf32>, vector<64x32xf32> -> vector<64x32xf32>
    %20 = arith.addf %15, %19 : vector<64x32xf32>
    %21 = vector.extract_strided_slice %4 {offsets = [62, 0], sizes = [2, 3], strides = [1, 1]} : vector<64x3xf32> to vector<2x3xf32>
    %c0_14 = arith.constant 0 : index
    %c0_15 = arith.constant 0 : index
    %22 = vector.load %arg6[%c0_14, %c0_15] : memref<2x3xf32, #tpu.memory_space<vmem>>, vector<2x3xf32>
    tpu.vector_store %arg6[%c0_14, %c0_15], %21 {strides = array<i32>} : memref<2x3xf32, #tpu.memory_space<vmem>>, vector<2x3xf32>,
    %c0_16 = arith.constant 0 : index
    %c0_17 = arith.constant 0 : index
    %23 = vector.load %arg4[%c0_16, %c0_17] : memref<1x32xf32, #tpu.memory_space<vmem>>, vector<1x32xf32>
    %24 = vector.broadcast %23 : vector<1x32xf32> to vector<64x32xf32>
    %25 = arith.addf %20, %24 : vector<64x32xf32>
    %c0_18 = arith.constant 0 : index
    %c0_19 = arith.constant 0 : index
    %c0_20 = arith.constant 0 : index
    %26 = vector.load %arg5[%c0_18, %c0_19, %c0_20] : memref<1x64x32xf32, #tpu.memory_space<vmem>>, vector<1x64x32xf32>
    %27 = vector.shape_cast %26 : vector<1x64x32xf32> to vector<64x32xf32>
    %28 = vector.shape_cast %25 : vector<64x32xf32> to vector<1x64x32xf32>
    tpu.vector_store %arg5[%c0_18, %c0_19, %c0_20], %28 {strides = array<i32>} : memref<1x64x32xf32, #tpu.memory_space<vmem>>, vector<1x64x32xf32>,
    return
  }
  func.func @transform_0(%arg0: i32, %arg1: i32) -> (i32, i32, i32) {
    %c0_i32 = arith.constant 0 : i32
    %c0_i32_0 = arith.constant 0 : i32
    return %arg0, %arg1, %c0_i32 : i32, i32, i32
  }
  func.func @transform_1(%arg0: i32, %arg1: i32) -> (i32, i32, i32) {
    %c0_i32 = arith.constant 0 : i32
    %c0_i32_0 = arith.constant 0 : i32
    %c0_i32_1 = arith.constant 0 : i32
    %c0_i32_2 = arith.constant 0 : i32
    return %c0_i32, %c0_i32_0, %c0_i32_1 : i32, i32, i32
  }
  func.func @transform_2(%arg0: i32, %arg1: i32) -> (i32, i32) {
    %c0_i32 = arith.constant 0 : i32
    %c0_i32_0 = arith.constant 0 : i32
    %c0_i32_1 = arith.constant 0 : i32
    return %c0_i32, %c0_i32_0 : i32, i32
  }
  func.func @transform_3(%arg0: i32, %arg1: i32) -> (i32, i32, i32) {
    %c0_i32 = arith.constant 0 : i32
    %c0_i32_0 = arith.constant 0 : i32
    return %arg0, %arg1, %c0_i32 : i32, i32, i32
  }
}

module attributes {stable_mosaic.version = 11 : i64} {
  func.func @_conv_fwd_kernel(%arg0: i32, %arg1: i32, %arg2: memref<1x16x2x128xf32, #tpu.memory_space<vmem>>, %arg3: memref<3x128x64xf32, #tpu.memory_space<vmem>>, %arg4: memref<1x64xf32, #tpu.memory_space<vmem>>, %arg5: memref<1x16x64xf32, #tpu.memory_space<vmem>>, %arg6: memref<2x128xf32, #tpu.memory_space<vmem>>) attributes {dimension_semantics = [#tpu.dimension_semantics<parallel>, #tpu.dimension_semantics<arbitrary>], iteration_bounds = array<i64: 2, 1>, scalar_prefetch = 0 : i64, scratch_operands = 1 : i64, tpu.core_type = #tpu.core_type<tc>, window_params = [{transform_indices = @transform_0, window_bounds = array<i64: 1, 16, 2, 128>}, {pipeline_mode = #tpu.pipeline_mode<synchronous>, transform_indices = @transform_1, window_bounds = array<i64: 3, 128, 64>}, {pipeline_mode = #tpu.pipeline_mode<synchronous>, transform_indices = @transform_2, window_bounds = array<i64: 1, 64>}, {transform_indices = @transform_3, window_bounds = array<i64: 1, 16, 64>}]} {
    %c0_i32 = arith.constant 0 : i32
    %0 = arith.cmpi eq, %arg1, %c0_i32 : i32
    %1 = arith.extui %0 : i1 to i32
    %c0_i32_0 = arith.constant 0 : i32
    %2 = arith.cmpi ne, %1, %c0_i32_0 : i32
    scf.if %2 {
      %cst_22 = arith.constant 0.000000e+00 : f32
      %34 = vector.broadcast %cst_22 : f32 to vector<2x128xf32>
      %c0_23 = arith.constant 0 : index
      %c0_24 = arith.constant 0 : index
      %35 = vector.load %arg6[%c0_23, %c0_24] : memref<2x128xf32, #tpu.memory_space<vmem>>, vector<2x128xf32>
      tpu.vector_store %arg6[%c0_23, %c0_24], %34 {strides = array<i32>} : memref<2x128xf32, #tpu.memory_space<vmem>>, vector<2x128xf32>,
    } else {
    }
    %c0 = arith.constant 0 : index
    %c0_1 = arith.constant 0 : index
    %c0_2 = arith.constant 0 : index
    %c0_3 = arith.constant 0 : index
    %3 = vector.load %arg2[%c0, %c0_1, %c0_2, %c0_3] : memref<1x16x2x128xf32, #tpu.memory_space<vmem>>, vector<1x16x2x128xf32>
    %4 = vector.shape_cast %3 : vector<1x16x2x128xf32> to vector<16x2x128xf32>
    %5 = vector.extract_strided_slice %4 {offsets = [0, 0, 0], sizes = [16, 1, 128], strides = [1, 1, 1]} : vector<16x2x128xf32> to vector<16x1x128xf32>
    %6 = vector.shape_cast %5 : vector<16x1x128xf32> to vector<16x128xf32>
    %7 = vector.extract_strided_slice %4 {offsets = [0, 1, 0], sizes = [16, 1, 128], strides = [1, 1, 1]} : vector<16x2x128xf32> to vector<16x1x128xf32>
    %8 = vector.shape_cast %7 : vector<16x1x128xf32> to vector<16x128xf32>
    %9 = arith.maximumf %6, %8 : vector<16x128xf32>
    %c0_4 = arith.constant 0 : index
    %c0_5 = arith.constant 0 : index
    %10 = vector.load %arg6[%c0_4, %c0_5] : memref<2x128xf32, #tpu.memory_space<vmem>>, vector<2x128xf32>
    %11 = tpu.concatenate %10, %9 in 0 : vector<2x128xf32>, vector<16x128xf32> -> vector<18x128xf32>
    %12 = vector.extract_strided_slice %11 {offsets = [0, 0], sizes = [16, 128], strides = [1, 1]} : vector<18x128xf32> to vector<16x128xf32>
    %c0_6 = arith.constant 0 : index
    %c0_7 = arith.constant 0 : index
    %c0_8 = arith.constant 0 : index
    %13 = vector.load %arg3[%c0_6, %c0_7, %c0_8] : memref<3x128x64xf32, #tpu.memory_space<vmem>>, vector<1x128x64xf32>
    %14 = vector.shape_cast %13 : vector<1x128x64xf32> to vector<128x64xf32>
    %cst = arith.constant dense<0.000000e+00> : vector<16x64xf32>
    %15 = tpu.matmul %12, %14, %cst {dimension_numbers = #tpu.dot_dimension_numbers<[1], [0], [0], [1], [0, 0, 1, 1], [], []>} : vector<16x128xf32>, vector<128x64xf32>, vector<16x64xf32> -> vector<16x64xf32>
    %16 = vector.extract_strided_slice %11 {offsets = [1, 0], sizes = [16, 128], strides = [1, 1]} : vector<18x128xf32> to vector<16x128xf32>
    %c1 = arith.constant 1 : index
    %c0_9 = arith.constant 0 : index
    %c0_10 = arith.constant 0 : index
    %17 = vector.load %arg3[%c1, %c0_9, %c0_10] : memref<3x128x64xf32, #tpu.memory_space<vmem>>, vector<1x128x64xf32>
    %18 = vector.shape_cast %17 : vector<1x128x64xf32> to vector<128x64xf32>
    %cst_11 = arith.constant dense<0.000000e+00> : vector<16x64xf32>
    %19 = tpu.matmul %16, %18, %cst_11 {dimension_numbers = #tpu.dot_dimension_numbers<[1], [0], [0], [1], [0, 0, 1, 1], [], []>} : vector<16x128xf32>, vector<128x64xf32>, vector<16x64xf32> -> vector<16x64xf32>
    %20 = arith.addf %15, %19 : vector<16x64xf32>
    %21 = vector.extract_strided_slice %11 {offsets = [2, 0], sizes = [16, 128], strides = [1, 1]} : vector<18x128xf32> to vector<16x128xf32>
    %c2 = arith.constant 2 : index
    %c0_12 = arith.constant 0 : index
    %c0_13 = arith.constant 0 : index
    %22 = vector.load %arg3[%c2, %c0_12, %c0_13] : memref<3x128x64xf32, #tpu.memory_space<vmem>>, vector<1x128x64xf32>
    %23 = vector.shape_cast %22 : vector<1x128x64xf32> to vector<128x64xf32>
    %cst_14 = arith.constant dense<0.000000e+00> : vector<16x64xf32>
    %24 = tpu.matmul %21, %23, %cst_14 {dimension_numbers = #tpu.dot_dimension_numbers<[1], [0], [0], [1], [0, 0, 1, 1], [], []>} : vector<16x128xf32>, vector<128x64xf32>, vector<16x64xf32> -> vector<16x64xf32>
    %25 = arith.addf %20, %24 : vector<16x64xf32>
    %26 = vector.extract_strided_slice %9 {offsets = [14, 0], sizes = [2, 128], strides = [1, 1]} : vector<16x128xf32> to vector<2x128xf32>
    %c0_15 = arith.constant 0 : index
    %c0_16 = arith.constant 0 : index
    %27 = vector.load %arg6[%c0_15, %c0_16] : memref<2x128xf32, #tpu.memory_space<vmem>>, vector<2x128xf32>
    tpu.vector_store %arg6[%c0_15, %c0_16], %26 {strides = array<i32>} : memref<2x128xf32, #tpu.memory_space<vmem>>, vector<2x128xf32>,
    %c0_17 = arith.constant 0 : index
    %c0_18 = arith.constant 0 : index
    %28 = vector.load %arg4[%c0_17, %c0_18] : memref<1x64xf32, #tpu.memory_space<vmem>>, vector<1x64xf32>
    %29 = vector.broadcast %28 : vector<1x64xf32> to vector<16x64xf32>
    %30 = arith.addf %25, %29 : vector<16x64xf32>
    %c0_19 = arith.constant 0 : index
    %c0_20 = arith.constant 0 : index
    %c0_21 = arith.constant 0 : index
    %31 = vector.load %arg5[%c0_19, %c0_20, %c0_21] : memref<1x16x64xf32, #tpu.memory_space<vmem>>, vector<1x16x64xf32>
    %32 = vector.shape_cast %31 : vector<1x16x64xf32> to vector<16x64xf32>
    %33 = vector.shape_cast %30 : vector<16x64xf32> to vector<1x16x64xf32>
    tpu.vector_store %arg5[%c0_19, %c0_20, %c0_21], %33 {strides = array<i32>} : memref<1x16x64xf32, #tpu.memory_space<vmem>>, vector<1x16x64xf32>,
    return
  }
  func.func @transform_0(%arg0: i32, %arg1: i32) -> (i32, i32, i32, i32) {
    %c0_i32 = arith.constant 0 : i32
    %c0_i32_0 = arith.constant 0 : i32
    %c0_i32_1 = arith.constant 0 : i32
    return %arg0, %arg1, %c0_i32, %c0_i32_0 : i32, i32, i32, i32
  }
  func.func @transform_1(%arg0: i32, %arg1: i32) -> (i32, i32, i32) {
    %c0_i32 = arith.constant 0 : i32
    %c0_i32_0 = arith.constant 0 : i32
    %c0_i32_1 = arith.constant 0 : i32
    %c0_i32_2 = arith.constant 0 : i32
    return %c0_i32, %c0_i32_0, %c0_i32_1 : i32, i32, i32
  }
  func.func @transform_2(%arg0: i32, %arg1: i32) -> (i32, i32) {
    %c0_i32 = arith.constant 0 : i32
    %c0_i32_0 = arith.constant 0 : i32
    %c0_i32_1 = arith.constant 0 : i32
    return %c0_i32, %c0_i32_0 : i32, i32
  }
  func.func @transform_3(%arg0: i32, %arg1: i32) -> (i32, i32, i32) {
    %c0_i32 = arith.constant 0 : i32
    %c0_i32_0 = arith.constant 0 : i32
    return %arg0, %arg1, %c0_i32 : i32, i32, i32
  }
}

module attributes {stable_mosaic.version = 11 : i64} {
  func.func @_conv_fwd_kernel(%arg0: i32, %arg1: i32, %arg2: memref<1x8x2x64xf32, #tpu.memory_space<vmem>>, %arg3: memref<3x64x64xf32, #tpu.memory_space<vmem>>, %arg4: memref<1x64xf32, #tpu.memory_space<vmem>>, %arg5: memref<1x8x64xf32, #tpu.memory_space<vmem>>, %arg6: memref<2x64xf32, #tpu.memory_space<vmem>>) attributes {dimension_semantics = [#tpu.dimension_semantics<parallel>, #tpu.dimension_semantics<arbitrary>], iteration_bounds = array<i64: 2, 1>, scalar_prefetch = 0 : i64, scratch_operands = 1 : i64, tpu.core_type = #tpu.core_type<tc>, window_params = [{transform_indices = @transform_0, window_bounds = array<i64: 1, 8, 2, 64>}, {pipeline_mode = #tpu.pipeline_mode<synchronous>, transform_indices = @transform_1, window_bounds = array<i64: 3, 64, 64>}, {pipeline_mode = #tpu.pipeline_mode<synchronous>, transform_indices = @transform_2, window_bounds = array<i64: 1, 64>}, {transform_indices = @transform_3, window_bounds = array<i64: 1, 8, 64>}]} {
    %c0_i32 = arith.constant 0 : i32
    %0 = arith.cmpi eq, %arg1, %c0_i32 : i32
    %1 = arith.extui %0 : i1 to i32
    %c0_i32_0 = arith.constant 0 : i32
    %2 = arith.cmpi ne, %1, %c0_i32_0 : i32
    scf.if %2 {
      %cst_22 = arith.constant 0.000000e+00 : f32
      %34 = vector.broadcast %cst_22 : f32 to vector<2x64xf32>
      %c0_23 = arith.constant 0 : index
      %c0_24 = arith.constant 0 : index
      %35 = vector.load %arg6[%c0_23, %c0_24] : memref<2x64xf32, #tpu.memory_space<vmem>>, vector<2x64xf32>
      tpu.vector_store %arg6[%c0_23, %c0_24], %34 {strides = array<i32>} : memref<2x64xf32, #tpu.memory_space<vmem>>, vector<2x64xf32>,
    } else {
    }
    %c0 = arith.constant 0 : index
    %c0_1 = arith.constant 0 : index
    %c0_2 = arith.constant 0 : index
    %c0_3 = arith.constant 0 : index
    %3 = vector.load %arg2[%c0, %c0_1, %c0_2, %c0_3] : memref<1x8x2x64xf32, #tpu.memory_space<vmem>>, vector<1x8x2x64xf32>
    %4 = vector.shape_cast %3 : vector<1x8x2x64xf32> to vector<8x2x64xf32>
    %5 = vector.extract_strided_slice %4 {offsets = [0, 0, 0], sizes = [8, 1, 64], strides = [1, 1, 1]} : vector<8x2x64xf32> to vector<8x1x64xf32>
    %6 = vector.shape_cast %5 : vector<8x1x64xf32> to vector<8x64xf32>
    %7 = vector.extract_strided_slice %4 {offsets = [0, 1, 0], sizes = [8, 1, 64], strides = [1, 1, 1]} : vector<8x2x64xf32> to vector<8x1x64xf32>
    %8 = vector.shape_cast %7 : vector<8x1x64xf32> to vector<8x64xf32>
    %9 = arith.maximumf %6, %8 : vector<8x64xf32>
    %c0_4 = arith.constant 0 : index
    %c0_5 = arith.constant 0 : index
    %10 = vector.load %arg6[%c0_4, %c0_5] : memref<2x64xf32, #tpu.memory_space<vmem>>, vector<2x64xf32>
    %11 = tpu.concatenate %10, %9 in 0 : vector<2x64xf32>, vector<8x64xf32> -> vector<10x64xf32>
    %12 = vector.extract_strided_slice %11 {offsets = [0, 0], sizes = [8, 64], strides = [1, 1]} : vector<10x64xf32> to vector<8x64xf32>
    %c0_6 = arith.constant 0 : index
    %c0_7 = arith.constant 0 : index
    %c0_8 = arith.constant 0 : index
    %13 = vector.load %arg3[%c0_6, %c0_7, %c0_8] : memref<3x64x64xf32, #tpu.memory_space<vmem>>, vector<1x64x64xf32>
    %14 = vector.shape_cast %13 : vector<1x64x64xf32> to vector<64x64xf32>
    %cst = arith.constant dense<0.000000e+00> : vector<8x64xf32>
    %15 = tpu.matmul %12, %14, %cst {dimension_numbers = #tpu.dot_dimension_numbers<[1], [0], [0], [1], [0, 0, 1, 1], [], []>} : vector<8x64xf32>, vector<64x64xf32>, vector<8x64xf32> -> vector<8x64xf32>
    %16 = vector.extract_strided_slice %11 {offsets = [1, 0], sizes = [8, 64], strides = [1, 1]} : vector<10x64xf32> to vector<8x64xf32>
    %c1 = arith.constant 1 : index
    %c0_9 = arith.constant 0 : index
    %c0_10 = arith.constant 0 : index
    %17 = vector.load %arg3[%c1, %c0_9, %c0_10] : memref<3x64x64xf32, #tpu.memory_space<vmem>>, vector<1x64x64xf32>
    %18 = vector.shape_cast %17 : vector<1x64x64xf32> to vector<64x64xf32>
    %cst_11 = arith.constant dense<0.000000e+00> : vector<8x64xf32>
    %19 = tpu.matmul %16, %18, %cst_11 {dimension_numbers = #tpu.dot_dimension_numbers<[1], [0], [0], [1], [0, 0, 1, 1], [], []>} : vector<8x64xf32>, vector<64x64xf32>, vector<8x64xf32> -> vector<8x64xf32>
    %20 = arith.addf %15, %19 : vector<8x64xf32>
    %21 = vector.extract_strided_slice %11 {offsets = [2, 0], sizes = [8, 64], strides = [1, 1]} : vector<10x64xf32> to vector<8x64xf32>
    %c2 = arith.constant 2 : index
    %c0_12 = arith.constant 0 : index
    %c0_13 = arith.constant 0 : index
    %22 = vector.load %arg3[%c2, %c0_12, %c0_13] : memref<3x64x64xf32, #tpu.memory_space<vmem>>, vector<1x64x64xf32>
    %23 = vector.shape_cast %22 : vector<1x64x64xf32> to vector<64x64xf32>
    %cst_14 = arith.constant dense<0.000000e+00> : vector<8x64xf32>
    %24 = tpu.matmul %21, %23, %cst_14 {dimension_numbers = #tpu.dot_dimension_numbers<[1], [0], [0], [1], [0, 0, 1, 1], [], []>} : vector<8x64xf32>, vector<64x64xf32>, vector<8x64xf32> -> vector<8x64xf32>
    %25 = arith.addf %20, %24 : vector<8x64xf32>
    %26 = vector.extract_strided_slice %9 {offsets = [6, 0], sizes = [2, 64], strides = [1, 1]} : vector<8x64xf32> to vector<2x64xf32>
    %c0_15 = arith.constant 0 : index
    %c0_16 = arith.constant 0 : index
    %27 = vector.load %arg6[%c0_15, %c0_16] : memref<2x64xf32, #tpu.memory_space<vmem>>, vector<2x64xf32>
    tpu.vector_store %arg6[%c0_15, %c0_16], %26 {strides = array<i32>} : memref<2x64xf32, #tpu.memory_space<vmem>>, vector<2x64xf32>,
    %c0_17 = arith.constant 0 : index
    %c0_18 = arith.constant 0 : index
    %28 = vector.load %arg4[%c0_17, %c0_18] : memref<1x64xf32, #tpu.memory_space<vmem>>, vector<1x64xf32>
    %29 = vector.broadcast %28 : vector<1x64xf32> to vector<8x64xf32>
    %30 = arith.addf %25, %29 : vector<8x64xf32>
    %c0_19 = arith.constant 0 : index
    %c0_20 = arith.constant 0 : index
    %c0_21 = arith.constant 0 : index
    %31 = vector.load %arg5[%c0_19, %c0_20, %c0_21] : memref<1x8x64xf32, #tpu.memory_space<vmem>>, vector<1x8x64xf32>
    %32 = vector.shape_cast %31 : vector<1x8x64xf32> to vector<8x64xf32>
    %33 = vector.shape_cast %30 : vector<8x64xf32> to vector<1x8x64xf32>
    tpu.vector_store %arg5[%c0_19, %c0_20, %c0_21], %33 {strides = array<i32>} : memref<1x8x64xf32, #tpu.memory_space<vmem>>, vector<1x8x64xf32>,
    return
  }
  func.func @transform_0(%arg0: i32, %arg1: i32) -> (i32, i32, i32, i32) {
    %c0_i32 = arith.constant 0 : i32
    %c0_i32_0 = arith.constant 0 : i32
    %c0_i32_1 = arith.constant 0 : i32
    return %arg0, %arg1, %c0_i32, %c0_i32_0 : i32, i32, i32, i32
  }
  func.func @transform_1(%arg0: i32, %arg1: i32) -> (i32, i32, i32) {
    %c0_i32 = arith.constant 0 : i32
    %c0_i32_0 = arith.constant 0 : i32
    %c0_i32_1 = arith.constant 0 : i32
    %c0_i32_2 = arith.constant 0 : i32
    return %c0_i32, %c0_i32_0, %c0_i32_1 : i32, i32, i32
  }
  func.func @transform_2(%arg0: i32, %arg1: i32) -> (i32, i32) {
    %c0_i32 = arith.constant 0 : i32
    %c0_i32_0 = arith.constant 0 : i32
    %c0_i32_1 = arith.constant 0 : i32
    return %c0_i32, %c0_i32_0 : i32, i32
  }
  func.func @transform_3(%arg0: i32, %arg1: i32) -> (i32, i32, i32) {
    %c0_i32 = arith.constant 0 : i32
    %c0_i32_0 = arith.constant 0 : i32
    return %arg0, %arg1, %c0_i32 : i32, i32, i32
  }
}

module attributes {stable_mosaic.version = 11 : i64} {
  func.func @_conv_fwd_kernel(%arg0: i32, %arg1: i32, %arg2: memref<1x4x2x64xf32, #tpu.memory_space<vmem>>, %arg3: memref<3x64x64xf32, #tpu.memory_space<vmem>>, %arg4: memref<1x64xf32, #tpu.memory_space<vmem>>, %arg5: memref<1x4x64xf32, #tpu.memory_space<vmem>>, %arg6: memref<2x64xf32, #tpu.memory_space<vmem>>) attributes {dimension_semantics = [#tpu.dimension_semantics<parallel>, #tpu.dimension_semantics<arbitrary>], iteration_bounds = array<i64: 2, 1>, scalar_prefetch = 0 : i64, scratch_operands = 1 : i64, tpu.core_type = #tpu.core_type<tc>, window_params = [{transform_indices = @transform_0, window_bounds = array<i64: 1, 4, 2, 64>}, {pipeline_mode = #tpu.pipeline_mode<synchronous>, transform_indices = @transform_1, window_bounds = array<i64: 3, 64, 64>}, {pipeline_mode = #tpu.pipeline_mode<synchronous>, transform_indices = @transform_2, window_bounds = array<i64: 1, 64>}, {transform_indices = @transform_3, window_bounds = array<i64: 1, 4, 64>}]} {
    %c0_i32 = arith.constant 0 : i32
    %0 = arith.cmpi eq, %arg1, %c0_i32 : i32
    %1 = arith.extui %0 : i1 to i32
    %c0_i32_0 = arith.constant 0 : i32
    %2 = arith.cmpi ne, %1, %c0_i32_0 : i32
    scf.if %2 {
      %cst_22 = arith.constant 0.000000e+00 : f32
      %34 = vector.broadcast %cst_22 : f32 to vector<2x64xf32>
      %c0_23 = arith.constant 0 : index
      %c0_24 = arith.constant 0 : index
      %35 = vector.load %arg6[%c0_23, %c0_24] : memref<2x64xf32, #tpu.memory_space<vmem>>, vector<2x64xf32>
      tpu.vector_store %arg6[%c0_23, %c0_24], %34 {strides = array<i32>} : memref<2x64xf32, #tpu.memory_space<vmem>>, vector<2x64xf32>,
    } else {
    }
    %c0 = arith.constant 0 : index
    %c0_1 = arith.constant 0 : index
    %c0_2 = arith.constant 0 : index
    %c0_3 = arith.constant 0 : index
    %3 = vector.load %arg2[%c0, %c0_1, %c0_2, %c0_3] : memref<1x4x2x64xf32, #tpu.memory_space<vmem>>, vector<1x4x2x64xf32>
    %4 = vector.shape_cast %3 : vector<1x4x2x64xf32> to vector<4x2x64xf32>
    %5 = vector.extract_strided_slice %4 {offsets = [0, 0, 0], sizes = [4, 1, 64], strides = [1, 1, 1]} : vector<4x2x64xf32> to vector<4x1x64xf32>
    %6 = vector.shape_cast %5 : vector<4x1x64xf32> to vector<4x64xf32>
    %7 = vector.extract_strided_slice %4 {offsets = [0, 1, 0], sizes = [4, 1, 64], strides = [1, 1, 1]} : vector<4x2x64xf32> to vector<4x1x64xf32>
    %8 = vector.shape_cast %7 : vector<4x1x64xf32> to vector<4x64xf32>
    %9 = arith.maximumf %6, %8 : vector<4x64xf32>
    %c0_4 = arith.constant 0 : index
    %c0_5 = arith.constant 0 : index
    %10 = vector.load %arg6[%c0_4, %c0_5] : memref<2x64xf32, #tpu.memory_space<vmem>>, vector<2x64xf32>
    %11 = tpu.concatenate %10, %9 in 0 : vector<2x64xf32>, vector<4x64xf32> -> vector<6x64xf32>
    %12 = vector.extract_strided_slice %11 {offsets = [0, 0], sizes = [4, 64], strides = [1, 1]} : vector<6x64xf32> to vector<4x64xf32>
    %c0_6 = arith.constant 0 : index
    %c0_7 = arith.constant 0 : index
    %c0_8 = arith.constant 0 : index
    %13 = vector.load %arg3[%c0_6, %c0_7, %c0_8] : memref<3x64x64xf32, #tpu.memory_space<vmem>>, vector<1x64x64xf32>
    %14 = vector.shape_cast %13 : vector<1x64x64xf32> to vector<64x64xf32>
    %cst = arith.constant dense<0.000000e+00> : vector<4x64xf32>
    %15 = tpu.matmul %12, %14, %cst {dimension_numbers = #tpu.dot_dimension_numbers<[1], [0], [0], [1], [0, 0, 1, 1], [], []>} : vector<4x64xf32>, vector<64x64xf32>, vector<4x64xf32> -> vector<4x64xf32>
    %16 = vector.extract_strided_slice %11 {offsets = [1, 0], sizes = [4, 64], strides = [1, 1]} : vector<6x64xf32> to vector<4x64xf32>
    %c1 = arith.constant 1 : index
    %c0_9 = arith.constant 0 : index
    %c0_10 = arith.constant 0 : index
    %17 = vector.load %arg3[%c1, %c0_9, %c0_10] : memref<3x64x64xf32, #tpu.memory_space<vmem>>, vector<1x64x64xf32>
    %18 = vector.shape_cast %17 : vector<1x64x64xf32> to vector<64x64xf32>
    %cst_11 = arith.constant dense<0.000000e+00> : vector<4x64xf32>
    %19 = tpu.matmul %16, %18, %cst_11 {dimension_numbers = #tpu.dot_dimension_numbers<[1], [0], [0], [1], [0, 0, 1, 1], [], []>} : vector<4x64xf32>, vector<64x64xf32>, vector<4x64xf32> -> vector<4x64xf32>
    %20 = arith.addf %15, %19 : vector<4x64xf32>
    %21 = vector.extract_strided_slice %11 {offsets = [2, 0], sizes = [4, 64], strides = [1, 1]} : vector<6x64xf32> to vector<4x64xf32>
    %c2 = arith.constant 2 : index
    %c0_12 = arith.constant 0 : index
    %c0_13 = arith.constant 0 : index
    %22 = vector.load %arg3[%c2, %c0_12, %c0_13] : memref<3x64x64xf32, #tpu.memory_space<vmem>>, vector<1x64x64xf32>
    %23 = vector.shape_cast %22 : vector<1x64x64xf32> to vector<64x64xf32>
    %cst_14 = arith.constant dense<0.000000e+00> : vector<4x64xf32>
    %24 = tpu.matmul %21, %23, %cst_14 {dimension_numbers = #tpu.dot_dimension_numbers<[1], [0], [0], [1], [0, 0, 1, 1], [], []>} : vector<4x64xf32>, vector<64x64xf32>, vector<4x64xf32> -> vector<4x64xf32>
    %25 = arith.addf %20, %24 : vector<4x64xf32>
    %26 = vector.extract_strided_slice %9 {offsets = [2, 0], sizes = [2, 64], strides = [1, 1]} : vector<4x64xf32> to vector<2x64xf32>
    %c0_15 = arith.constant 0 : index
    %c0_16 = arith.constant 0 : index
    %27 = vector.load %arg6[%c0_15, %c0_16] : memref<2x64xf32, #tpu.memory_space<vmem>>, vector<2x64xf32>
    tpu.vector_store %arg6[%c0_15, %c0_16], %26 {strides = array<i32>} : memref<2x64xf32, #tpu.memory_space<vmem>>, vector<2x64xf32>,
    %c0_17 = arith.constant 0 : index
    %c0_18 = arith.constant 0 : index
    %28 = vector.load %arg4[%c0_17, %c0_18] : memref<1x64xf32, #tpu.memory_space<vmem>>, vector<1x64xf32>
    %29 = vector.broadcast %28 : vector<1x64xf32> to vector<4x64xf32>
    %30 = arith.addf %25, %29 : vector<4x64xf32>
    %c0_19 = arith.constant 0 : index
    %c0_20 = arith.constant 0 : index
    %c0_21 = arith.constant 0 : index
    %31 = vector.load %arg5[%c0_19, %c0_20, %c0_21] : memref<1x4x64xf32, #tpu.memory_space<vmem>>, vector<1x4x64xf32>
    %32 = vector.shape_cast %31 : vector<1x4x64xf32> to vector<4x64xf32>
    %33 = vector.shape_cast %30 : vector<4x64xf32> to vector<1x4x64xf32>
    tpu.vector_store %arg5[%c0_19, %c0_20, %c0_21], %33 {strides = array<i32>} : memref<1x4x64xf32, #tpu.memory_space<vmem>>, vector<1x4x64xf32>,
    return
  }
  func.func @transform_0(%arg0: i32, %arg1: i32) -> (i32, i32, i32, i32) {
    %c0_i32 = arith.constant 0 : i32
    %c0_i32_0 = arith.constant 0 : i32
    %c0_i32_1 = arith.constant 0 : i32
    return %arg0, %arg1, %c0_i32, %c0_i32_0 : i32, i32, i32, i32
  }
  func.func @transform_1(%arg0: i32, %arg1: i32) -> (i32, i32, i32) {
    %c0_i32 = arith.constant 0 : i32
    %c0_i32_0 = arith.constant 0 : i32
    %c0_i32_1 = arith.constant 0 : i32
    %c0_i32_2 = arith.constant 0 : i32
    return %c0_i32, %c0_i32_0, %c0_i32_1 : i32, i32, i32
  }
  func.func @transform_2(%arg0: i32, %arg1: i32) -> (i32, i32) {
    %c0_i32 = arith.constant 0 : i32
    %c0_i32_0 = arith.constant 0 : i32
    %c0_i32_1 = arith.constant 0 : i32
    return %c0_i32, %c0_i32_0 : i32, i32
  }
  func.func @transform_3(%arg0: i32, %arg1: i32) -> (i32, i32, i32) {
    %c0_i32 = arith.constant 0 : i32
    %c0_i32_0 = arith.constant 0 : i32
    return %arg0, %arg1, %c0_i32 : i32, i32, i32
  }
}

module attributes {stable_mosaic.version = 11 : i64} {
  func.func @_deconv_up2_kernel(%arg0: i32, %arg1: i32, %arg2: memref<1x4x64xf32, #tpu.memory_space<vmem>>, %arg3: memref<1x4x64xf32, #tpu.memory_space<vmem>>, %arg4: memref<3x64x64xf32, #tpu.memory_space<vmem>>, %arg5: memref<1x64xf32, #tpu.memory_space<vmem>>, %arg6: memref<1x4x128xf32, #tpu.memory_space<vmem>>) attributes {dimension_semantics = [#tpu.dimension_semantics<parallel>, #tpu.dimension_semantics<parallel>], iteration_bounds = array<i64: 2, 1>, scalar_prefetch = 0 : i64, scratch_operands = 0 : i64, tpu.core_type = #tpu.core_type<tc>, window_params = [{transform_indices = @transform_0, window_bounds = array<i64: 1, 4, 64>}, {transform_indices = @transform_1, window_bounds = array<i64: 1, 4, 64>}, {pipeline_mode = #tpu.pipeline_mode<synchronous>, transform_indices = @transform_2, window_bounds = array<i64: 3, 64, 64>}, {pipeline_mode = #tpu.pipeline_mode<synchronous>, transform_indices = @transform_3, window_bounds = array<i64: 1, 64>}, {transform_indices = @transform_4, window_bounds = array<i64: 1, 4, 128>}]} {
    %c0 = arith.constant 0 : index
    %c0_0 = arith.constant 0 : index
    %c0_1 = arith.constant 0 : index
    %0 = vector.load %arg2[%c0, %c0_0, %c0_1] : memref<1x4x64xf32, #tpu.memory_space<vmem>>, vector<1x4x64xf32>
    %1 = vector.shape_cast %0 : vector<1x4x64xf32> to vector<4x64xf32>
    %c0_2 = arith.constant 0 : index
    %c0_3 = arith.constant 0 : index
    %c0_4 = arith.constant 0 : index
    %2 = vector.load %arg3[%c0_2, %c0_3, %c0_4] : memref<1x4x64xf32, #tpu.memory_space<vmem>>, vector<1x1x64xf32>
    %3 = vector.shape_cast %2 : vector<1x1x64xf32> to vector<1x64xf32>
    %c0_i32 = arith.constant 0 : i32
    %4 = arith.cmpi eq, %arg1, %c0_i32 : i32
    %cst = arith.constant 0.000000e+00 : f32
    %5 = vector.broadcast %cst : f32 to vector<1x64xf32>
    %6 = arith.select %4, %5, %3 : vector<1x64xf32>
    %7 = vector.extract_strided_slice %1 {offsets = [1, 0], sizes = [3, 64], strides = [1, 1]} : vector<4x64xf32> to vector<3x64xf32>
    %8 = tpu.concatenate %7, %6 in 0 : vector<3x64xf32>, vector<1x64xf32> -> vector<4x64xf32>
    %c0_5 = arith.constant 0 : index
    %c0_6 = arith.constant 0 : index
    %9 = vector.load %arg5[%c0_5, %c0_6] : memref<1x64xf32, #tpu.memory_space<vmem>>, vector<1x64xf32>
    %c1 = arith.constant 1 : index
    %c0_7 = arith.constant 0 : index
    %c0_8 = arith.constant 0 : index
    %10 = vector.load %arg4[%c1, %c0_7, %c0_8] : memref<3x64x64xf32, #tpu.memory_space<vmem>>, vector<1x64x64xf32>
    %11 = vector.shape_cast %10 : vector<1x64x64xf32> to vector<64x64xf32>
    %cst_9 = arith.constant dense<0.000000e+00> : vector<4x64xf32>
    %12 = tpu.matmul %1, %11, %cst_9 {dimension_numbers = #tpu.dot_dimension_numbers<[1], [0], [0], [1], [0, 0, 1, 1], [], []>} : vector<4x64xf32>, vector<64x64xf32>, vector<4x64xf32> -> vector<4x64xf32>
    %13 = vector.broadcast %9 : vector<1x64xf32> to vector<4x64xf32>
    %14 = arith.addf %12, %13 : vector<4x64xf32>
    %c0_10 = arith.constant 0 : index
    %c0_11 = arith.constant 0 : index
    %c0_12 = arith.constant 0 : index
    %15 = vector.load %arg4[%c0_10, %c0_11, %c0_12] : memref<3x64x64xf32, #tpu.memory_space<vmem>>, vector<1x64x64xf32>
    %16 = vector.shape_cast %15 : vector<1x64x64xf32> to vector<64x64xf32>
    %cst_13 = arith.constant dense<0.000000e+00> : vector<4x64xf32>
    %17 = tpu.matmul %8, %16, %cst_13 {dimension_numbers = #tpu.dot_dimension_numbers<[1], [0], [0], [1], [0, 0, 1, 1], [], []>} : vector<4x64xf32>, vector<64x64xf32>, vector<4x64xf32> -> vector<4x64xf32>
    %c2 = arith.constant 2 : index
    %c0_14 = arith.constant 0 : index
    %c0_15 = arith.constant 0 : index
    %18 = vector.load %arg4[%c2, %c0_14, %c0_15] : memref<3x64x64xf32, #tpu.memory_space<vmem>>, vector<1x64x64xf32>
    %19 = vector.shape_cast %18 : vector<1x64x64xf32> to vector<64x64xf32>
    %cst_16 = arith.constant dense<0.000000e+00> : vector<4x64xf32>
    %20 = tpu.matmul %1, %19, %cst_16 {dimension_numbers = #tpu.dot_dimension_numbers<[1], [0], [0], [1], [0, 0, 1, 1], [], []>} : vector<4x64xf32>, vector<64x64xf32>, vector<4x64xf32> -> vector<4x64xf32>
    %21 = arith.addf %17, %20 : vector<4x64xf32>
    %22 = vector.broadcast %9 : vector<1x64xf32> to vector<4x64xf32>
    %23 = arith.addf %21, %22 : vector<4x64xf32>
    %24 = tpu.concatenate %14, %23 in 1 : vector<4x64xf32>, vector<4x64xf32> -> vector<4x128xf32>
    %c0_17 = arith.constant 0 : index
    %c0_18 = arith.constant 0 : index
    %c0_19 = arith.constant 0 : index
    %25 = vector.load %arg6[%c0_17, %c0_18, %c0_19] : memref<1x4x128xf32, #tpu.memory_space<vmem>>, vector<1x4x128xf32>
    %26 = vector.shape_cast %25 : vector<1x4x128xf32> to vector<4x128xf32>
    %27 = vector.shape_cast %24 : vector<4x128xf32> to vector<1x4x128xf32>
    tpu.vector_store %arg6[%c0_17, %c0_18, %c0_19], %27 {strides = array<i32>} : memref<1x4x128xf32, #tpu.memory_space<vmem>>, vector<1x4x128xf32>,
    return
  }
  func.func @transform_0(%arg0: i32, %arg1: i32) -> (i32, i32, i32) {
    %c0_i32 = arith.constant 0 : i32
    %c0_i32_0 = arith.constant 0 : i32
    return %arg0, %arg1, %c0_i32 : i32, i32, i32
  }
  func.func @transform_1(%arg0: i32, %arg1: i32) -> (i32, i32, i32) {
    %c1_i32 = arith.constant 1 : i32
    %0 = arith.addi %arg1, %c1_i32 : i32
    %c0_i32 = arith.constant 0 : i32
    %1 = arith.minsi %0, %c0_i32 : i32
    %c0_i32_0 = arith.constant 0 : i32
    %c0_i32_1 = arith.constant 0 : i32
    return %arg0, %1, %c0_i32_0 : i32, i32, i32
  }
  func.func @transform_2(%arg0: i32, %arg1: i32) -> (i32, i32, i32) {
    %c0_i32 = arith.constant 0 : i32
    %c0_i32_0 = arith.constant 0 : i32
    %c0_i32_1 = arith.constant 0 : i32
    %c0_i32_2 = arith.constant 0 : i32
    return %c0_i32, %c0_i32_0, %c0_i32_1 : i32, i32, i32
  }
  func.func @transform_3(%arg0: i32, %arg1: i32) -> (i32, i32) {
    %c0_i32 = arith.constant 0 : i32
    %c0_i32_0 = arith.constant 0 : i32
    %c0_i32_1 = arith.constant 0 : i32
    return %c0_i32, %c0_i32_0 : i32, i32
  }
  func.func @transform_4(%arg0: i32, %arg1: i32) -> (i32, i32, i32) {
    %c0_i32 = arith.constant 0 : i32
    %c0_i32_0 = arith.constant 0 : i32
    return %arg0, %arg1, %c0_i32 : i32, i32, i32
  }
}

module attributes {stable_mosaic.version = 11 : i64} {
  func.func @_deconv_up2_kernel(%arg0: i32, %arg1: i32, %arg2: memref<1x8x64xf32, #tpu.memory_space<vmem>>, %arg3: memref<1x8x64xf32, #tpu.memory_space<vmem>>, %arg4: memref<3x64x64xf32, #tpu.memory_space<vmem>>, %arg5: memref<1x64xf32, #tpu.memory_space<vmem>>, %arg6: memref<1x8x128xf32, #tpu.memory_space<vmem>>) attributes {dimension_semantics = [#tpu.dimension_semantics<parallel>, #tpu.dimension_semantics<parallel>], iteration_bounds = array<i64: 2, 1>, scalar_prefetch = 0 : i64, scratch_operands = 0 : i64, tpu.core_type = #tpu.core_type<tc>, window_params = [{transform_indices = @transform_0, window_bounds = array<i64: 1, 8, 64>}, {transform_indices = @transform_1, window_bounds = array<i64: 1, 8, 64>}, {pipeline_mode = #tpu.pipeline_mode<synchronous>, transform_indices = @transform_2, window_bounds = array<i64: 3, 64, 64>}, {pipeline_mode = #tpu.pipeline_mode<synchronous>, transform_indices = @transform_3, window_bounds = array<i64: 1, 64>}, {transform_indices = @transform_4, window_bounds = array<i64: 1, 8, 128>}]} {
    %c0 = arith.constant 0 : index
    %c0_0 = arith.constant 0 : index
    %c0_1 = arith.constant 0 : index
    %0 = vector.load %arg2[%c0, %c0_0, %c0_1] : memref<1x8x64xf32, #tpu.memory_space<vmem>>, vector<1x8x64xf32>
    %1 = vector.shape_cast %0 : vector<1x8x64xf32> to vector<8x64xf32>
    %c0_2 = arith.constant 0 : index
    %c0_3 = arith.constant 0 : index
    %c0_4 = arith.constant 0 : index
    %2 = vector.load %arg3[%c0_2, %c0_3, %c0_4] : memref<1x8x64xf32, #tpu.memory_space<vmem>>, vector<1x1x64xf32>
    %3 = vector.shape_cast %2 : vector<1x1x64xf32> to vector<1x64xf32>
    %c0_i32 = arith.constant 0 : i32
    %4 = arith.cmpi eq, %arg1, %c0_i32 : i32
    %cst = arith.constant 0.000000e+00 : f32
    %5 = vector.broadcast %cst : f32 to vector<1x64xf32>
    %6 = arith.select %4, %5, %3 : vector<1x64xf32>
    %7 = vector.extract_strided_slice %1 {offsets = [1, 0], sizes = [7, 64], strides = [1, 1]} : vector<8x64xf32> to vector<7x64xf32>
    %8 = tpu.concatenate %7, %6 in 0 : vector<7x64xf32>, vector<1x64xf32> -> vector<8x64xf32>
    %c0_5 = arith.constant 0 : index
    %c0_6 = arith.constant 0 : index
    %9 = vector.load %arg5[%c0_5, %c0_6] : memref<1x64xf32, #tpu.memory_space<vmem>>, vector<1x64xf32>
    %c1 = arith.constant 1 : index
    %c0_7 = arith.constant 0 : index
    %c0_8 = arith.constant 0 : index
    %10 = vector.load %arg4[%c1, %c0_7, %c0_8] : memref<3x64x64xf32, #tpu.memory_space<vmem>>, vector<1x64x64xf32>
    %11 = vector.shape_cast %10 : vector<1x64x64xf32> to vector<64x64xf32>
    %cst_9 = arith.constant dense<0.000000e+00> : vector<8x64xf32>
    %12 = tpu.matmul %1, %11, %cst_9 {dimension_numbers = #tpu.dot_dimension_numbers<[1], [0], [0], [1], [0, 0, 1, 1], [], []>} : vector<8x64xf32>, vector<64x64xf32>, vector<8x64xf32> -> vector<8x64xf32>
    %13 = vector.broadcast %9 : vector<1x64xf32> to vector<8x64xf32>
    %14 = arith.addf %12, %13 : vector<8x64xf32>
    %c0_10 = arith.constant 0 : index
    %c0_11 = arith.constant 0 : index
    %c0_12 = arith.constant 0 : index
    %15 = vector.load %arg4[%c0_10, %c0_11, %c0_12] : memref<3x64x64xf32, #tpu.memory_space<vmem>>, vector<1x64x64xf32>
    %16 = vector.shape_cast %15 : vector<1x64x64xf32> to vector<64x64xf32>
    %cst_13 = arith.constant dense<0.000000e+00> : vector<8x64xf32>
    %17 = tpu.matmul %8, %16, %cst_13 {dimension_numbers = #tpu.dot_dimension_numbers<[1], [0], [0], [1], [0, 0, 1, 1], [], []>} : vector<8x64xf32>, vector<64x64xf32>, vector<8x64xf32> -> vector<8x64xf32>
    %c2 = arith.constant 2 : index
    %c0_14 = arith.constant 0 : index
    %c0_15 = arith.constant 0 : index
    %18 = vector.load %arg4[%c2, %c0_14, %c0_15] : memref<3x64x64xf32, #tpu.memory_space<vmem>>, vector<1x64x64xf32>
    %19 = vector.shape_cast %18 : vector<1x64x64xf32> to vector<64x64xf32>
    %cst_16 = arith.constant dense<0.000000e+00> : vector<8x64xf32>
    %20 = tpu.matmul %1, %19, %cst_16 {dimension_numbers = #tpu.dot_dimension_numbers<[1], [0], [0], [1], [0, 0, 1, 1], [], []>} : vector<8x64xf32>, vector<64x64xf32>, vector<8x64xf32> -> vector<8x64xf32>
    %21 = arith.addf %17, %20 : vector<8x64xf32>
    %22 = vector.broadcast %9 : vector<1x64xf32> to vector<8x64xf32>
    %23 = arith.addf %21, %22 : vector<8x64xf32>
    %24 = tpu.concatenate %14, %23 in 1 : vector<8x64xf32>, vector<8x64xf32> -> vector<8x128xf32>
    %c0_17 = arith.constant 0 : index
    %c0_18 = arith.constant 0 : index
    %c0_19 = arith.constant 0 : index
    %25 = vector.load %arg6[%c0_17, %c0_18, %c0_19] : memref<1x8x128xf32, #tpu.memory_space<vmem>>, vector<1x8x128xf32>
    %26 = vector.shape_cast %25 : vector<1x8x128xf32> to vector<8x128xf32>
    %27 = vector.shape_cast %24 : vector<8x128xf32> to vector<1x8x128xf32>
    tpu.vector_store %arg6[%c0_17, %c0_18, %c0_19], %27 {strides = array<i32>} : memref<1x8x128xf32, #tpu.memory_space<vmem>>, vector<1x8x128xf32>,
    return
  }
  func.func @transform_0(%arg0: i32, %arg1: i32) -> (i32, i32, i32) {
    %c0_i32 = arith.constant 0 : i32
    %c0_i32_0 = arith.constant 0 : i32
    return %arg0, %arg1, %c0_i32 : i32, i32, i32
  }
  func.func @transform_1(%arg0: i32, %arg1: i32) -> (i32, i32, i32) {
    %c1_i32 = arith.constant 1 : i32
    %0 = arith.addi %arg1, %c1_i32 : i32
    %c0_i32 = arith.constant 0 : i32
    %1 = arith.minsi %0, %c0_i32 : i32
    %c0_i32_0 = arith.constant 0 : i32
    %c0_i32_1 = arith.constant 0 : i32
    return %arg0, %1, %c0_i32_0 : i32, i32, i32
  }
  func.func @transform_2(%arg0: i32, %arg1: i32) -> (i32, i32, i32) {
    %c0_i32 = arith.constant 0 : i32
    %c0_i32_0 = arith.constant 0 : i32
    %c0_i32_1 = arith.constant 0 : i32
    %c0_i32_2 = arith.constant 0 : i32
    return %c0_i32, %c0_i32_0, %c0_i32_1 : i32, i32, i32
  }
  func.func @transform_3(%arg0: i32, %arg1: i32) -> (i32, i32) {
    %c0_i32 = arith.constant 0 : i32
    %c0_i32_0 = arith.constant 0 : i32
    %c0_i32_1 = arith.constant 0 : i32
    return %c0_i32, %c0_i32_0 : i32, i32
  }
  func.func @transform_4(%arg0: i32, %arg1: i32) -> (i32, i32, i32) {
    %c0_i32 = arith.constant 0 : i32
    %c0_i32_0 = arith.constant 0 : i32
    return %arg0, %arg1, %c0_i32 : i32, i32, i32
  }
}

module attributes {stable_mosaic.version = 11 : i64} {
  func.func @_conv_fwd_kernel(%arg0: i32, %arg1: i32, %arg2: memref<1x8x64xf32, #tpu.memory_space<vmem>>, %arg3: memref<1x8x64xf32, #tpu.memory_space<vmem>>, %arg4: memref<3x64x64xf32, #tpu.memory_space<vmem>>, %arg5: memref<3x64x64xf32, #tpu.memory_space<vmem>>, %arg6: memref<1x64xf32, #tpu.memory_space<vmem>>, %arg7: memref<1x8x64xf32, #tpu.memory_space<vmem>>, %arg8: memref<2x64xf32, #tpu.memory_space<vmem>>, %arg9: memref<2x64xf32, #tpu.memory_space<vmem>>) attributes {dimension_semantics = [#tpu.dimension_semantics<parallel>, #tpu.dimension_semantics<arbitrary>], iteration_bounds = array<i64: 2, 1>, scalar_prefetch = 0 : i64, scratch_operands = 2 : i64, tpu.core_type = #tpu.core_type<tc>, window_params = [{transform_indices = @transform_0, window_bounds = array<i64: 1, 8, 64>}, {transform_indices = @transform_1, window_bounds = array<i64: 1, 8, 64>}, {pipeline_mode = #tpu.pipeline_mode<synchronous>, transform_indices = @transform_2, window_bounds = array<i64: 3, 64, 64>}, {pipeline_mode = #tpu.pipeline_mode<synchronous>, transform_indices = @transform_3, window_bounds = array<i64: 3, 64, 64>}, {pipeline_mode = #tpu.pipeline_mode<synchronous>, transform_indices = @transform_4, window_bounds = array<i64: 1, 64>}, {transform_indices = @transform_5, window_bounds = array<i64: 1, 8, 64>}]} {
    %c0_i32 = arith.constant 0 : i32
    %0 = arith.cmpi eq, %arg1, %c0_i32 : i32
    %1 = arith.extui %0 : i1 to i32
    %c0_i32_0 = arith.constant 0 : i32
    %2 = arith.cmpi ne, %1, %c0_i32_0 : i32
    scf.if %2 {
      %cst_40 = arith.constant 0.000000e+00 : f32
      %50 = vector.broadcast %cst_40 : f32 to vector<2x64xf32>
      %c0_41 = arith.constant 0 : index
      %c0_42 = arith.constant 0 : index
      %51 = vector.load %arg8[%c0_41, %c0_42] : memref<2x64xf32, #tpu.memory_space<vmem>>, vector<2x64xf32>
      tpu.vector_store %arg8[%c0_41, %c0_42], %50 {strides = array<i32>} : memref<2x64xf32, #tpu.memory_space<vmem>>, vector<2x64xf32>,
      %cst_43 = arith.constant 0.000000e+00 : f32
      %52 = vector.broadcast %cst_43 : f32 to vector<2x64xf32>
      %c0_44 = arith.constant 0 : index
      %c0_45 = arith.constant 0 : index
      %53 = vector.load %arg9[%c0_44, %c0_45] : memref<2x64xf32, #tpu.memory_space<vmem>>, vector<2x64xf32>
      tpu.vector_store %arg9[%c0_44, %c0_45], %52 {strides = array<i32>} : memref<2x64xf32, #tpu.memory_space<vmem>>, vector<2x64xf32>,
    } else {
    }
    %c0 = arith.constant 0 : index
    %c0_1 = arith.constant 0 : index
    %c0_2 = arith.constant 0 : index
    %3 = vector.load %arg2[%c0, %c0_1, %c0_2] : memref<1x8x64xf32, #tpu.memory_space<vmem>>, vector<1x8x64xf32>
    %4 = vector.shape_cast %3 : vector<1x8x64xf32> to vector<8x64xf32>
    %c0_3 = arith.constant 0 : index
    %c0_4 = arith.constant 0 : index
    %5 = vector.load %arg8[%c0_3, %c0_4] : memref<2x64xf32, #tpu.memory_space<vmem>>, vector<2x64xf32>
    %6 = tpu.concatenate %5, %4 in 0 : vector<2x64xf32>, vector<8x64xf32> -> vector<10x64xf32>
    %7 = vector.extract_strided_slice %6 {offsets = [0, 0], sizes = [8, 64], strides = [1, 1]} : vector<10x64xf32> to vector<8x64xf32>
    %c0_5 = arith.constant 0 : index
    %c0_6 = arith.constant 0 : index
    %c0_7 = arith.constant 0 : index
    %8 = vector.load %arg4[%c0_5, %c0_6, %c0_7] : memref<3x64x64xf32, #tpu.memory_space<vmem>>, vector<1x64x64xf32>
    %9 = vector.shape_cast %8 : vector<1x64x64xf32> to vector<64x64xf32>
    %cst = arith.constant dense<0.000000e+00> : vector<8x64xf32>
    %10 = tpu.matmul %7, %9, %cst {dimension_numbers = #tpu.dot_dimension_numbers<[1], [0], [0], [1], [0, 0, 1, 1], [], []>} : vector<8x64xf32>, vector<64x64xf32>, vector<8x64xf32> -> vector<8x64xf32>
    %11 = vector.extract_strided_slice %6 {offsets = [1, 0], sizes = [8, 64], strides = [1, 1]} : vector<10x64xf32> to vector<8x64xf32>
    %c1 = arith.constant 1 : index
    %c0_8 = arith.constant 0 : index
    %c0_9 = arith.constant 0 : index
    %12 = vector.load %arg4[%c1, %c0_8, %c0_9] : memref<3x64x64xf32, #tpu.memory_space<vmem>>, vector<1x64x64xf32>
    %13 = vector.shape_cast %12 : vector<1x64x64xf32> to vector<64x64xf32>
    %cst_10 = arith.constant dense<0.000000e+00> : vector<8x64xf32>
    %14 = tpu.matmul %11, %13, %cst_10 {dimension_numbers = #tpu.dot_dimension_numbers<[1], [0], [0], [1], [0, 0, 1, 1], [], []>} : vector<8x64xf32>, vector<64x64xf32>, vector<8x64xf32> -> vector<8x64xf32>
    %15 = arith.addf %10, %14 : vector<8x64xf32>
    %16 = vector.extract_strided_slice %6 {offsets = [2, 0], sizes = [8, 64], strides = [1, 1]} : vector<10x64xf32> to vector<8x64xf32>
    %c2 = arith.constant 2 : index
    %c0_11 = arith.constant 0 : index
    %c0_12 = arith.constant 0 : index
    %17 = vector.load %arg4[%c2, %c0_11, %c0_12] : memref<3x64x64xf32, #tpu.memory_space<vmem>>, vector<1x64x64xf32>
    %18 = vector.shape_cast %17 : vector<1x64x64xf32> to vector<64x64xf32>
    %cst_13 = arith.constant dense<0.000000e+00> : vector<8x64xf32>
    %19 = tpu.matmul %16, %18, %cst_13 {dimension_numbers = #tpu.dot_dimension_numbers<[1], [0], [0], [1], [0, 0, 1, 1], [], []>} : vector<8x64xf32>, vector<64x64xf32>, vector<8x64xf32> -> vector<8x64xf32>
    %20 = arith.addf %15, %19 : vector<8x64xf32>
    %c0_14 = arith.constant 0 : index
    %c0_15 = arith.constant 0 : index
    %c0_16 = arith.constant 0 : index
    %21 = vector.load %arg3[%c0_14, %c0_15, %c0_16] : memref<1x8x64xf32, #tpu.memory_space<vmem>>, vector<1x8x64xf32>
    %22 = vector.shape_cast %21 : vector<1x8x64xf32> to vector<8x64xf32>
    %c0_17 = arith.constant 0 : index
    %c0_18 = arith.constant 0 : index
    %23 = vector.load %arg9[%c0_17, %c0_18] : memref<2x64xf32, #tpu.memory_space<vmem>>, vector<2x64xf32>
    %24 = tpu.concatenate %23, %22 in 0 : vector<2x64xf32>, vector<8x64xf32> -> vector<10x64xf32>
    %25 = vector.extract_strided_slice %24 {offsets = [0, 0], sizes = [8, 64], strides = [1, 1]} : vector<10x64xf32> to vector<8x64xf32>
    %c0_19 = arith.constant 0 : index
    %c0_20 = arith.constant 0 : index
    %c0_21 = arith.constant 0 : index
    %26 = vector.load %arg5[%c0_19, %c0_20, %c0_21] : memref<3x64x64xf32, #tpu.memory_space<vmem>>, vector<1x64x64xf32>
    %27 = vector.shape_cast %26 : vector<1x64x64xf32> to vector<64x64xf32>
    %cst_22 = arith.constant dense<0.000000e+00> : vector<8x64xf32>
    %28 = tpu.matmul %25, %27, %cst_22 {dimension_numbers = #tpu.dot_dimension_numbers<[1], [0], [0], [1], [0, 0, 1, 1], [], []>} : vector<8x64xf32>, vector<64x64xf32>, vector<8x64xf32> -> vector<8x64xf32>
    %29 = arith.addf %20, %28 : vector<8x64xf32>
    %30 = vector.extract_strided_slice %24 {offsets = [1, 0], sizes = [8, 64], strides = [1, 1]} : vector<10x64xf32> to vector<8x64xf32>
    %c1_23 = arith.constant 1 : index
    %c0_24 = arith.constant 0 : index
    %c0_25 = arith.constant 0 : index
    %31 = vector.load %arg5[%c1_23, %c0_24, %c0_25] : memref<3x64x64xf32, #tpu.memory_space<vmem>>, vector<1x64x64xf32>
    %32 = vector.shape_cast %31 : vector<1x64x64xf32> to vector<64x64xf32>
    %cst_26 = arith.constant dense<0.000000e+00> : vector<8x64xf32>
    %33 = tpu.matmul %30, %32, %cst_26 {dimension_numbers = #tpu.dot_dimension_numbers<[1], [0], [0], [1], [0, 0, 1, 1], [], []>} : vector<8x64xf32>, vector<64x64xf32>, vector<8x64xf32> -> vector<8x64xf32>
    %34 = arith.addf %29, %33 : vector<8x64xf32>
    %35 = vector.extract_strided_slice %24 {offsets = [2, 0], sizes = [8, 64], strides = [1, 1]} : vector<10x64xf32> to vector<8x64xf32>
    %c2_27 = arith.constant 2 : index
    %c0_28 = arith.constant 0 : index
    %c0_29 = arith.constant 0 : index
    %36 = vector.load %arg5[%c2_27, %c0_28, %c0_29] : memref<3x64x64xf32, #tpu.memory_space<vmem>>, vector<1x64x64xf32>
    %37 = vector.shape_cast %36 : vector<1x64x64xf32> to vector<64x64xf32>
    %cst_30 = arith.constant dense<0.000000e+00> : vector<8x64xf32>
    %38 = tpu.matmul %35, %37, %cst_30 {dimension_numbers = #tpu.dot_dimension_numbers<[1], [0], [0], [1], [0, 0, 1, 1], [], []>} : vector<8x64xf32>, vector<64x64xf32>, vector<8x64xf32> -> vector<8x64xf32>
    %39 = arith.addf %34, %38 : vector<8x64xf32>
    %40 = vector.extract_strided_slice %22 {offsets = [6, 0], sizes = [2, 64], strides = [1, 1]} : vector<8x64xf32> to vector<2x64xf32>
    %c0_31 = arith.constant 0 : index
    %c0_32 = arith.constant 0 : index
    %41 = vector.load %arg9[%c0_31, %c0_32] : memref<2x64xf32, #tpu.memory_space<vmem>>, vector<2x64xf32>
    tpu.vector_store %arg9[%c0_31, %c0_32], %40 {strides = array<i32>} : memref<2x64xf32, #tpu.memory_space<vmem>>, vector<2x64xf32>,
    %42 = vector.extract_strided_slice %4 {offsets = [6, 0], sizes = [2, 64], strides = [1, 1]} : vector<8x64xf32> to vector<2x64xf32>
    %c0_33 = arith.constant 0 : index
    %c0_34 = arith.constant 0 : index
    %43 = vector.load %arg8[%c0_33, %c0_34] : memref<2x64xf32, #tpu.memory_space<vmem>>, vector<2x64xf32>
    tpu.vector_store %arg8[%c0_33, %c0_34], %42 {strides = array<i32>} : memref<2x64xf32, #tpu.memory_space<vmem>>, vector<2x64xf32>,
    %c0_35 = arith.constant 0 : index
    %c0_36 = arith.constant 0 : index
    %44 = vector.load %arg6[%c0_35, %c0_36] : memref<1x64xf32, #tpu.memory_space<vmem>>, vector<1x64xf32>
    %45 = vector.broadcast %44 : vector<1x64xf32> to vector<8x64xf32>
    %46 = arith.addf %39, %45 : vector<8x64xf32>
    %c0_37 = arith.constant 0 : index
    %c0_38 = arith.constant 0 : index
    %c0_39 = arith.constant 0 : index
    %47 = vector.load %arg7[%c0_37, %c0_38, %c0_39] : memref<1x8x64xf32, #tpu.memory_space<vmem>>, vector<1x8x64xf32>
    %48 = vector.shape_cast %47 : vector<1x8x64xf32> to vector<8x64xf32>
    %49 = vector.shape_cast %46 : vector<8x64xf32> to vector<1x8x64xf32>
    tpu.vector_store %arg7[%c0_37, %c0_38, %c0_39], %49 {strides = array<i32>} : memref<1x8x64xf32, #tpu.memory_space<vmem>>, vector<1x8x64xf32>,
    return
  }
  func.func @transform_0(%arg0: i32, %arg1: i32) -> (i32, i32, i32) {
    %c0_i32 = arith.constant 0 : i32
    %c0_i32_0 = arith.constant 0 : i32
    return %arg0, %arg1, %c0_i32 : i32, i32, i32
  }
  func.func @transform_1(%arg0: i32, %arg1: i32) -> (i32, i32, i32) {
    %c0_i32 = arith.constant 0 : i32
    %c0_i32_0 = arith.constant 0 : i32
    return %arg0, %arg1, %c0_i32 : i32, i32, i32
  }
  func.func @transform_2(%arg0: i32, %arg1: i32) -> (i32, i32, i32) {
    %c0_i32 = arith.constant 0 : i32
    %c0_i32_0 = arith.constant 0 : i32
    %c0_i32_1 = arith.constant 0 : i32
    %c0_i32_2 = arith.constant 0 : i32
    return %c0_i32, %c0_i32_0, %c0_i32_1 : i32, i32, i32
  }
  func.func @transform_3(%arg0: i32, %arg1: i32) -> (i32, i32, i32) {
    %c0_i32 = arith.constant 0 : i32
    %c0_i32_0 = arith.constant 0 : i32
    %c0_i32_1 = arith.constant 0 : i32
    %c0_i32_2 = arith.constant 0 : i32
    return %c0_i32, %c0_i32_0, %c0_i32_1 : i32, i32, i32
  }
  func.func @transform_4(%arg0: i32, %arg1: i32) -> (i32, i32) {
    %c0_i32 = arith.constant 0 : i32
    %c0_i32_0 = arith.constant 0 : i32
    %c0_i32_1 = arith.constant 0 : i32
    return %c0_i32, %c0_i32_0 : i32, i32
  }
  func.func @transform_5(%arg0: i32, %arg1: i32) -> (i32, i32, i32) {
    %c0_i32 = arith.constant 0 : i32
    %c0_i32_0 = arith.constant 0 : i32
    return %arg0, %arg1, %c0_i32 : i32, i32, i32
  }
}

module attributes {stable_mosaic.version = 11 : i64} {
  func.func @_conv_fwd_kernel(%arg0: i32, %arg1: i32, %arg2: memref<1x16x64xf32, #tpu.memory_space<vmem>>, %arg3: memref<1x16x64xf32, #tpu.memory_space<vmem>>, %arg4: memref<3x64x128xf32, #tpu.memory_space<vmem>>, %arg5: memref<3x64x128xf32, #tpu.memory_space<vmem>>, %arg6: memref<1x128xf32, #tpu.memory_space<vmem>>, %arg7: memref<1x16x128xf32, #tpu.memory_space<vmem>>, %arg8: memref<2x64xf32, #tpu.memory_space<vmem>>, %arg9: memref<2x64xf32, #tpu.memory_space<vmem>>) attributes {dimension_semantics = [#tpu.dimension_semantics<parallel>, #tpu.dimension_semantics<arbitrary>], iteration_bounds = array<i64: 2, 1>, scalar_prefetch = 0 : i64, scratch_operands = 2 : i64, tpu.core_type = #tpu.core_type<tc>, window_params = [{transform_indices = @transform_0, window_bounds = array<i64: 1, 16, 64>}, {transform_indices = @transform_1, window_bounds = array<i64: 1, 16, 64>}, {pipeline_mode = #tpu.pipeline_mode<synchronous>, transform_indices = @transform_2, window_bounds = array<i64: 3, 64, 128>}, {pipeline_mode = #tpu.pipeline_mode<synchronous>, transform_indices = @transform_3, window_bounds = array<i64: 3, 64, 128>}, {pipeline_mode = #tpu.pipeline_mode<synchronous>, transform_indices = @transform_4, window_bounds = array<i64: 1, 128>}, {transform_indices = @transform_5, window_bounds = array<i64: 1, 16, 128>}]} {
    %c0_i32 = arith.constant 0 : i32
    %0 = arith.cmpi eq, %arg1, %c0_i32 : i32
    %1 = arith.extui %0 : i1 to i32
    %c0_i32_0 = arith.constant 0 : i32
    %2 = arith.cmpi ne, %1, %c0_i32_0 : i32
    scf.if %2 {
      %cst_40 = arith.constant 0.000000e+00 : f32
      %50 = vector.broadcast %cst_40 : f32 to vector<2x64xf32>
      %c0_41 = arith.constant 0 : index
      %c0_42 = arith.constant 0 : index
      %51 = vector.load %arg8[%c0_41, %c0_42] : memref<2x64xf32, #tpu.memory_space<vmem>>, vector<2x64xf32>
      tpu.vector_store %arg8[%c0_41, %c0_42], %50 {strides = array<i32>} : memref<2x64xf32, #tpu.memory_space<vmem>>, vector<2x64xf32>,
      %cst_43 = arith.constant 0.000000e+00 : f32
      %52 = vector.broadcast %cst_43 : f32 to vector<2x64xf32>
      %c0_44 = arith.constant 0 : index
      %c0_45 = arith.constant 0 : index
      %53 = vector.load %arg9[%c0_44, %c0_45] : memref<2x64xf32, #tpu.memory_space<vmem>>, vector<2x64xf32>
      tpu.vector_store %arg9[%c0_44, %c0_45], %52 {strides = array<i32>} : memref<2x64xf32, #tpu.memory_space<vmem>>, vector<2x64xf32>,
    } else {
    }
    %c0 = arith.constant 0 : index
    %c0_1 = arith.constant 0 : index
    %c0_2 = arith.constant 0 : index
    %3 = vector.load %arg2[%c0, %c0_1, %c0_2] : memref<1x16x64xf32, #tpu.memory_space<vmem>>, vector<1x16x64xf32>
    %4 = vector.shape_cast %3 : vector<1x16x64xf32> to vector<16x64xf32>
    %c0_3 = arith.constant 0 : index
    %c0_4 = arith.constant 0 : index
    %5 = vector.load %arg8[%c0_3, %c0_4] : memref<2x64xf32, #tpu.memory_space<vmem>>, vector<2x64xf32>
    %6 = tpu.concatenate %5, %4 in 0 : vector<2x64xf32>, vector<16x64xf32> -> vector<18x64xf32>
    %7 = vector.extract_strided_slice %6 {offsets = [0, 0], sizes = [16, 64], strides = [1, 1]} : vector<18x64xf32> to vector<16x64xf32>
    %c0_5 = arith.constant 0 : index
    %c0_6 = arith.constant 0 : index
    %c0_7 = arith.constant 0 : index
    %8 = vector.load %arg4[%c0_5, %c0_6, %c0_7] : memref<3x64x128xf32, #tpu.memory_space<vmem>>, vector<1x64x128xf32>
    %9 = vector.shape_cast %8 : vector<1x64x128xf32> to vector<64x128xf32>
    %cst = arith.constant dense<0.000000e+00> : vector<16x128xf32>
    %10 = tpu.matmul %7, %9, %cst {dimension_numbers = #tpu.dot_dimension_numbers<[1], [0], [0], [1], [0, 0, 1, 1], [], []>} : vector<16x64xf32>, vector<64x128xf32>, vector<16x128xf32> -> vector<16x128xf32>
    %11 = vector.extract_strided_slice %6 {offsets = [1, 0], sizes = [16, 64], strides = [1, 1]} : vector<18x64xf32> to vector<16x64xf32>
    %c1 = arith.constant 1 : index
    %c0_8 = arith.constant 0 : index
    %c0_9 = arith.constant 0 : index
    %12 = vector.load %arg4[%c1, %c0_8, %c0_9] : memref<3x64x128xf32, #tpu.memory_space<vmem>>, vector<1x64x128xf32>
    %13 = vector.shape_cast %12 : vector<1x64x128xf32> to vector<64x128xf32>
    %cst_10 = arith.constant dense<0.000000e+00> : vector<16x128xf32>
    %14 = tpu.matmul %11, %13, %cst_10 {dimension_numbers = #tpu.dot_dimension_numbers<[1], [0], [0], [1], [0, 0, 1, 1], [], []>} : vector<16x64xf32>, vector<64x128xf32>, vector<16x128xf32> -> vector<16x128xf32>
    %15 = arith.addf %10, %14 : vector<16x128xf32>
    %16 = vector.extract_strided_slice %6 {offsets = [2, 0], sizes = [16, 64], strides = [1, 1]} : vector<18x64xf32> to vector<16x64xf32>
    %c2 = arith.constant 2 : index
    %c0_11 = arith.constant 0 : index
    %c0_12 = arith.constant 0 : index
    %17 = vector.load %arg4[%c2, %c0_11, %c0_12] : memref<3x64x128xf32, #tpu.memory_space<vmem>>, vector<1x64x128xf32>
    %18 = vector.shape_cast %17 : vector<1x64x128xf32> to vector<64x128xf32>
    %cst_13 = arith.constant dense<0.000000e+00> : vector<16x128xf32>
    %19 = tpu.matmul %16, %18, %cst_13 {dimension_numbers = #tpu.dot_dimension_numbers<[1], [0], [0], [1], [0, 0, 1, 1], [], []>} : vector<16x64xf32>, vector<64x128xf32>, vector<16x128xf32> -> vector<16x128xf32>
    %20 = arith.addf %15, %19 : vector<16x128xf32>
    %c0_14 = arith.constant 0 : index
    %c0_15 = arith.constant 0 : index
    %c0_16 = arith.constant 0 : index
    %21 = vector.load %arg3[%c0_14, %c0_15, %c0_16] : memref<1x16x64xf32, #tpu.memory_space<vmem>>, vector<1x16x64xf32>
    %22 = vector.shape_cast %21 : vector<1x16x64xf32> to vector<16x64xf32>
    %c0_17 = arith.constant 0 : index
    %c0_18 = arith.constant 0 : index
    %23 = vector.load %arg9[%c0_17, %c0_18] : memref<2x64xf32, #tpu.memory_space<vmem>>, vector<2x64xf32>
    %24 = tpu.concatenate %23, %22 in 0 : vector<2x64xf32>, vector<16x64xf32> -> vector<18x64xf32>
    %25 = vector.extract_strided_slice %24 {offsets = [0, 0], sizes = [16, 64], strides = [1, 1]} : vector<18x64xf32> to vector<16x64xf32>
    %c0_19 = arith.constant 0 : index
    %c0_20 = arith.constant 0 : index
    %c0_21 = arith.constant 0 : index
    %26 = vector.load %arg5[%c0_19, %c0_20, %c0_21] : memref<3x64x128xf32, #tpu.memory_space<vmem>>, vector<1x64x128xf32>
    %27 = vector.shape_cast %26 : vector<1x64x128xf32> to vector<64x128xf32>
    %cst_22 = arith.constant dense<0.000000e+00> : vector<16x128xf32>
    %28 = tpu.matmul %25, %27, %cst_22 {dimension_numbers = #tpu.dot_dimension_numbers<[1], [0], [0], [1], [0, 0, 1, 1], [], []>} : vector<16x64xf32>, vector<64x128xf32>, vector<16x128xf32> -> vector<16x128xf32>
    %29 = arith.addf %20, %28 : vector<16x128xf32>
    %30 = vector.extract_strided_slice %24 {offsets = [1, 0], sizes = [16, 64], strides = [1, 1]} : vector<18x64xf32> to vector<16x64xf32>
    %c1_23 = arith.constant 1 : index
    %c0_24 = arith.constant 0 : index
    %c0_25 = arith.constant 0 : index
    %31 = vector.load %arg5[%c1_23, %c0_24, %c0_25] : memref<3x64x128xf32, #tpu.memory_space<vmem>>, vector<1x64x128xf32>
    %32 = vector.shape_cast %31 : vector<1x64x128xf32> to vector<64x128xf32>
    %cst_26 = arith.constant dense<0.000000e+00> : vector<16x128xf32>
    %33 = tpu.matmul %30, %32, %cst_26 {dimension_numbers = #tpu.dot_dimension_numbers<[1], [0], [0], [1], [0, 0, 1, 1], [], []>} : vector<16x64xf32>, vector<64x128xf32>, vector<16x128xf32> -> vector<16x128xf32>
    %34 = arith.addf %29, %33 : vector<16x128xf32>
    %35 = vector.extract_strided_slice %24 {offsets = [2, 0], sizes = [16, 64], strides = [1, 1]} : vector<18x64xf32> to vector<16x64xf32>
    %c2_27 = arith.constant 2 : index
    %c0_28 = arith.constant 0 : index
    %c0_29 = arith.constant 0 : index
    %36 = vector.load %arg5[%c2_27, %c0_28, %c0_29] : memref<3x64x128xf32, #tpu.memory_space<vmem>>, vector<1x64x128xf32>
    %37 = vector.shape_cast %36 : vector<1x64x128xf32> to vector<64x128xf32>
    %cst_30 = arith.constant dense<0.000000e+00> : vector<16x128xf32>
    %38 = tpu.matmul %35, %37, %cst_30 {dimension_numbers = #tpu.dot_dimension_numbers<[1], [0], [0], [1], [0, 0, 1, 1], [], []>} : vector<16x64xf32>, vector<64x128xf32>, vector<16x128xf32> -> vector<16x128xf32>
    %39 = arith.addf %34, %38 : vector<16x128xf32>
    %40 = vector.extract_strided_slice %22 {offsets = [14, 0], sizes = [2, 64], strides = [1, 1]} : vector<16x64xf32> to vector<2x64xf32>
    %c0_31 = arith.constant 0 : index
    %c0_32 = arith.constant 0 : index
    %41 = vector.load %arg9[%c0_31, %c0_32] : memref<2x64xf32, #tpu.memory_space<vmem>>, vector<2x64xf32>
    tpu.vector_store %arg9[%c0_31, %c0_32], %40 {strides = array<i32>} : memref<2x64xf32, #tpu.memory_space<vmem>>, vector<2x64xf32>,
    %42 = vector.extract_strided_slice %4 {offsets = [14, 0], sizes = [2, 64], strides = [1, 1]} : vector<16x64xf32> to vector<2x64xf32>
    %c0_33 = arith.constant 0 : index
    %c0_34 = arith.constant 0 : index
    %43 = vector.load %arg8[%c0_33, %c0_34] : memref<2x64xf32, #tpu.memory_space<vmem>>, vector<2x64xf32>
    tpu.vector_store %arg8[%c0_33, %c0_34], %42 {strides = array<i32>} : memref<2x64xf32, #tpu.memory_space<vmem>>, vector<2x64xf32>,
    %c0_35 = arith.constant 0 : index
    %c0_36 = arith.constant 0 : index
    %44 = vector.load %arg6[%c0_35, %c0_36] : memref<1x128xf32, #tpu.memory_space<vmem>>, vector<1x128xf32>
    %45 = vector.broadcast %44 : vector<1x128xf32> to vector<16x128xf32>
    %46 = arith.addf %39, %45 : vector<16x128xf32>
    %c0_37 = arith.constant 0 : index
    %c0_38 = arith.constant 0 : index
    %c0_39 = arith.constant 0 : index
    %47 = vector.load %arg7[%c0_37, %c0_38, %c0_39] : memref<1x16x128xf32, #tpu.memory_space<vmem>>, vector<1x16x128xf32>
    %48 = vector.shape_cast %47 : vector<1x16x128xf32> to vector<16x128xf32>
    %49 = vector.shape_cast %46 : vector<16x128xf32> to vector<1x16x128xf32>
    tpu.vector_store %arg7[%c0_37, %c0_38, %c0_39], %49 {strides = array<i32>} : memref<1x16x128xf32, #tpu.memory_space<vmem>>, vector<1x16x128xf32>,
    return
  }
  func.func @transform_0(%arg0: i32, %arg1: i32) -> (i32, i32, i32) {
    %c0_i32 = arith.constant 0 : i32
    %c0_i32_0 = arith.constant 0 : i32
    return %arg0, %arg1, %c0_i32 : i32, i32, i32
  }
  func.func @transform_1(%arg0: i32, %arg1: i32) -> (i32, i32, i32) {
    %c0_i32 = arith.constant 0 : i32
    %c0_i32_0 = arith.constant 0 : i32
    return %arg0, %arg1, %c0_i32 : i32, i32, i32
  }
  func.func @transform_2(%arg0: i32, %arg1: i32) -> (i32, i32, i32) {
    %c0_i32 = arith.constant 0 : i32
    %c0_i32_0 = arith.constant 0 : i32
    %c0_i32_1 = arith.constant 0 : i32
    %c0_i32_2 = arith.constant 0 : i32
    return %c0_i32, %c0_i32_0, %c0_i32_1 : i32, i32, i32
  }
  func.func @transform_3(%arg0: i32, %arg1: i32) -> (i32, i32, i32) {
    %c0_i32 = arith.constant 0 : i32
    %c0_i32_0 = arith.constant 0 : i32
    %c0_i32_1 = arith.constant 0 : i32
    %c0_i32_2 = arith.constant 0 : i32
    return %c0_i32, %c0_i32_0, %c0_i32_1 : i32, i32, i32
  }
  func.func @transform_4(%arg0: i32, %arg1: i32) -> (i32, i32) {
    %c0_i32 = arith.constant 0 : i32
    %c0_i32_0 = arith.constant 0 : i32
    %c0_i32_1 = arith.constant 0 : i32
    return %c0_i32, %c0_i32_0 : i32, i32
  }
  func.func @transform_5(%arg0: i32, %arg1: i32) -> (i32, i32, i32) {
    %c0_i32 = arith.constant 0 : i32
    %c0_i32_0 = arith.constant 0 : i32
    return %arg0, %arg1, %c0_i32 : i32, i32, i32
  }
}

module attributes {stable_mosaic.version = 11 : i64} {
  func.func @_deconv_up2_kernel(%arg0: i32, %arg1: i32, %arg2: memref<1x16x128xf32, #tpu.memory_space<vmem>>, %arg3: memref<1x16x128xf32, #tpu.memory_space<vmem>>, %arg4: memref<3x128x128xf32, #tpu.memory_space<vmem>>, %arg5: memref<1x128xf32, #tpu.memory_space<vmem>>, %arg6: memref<1x16x256xf32, #tpu.memory_space<vmem>>) attributes {dimension_semantics = [#tpu.dimension_semantics<parallel>, #tpu.dimension_semantics<parallel>], iteration_bounds = array<i64: 2, 1>, scalar_prefetch = 0 : i64, scratch_operands = 0 : i64, tpu.core_type = #tpu.core_type<tc>, window_params = [{transform_indices = @transform_0, window_bounds = array<i64: 1, 16, 128>}, {transform_indices = @transform_1, window_bounds = array<i64: 1, 16, 128>}, {pipeline_mode = #tpu.pipeline_mode<synchronous>, transform_indices = @transform_2, window_bounds = array<i64: 3, 128, 128>}, {pipeline_mode = #tpu.pipeline_mode<synchronous>, transform_indices = @transform_3, window_bounds = array<i64: 1, 128>}, {transform_indices = @transform_4, window_bounds = array<i64: 1, 16, 256>}]} {
    %c0 = arith.constant 0 : index
    %c0_0 = arith.constant 0 : index
    %c0_1 = arith.constant 0 : index
    %0 = vector.load %arg2[%c0, %c0_0, %c0_1] : memref<1x16x128xf32, #tpu.memory_space<vmem>>, vector<1x16x128xf32>
    %1 = vector.shape_cast %0 : vector<1x16x128xf32> to vector<16x128xf32>
    %c0_2 = arith.constant 0 : index
    %c0_3 = arith.constant 0 : index
    %c0_4 = arith.constant 0 : index
    %2 = vector.load %arg3[%c0_2, %c0_3, %c0_4] : memref<1x16x128xf32, #tpu.memory_space<vmem>>, vector<1x1x128xf32>
    %3 = vector.shape_cast %2 : vector<1x1x128xf32> to vector<1x128xf32>
    %c0_i32 = arith.constant 0 : i32
    %4 = arith.cmpi eq, %arg1, %c0_i32 : i32
    %cst = arith.constant 0.000000e+00 : f32
    %5 = vector.broadcast %cst : f32 to vector<1x128xf32>
    %6 = arith.select %4, %5, %3 : vector<1x128xf32>
    %7 = vector.extract_strided_slice %1 {offsets = [1, 0], sizes = [15, 128], strides = [1, 1]} : vector<16x128xf32> to vector<15x128xf32>
    %8 = tpu.concatenate %7, %6 in 0 : vector<15x128xf32>, vector<1x128xf32> -> vector<16x128xf32>
    %c0_5 = arith.constant 0 : index
    %c0_6 = arith.constant 0 : index
    %9 = vector.load %arg5[%c0_5, %c0_6] : memref<1x128xf32, #tpu.memory_space<vmem>>, vector<1x128xf32>
    %c1 = arith.constant 1 : index
    %c0_7 = arith.constant 0 : index
    %c0_8 = arith.constant 0 : index
    %10 = vector.load %arg4[%c1, %c0_7, %c0_8] : memref<3x128x128xf32, #tpu.memory_space<vmem>>, vector<1x128x128xf32>
    %11 = vector.shape_cast %10 : vector<1x128x128xf32> to vector<128x128xf32>
    %cst_9 = arith.constant dense<0.000000e+00> : vector<16x128xf32>
    %12 = tpu.matmul %1, %11, %cst_9 {dimension_numbers = #tpu.dot_dimension_numbers<[1], [0], [0], [1], [0, 0, 1, 1], [], []>} : vector<16x128xf32>, vector<128x128xf32>, vector<16x128xf32> -> vector<16x128xf32>
    %13 = vector.broadcast %9 : vector<1x128xf32> to vector<16x128xf32>
    %14 = arith.addf %12, %13 : vector<16x128xf32>
    %c0_10 = arith.constant 0 : index
    %c0_11 = arith.constant 0 : index
    %c0_12 = arith.constant 0 : index
    %15 = vector.load %arg4[%c0_10, %c0_11, %c0_12] : memref<3x128x128xf32, #tpu.memory_space<vmem>>, vector<1x128x128xf32>
    %16 = vector.shape_cast %15 : vector<1x128x128xf32> to vector<128x128xf32>
    %cst_13 = arith.constant dense<0.000000e+00> : vector<16x128xf32>
    %17 = tpu.matmul %8, %16, %cst_13 {dimension_numbers = #tpu.dot_dimension_numbers<[1], [0], [0], [1], [0, 0, 1, 1], [], []>} : vector<16x128xf32>, vector<128x128xf32>, vector<16x128xf32> -> vector<16x128xf32>
    %c2 = arith.constant 2 : index
    %c0_14 = arith.constant 0 : index
    %c0_15 = arith.constant 0 : index
    %18 = vector.load %arg4[%c2, %c0_14, %c0_15] : memref<3x128x128xf32, #tpu.memory_space<vmem>>, vector<1x128x128xf32>
    %19 = vector.shape_cast %18 : vector<1x128x128xf32> to vector<128x128xf32>
    %cst_16 = arith.constant dense<0.000000e+00> : vector<16x128xf32>
    %20 = tpu.matmul %1, %19, %cst_16 {dimension_numbers = #tpu.dot_dimension_numbers<[1], [0], [0], [1], [0, 0, 1, 1], [], []>} : vector<16x128xf32>, vector<128x128xf32>, vector<16x128xf32> -> vector<16x128xf32>
    %21 = arith.addf %17, %20 : vector<16x128xf32>
    %22 = vector.broadcast %9 : vector<1x128xf32> to vector<16x128xf32>
    %23 = arith.addf %21, %22 : vector<16x128xf32>
    %24 = tpu.concatenate %14, %23 in 1 : vector<16x128xf32>, vector<16x128xf32> -> vector<16x256xf32>
    %c0_17 = arith.constant 0 : index
    %c0_18 = arith.constant 0 : index
    %c0_19 = arith.constant 0 : index
    %25 = vector.load %arg6[%c0_17, %c0_18, %c0_19] : memref<1x16x256xf32, #tpu.memory_space<vmem>>, vector<1x16x256xf32>
    %26 = vector.shape_cast %25 : vector<1x16x256xf32> to vector<16x256xf32>
    %27 = vector.shape_cast %24 : vector<16x256xf32> to vector<1x16x256xf32>
    tpu.vector_store %arg6[%c0_17, %c0_18, %c0_19], %27 {strides = array<i32>} : memref<1x16x256xf32, #tpu.memory_space<vmem>>, vector<1x16x256xf32>,
    return
  }
  func.func @transform_0(%arg0: i32, %arg1: i32) -> (i32, i32, i32) {
    %c0_i32 = arith.constant 0 : i32
    %c0_i32_0 = arith.constant 0 : i32
    return %arg0, %arg1, %c0_i32 : i32, i32, i32
  }
  func.func @transform_1(%arg0: i32, %arg1: i32) -> (i32, i32, i32) {
    %c1_i32 = arith.constant 1 : i32
    %0 = arith.addi %arg1, %c1_i32 : i32
    %c0_i32 = arith.constant 0 : i32
    %1 = arith.minsi %0, %c0_i32 : i32
    %c0_i32_0 = arith.constant 0 : i32
    %c0_i32_1 = arith.constant 0 : i32
    return %arg0, %1, %c0_i32_0 : i32, i32, i32
  }
  func.func @transform_2(%arg0: i32, %arg1: i32) -> (i32, i32, i32) {
    %c0_i32 = arith.constant 0 : i32
    %c0_i32_0 = arith.constant 0 : i32
    %c0_i32_1 = arith.constant 0 : i32
    %c0_i32_2 = arith.constant 0 : i32
    return %c0_i32, %c0_i32_0, %c0_i32_1 : i32, i32, i32
  }
  func.func @transform_3(%arg0: i32, %arg1: i32) -> (i32, i32) {
    %c0_i32 = arith.constant 0 : i32
    %c0_i32_0 = arith.constant 0 : i32
    %c0_i32_1 = arith.constant 0 : i32
    return %c0_i32, %c0_i32_0 : i32, i32
  }
  func.func @transform_4(%arg0: i32, %arg1: i32) -> (i32, i32, i32) {
    %c0_i32 = arith.constant 0 : i32
    %c0_i32_0 = arith.constant 0 : i32
    return %arg0, %arg1, %c0_i32 : i32, i32, i32
  }
}

module attributes {stable_mosaic.version = 11 : i64} {
  func.func @_deconv_up2_kernel(%arg0: i32, %arg1: i32, %arg2: memref<1x32x128xf32, #tpu.memory_space<vmem>>, %arg3: memref<1x32x128xf32, #tpu.memory_space<vmem>>, %arg4: memref<3x128x128xf32, #tpu.memory_space<vmem>>, %arg5: memref<1x128xf32, #tpu.memory_space<vmem>>, %arg6: memref<1x32x256xf32, #tpu.memory_space<vmem>>) attributes {dimension_semantics = [#tpu.dimension_semantics<parallel>, #tpu.dimension_semantics<parallel>], iteration_bounds = array<i64: 2, 1>, scalar_prefetch = 0 : i64, scratch_operands = 0 : i64, tpu.core_type = #tpu.core_type<tc>, window_params = [{transform_indices = @transform_0, window_bounds = array<i64: 1, 32, 128>}, {transform_indices = @transform_1, window_bounds = array<i64: 1, 32, 128>}, {pipeline_mode = #tpu.pipeline_mode<synchronous>, transform_indices = @transform_2, window_bounds = array<i64: 3, 128, 128>}, {pipeline_mode = #tpu.pipeline_mode<synchronous>, transform_indices = @transform_3, window_bounds = array<i64: 1, 128>}, {transform_indices = @transform_4, window_bounds = array<i64: 1, 32, 256>}]} {
    %c0 = arith.constant 0 : index
    %c0_0 = arith.constant 0 : index
    %c0_1 = arith.constant 0 : index
    %0 = vector.load %arg2[%c0, %c0_0, %c0_1] : memref<1x32x128xf32, #tpu.memory_space<vmem>>, vector<1x32x128xf32>
    %1 = vector.shape_cast %0 : vector<1x32x128xf32> to vector<32x128xf32>
    %c0_2 = arith.constant 0 : index
    %c0_3 = arith.constant 0 : index
    %c0_4 = arith.constant 0 : index
    %2 = vector.load %arg3[%c0_2, %c0_3, %c0_4] : memref<1x32x128xf32, #tpu.memory_space<vmem>>, vector<1x1x128xf32>
    %3 = vector.shape_cast %2 : vector<1x1x128xf32> to vector<1x128xf32>
    %c0_i32 = arith.constant 0 : i32
    %4 = arith.cmpi eq, %arg1, %c0_i32 : i32
    %cst = arith.constant 0.000000e+00 : f32
    %5 = vector.broadcast %cst : f32 to vector<1x128xf32>
    %6 = arith.select %4, %5, %3 : vector<1x128xf32>
    %7 = vector.extract_strided_slice %1 {offsets = [1, 0], sizes = [31, 128], strides = [1, 1]} : vector<32x128xf32> to vector<31x128xf32>
    %8 = tpu.concatenate %7, %6 in 0 : vector<31x128xf32>, vector<1x128xf32> -> vector<32x128xf32>
    %c0_5 = arith.constant 0 : index
    %c0_6 = arith.constant 0 : index
    %9 = vector.load %arg5[%c0_5, %c0_6] : memref<1x128xf32, #tpu.memory_space<vmem>>, vector<1x128xf32>
    %c1 = arith.constant 1 : index
    %c0_7 = arith.constant 0 : index
    %c0_8 = arith.constant 0 : index
    %10 = vector.load %arg4[%c1, %c0_7, %c0_8] : memref<3x128x128xf32, #tpu.memory_space<vmem>>, vector<1x128x128xf32>
    %11 = vector.shape_cast %10 : vector<1x128x128xf32> to vector<128x128xf32>
    %cst_9 = arith.constant dense<0.000000e+00> : vector<32x128xf32>
    %12 = tpu.matmul %1, %11, %cst_9 {dimension_numbers = #tpu.dot_dimension_numbers<[1], [0], [0], [1], [0, 0, 1, 1], [], []>} : vector<32x128xf32>, vector<128x128xf32>, vector<32x128xf32> -> vector<32x128xf32>
    %13 = vector.broadcast %9 : vector<1x128xf32> to vector<32x128xf32>
    %14 = arith.addf %12, %13 : vector<32x128xf32>
    %c0_10 = arith.constant 0 : index
    %c0_11 = arith.constant 0 : index
    %c0_12 = arith.constant 0 : index
    %15 = vector.load %arg4[%c0_10, %c0_11, %c0_12] : memref<3x128x128xf32, #tpu.memory_space<vmem>>, vector<1x128x128xf32>
    %16 = vector.shape_cast %15 : vector<1x128x128xf32> to vector<128x128xf32>
    %cst_13 = arith.constant dense<0.000000e+00> : vector<32x128xf32>
    %17 = tpu.matmul %8, %16, %cst_13 {dimension_numbers = #tpu.dot_dimension_numbers<[1], [0], [0], [1], [0, 0, 1, 1], [], []>} : vector<32x128xf32>, vector<128x128xf32>, vector<32x128xf32> -> vector<32x128xf32>
    %c2 = arith.constant 2 : index
    %c0_14 = arith.constant 0 : index
    %c0_15 = arith.constant 0 : index
    %18 = vector.load %arg4[%c2, %c0_14, %c0_15] : memref<3x128x128xf32, #tpu.memory_space<vmem>>, vector<1x128x128xf32>
    %19 = vector.shape_cast %18 : vector<1x128x128xf32> to vector<128x128xf32>
    %cst_16 = arith.constant dense<0.000000e+00> : vector<32x128xf32>
    %20 = tpu.matmul %1, %19, %cst_16 {dimension_numbers = #tpu.dot_dimension_numbers<[1], [0], [0], [1], [0, 0, 1, 1], [], []>} : vector<32x128xf32>, vector<128x128xf32>, vector<32x128xf32> -> vector<32x128xf32>
    %21 = arith.addf %17, %20 : vector<32x128xf32>
    %22 = vector.broadcast %9 : vector<1x128xf32> to vector<32x128xf32>
    %23 = arith.addf %21, %22 : vector<32x128xf32>
    %24 = tpu.concatenate %14, %23 in 1 : vector<32x128xf32>, vector<32x128xf32> -> vector<32x256xf32>
    %c0_17 = arith.constant 0 : index
    %c0_18 = arith.constant 0 : index
    %c0_19 = arith.constant 0 : index
    %25 = vector.load %arg6[%c0_17, %c0_18, %c0_19] : memref<1x32x256xf32, #tpu.memory_space<vmem>>, vector<1x32x256xf32>
    %26 = vector.shape_cast %25 : vector<1x32x256xf32> to vector<32x256xf32>
    %27 = vector.shape_cast %24 : vector<32x256xf32> to vector<1x32x256xf32>
    tpu.vector_store %arg6[%c0_17, %c0_18, %c0_19], %27 {strides = array<i32>} : memref<1x32x256xf32, #tpu.memory_space<vmem>>, vector<1x32x256xf32>,
    return
  }
  func.func @transform_0(%arg0: i32, %arg1: i32) -> (i32, i32, i32) {
    %c0_i32 = arith.constant 0 : i32
    %c0_i32_0 = arith.constant 0 : i32
    return %arg0, %arg1, %c0_i32 : i32, i32, i32
  }
  func.func @transform_1(%arg0: i32, %arg1: i32) -> (i32, i32, i32) {
    %c1_i32 = arith.constant 1 : i32
    %0 = arith.addi %arg1, %c1_i32 : i32
    %c0_i32 = arith.constant 0 : i32
    %1 = arith.minsi %0, %c0_i32 : i32
    %c0_i32_0 = arith.constant 0 : i32
    %c0_i32_1 = arith.constant 0 : i32
    return %arg0, %1, %c0_i32_0 : i32, i32, i32
  }
  func.func @transform_2(%arg0: i32, %arg1: i32) -> (i32, i32, i32) {
    %c0_i32 = arith.constant 0 : i32
    %c0_i32_0 = arith.constant 0 : i32
    %c0_i32_1 = arith.constant 0 : i32
    %c0_i32_2 = arith.constant 0 : i32
    return %c0_i32, %c0_i32_0, %c0_i32_1 : i32, i32, i32
  }
  func.func @transform_3(%arg0: i32, %arg1: i32) -> (i32, i32) {
    %c0_i32 = arith.constant 0 : i32
    %c0_i32_0 = arith.constant 0 : i32
    %c0_i32_1 = arith.constant 0 : i32
    return %c0_i32, %c0_i32_0 : i32, i32
  }
  func.func @transform_4(%arg0: i32, %arg1: i32) -> (i32, i32, i32) {
    %c0_i32 = arith.constant 0 : i32
    %c0_i32_0 = arith.constant 0 : i32
    return %arg0, %arg1, %c0_i32 : i32, i32, i32
  }
}

module attributes {stable_mosaic.version = 11 : i64} {
  func.func @_conv_fwd_kernel(%arg0: i32, %arg1: i32, %arg2: memref<1x32x128xf32, #tpu.memory_space<vmem>>, %arg3: memref<1x32x128xf32, #tpu.memory_space<vmem>>, %arg4: memref<3x128x128xf32, #tpu.memory_space<vmem>>, %arg5: memref<3x128x128xf32, #tpu.memory_space<vmem>>, %arg6: memref<1x128xf32, #tpu.memory_space<vmem>>, %arg7: memref<1x32x128xf32, #tpu.memory_space<vmem>>, %arg8: memref<2x128xf32, #tpu.memory_space<vmem>>, %arg9: memref<2x128xf32, #tpu.memory_space<vmem>>) attributes {dimension_semantics = [#tpu.dimension_semantics<parallel>, #tpu.dimension_semantics<arbitrary>], iteration_bounds = array<i64: 2, 1>, scalar_prefetch = 0 : i64, scratch_operands = 2 : i64, tpu.core_type = #tpu.core_type<tc>, window_params = [{transform_indices = @transform_0, window_bounds = array<i64: 1, 32, 128>}, {transform_indices = @transform_1, window_bounds = array<i64: 1, 32, 128>}, {pipeline_mode = #tpu.pipeline_mode<synchronous>, transform_indices = @transform_2, window_bounds = array<i64: 3, 128, 128>}, {pipeline_mode = #tpu.pipeline_mode<synchronous>, transform_indices = @transform_3, window_bounds = array<i64: 3, 128, 128>}, {pipeline_mode = #tpu.pipeline_mode<synchronous>, transform_indices = @transform_4, window_bounds = array<i64: 1, 128>}, {transform_indices = @transform_5, window_bounds = array<i64: 1, 32, 128>}]} {
    %c0_i32 = arith.constant 0 : i32
    %0 = arith.cmpi eq, %arg1, %c0_i32 : i32
    %1 = arith.extui %0 : i1 to i32
    %c0_i32_0 = arith.constant 0 : i32
    %2 = arith.cmpi ne, %1, %c0_i32_0 : i32
    scf.if %2 {
      %cst_40 = arith.constant 0.000000e+00 : f32
      %50 = vector.broadcast %cst_40 : f32 to vector<2x128xf32>
      %c0_41 = arith.constant 0 : index
      %c0_42 = arith.constant 0 : index
      %51 = vector.load %arg8[%c0_41, %c0_42] : memref<2x128xf32, #tpu.memory_space<vmem>>, vector<2x128xf32>
      tpu.vector_store %arg8[%c0_41, %c0_42], %50 {strides = array<i32>} : memref<2x128xf32, #tpu.memory_space<vmem>>, vector<2x128xf32>,
      %cst_43 = arith.constant 0.000000e+00 : f32
      %52 = vector.broadcast %cst_43 : f32 to vector<2x128xf32>
      %c0_44 = arith.constant 0 : index
      %c0_45 = arith.constant 0 : index
      %53 = vector.load %arg9[%c0_44, %c0_45] : memref<2x128xf32, #tpu.memory_space<vmem>>, vector<2x128xf32>
      tpu.vector_store %arg9[%c0_44, %c0_45], %52 {strides = array<i32>} : memref<2x128xf32, #tpu.memory_space<vmem>>, vector<2x128xf32>,
    } else {
    }
    %c0 = arith.constant 0 : index
    %c0_1 = arith.constant 0 : index
    %c0_2 = arith.constant 0 : index
    %3 = vector.load %arg2[%c0, %c0_1, %c0_2] : memref<1x32x128xf32, #tpu.memory_space<vmem>>, vector<1x32x128xf32>
    %4 = vector.shape_cast %3 : vector<1x32x128xf32> to vector<32x128xf32>
    %c0_3 = arith.constant 0 : index
    %c0_4 = arith.constant 0 : index
    %5 = vector.load %arg8[%c0_3, %c0_4] : memref<2x128xf32, #tpu.memory_space<vmem>>, vector<2x128xf32>
    %6 = tpu.concatenate %5, %4 in 0 : vector<2x128xf32>, vector<32x128xf32> -> vector<34x128xf32>
    %7 = vector.extract_strided_slice %6 {offsets = [0, 0], sizes = [32, 128], strides = [1, 1]} : vector<34x128xf32> to vector<32x128xf32>
    %c0_5 = arith.constant 0 : index
    %c0_6 = arith.constant 0 : index
    %c0_7 = arith.constant 0 : index
    %8 = vector.load %arg4[%c0_5, %c0_6, %c0_7] : memref<3x128x128xf32, #tpu.memory_space<vmem>>, vector<1x128x128xf32>
    %9 = vector.shape_cast %8 : vector<1x128x128xf32> to vector<128x128xf32>
    %cst = arith.constant dense<0.000000e+00> : vector<32x128xf32>
    %10 = tpu.matmul %7, %9, %cst {dimension_numbers = #tpu.dot_dimension_numbers<[1], [0], [0], [1], [0, 0, 1, 1], [], []>} : vector<32x128xf32>, vector<128x128xf32>, vector<32x128xf32> -> vector<32x128xf32>
    %11 = vector.extract_strided_slice %6 {offsets = [1, 0], sizes = [32, 128], strides = [1, 1]} : vector<34x128xf32> to vector<32x128xf32>
    %c1 = arith.constant 1 : index
    %c0_8 = arith.constant 0 : index
    %c0_9 = arith.constant 0 : index
    %12 = vector.load %arg4[%c1, %c0_8, %c0_9] : memref<3x128x128xf32, #tpu.memory_space<vmem>>, vector<1x128x128xf32>
    %13 = vector.shape_cast %12 : vector<1x128x128xf32> to vector<128x128xf32>
    %cst_10 = arith.constant dense<0.000000e+00> : vector<32x128xf32>
    %14 = tpu.matmul %11, %13, %cst_10 {dimension_numbers = #tpu.dot_dimension_numbers<[1], [0], [0], [1], [0, 0, 1, 1], [], []>} : vector<32x128xf32>, vector<128x128xf32>, vector<32x128xf32> -> vector<32x128xf32>
    %15 = arith.addf %10, %14 : vector<32x128xf32>
    %16 = vector.extract_strided_slice %6 {offsets = [2, 0], sizes = [32, 128], strides = [1, 1]} : vector<34x128xf32> to vector<32x128xf32>
    %c2 = arith.constant 2 : index
    %c0_11 = arith.constant 0 : index
    %c0_12 = arith.constant 0 : index
    %17 = vector.load %arg4[%c2, %c0_11, %c0_12] : memref<3x128x128xf32, #tpu.memory_space<vmem>>, vector<1x128x128xf32>
    %18 = vector.shape_cast %17 : vector<1x128x128xf32> to vector<128x128xf32>
    %cst_13 = arith.constant dense<0.000000e+00> : vector<32x128xf32>
    %19 = tpu.matmul %16, %18, %cst_13 {dimension_numbers = #tpu.dot_dimension_numbers<[1], [0], [0], [1], [0, 0, 1, 1], [], []>} : vector<32x128xf32>, vector<128x128xf32>, vector<32x128xf32> -> vector<32x128xf32>
    %20 = arith.addf %15, %19 : vector<32x128xf32>
    %c0_14 = arith.constant 0 : index
    %c0_15 = arith.constant 0 : index
    %c0_16 = arith.constant 0 : index
    %21 = vector.load %arg3[%c0_14, %c0_15, %c0_16] : memref<1x32x128xf32, #tpu.memory_space<vmem>>, vector<1x32x128xf32>
    %22 = vector.shape_cast %21 : vector<1x32x128xf32> to vector<32x128xf32>
    %c0_17 = arith.constant 0 : index
    %c0_18 = arith.constant 0 : index
    %23 = vector.load %arg9[%c0_17, %c0_18] : memref<2x128xf32, #tpu.memory_space<vmem>>, vector<2x128xf32>
    %24 = tpu.concatenate %23, %22 in 0 : vector<2x128xf32>, vector<32x128xf32> -> vector<34x128xf32>
    %25 = vector.extract_strided_slice %24 {offsets = [0, 0], sizes = [32, 128], strides = [1, 1]} : vector<34x128xf32> to vector<32x128xf32>
    %c0_19 = arith.constant 0 : index
    %c0_20 = arith.constant 0 : index
    %c0_21 = arith.constant 0 : index
    %26 = vector.load %arg5[%c0_19, %c0_20, %c0_21] : memref<3x128x128xf32, #tpu.memory_space<vmem>>, vector<1x128x128xf32>
    %27 = vector.shape_cast %26 : vector<1x128x128xf32> to vector<128x128xf32>
    %cst_22 = arith.constant dense<0.000000e+00> : vector<32x128xf32>
    %28 = tpu.matmul %25, %27, %cst_22 {dimension_numbers = #tpu.dot_dimension_numbers<[1], [0], [0], [1], [0, 0, 1, 1], [], []>} : vector<32x128xf32>, vector<128x128xf32>, vector<32x128xf32> -> vector<32x128xf32>
    %29 = arith.addf %20, %28 : vector<32x128xf32>
    %30 = vector.extract_strided_slice %24 {offsets = [1, 0], sizes = [32, 128], strides = [1, 1]} : vector<34x128xf32> to vector<32x128xf32>
    %c1_23 = arith.constant 1 : index
    %c0_24 = arith.constant 0 : index
    %c0_25 = arith.constant 0 : index
    %31 = vector.load %arg5[%c1_23, %c0_24, %c0_25] : memref<3x128x128xf32, #tpu.memory_space<vmem>>, vector<1x128x128xf32>
    %32 = vector.shape_cast %31 : vector<1x128x128xf32> to vector<128x128xf32>
    %cst_26 = arith.constant dense<0.000000e+00> : vector<32x128xf32>
    %33 = tpu.matmul %30, %32, %cst_26 {dimension_numbers = #tpu.dot_dimension_numbers<[1], [0], [0], [1], [0, 0, 1, 1], [], []>} : vector<32x128xf32>, vector<128x128xf32>, vector<32x128xf32> -> vector<32x128xf32>
    %34 = arith.addf %29, %33 : vector<32x128xf32>
    %35 = vector.extract_strided_slice %24 {offsets = [2, 0], sizes = [32, 128], strides = [1, 1]} : vector<34x128xf32> to vector<32x128xf32>
    %c2_27 = arith.constant 2 : index
    %c0_28 = arith.constant 0 : index
    %c0_29 = arith.constant 0 : index
    %36 = vector.load %arg5[%c2_27, %c0_28, %c0_29] : memref<3x128x128xf32, #tpu.memory_space<vmem>>, vector<1x128x128xf32>
    %37 = vector.shape_cast %36 : vector<1x128x128xf32> to vector<128x128xf32>
    %cst_30 = arith.constant dense<0.000000e+00> : vector<32x128xf32>
    %38 = tpu.matmul %35, %37, %cst_30 {dimension_numbers = #tpu.dot_dimension_numbers<[1], [0], [0], [1], [0, 0, 1, 1], [], []>} : vector<32x128xf32>, vector<128x128xf32>, vector<32x128xf32> -> vector<32x128xf32>
    %39 = arith.addf %34, %38 : vector<32x128xf32>
    %40 = vector.extract_strided_slice %22 {offsets = [30, 0], sizes = [2, 128], strides = [1, 1]} : vector<32x128xf32> to vector<2x128xf32>
    %c0_31 = arith.constant 0 : index
    %c0_32 = arith.constant 0 : index
    %41 = vector.load %arg9[%c0_31, %c0_32] : memref<2x128xf32, #tpu.memory_space<vmem>>, vector<2x128xf32>
    tpu.vector_store %arg9[%c0_31, %c0_32], %40 {strides = array<i32>} : memref<2x128xf32, #tpu.memory_space<vmem>>, vector<2x128xf32>,
    %42 = vector.extract_strided_slice %4 {offsets = [30, 0], sizes = [2, 128], strides = [1, 1]} : vector<32x128xf32> to vector<2x128xf32>
    %c0_33 = arith.constant 0 : index
    %c0_34 = arith.constant 0 : index
    %43 = vector.load %arg8[%c0_33, %c0_34] : memref<2x128xf32, #tpu.memory_space<vmem>>, vector<2x128xf32>
    tpu.vector_store %arg8[%c0_33, %c0_34], %42 {strides = array<i32>} : memref<2x128xf32, #tpu.memory_space<vmem>>, vector<2x128xf32>,
    %c0_35 = arith.constant 0 : index
    %c0_36 = arith.constant 0 : index
    %44 = vector.load %arg6[%c0_35, %c0_36] : memref<1x128xf32, #tpu.memory_space<vmem>>, vector<1x128xf32>
    %45 = vector.broadcast %44 : vector<1x128xf32> to vector<32x128xf32>
    %46 = arith.addf %39, %45 : vector<32x128xf32>
    %c0_37 = arith.constant 0 : index
    %c0_38 = arith.constant 0 : index
    %c0_39 = arith.constant 0 : index
    %47 = vector.load %arg7[%c0_37, %c0_38, %c0_39] : memref<1x32x128xf32, #tpu.memory_space<vmem>>, vector<1x32x128xf32>
    %48 = vector.shape_cast %47 : vector<1x32x128xf32> to vector<32x128xf32>
    %49 = vector.shape_cast %46 : vector<32x128xf32> to vector<1x32x128xf32>
    tpu.vector_store %arg7[%c0_37, %c0_38, %c0_39], %49 {strides = array<i32>} : memref<1x32x128xf32, #tpu.memory_space<vmem>>, vector<1x32x128xf32>,
    return
  }
  func.func @transform_0(%arg0: i32, %arg1: i32) -> (i32, i32, i32) {
    %c0_i32 = arith.constant 0 : i32
    %c0_i32_0 = arith.constant 0 : i32
    return %arg0, %arg1, %c0_i32 : i32, i32, i32
  }
  func.func @transform_1(%arg0: i32, %arg1: i32) -> (i32, i32, i32) {
    %c0_i32 = arith.constant 0 : i32
    %c0_i32_0 = arith.constant 0 : i32
    return %arg0, %arg1, %c0_i32 : i32, i32, i32
  }
  func.func @transform_2(%arg0: i32, %arg1: i32) -> (i32, i32, i32) {
    %c0_i32 = arith.constant 0 : i32
    %c0_i32_0 = arith.constant 0 : i32
    %c0_i32_1 = arith.constant 0 : i32
    %c0_i32_2 = arith.constant 0 : i32
    return %c0_i32, %c0_i32_0, %c0_i32_1 : i32, i32, i32
  }
  func.func @transform_3(%arg0: i32, %arg1: i32) -> (i32, i32, i32) {
    %c0_i32 = arith.constant 0 : i32
    %c0_i32_0 = arith.constant 0 : i32
    %c0_i32_1 = arith.constant 0 : i32
    %c0_i32_2 = arith.constant 0 : i32
    return %c0_i32, %c0_i32_0, %c0_i32_1 : i32, i32, i32
  }
  func.func @transform_4(%arg0: i32, %arg1: i32) -> (i32, i32) {
    %c0_i32 = arith.constant 0 : i32
    %c0_i32_0 = arith.constant 0 : i32
    %c0_i32_1 = arith.constant 0 : i32
    return %c0_i32, %c0_i32_0 : i32, i32
  }
  func.func @transform_5(%arg0: i32, %arg1: i32) -> (i32, i32, i32) {
    %c0_i32 = arith.constant 0 : i32
    %c0_i32_0 = arith.constant 0 : i32
    return %arg0, %arg1, %c0_i32 : i32, i32, i32
  }
}

module attributes {stable_mosaic.version = 11 : i64} {
  func.func @_conv_fwd_kernel(%arg0: i32, %arg1: i32, %arg2: memref<1x64x128xf32, #tpu.memory_space<vmem>>, %arg3: memref<1x64x32xf32, #tpu.memory_space<vmem>>, %arg4: memref<3x128x2xf32, #tpu.memory_space<vmem>>, %arg5: memref<3x32x2xf32, #tpu.memory_space<vmem>>, %arg6: memref<1x2xf32, #tpu.memory_space<vmem>>, %arg7: memref<1x64x2xf32, #tpu.memory_space<vmem>>, %arg8: memref<2x128xf32, #tpu.memory_space<vmem>>, %arg9: memref<2x32xf32, #tpu.memory_space<vmem>>) attributes {dimension_semantics = [#tpu.dimension_semantics<parallel>, #tpu.dimension_semantics<arbitrary>], iteration_bounds = array<i64: 2, 1>, scalar_prefetch = 0 : i64, scratch_operands = 2 : i64, tpu.core_type = #tpu.core_type<tc>, window_params = [{transform_indices = @transform_0, window_bounds = array<i64: 1, 64, 128>}, {transform_indices = @transform_1, window_bounds = array<i64: 1, 64, 32>}, {pipeline_mode = #tpu.pipeline_mode<synchronous>, transform_indices = @transform_2, window_bounds = array<i64: 3, 128, 2>}, {pipeline_mode = #tpu.pipeline_mode<synchronous>, transform_indices = @transform_3, window_bounds = array<i64: 3, 32, 2>}, {pipeline_mode = #tpu.pipeline_mode<synchronous>, transform_indices = @transform_4, window_bounds = array<i64: 1, 2>}, {transform_indices = @transform_5, window_bounds = array<i64: 1, 64, 2>}]} {
    %c0_i32 = arith.constant 0 : i32
    %0 = arith.cmpi eq, %arg1, %c0_i32 : i32
    %1 = arith.extui %0 : i1 to i32
    %c0_i32_0 = arith.constant 0 : i32
    %2 = arith.cmpi ne, %1, %c0_i32_0 : i32
    scf.if %2 {
      %cst_40 = arith.constant 0.000000e+00 : f32
      %50 = vector.broadcast %cst_40 : f32 to vector<2x128xf32>
      %c0_41 = arith.constant 0 : index
      %c0_42 = arith.constant 0 : index
      %51 = vector.load %arg8[%c0_41, %c0_42] : memref<2x128xf32, #tpu.memory_space<vmem>>, vector<2x128xf32>
      tpu.vector_store %arg8[%c0_41, %c0_42], %50 {strides = array<i32>} : memref<2x128xf32, #tpu.memory_space<vmem>>, vector<2x128xf32>,
      %cst_43 = arith.constant 0.000000e+00 : f32
      %52 = vector.broadcast %cst_43 : f32 to vector<2x32xf32>
      %c0_44 = arith.constant 0 : index
      %c0_45 = arith.constant 0 : index
      %53 = vector.load %arg9[%c0_44, %c0_45] : memref<2x32xf32, #tpu.memory_space<vmem>>, vector<2x32xf32>
      tpu.vector_store %arg9[%c0_44, %c0_45], %52 {strides = array<i32>} : memref<2x32xf32, #tpu.memory_space<vmem>>, vector<2x32xf32>,
    } else {
    }
    %c0 = arith.constant 0 : index
    %c0_1 = arith.constant 0 : index
    %c0_2 = arith.constant 0 : index
    %3 = vector.load %arg2[%c0, %c0_1, %c0_2] : memref<1x64x128xf32, #tpu.memory_space<vmem>>, vector<1x64x128xf32>
    %4 = vector.shape_cast %3 : vector<1x64x128xf32> to vector<64x128xf32>
    %c0_3 = arith.constant 0 : index
    %c0_4 = arith.constant 0 : index
    %5 = vector.load %arg8[%c0_3, %c0_4] : memref<2x128xf32, #tpu.memory_space<vmem>>, vector<2x128xf32>
    %6 = tpu.concatenate %5, %4 in 0 : vector<2x128xf32>, vector<64x128xf32> -> vector<66x128xf32>
    %7 = vector.extract_strided_slice %6 {offsets = [0, 0], sizes = [64, 128], strides = [1, 1]} : vector<66x128xf32> to vector<64x128xf32>
    %c0_5 = arith.constant 0 : index
    %c0_6 = arith.constant 0 : index
    %c0_7 = arith.constant 0 : index
    %8 = vector.load %arg4[%c0_5, %c0_6, %c0_7] : memref<3x128x2xf32, #tpu.memory_space<vmem>>, vector<1x128x2xf32>
    %9 = vector.shape_cast %8 : vector<1x128x2xf32> to vector<128x2xf32>
    %cst = arith.constant dense<0.000000e+00> : vector<64x2xf32>
    %10 = tpu.matmul %7, %9, %cst {dimension_numbers = #tpu.dot_dimension_numbers<[1], [0], [0], [1], [0, 0, 1, 1], [], []>} : vector<64x128xf32>, vector<128x2xf32>, vector<64x2xf32> -> vector<64x2xf32>
    %11 = vector.extract_strided_slice %6 {offsets = [1, 0], sizes = [64, 128], strides = [1, 1]} : vector<66x128xf32> to vector<64x128xf32>
    %c1 = arith.constant 1 : index
    %c0_8 = arith.constant 0 : index
    %c0_9 = arith.constant 0 : index
    %12 = vector.load %arg4[%c1, %c0_8, %c0_9] : memref<3x128x2xf32, #tpu.memory_space<vmem>>, vector<1x128x2xf32>
    %13 = vector.shape_cast %12 : vector<1x128x2xf32> to vector<128x2xf32>
    %cst_10 = arith.constant dense<0.000000e+00> : vector<64x2xf32>
    %14 = tpu.matmul %11, %13, %cst_10 {dimension_numbers = #tpu.dot_dimension_numbers<[1], [0], [0], [1], [0, 0, 1, 1], [], []>} : vector<64x128xf32>, vector<128x2xf32>, vector<64x2xf32> -> vector<64x2xf32>
    %15 = arith.addf %10, %14 : vector<64x2xf32>
    %16 = vector.extract_strided_slice %6 {offsets = [2, 0], sizes = [64, 128], strides = [1, 1]} : vector<66x128xf32> to vector<64x128xf32>
    %c2 = arith.constant 2 : index
    %c0_11 = arith.constant 0 : index
    %c0_12 = arith.constant 0 : index
    %17 = vector.load %arg4[%c2, %c0_11, %c0_12] : memref<3x128x2xf32, #tpu.memory_space<vmem>>, vector<1x128x2xf32>
    %18 = vector.shape_cast %17 : vector<1x128x2xf32> to vector<128x2xf32>
    %cst_13 = arith.constant dense<0.000000e+00> : vector<64x2xf32>
    %19 = tpu.matmul %16, %18, %cst_13 {dimension_numbers = #tpu.dot_dimension_numbers<[1], [0], [0], [1], [0, 0, 1, 1], [], []>} : vector<64x128xf32>, vector<128x2xf32>, vector<64x2xf32> -> vector<64x2xf32>
    %20 = arith.addf %15, %19 : vector<64x2xf32>
    %c0_14 = arith.constant 0 : index
    %c0_15 = arith.constant 0 : index
    %c0_16 = arith.constant 0 : index
    %21 = vector.load %arg3[%c0_14, %c0_15, %c0_16] : memref<1x64x32xf32, #tpu.memory_space<vmem>>, vector<1x64x32xf32>
    %22 = vector.shape_cast %21 : vector<1x64x32xf32> to vector<64x32xf32>
    %c0_17 = arith.constant 0 : index
    %c0_18 = arith.constant 0 : index
    %23 = vector.load %arg9[%c0_17, %c0_18] : memref<2x32xf32, #tpu.memory_space<vmem>>, vector<2x32xf32>
    %24 = tpu.concatenate %23, %22 in 0 : vector<2x32xf32>, vector<64x32xf32> -> vector<66x32xf32>
    %25 = vector.extract_strided_slice %24 {offsets = [0, 0], sizes = [64, 32], strides = [1, 1]} : vector<66x32xf32> to vector<64x32xf32>
    %c0_19 = arith.constant 0 : index
    %c0_20 = arith.constant 0 : index
    %c0_21 = arith.constant 0 : index
    %26 = vector.load %arg5[%c0_19, %c0_20, %c0_21] : memref<3x32x2xf32, #tpu.memory_space<vmem>>, vector<1x32x2xf32>
    %27 = vector.shape_cast %26 : vector<1x32x2xf32> to vector<32x2xf32>
    %cst_22 = arith.constant dense<0.000000e+00> : vector<64x2xf32>
    %28 = tpu.matmul %25, %27, %cst_22 {dimension_numbers = #tpu.dot_dimension_numbers<[1], [0], [0], [1], [0, 0, 1, 1], [], []>} : vector<64x32xf32>, vector<32x2xf32>, vector<64x2xf32> -> vector<64x2xf32>
    %29 = arith.addf %20, %28 : vector<64x2xf32>
    %30 = vector.extract_strided_slice %24 {offsets = [1, 0], sizes = [64, 32], strides = [1, 1]} : vector<66x32xf32> to vector<64x32xf32>
    %c1_23 = arith.constant 1 : index
    %c0_24 = arith.constant 0 : index
    %c0_25 = arith.constant 0 : index
    %31 = vector.load %arg5[%c1_23, %c0_24, %c0_25] : memref<3x32x2xf32, #tpu.memory_space<vmem>>, vector<1x32x2xf32>
    %32 = vector.shape_cast %31 : vector<1x32x2xf32> to vector<32x2xf32>
    %cst_26 = arith.constant dense<0.000000e+00> : vector<64x2xf32>
    %33 = tpu.matmul %30, %32, %cst_26 {dimension_numbers = #tpu.dot_dimension_numbers<[1], [0], [0], [1], [0, 0, 1, 1], [], []>} : vector<64x32xf32>, vector<32x2xf32>, vector<64x2xf32> -> vector<64x2xf32>
    %34 = arith.addf %29, %33 : vector<64x2xf32>
    %35 = vector.extract_strided_slice %24 {offsets = [2, 0], sizes = [64, 32], strides = [1, 1]} : vector<66x32xf32> to vector<64x32xf32>
    %c2_27 = arith.constant 2 : index
    %c0_28 = arith.constant 0 : index
    %c0_29 = arith.constant 0 : index
    %36 = vector.load %arg5[%c2_27, %c0_28, %c0_29] : memref<3x32x2xf32, #tpu.memory_space<vmem>>, vector<1x32x2xf32>
    %37 = vector.shape_cast %36 : vector<1x32x2xf32> to vector<32x2xf32>
    %cst_30 = arith.constant dense<0.000000e+00> : vector<64x2xf32>
    %38 = tpu.matmul %35, %37, %cst_30 {dimension_numbers = #tpu.dot_dimension_numbers<[1], [0], [0], [1], [0, 0, 1, 1], [], []>} : vector<64x32xf32>, vector<32x2xf32>, vector<64x2xf32> -> vector<64x2xf32>
    %39 = arith.addf %34, %38 : vector<64x2xf32>
    %40 = vector.extract_strided_slice %22 {offsets = [62, 0], sizes = [2, 32], strides = [1, 1]} : vector<64x32xf32> to vector<2x32xf32>
    %c0_31 = arith.constant 0 : index
    %c0_32 = arith.constant 0 : index
    %41 = vector.load %arg9[%c0_31, %c0_32] : memref<2x32xf32, #tpu.memory_space<vmem>>, vector<2x32xf32>
    tpu.vector_store %arg9[%c0_31, %c0_32], %40 {strides = array<i32>} : memref<2x32xf32, #tpu.memory_space<vmem>>, vector<2x32xf32>,
    %42 = vector.extract_strided_slice %4 {offsets = [62, 0], sizes = [2, 128], strides = [1, 1]} : vector<64x128xf32> to vector<2x128xf32>
    %c0_33 = arith.constant 0 : index
    %c0_34 = arith.constant 0 : index
    %43 = vector.load %arg8[%c0_33, %c0_34] : memref<2x128xf32, #tpu.memory_space<vmem>>, vector<2x128xf32>
    tpu.vector_store %arg8[%c0_33, %c0_34], %42 {strides = array<i32>} : memref<2x128xf32, #tpu.memory_space<vmem>>, vector<2x128xf32>,
    %c0_35 = arith.constant 0 : index
    %c0_36 = arith.constant 0 : index
    %44 = vector.load %arg6[%c0_35, %c0_36] : memref<1x2xf32, #tpu.memory_space<vmem>>, vector<1x2xf32>
    %45 = vector.broadcast %44 : vector<1x2xf32> to vector<64x2xf32>
    %46 = arith.addf %39, %45 : vector<64x2xf32>
    %c0_37 = arith.constant 0 : index
    %c0_38 = arith.constant 0 : index
    %c0_39 = arith.constant 0 : index
    %47 = vector.load %arg7[%c0_37, %c0_38, %c0_39] : memref<1x64x2xf32, #tpu.memory_space<vmem>>, vector<1x64x2xf32>
    %48 = vector.shape_cast %47 : vector<1x64x2xf32> to vector<64x2xf32>
    %49 = vector.shape_cast %46 : vector<64x2xf32> to vector<1x64x2xf32>
    tpu.vector_store %arg7[%c0_37, %c0_38, %c0_39], %49 {strides = array<i32>} : memref<1x64x2xf32, #tpu.memory_space<vmem>>, vector<1x64x2xf32>,
    return
  }
  func.func @transform_0(%arg0: i32, %arg1: i32) -> (i32, i32, i32) {
    %c0_i32 = arith.constant 0 : i32
    %c0_i32_0 = arith.constant 0 : i32
    return %arg0, %arg1, %c0_i32 : i32, i32, i32
  }
  func.func @transform_1(%arg0: i32, %arg1: i32) -> (i32, i32, i32) {
    %c0_i32 = arith.constant 0 : i32
    %c0_i32_0 = arith.constant 0 : i32
    return %arg0, %arg1, %c0_i32 : i32, i32, i32
  }
  func.func @transform_2(%arg0: i32, %arg1: i32) -> (i32, i32, i32) {
    %c0_i32 = arith.constant 0 : i32
    %c0_i32_0 = arith.constant 0 : i32
    %c0_i32_1 = arith.constant 0 : i32
    %c0_i32_2 = arith.constant 0 : i32
    return %c0_i32, %c0_i32_0, %c0_i32_1 : i32, i32, i32
  }
  func.func @transform_3(%arg0: i32, %arg1: i32) -> (i32, i32, i32) {
    %c0_i32 = arith.constant 0 : i32
    %c0_i32_0 = arith.constant 0 : i32
    %c0_i32_1 = arith.constant 0 : i32
    %c0_i32_2 = arith.constant 0 : i32
    return %c0_i32, %c0_i32_0, %c0_i32_1 : i32, i32, i32
  }
  func.func @transform_4(%arg0: i32, %arg1: i32) -> (i32, i32) {
    %c0_i32 = arith.constant 0 : i32
    %c0_i32_0 = arith.constant 0 : i32
    %c0_i32_1 = arith.constant 0 : i32
    return %c0_i32, %c0_i32_0 : i32, i32
  }
  func.func @transform_5(%arg0: i32, %arg1: i32) -> (i32, i32, i32) {
    %c0_i32 = arith.constant 0 : i32
    %c0_i32_0 = arith.constant 0 : i32
    return %arg0, %arg1, %c0_i32 : i32, i32, i32
  }
}

</mosaic_0001>

<bundles_post_ra>
// kernel: cnn_music_forward.14
= control target key start
LH: loop header
LB: loop body
LE: loop exit
PB: predicated region body
PF: predicated region fallthrough
CT: control target
= control target key end

     0   :  { %s1104_s12 = smov 0   ;;  %s1106_s13 = smov 0   ;;  %s1291_s0 = inlined_call_operand.vmem [shape: f32[2,32,2,32], index: 0, kind: input, shape index: {}]   ;;  %s1292_s1 = inlined_call_operand.vmem [shape: f32[3,32,128], index: 1, kind: input, shape index: {}]   ;;  %s1293_s2 = inlined_call_operand.vmem [shape: f32[1,128], index: 2, kind: input, shape index: {}]   ;;  %s1294_s3 = inlined_call_operand.vmem [shape: f32[2,32,128], index: 3, kind: output, shape index: {}]  }
   0x1   :  { %s1108_s14 = smov 0  }
   0x2 LB: > { %s25_s15 = sadd.s32 1, %s1077_s13  ;;  %p902_p0 = scmp.ge.s32.totalorder %s1081_s14, 1  ;;  %s1081_s14 = sphi %s1108_s14, %s13_s14   ;;  %s1077_s13 = sphi %s1106_s13, %s1296_s13   ;;  %s1073_s12 = sphi %s1104_s12, %s1295_s12  }
   0x3   : > { %p27_p1 = scmp.ge.s32.totalorder %s25_s15, 2  ;;  %p158_p2 = scmp.lt.s32.totalorder %s1081_s14, 3 }
   0x5   : > { %s1298_s15 = smov (%p27_p1, %s25_s15), 0  ;;  %p159_p3 = pnand %p902_p0, %p158_p2 }
   0x6   : > { %v474_v0 = vld [vmem:[%s1292_s1] sm:$0xff] (!%p159_p3)  ;;  %v475_v1 = vld [vmem:[%s1292_s1 + $0x8] sm:$0xff] (!%p159_p3)  ;;  %p191_p4 = scmp.lt.s32.totalorder (!%p159_p3), %s1073_s12, 1  ;;  %vm214_vm0 = vcmask (!%p159_p3), 254976   ;;  %v476_v5 = vld [vmem:[%s1292_s1 + $0x10] sm:$0xff] (!%p159_p3)  ;;  %v1083_v7 = vmov (!%p159_p3), 0.0  }
   0x7   : > { %162 = sbr.rel (%p159_p3) target bundleno = 282 (0x11a), region = 32  ;;  %v907_v2 = vld [vmem:[%s1292_s1 + $0x20] sm:$0xff] (!%p159_p3)  ;;  %v1006_v3 = vpack.c.bf16 (!%p159_p3), %v475_v1, %v474_v0  ;;  %v908_v4 = vld [vmem:[%s1292_s1 + $0x28] sm:$0xff] (!%p159_p3)  ;;  %v477_v6 = vld [vmem:[%s1292_s1 + $0x18] sm:$0xff] (!%p159_p3)  ;;  %215 = vst.msk [vmem:[#allocation2] sm:$0x3] (!%p159_p3), %vm214_vm0, %v1083_v7 }
   0x8   : > { %v998_v8 = vpack.c.bf16 (!%p159_p3), %v908_v4, %v907_v2  ;;  %v1010_v9 = vpack.c.bf16 (!%p159_p3), %v477_v6, %v476_v5  ;;  %v909_v10 = vld [vmem:[%s1292_s1 + $0x30] sm:$0xff] (!%p159_p3)  ;;  %v910_v11 = vld [vmem:[%s1292_s1 + $0x38] sm:$0xff] (!%p159_p3)  ;;  %v919_v12 = vld [vmem:[%s1292_s1 + $0x40] sm:$0xff] (!%p159_p3)  ;;  %vm411_vm1 = vcmask (!%p159_p3), 1043459   ;;  %vm414_vm2 = vcmask (!%p159_p3), 1044484  }
   0x9   : > { %1007 = vmatprep.subr.bf16.mxu0 (!%p159_p3), %v1006_v3  ;;  %v1002_v13 = vpack.c.bf16 (!%p159_p3), %v910_v11, %v909_v10  ;;  %v920_v14 = vld [vmem:[%s1292_s1 + $0x48] sm:$0xff] (!%p159_p3)  ;;  %vm417_vm3 = vcmask (!%p159_p3), 1045509   ;;  %vm420_vm4 = vcmask (!%p159_p3), 1046534   ;;  %vm423_vm5 = vcmask (!%p159_p3), 1047559   ;;  %v921_v7 = vld [vmem:[%s1292_s1 + $0x50] sm:$0xff] (!%p159_p3) }
   0xa   : > { %1009 = vmatpush3.bf16.msra.mxu0 (!%p159_p3), %v1006_v3  ;;  %999 = vmatprep.subr.bf16.mxu1 (!%p159_p3), %v998_v8  ;;  %v1161_v15 = vpack.c.bf16 (!%p159_p3), %v920_v14, %v919_v12  ;;  %vm426_vm6 = vcmask (!%p159_p3), 1041409   ;;  %vm472_vm7 = vcmask (!%p159_p3), 1041408   ;;  %vm494_vm8 = vcmask (!%p159_p3), 261120  }
   0xb   : > { %1001 = vmatpush3.bf16.msra.mxu1 (!%p159_p3), %v998_v8  ;;  %1011 = vmatprep.subr.bf16.mxu0 (!%p159_p3), %v1010_v9  ;;  %vm429_vm9 = vcmask (!%p159_p3), 1042434   ;;  %v922_v8 = vld [vmem:[%s1292_s1 + $0x58] sm:$0xff] (!%p159_p3)  ;;  %vm484_vm10 = vcmask (!%p159_p3), 1046528   ;;  %vm686_vm11 = vcmask (!%p159_p3), 1045504  }
   0xc   : > { %1003 = vmatprep.subr.bf16.mxu1 (!%p159_p3), %v1002_v13 }
   0xe   : > { %s1300_s12 = smov (!%p191_p4, %s1073_s12), 1  ;;  %1013 = vmatpush3.bf16.msra.mxu0 %v1010_v9  ;;  %v376_v62 = vld [vmem:[#allocation2] sm:$0x3] }
   0xf   : > { %s930_s9 = sshll.u32 %s1300_s12, 6  ;;  %1005 = vmatpush3.bf16.msra.mxu1 %v1002_v13  ;;  %1015 = vmatprep.subr.bf16.mxu0 %v1161_v15  ;;  %s931_s21 = sshll.u32 %s1300_s12, 5 }
  0x10   : > { %s1159_s16 = scalar_lea.vmem %s1291_s0, %s930_s9  ;;  %1022 = vmatprep.subr.bf16.mxu1 %v1161_v15  ;;  %s208_s26 = scalar_lea.vmem %s1294_s3, %s931_s21 }
  0x11   : > { %v216_v16 = vld [vmem:[%s1159_s16] sm:$0x3]  ;;  %v217_v17 = vld [vmem:[%s1159_s16 + $0x2] sm:$0x3]  ;;  %v218_v18 = vld [vmem:[%s1159_s16 + $0x4] sm:$0x3] }
  0x12   : > { %v219_v19 = vld [vmem:[%s1159_s16 + $0x6] sm:$0x3]  ;;  %v220_v20 = vld [vmem:[%s1159_s16 + $0x8] sm:$0x3]  ;;  %v221_v21 = vld [vmem:[%s1159_s16 + $0xa] sm:$0x3] }
  0x13   : > { %v246_v22 = vld [vmem:[%s1159_s16 + $0x3c] sm:$0x3]  ;;  %v247_v23 = vld [vmem:[%s1159_s16 + $0x3e] sm:$0x3]  ;;  %v280_v24 = vrot.slane %v216_v16, 1  ;;  %v281_v25 = vrot.slane %v217_v17, 1 }
  0x14   : > { %v282_v26 = vrot.slane %v218_v18, 1  ;;  %v283_v27 = vrot.slane %v219_v19, 1  ;;  %v284_v28 = vrot.slane %v220_v20, 1  ;;  %v285_v29 = vrot.slane %v221_v21, 1  ;;  %v222_v34 = vld [vmem:[%s1159_s16 + $0xc] sm:$0x3] }
  0x15   : > { %v310_v30 = vrot.slane %v246_v22, 1  ;;  %v311_v31 = vrot.slane %v247_v23, 1  ;;  %v344_v32 = vmax.f32 %v216_v16, %v280_v24  ;;  %v345_v33 = vmax.f32 %v217_v17, %v281_v25  ;;  %v223_v39 = vld [vmem:[%s1159_s16 + $0xe] sm:$0x3]  ;;  %v224_v40 = vld [vmem:[%s1159_s16 + $0x10] sm:$0x3] }
  0x16   : > { %v346_v35 = vmax.f32 %v218_v18, %v282_v26  ;;  %v347_v36 = vmax.f32 %v219_v19, %v283_v27  ;;  %v348_v37 = vmax.f32 %v220_v20, %v284_v28  ;;  %v349_v38 = vmax.f32 %v221_v21, %v285_v29  ;;  %v225_v41 = vld [vmem:[%s1159_s16 + $0x12] sm:$0x3]  ;;  %v226_v46 = vld [vmem:[%s1159_s16 + $0x14] sm:$0x3]  ;;  %v227_v47 = vld [vmem:[%s1159_s16 + $0x16] sm:$0x3] }
  0x17   : > { %v374_v42 = vmax.f32 %v246_v22, %v310_v30  ;;  %v375_v43 = vmax.f32 %v247_v23, %v311_v31  ;;  %v409_v44 = vrot.slane %v344_v32, 6  ;;  %v410_v45 = vrot.slane %v345_v33, 5  ;;  %v228_v52 = vld [vmem:[%s1159_s16 + $0x18] sm:$0x3]  ;;  %v229_v55 = vld [vmem:[%s1159_s16 + $0x1a] sm:$0x3] }
  0x18   : > { %v413_v48 = vrot.slane %v346_v35, 4  ;;  %v416_v49 = vrot.slane %v347_v36, 3  ;;  %v419_v50 = vrot.slane %v348_v37, 2  ;;  %v422_v51 = vrot.slane %v349_v38, 1  ;;  %v230_v13 = vld [vmem:[%s1159_s16 + $0x1c] sm:$0x3] }
  0x19   : > { %v412_v53 = vsel %vm411_vm1, %v410_v45, %v409_v44  ;;  %v469_v54 = vrot.slane %v375_v43, 7  ;;  %v286_v56 = vrot.slane %v222_v34, 1  ;;  %v287_v57 = vrot.slane %v223_v39, 1  ;;  %v231_v14 = vld [vmem:[%s1159_s16 + $0x1e] sm:$0x3] }
  0x1a   : > { %v415_v58 = vsel %vm414_vm2, %v413_v48, %v412_v53  ;;  %v288_v59 = vrot.slane %v224_v40, 1  ;;  %v289_v60 = vrot.slane %v225_v41, 1  ;;  %v290_v61 = vrot.slane %v226_v46, 1  ;;  %v232_v16 = vld [vmem:[%s1159_s16 + $0x20] sm:$0x3] }
  0x1b   : > { %v418_v63 = vsel %vm417_vm3, %v416_v49, %v415_v58  ;;  %v1185_v0 = vsel %vm426_vm6, %v469_v54, %v374_v42  ;;  %v291_v1 = vrot.slane %v227_v47, 1  ;;  %v292_v2 = vrot.slane %v228_v52, 1  ;;  %v233_v21 = vld [vmem:[%s1159_s16 + $0x22] sm:$0x3]  ;;  %v234_v22 = vld [vmem:[%s1159_s16 + $0x24] sm:$0x3] }
  0x1c   : > { %v421_v3 = vsel %vm420_vm4, %v419_v50, %v418_v63  ;;  %795 = vst.msk [vmem:[#allocation2] sm:$0x3] %vm214_vm0, %v1185_v0  ;;  %v293_v4 = vrot.slane %v229_v55, 1  ;;  %v350_v5 = vmax.f32 %v222_v34, %v286_v56  ;;  %v351_v6 = vmax.f32 %v223_v39, %v287_v57  ;;  %v235_v23 = vld [vmem:[%s1159_s16 + $0x26] sm:$0x3] }
  0x1d   : > { %v424_v9 = vsel %vm423_vm5, %v422_v51, %v421_v3  ;;  %v352_v10 = vmax.f32 %v224_v40, %v288_v59  ;;  %v353_v11 = vmax.f32 %v225_v41, %v289_v60  ;;  %v354_v12 = vmax.f32 %v226_v46, %v290_v61  ;;  %v236_v27 = vld [vmem:[%s1159_s16 + $0x28] sm:$0x3]  ;;  %v237_v33 = vld [vmem:[%s1159_s16 + $0x2a] sm:$0x3]  ;;  %v238_v54 = vld [vmem:[%s1159_s16 + $0x2c] sm:$0x3] }
  0x1e   : > { %v1201_v17 = vsel %vm472_vm7, %v376_v62, %v424_v9  ;;  %v355_v18 = vmax.f32 %v227_v47, %v291_v1  ;;  %v356_v19 = vmax.f32 %v228_v52, %v292_v2  ;;  %v357_v20 = vmax.f32 %v229_v55, %v293_v4  ;;  %v239_v55 = vld [vmem:[%s1159_s16 + $0x2e] sm:$0x3]  ;;  %v240_v60 = vld [vmem:[%s1159_s16 + $0x30] sm:$0x3]  ;;  %v241_v61 = vld [vmem:[%s1159_s16 + $0x32] sm:$0x3] }
  0x1f   : > { %v485_v24 = vrot.slane %v1201_v17, 1  ;;  %978 = vmatprep.mubr.msk.f32.mxu0 %vm494_vm8, %v1201_v17  ;;  %v425_v25 = vrot.slane %v351_v6, 7  ;;  %v428_v26 = vrot.slane %v352_v10, 6  ;;  %v1210_v28 = vpack.c.bf16 %v922_v8, %v921_v7  ;;  %v242_v3 = vld [vmem:[%s1159_s16 + $0x34] sm:$0x3] }
  0x20   : > { %v431_v29 = vrot.slane %v353_v11, 5  ;;  %v433_v30 = vrot.slane %v354_v12, 4  ;;  %v435_v31 = vrot.slane %v355_v18, 3  ;;  %v437_v32 = vrot.slane %v356_v19, 2  ;;  %v243_v7 = vld [vmem:[%s1159_s16 + $0x36] sm:$0x3] }
  0x21   : > { %v427_v34 = vsel %vm426_vm6, %v425_v25, %v350_v5  ;;  %v439_v35 = vrot.slane %v357_v20, 1  ;;  %v294_v36 = vrot.slane %v230_v13, 1  ;;  %v295_v37 = vrot.slane %v231_v14, 1  ;;  %v244_v8 = vld [vmem:[%s1159_s16 + $0x38] sm:$0x3] }
  0x22   : > { %v430_v38 = vsel %vm429_vm9, %v428_v26, %v427_v34  ;;  %v296_v39 = vrot.slane %v232_v16, 1  ;;  %v297_v40 = vrot.slane %v233_v21, 1  ;;  %v298_v41 = vrot.slane %v234_v22, 1  ;;  %v245_v12 = vld [vmem:[%s1159_s16 + $0x3a] sm:$0x3] }
  0x23   : > { %v432_v42 = vsel %vm411_vm1, %v431_v29, %v430_v38  ;;  %v299_v43 = vrot.slane %v235_v23, 1  ;;  %v300_v44 = vrot.slane %v236_v27, 1  ;;  %v301_v45 = vrot.slane %v237_v33, 1 }
  0x24   : > { %v434_v46 = vsel %vm414_vm2, %v433_v30, %v432_v42  ;;  %v358_v47 = vmax.f32 %v230_v13, %v294_v36  ;;  %v359_v48 = vmax.f32 %v231_v14, %v295_v37  ;;  %v360_v49 = vmax.f32 %v232_v16, %v296_v39 }
  0x25   : > { %v436_v50 = vsel %vm417_vm3, %v435_v31, %v434_v46  ;;  %v361_v51 = vmax.f32 %v233_v21, %v297_v40  ;;  %v362_v52 = vmax.f32 %v234_v22, %v298_v41  ;;  %v363_v53 = vmax.f32 %v235_v23, %v299_v43 }
  0x26   : > { %v438_v56 = vsel %vm420_vm4, %v437_v32, %v436_v50  ;;  %v364_v57 = vmax.f32 %v236_v27, %v300_v44  ;;  %v365_v58 = vmax.f32 %v237_v33, %v301_v45  ;;  %v441_v59 = vrot.slane %v359_v48, 7 }
  0x27   : > { %v1224_v62 = vsel %vm423_vm5, %v439_v35, %v438_v56  ;;  %v443_v63 = vrot.slane %v360_v49, 6  ;;  %v445_v1 = vrot.slane %v361_v51, 5  ;;  %v447_v2 = vrot.slane %v362_v52, 4 }
  0x28   : > { %979 = vmatmul.mubr.msk.f32.vlgmr.msra.gmra.mrb[0].mxu0 %vm494_vm8, %v1224_v62  ;;  %v486_v4 = vrot.slane %v1224_v62, 1  ;;  %v442_v5 = vsel %vm426_vm6, %v441_v59, %v358_v47  ;;  %v449_v6 = vrot.slane %v363_v53, 3  ;;  %v451_v10 = vrot.slane %v364_v57, 2 }
  0x29   : > { %1017 = vmatpush3.bf16.msra.mxu0 %v1161_v15  ;;  %v444_v9 = vsel %vm429_vm9, %v443_v63, %v442_v5  ;;  %v453_v11 = vrot.slane %v365_v58, 1  ;;  %v302_v13 = vrot.slane %v238_v54, 1  ;;  %v303_v18 = vrot.slane %v239_v55, 1 }
  0x2a   : > { %v487_v14 = vsel %vm484_vm10, %v485_v24, %v486_v4  ;;  %v446_v16 = vsel %vm411_vm1, %v445_v1, %v444_v9  ;;  %v304_v19 = vrot.slane %v240_v60, 1  ;;  %1019 = vmatprep.subr.bf16.mxu0 %v1210_v28  ;;  %v305_v21 = vrot.slane %v241_v61, 1 }
  0x2b   : > { %964 = vmatprep.mubr.msk.f32.mxu1 %vm494_vm8, %v487_v14  ;;  %v448_v20 = vsel %vm414_vm2, %v447_v2, %v446_v16  ;;  %v306_v22 = vrot.slane %v242_v3, 1  ;;  %v307_v23 = vrot.slane %v243_v7, 1  ;;  %v308_v26 = vrot.slane %v244_v8, 1 }
  0x2c   : > { %v450_v25 = vsel %vm417_vm3, %v449_v6, %v448_v20  ;;  %v309_v27 = vrot.slane %v245_v12, 1  ;;  %v366_v29 = vmax.f32 %v238_v54, %v302_v13  ;;  %v367_v30 = vmax.f32 %v239_v55, %v303_v18  ;;  %v927_v6 = vld [vmem:[%s1293_s2] ss:$0 sm:$0xff] }
  0x2d   : > { %v452_v24 = vsel %vm420_vm4, %v451_v10, %v450_v25  ;;  %v368_v31 = vmax.f32 %v240_v60, %v304_v19  ;;  %v369_v32 = vmax.f32 %v241_v61, %v305_v21  ;;  %1021 = vmatpush3.bf16.msra.mxu0 %v1210_v28  ;;  %v370_v34 = vmax.f32 %v242_v3, %v306_v22 }
  0x2e   : > { %v454_v33 = vsel %vm423_vm5, %v453_v11, %v452_v24  ;;  %v371_v35 = vmax.f32 %v243_v7, %v307_v23  ;;  %v372_v36 = vmax.f32 %v244_v8, %v308_v26  ;;  %v373_v38 = vmax.f32 %v245_v12, %v309_v27 }
  0x2f   : > { %v488_v37 = vrot.slane %v454_v33, 1  ;;  %981 = vmatprep.mubr.msk.f32.mxu0 %vm494_vm8, %v454_v33  ;;  %v455_v39 = vrot.slane %v367_v30, 7  ;;  %v457_v40 = vrot.slane %v368_v31, 6  ;;  %v459_v41 = vrot.slane %v369_v32, 5 }
  0x30   : > { %v461_v42 = vrot.slane %v370_v34, 4  ;;  %v463_v45 = vrot.slane %v371_v35, 3  ;;  %v687_v46 = vrot.slane %v1201_v17, 2  ;;  %v688_v47 = vrot.slane %v1224_v62, 2 }
  0x31   : > { %v489_v43 = vsel %vm484_vm10, %v486_v4, %v488_v37  ;;  %v456_v44 = vsel %vm426_vm6, %v455_v39, %v366_v29  ;;  %v465_v49 = vrot.slane %v372_v36, 2  ;;  %v467_v51 = vrot.slane %v373_v38, 1 }
  0x32   : > { %965 = vmatmul.mubr.msk.f32.vlgmr.msra.gmra.mrb[0].mxu1 %vm494_vm8, %v489_v43  ;;  %v458_v48 = vsel %vm429_vm9, %v457_v40, %v456_v44  ;;  %v690_v53 = vrot.slane %v454_v33, 2  ;;  %v689_v55 = vsel %vm686_vm11, %v687_v46, %v688_v47  ;;  %v492_v56 = vrot.slane %v1185_v0, 1 }
  0x33   : > { %v460_v50 = vsel %vm411_vm1, %v459_v41, %v458_v48  ;;  %1024 = vmatpush3.bf16.msra.mxu1 %v1161_v15  ;;  %v694_v60 = vrot.slane %v1185_v0, 2 }
  0x34   : > { %v462_v52 = vsel %vm414_vm2, %v461_v42, %v460_v50  ;;  %1023 = vmatprep.subr.bf16.mxu1 %v1210_v28  ;;  %v691_v59 = vsel %vm686_vm11, %v688_v47, %v690_v53 }
  0x35   : > { %v464_v17 = vsel %vm417_vm3, %v463_v45, %v462_v52 }
  0x36   : > { %v466_v54 = vsel %vm420_vm4, %v465_v49, %v464_v17 }
  0x37   : > { %v468_v57 = vsel %vm423_vm5, %v467_v51, %v466_v54  ;;  %1025 = vmatpush3.bf16.msra.mxu1 %v1210_v28 }
  0x38   : > { %v490_v58 = vrot.slane %v468_v57, 1  ;;  %982 = vmatmul.mubr.msk.f32.gmra.mrb[2].mxu0 %vm494_vm8, %v468_v57  ;;  %v692_v15 = vrot.slane %v468_v57, 2 }
  0x39   : > { %992 = vmatprep.mubr.msk.f32.mxu0 %vm494_vm8, %v689_v55 }
  0x3a   : > { %v491_v61 = vsel %vm484_vm10, %v488_v37, %v490_v58  ;;  %v493_v62 = vsel %vm484_vm10, %v490_v58, %v492_v56  ;;  %v693_v63 = vsel %vm686_vm11, %v690_v53, %v692_v15  ;;  %v695_v28 = vsel %vm686_vm11, %v692_v15, %v694_v60 }
  0x3b   : > { %967 = vmatprep.mubr.msk.f32.mxu1 %vm494_vm8, %v491_v61 }
  0x3c   : > { %968 = vmatmul.mubr.msk.f32.gmra.mrb[2].mxu1 %vm494_vm8, %v493_v62  ;;  %993 = vmatmul.mubr.msk.f32.vlgmr.msra.gmra.mrb[0].mxu0 %vm494_vm8, %v691_v59 }
  0x3d   : > { %995 = vmatprep.mubr.msk.f32.mxu1 %vm494_vm8, %v693_v63 }
  0x40   : > { %996 = vmatmul.mubr.msk.f32.vlgmr.msra.gmra.mrb[4].mxu1 %vm494_vm8, %v695_v28 }
 0x105   : > { %v966_v1 = vpop.f32.mrb[0].mxu1 }
 0x106   : > { %v569_v0 = vpop.f32.mrb[1].mxu1 }
 0x10b   : > { %v983_v2 = vpop.f32.mrb[2].mxu0 }
 0x10c   : > { %v672_v3 = vpop.f32.mrb[3].mxu0 }
 0x10f   : > { %v969_v4 = vpop.f32.mrb[2].mxu1  ;;  %v994_v5 = vpop.f32.mrb[0].mxu0 }
 0x110   : > { %v678_v7 = vadd.f32 %v983_v2, %v969_v4  ;;  %v1026_v8 = vadd.f32 %v994_v5, %v966_v1  ;;  %v579_v9 = vpop.f32.mrb[3].mxu1  ;;  %v770_v10 = vpop.f32.mrb[1].mxu0 }
 0x111   : > { %v673_v11 = vadd.f32 %v672_v3, %v579_v9  ;;  %v1027_v12 = vadd.f32 %v770_v10, %v569_v0 }
 0x112   : > { %v804_v13 = vadd.f32 %v1026_v8, %v927_v6 }
 0x113   : > { %v803_v14 = vadd.f32 %v1027_v12, %v927_v6  ;;  %v997_v16 = vpop.f32.mrb[4].mxu1 }
 0x114   : > { %808 = vst [vmem:[%s208_s26 + $0x8] sm:$0xff] %v804_v13  ;;  %v792_v18 = vadd.f32 %v997_v16, %v678_v7  ;;  %v780_v19 = vpop.f32.mrb[5].mxu1 }
 0x115   : > { %807 = vst [vmem:[%s208_s26] sm:$0xff] %v803_v14  ;;  %v791_v20 = vadd.f32 %v780_v19, %v673_v11 }
 0x116   : > { %v806_v21 = vadd.f32 %v927_v6, %v792_v18 }
 0x117   : > { %v805_v22 = vadd.f32 %v927_v6, %v791_v20 }
 0x118   : > { %810 = vst [vmem:[%s208_s26 + $0x18] sm:$0xff] %v806_v21 }
 0x119   : > { %809 = vst [vmem:[%s208_s26 + $0x10] sm:$0xff] %v805_v22 }
 0x11a PF: > { %s13_s14 = sadd.s32 1, %s1081_s14   ;;  %s1295_s12 = smov %s1077_s13 }
 0x11b   : > { %p10_p5 = scmp.ge.s32.totalorder %s13_s14, 4   ;;  %s1296_s13 = smov %s1298_s15 }
 0x11d   :  { %12 = sbr.rel (!%p10_p5) target bundleno = 2 (0x2), region = 68 }

// kernel: cnn_music_forward.13
= control target key start
LH: loop header
LB: loop body
LE: loop exit
PB: predicated region body
PF: predicated region fallthrough
CT: control target
= control target key end

     0   :  { %s988_s12 = smov 0   ;;  %s990_s13 = smov 0   ;;  %s1136_s0 = inlined_call_operand.vmem [shape: f32[2,64,3], index: 0, kind: input, shape index: {}]   ;;  %s1137_s1 = inlined_call_operand.vmem [shape: f32[3,3,32], index: 1, kind: input, shape index: {}]   ;;  %s1138_s2 = inlined_call_operand.vmem [shape: f32[1,32], index: 2, kind: input, shape index: {}]   ;;  %s1139_s3 = inlined_call_operand.vmem [shape: f32[2,64,32], index: 3, kind: output, shape index: {}]  }
   0x1   :  { %s992_s14 = smov 0  }
   0x2 LB: > { %s25_s15 = sadd.s32 1, %s961_s13  ;;  %p792_p0 = scmp.ge.s32.totalorder %s965_s14, 1  ;;  %s965_s14 = sphi %s992_s14, %s13_s14   ;;  %s961_s13 = sphi %s990_s13, %s1141_s13   ;;  %s957_s12 = sphi %s988_s12, %s1140_s12  }
   0x3   : > { %p27_p1 = scmp.ge.s32.totalorder %s25_s15, 2  ;;  %p158_p2 = scmp.lt.s32.totalorder %s965_s14, 3 }
   0x5   : > { %s1143_s15 = smov (%p27_p1, %s25_s15), 0  ;;  %p159_p3 = pnand %p792_p0, %p158_p2 }
   0x6   : > { %v1009_v0 = vld [vmem:[%s1137_s1] sm:$0x7] (!%p159_p3)  ;;  %vm290_vm0 = vcmask (!%p159_p3), 1042432   ;;  %p191_p4 = scmp.lt.s32.totalorder (!%p159_p3), %s957_s12, 1  ;;  %vm214_vm1 = vcmask (!%p159_p3), 17408   ;;  %v967_v1 = vmov (!%p159_p3), 0.0  }
   0x7   : > { %162 = sbr.rel (%p159_p3) target bundleno = 264 (0x108), region = 32  ;;  %872 = vmatprep.subr.msk.mxu0 (!%p159_p3), %vm290_vm0, %v1009_v0  ;;  %215 = vst.msk [vmem:[#allocation2] sm:$0x3] (!%p159_p3), %vm214_vm1, %v967_v1  ;;  %v797_v2 = vld [vmem:[%s1137_s1 + $0x4] sm:$0x7] (!%p159_p3)  ;;  %vm233_vm2 = vcmask (!%p159_p3), 1041408  }
   0x8   : > { %873 = vmatpush3.msk.msra.mxu0 (!%p159_p3), %vm290_vm0, %v1009_v0  ;;  %858 = vmatprep.subr.msk.mxu1 (!%p159_p3), %vm290_vm0, %v797_v2  ;;  %v816_v3 = vld [vmem:[%s1137_s1 + $0x8] sm:$0x7] (!%p159_p3)  ;;  %vm273_vm3 = vcmask (!%p159_p3), 23552   ;;  %vm675_vm4 = vcmask (!%p159_p3), 23558   ;;  %vm255_vm5 = vcmask (!%p159_p3), 1046528   ;;  %vm525_vm6 = vcmask (!%p159_p3), 1045504  }
   0x9   : > { %859 = vmatpush3.msk.msra.mxu1 (!%p159_p3), %vm290_vm0, %v797_v2  ;;  %886 = vmatprep.subr.msk.mxu0 (!%p159_p3), %vm290_vm0, %v816_v3  ;;  %vm692_vm7 = vcmask (!%p159_p3), 261120  }
   0xa   : > { %900 = vmatprep.subr.msk.mxu1 (!%p159_p3), %vm290_vm0, %v1009_v0 }
   0xe   : > { %s1145_s12 = smov (!%p191_p4, %s957_s12), 1  ;;  %v224_v12 = vld [vmem:[#allocation2] sm:$0x3] }
   0xf   : > { %s829_s22 = sshll.u32 %s1145_s12, 6 }
  0x10   : > { %s1034_s25 = scalar_lea.vmem %s1136_s0, %s829_s22  ;;  %s1109_s30 = scalar_lea.vmem %s1139_s3, %s829_s22 }
  0x11   : > { %v216_v4 = vld [vmem:[%s1034_s25] sm:$0xff]  ;;  %v223_v5 = vld [vmem:[%s1034_s25 + $0x38] sm:$0xff]  ;;  %v217_v6 = vld [vmem:[%s1034_s25 + $0x8] sm:$0xff] }
  0x12   : > { %v234_v7 = vrot.slane %v216_v4, 6  ;;  %v235_v8 = vrot.slane %v217_v6, 6  ;;  %v218_v9 = vld [vmem:[%s1034_s25 + $0x10] sm:$0xff]  ;;  %v219_v10 = vld [vmem:[%s1034_s25 + $0x18] sm:$0xff]  ;;  %v220_v11 = vld [vmem:[%s1034_s25 + $0x20] sm:$0xff]  ;;  %v1043_v17 = vrot.slane %v223_v5, 6 }
  0x13   : > { %v237_v13 = vrot.slane %v218_v9, 6  ;;  %v239_v14 = vrot.slane %v219_v10, 6  ;;  %v241_v15 = vrot.slane %v220_v11, 6  ;;  %v221_v16 = vld [vmem:[%s1034_s25 + $0x28] sm:$0xff]  ;;  %676 = vst.msk [vmem:[#allocation2 - $0x6] sm:$0xc0] %vm675_vm4, %v223_v5 }
  0x14   : > { %v250_v18 = vsel %vm233_vm2, %v224_v12, %v234_v7  ;;  %v236_v19 = vsel %vm233_vm2, %v234_v7, %v235_v8  ;;  %v243_v20 = vrot.slane %v221_v16, 6  ;;  %v222_v29 = vld [vmem:[%s1034_s25 + $0x30] sm:$0xff]  ;;  %v271_v53 = vrot.slane %v1043_v17, 1 }
  0x15   : > { %v256_v21 = vrot.slane %v250_v18, 1  ;;  %874 = vmatprep.mubr.msk.f32.mxu0 %vm273_vm3, %v250_v18  ;;  %v526_v22 = vrot.slane %v250_v18, 2  ;;  %v527_v23 = vrot.slane %v236_v19, 2  ;;  %v257_v24 = vrot.slane %v236_v19, 1 }
  0x16   : > { %875 = vmatmul.mubr.msk.f32.vlgmr.msra.gmra.mrb[0].mxu0 %vm273_vm3, %v236_v19  ;;  %v238_v25 = vsel %vm233_vm2, %v235_v8, %v237_v13  ;;  %v240_v26 = vsel %vm233_vm2, %v237_v13, %v239_v14  ;;  %v242_v27 = vsel %vm233_vm2, %v239_v14, %v241_v15  ;;  %v244_v28 = vsel %vm233_vm2, %v241_v15, %v243_v20 }
  0x17   : > { %v258_v30 = vsel %vm255_vm5, %v256_v21, %v257_v24  ;;  %v259_v31 = vrot.slane %v238_v25, 1  ;;  %v529_v32 = vrot.slane %v238_v25, 2  ;;  %877 = vmatprep.mubr.msk.f32.mxu0 %vm273_vm3, %v238_v25  ;;  %887 = vmatpush3.msk.msra.mxu0 %vm290_vm0, %v816_v3  ;;  %v261_v33 = vrot.slane %v240_v26, 1  ;;  %v826_v3 = vld [vmem:[%s1138_s2] ss:$0 sm:$0xff] }
  0x18   : > { %860 = vmatprep.mubr.msk.f32.mxu1 %vm273_vm3, %v258_v30  ;;  %v531_v34 = vrot.slane %v240_v26, 2  ;;  %v263_v35 = vrot.slane %v242_v27, 1  ;;  %v265_v36 = vrot.slane %v244_v28, 1  ;;  %v528_v39 = vsel %vm525_vm6, %v526_v22, %v527_v23 }
  0x19   : > { %v260_v37 = vsel %vm255_vm5, %v257_v24, %v259_v31  ;;  %v262_v38 = vsel %vm255_vm5, %v259_v31, %v261_v33  ;;  %v245_v40 = vrot.slane %v222_v29, 6  ;;  %v530_v42 = vsel %vm525_vm6, %v527_v23, %v529_v32 }
  0x1a   : > { %861 = vmatmul.mubr.msk.f32.vlgmr.msra.gmra.mrb[0].mxu1 %vm273_vm3, %v260_v37  ;;  %878 = vmatmul.mubr.msk.f32.gmra.mrb[2].mxu0 %vm273_vm3, %v240_v26  ;;  %v264_v41 = vsel %vm255_vm5, %v261_v33, %v263_v35  ;;  %v266_v43 = vsel %vm255_vm5, %v263_v35, %v265_v36  ;;  %v533_v45 = vrot.slane %v242_v27, 2  ;;  %v532_v48 = vsel %vm525_vm6, %v529_v32, %v531_v34 }
  0x1b   : > { %901 = vmatpush3.msk.msra.mxu1 %vm290_vm0, %v1009_v0  ;;  %863 = vmatprep.mubr.msk.f32.mxu1 %vm273_vm3, %v262_v38  ;;  %v246_v44 = vsel %vm233_vm2, %v243_v20, %v245_v40  ;;  %v248_v46 = vsel %vm233_vm2, %v245_v40, %v1043_v17  ;;  %v535_v50 = vrot.slane %v244_v28, 2  ;;  %v541_v60 = vrot.slane %v1043_v17, 2 }
  0x1c   : > { %888 = vmatprep.mubr.msk.f32.mxu0 %vm273_vm3, %v528_v39  ;;  %v267_v47 = vrot.slane %v246_v44, 1  ;;  %v269_v49 = vrot.slane %v248_v46, 1  ;;  %v534_v52 = vsel %vm525_vm6, %v531_v34, %v533_v45  ;;  %v537_v54 = vrot.slane %v246_v44, 2 }
  0x1d   : > { %v536_v56 = vsel %vm525_vm6, %v533_v45, %v535_v50  ;;  %v539_v57 = vrot.slane %v248_v46, 2 }
  0x1e   : > { %864 = vmatmul.mubr.msk.f32.gmra.mrb[2].mxu1 %vm273_vm3, %v264_v41  ;;  %889 = vmatmul.mubr.msk.f32.vlgmr.msra.gmra.mrb[0].mxu0 %vm273_vm3, %v530_v42  ;;  %v268_v51 = vsel %vm255_vm5, %v265_v36, %v267_v47  ;;  %v270_v55 = vsel %vm255_vm5, %v267_v47, %v269_v49  ;;  %v272_v58 = vsel %vm255_vm5, %v269_v49, %v271_v53 }
  0x1f   : > { %866 = vmatprep.mubr.msk.f32.mxu1 %vm273_vm3, %v266_v43  ;;  %891 = vmatprep.mubr.msk.f32.mxu0 %vm273_vm3, %v532_v48  ;;  %v538_v59 = vsel %vm525_vm6, %v535_v50, %v537_v54  ;;  %v540_v61 = vsel %vm525_vm6, %v537_v54, %v539_v57  ;;  %v542_v62 = vsel %vm525_vm6, %v539_v57, %v541_v60 }
  0x22   : > { %867 = vmatmul.mubr.msk.f32.gmra.mrb[4].mxu1 %vm273_vm3, %v268_v51  ;;  %892 = vmatmul.mubr.msk.f32.gmra.mrb[2].mxu0 %vm273_vm3, %v534_v52 }
  0x23   : > { %869 = vmatprep.mubr.msk.f32.mxu1 %vm273_vm3, %v270_v55  ;;  %894 = vmatprep.mubr.msk.f32.mxu0 %vm273_vm3, %v536_v56 }
  0x26   : > { %870 = vmatmul.mubr.msk.f32.gmra.mrb[6].mxu1 %vm273_vm3, %v272_v58  ;;  %895 = vmatmul.mubr.msk.f32.gmra.mrb[4].mxu0 %vm273_vm3, %v538_v59 }
  0x27   : > { %880 = vmatprep.mubr.msk.f32.mxu1 %vm273_vm3, %v242_v27  ;;  %897 = vmatprep.mubr.msk.f32.mxu0 %vm273_vm3, %v540_v61 }
  0x2a   : > { %881 = vmatmul.mubr.msk.f32.vlgmr.msra.gmra.mrb[4].mxu1 %vm273_vm3, %v244_v28  ;;  %898 = vmatmul.mubr.msk.f32.gmra.mrb[6].mxu0 %vm273_vm3, %v542_v62 }
  0x2b   : > { %883 = vmatprep.mubr.msk.f32.mxu1 %vm273_vm3, %v246_v44 }
  0x2e   : > { %884 = vmatmul.mubr.msk.f32.gmra.mrb[6].mxu1 %vm273_vm3, %v248_v46 }
  0xed   : > { %v862_v63 = vpop.f32.mrb[0].mxu1 }
  0xee   : > { %v360_v0 = vpop.f32.mrb[1].mxu1 }
  0xf1   : > { %v865_v1 = vpop.f32.mrb[2].mxu1  ;;  %v890_v2 = vpop.f32.mrb[0].mxu0 }
  0xf2   : > { %v370_v4 = vpop.f32.mrb[3].mxu1  ;;  %v902_v5 = vadd.f32 %v890_v2, %v862_v63  ;;  %v628_v6 = vpop.f32.mrb[1].mxu0 }
  0xf3   : > { %v903_v7 = vadd.f32 %v628_v6, %v360_v0 }
  0xf4   : > { %v685_v8 = vadd.f32 %v902_v5, %v826_v3 }
  0xf5   : > { %v684_v9 = vadd.f32 %v903_v7, %v826_v3  ;;  %v893_v10 = vpop.f32.mrb[2].mxu0 }
  0xf6   : > { %694 = vst.msk [vmem:[%s1109_s30 + $0x8] sm:$0xff] %vm692_vm7, %v685_v8  ;;  %v904_v11 = vadd.f32 %v893_v10, %v865_v1  ;;  %v638_v12 = vpop.f32.mrb[3].mxu0 }
  0xf7   : > { %693 = vst.msk [vmem:[%s1109_s30] sm:$0xff] %vm692_vm7, %v684_v9  ;;  %v905_v13 = vadd.f32 %v638_v12, %v370_v4 }
  0xf8   : > { %v687_v14 = vadd.f32 %v904_v11, %v826_v3 }
  0xf9   : > { %v686_v15 = vadd.f32 %v905_v13, %v826_v3  ;;  %v896_v16 = vpop.f32.mrb[4].mxu0 }
  0xfa   : > { %696 = vst.msk [vmem:[%s1109_s30 + $0x18] sm:$0xff] %vm692_vm7, %v687_v14  ;;  %v648_v17 = vpop.f32.mrb[5].mxu0 }
  0xfb   : > { %695 = vst.msk [vmem:[%s1109_s30 + $0x10] sm:$0xff] %vm692_vm7, %v686_v15 }
  0xfd   : > { %v882_v18 = vpop.f32.mrb[4].mxu1  ;;  %v899_v19 = vpop.f32.mrb[6].mxu0 }
  0xfe   : > { %v906_v20 = vadd.f32 %v896_v16, %v882_v18  ;;  %v504_v21 = vpop.f32.mrb[5].mxu1  ;;  %v658_v22 = vpop.f32.mrb[7].mxu0 }
  0xff   : > { %v907_v23 = vadd.f32 %v648_v17, %v504_v21 }
 0x100   : > { %v689_v24 = vadd.f32 %v906_v20, %v826_v3 }
 0x101   : > { %v688_v25 = vadd.f32 %v907_v23, %v826_v3  ;;  %v885_v26 = vpop.f32.mrb[6].mxu1 }
 0x102   : > { %698 = vst.msk [vmem:[%s1109_s30 + $0x28] sm:$0xff] %vm692_vm7, %v689_v24  ;;  %v908_v27 = vadd.f32 %v899_v19, %v885_v26  ;;  %v514_v28 = vpop.f32.mrb[7].mxu1 }
 0x103   : > { %697 = vst.msk [vmem:[%s1109_s30 + $0x20] sm:$0xff] %vm692_vm7, %v688_v25  ;;  %v909_v29 = vadd.f32 %v658_v22, %v514_v28 }
 0x104   : > { %v691_v30 = vadd.f32 %v908_v27, %v826_v3 }
 0x105   : > { %v690_v31 = vadd.f32 %v909_v29, %v826_v3 }
 0x106   : > { %700 = vst.msk [vmem:[%s1109_s30 + $0x38] sm:$0xff] %vm692_vm7, %v691_v30 }
 0x107   : > { %699 = vst.msk [vmem:[%s1109_s30 + $0x30] sm:$0xff] %vm692_vm7, %v690_v31 }
 0x108 PF: > { %s13_s14 = sadd.s32 1, %s965_s14   ;;  %s1140_s12 = smov %s961_s13 }
 0x109   : > { %p10_p5 = scmp.ge.s32.totalorder %s13_s14, 4   ;;  %s1141_s13 = smov %s1143_s15 }
 0x10b   :  { %12 = sbr.rel (!%p10_p5) target bundleno = 2 (0x2), region = 68 }

// kernel: cnn_music_forward.15
= control target key start
LH: loop header
LB: loop body
LE: loop exit
PB: predicated region body
PF: predicated region fallthrough
CT: control target
= control target key end

     0   :  { %s1120_s12 = smov 0   ;;  %s1122_s13 = smov 0   ;;  %s1366_s0 = inlined_call_operand.vmem [shape: f32[2,16,2,128], index: 0, kind: input, shape index: {}]   ;;  %s1367_s1 = inlined_call_operand.vmem [shape: f32[3,128,64], index: 1, kind: input, shape index: {}]   ;;  %s1368_s2 = inlined_call_operand.vmem [shape: f32[1,64], index: 2, kind: input, shape index: {}]   ;;  %s1369_s3 = inlined_call_operand.vmem [shape: f32[2,16,64], index: 3, kind: output, shape index: {}]  }
   0x1   :  { %s1124_s14 = smov 0  }
   0x2 LB: > { %s25_s15 = sadd.s32 1, %s1093_s13  ;;  %p749_p0 = scmp.ge.s32.totalorder %s1097_s14, 1  ;;  %s1097_s14 = sphi %s1124_s14, %s13_s14   ;;  %s1093_s13 = sphi %s1122_s13, %s1371_s13   ;;  %s1089_s12 = sphi %s1120_s12, %s1370_s12  }
   0x3   : > { %p27_p1 = scmp.ge.s32.totalorder %s25_s15, 2  ;;  %p158_p2 = scmp.lt.s32.totalorder %s1097_s14, 3 }
   0x5   : > { %s1373_s15 = smov (%p27_p1, %s25_s15), 0  ;;  %p159_p3 = pnand %p749_p0, %p158_p2 }
   0x6   : > { %v350_v0 = vld [vmem:[%s1367_s1] sm:$0xff] (!%p159_p3)  ;;  %v351_v1 = vld [vmem:[%s1367_s1 + $0x8] sm:$0xff] (!%p159_p3)  ;;  %v352_v2 = vld [vmem:[%s1367_s1 + $0x10] sm:$0xff] (!%p159_p3)  ;;  %p191_p4 = scmp.lt.s32.totalorder (!%p159_p3), %s1089_s12, 1  ;;  %v1099_v5 = vmov (!%p159_p3), 0.0   ;;  %vm314_vm0 = vcmask (!%p159_p3), 1043459  }
   0x7   : > { %162 = sbr.rel (%p159_p3) target bundleno = 291 (0x123), region = 32  ;;  %v982_v3 = vpack.c.bf16 (!%p159_p3), %v351_v1, %v350_v0  ;;  %v353_v4 = vld [vmem:[%s1367_s1 + $0x18] sm:$0xff] (!%p159_p3)  ;;  %214 = vst [vmem:[#allocation2] sm:$0x3] (!%p159_p3), %v1099_v5  ;;  %v354_v7 = vld [vmem:[%s1367_s1 + $0x20] sm:$0xff] (!%p159_p3)  ;;  %v355_v8 = vld [vmem:[%s1367_s1 + $0x28] sm:$0xff] (!%p159_p3) }
   0x8   : > { %v986_v6 = vpack.c.bf16 (!%p159_p3), %v353_v4, %v352_v2  ;;  %v356_v9 = vld [vmem:[%s1367_s1 + $0x30] sm:$0xff] (!%p159_p3)  ;;  %v357_v10 = vld [vmem:[%s1367_s1 + $0x38] sm:$0xff] (!%p159_p3)  ;;  %v358_v11 = vld [vmem:[%s1367_s1 + $0x40] sm:$0xff] (!%p159_p3)  ;;  %v990_v14 = vpack.c.bf16 (!%p159_p3), %v355_v8, %v354_v7  ;;  %vm317_vm1 = vcmask (!%p159_p3), 1044484   ;;  %vm329_vm2 = vcmask (!%p159_p3), 1041409  }
   0x9   : > { %983 = vmatprep.subr.bf16.mxu0 (!%p159_p3), %v982_v3  ;;  %v359_v12 = vld [vmem:[%s1367_s1 + $0x48] sm:$0xff] (!%p159_p3)  ;;  %v360_v13 = vld [vmem:[%s1367_s1 + $0x50] sm:$0xff] (!%p159_p3)  ;;  %v361_v15 = vld [vmem:[%s1367_s1 + $0x58] sm:$0xff] (!%p159_p3)  ;;  %vm320_vm3 = vcmask (!%p159_p3), 1045509   ;;  %v994_v25 = vpack.c.bf16 (!%p159_p3), %v357_v10, %v356_v9  ;;  %vm323_vm4 = vcmask (!%p159_p3), 1046534   ;;  %vm326_vm5 = vcmask (!%p159_p3), 1047559  }
   0xa   : > { %985 = vmatpush3.bf16.msra.mxu0 (!%p159_p3), %v982_v3  ;;  %v754_v16 = vld [vmem:[%s1367_s1 + $0x80] sm:$0xff] (!%p159_p3)  ;;  %v755_v17 = vld [vmem:[%s1367_s1 + $0x88] sm:$0xff] (!%p159_p3)  ;;  %v1194_v26 = vpack.c.bf16 (!%p159_p3), %v359_v12, %v358_v11  ;;  %v1196_v27 = vpack.c.bf16 (!%p159_p3), %v361_v15, %v360_v13  ;;  %vm348_vm6 = vcmask (!%p159_p3), 1041408   ;;  %vm332_vm7 = vcmask (!%p159_p3), 1042434  }
   0xb   : > { %987 = vmatprep.subr.bf16.mxu0 (!%p159_p3), %v986_v6  ;;  %v950_v18 = vpack.c.bf16 (!%p159_p3), %v755_v17, %v754_v16  ;;  %v362_v44 = vld [vmem:[%s1367_s1 + $0x60] sm:$0xff] (!%p159_p3)  ;;  %v363_v45 = vld [vmem:[%s1367_s1 + $0x68] sm:$0xff] (!%p159_p3)  ;;  %vm384_vm8 = vcmask (!%p159_p3), 1046528   ;;  %vm559_vm9 = vcmask (!%p159_p3), 1045504   ;;  %vm655_vm10 = vcmask (!%p159_p3), 523264  }
   0xc   : > { %v1213_v63 = vpack.c.bf16 (!%p159_p3), %v363_v45, %v362_v44  ;;  %v761_v44 = vld [vmem:[%s1367_s1 + $0xb8] sm:$0xff] (!%p159_p3) }
   0xd   : > { %951 = vmatprep.subr.bf16.mxu1 (!%p159_p3), %v950_v18 }
   0xe   : > { %s1375_s12 = smov (!%p191_p4, %s1089_s12), 1  ;;  %989 = vmatpush3.bf16.msra.mxu0 %v986_v6  ;;  %953 = vmatpush3.bf16.msra.mxu1 %v950_v18  ;;  %v295_v8 = vld [vmem:[#allocation2] sm:$0x3] }
   0xf   : > { %s789_s11 = sshll.u32 %s1375_s12, 5  ;;  %991 = vmatprep.subr.bf16.mxu0 %v990_v14 }
  0x10   : > { %s1186_s24 = scalar_lea.vmem %s1366_s0, %s789_s11 }
  0x11   : > { %v215_v19 = vld [vmem:[%s1186_s24] sm:$0x3]  ;;  %v216_v20 = vld [vmem:[%s1186_s24 + $0x2] sm:$0x3]  ;;  %v217_v21 = vld [vmem:[%s1186_s24 + $0x4] sm:$0x3] }
  0x12   : > { %v218_v22 = vld [vmem:[%s1186_s24 + $0x6] sm:$0x3]  ;;  %v219_v23 = vld [vmem:[%s1186_s24 + $0x8] sm:$0x3]  ;;  %v220_v24 = vld [vmem:[%s1186_s24 + $0xa] sm:$0x3]  ;;  %993 = vmatpush3.bf16.msra.mxu0 %v990_v14 }
  0x13   : > { %v221_v28 = vld [vmem:[%s1186_s24 + $0xc] sm:$0x3]  ;;  %v222_v29 = vld [vmem:[%s1186_s24 + $0xe] sm:$0x3]  ;;  %v229_v30 = vld [vmem:[%s1186_s24 + $0x1c] sm:$0x3]  ;;  %995 = vmatprep.subr.bf16.mxu0 %v994_v25 }
  0x14   : > { %v230_v31 = vld [vmem:[%s1186_s24 + $0x1e] sm:$0x3]  ;;  %v247_v32 = vrot.slane %v215_v19, 1  ;;  %v248_v33 = vrot.slane %v216_v20, 1  ;;  %v249_v34 = vrot.slane %v217_v21, 1  ;;  %v250_v35 = vrot.slane %v218_v22, 1 }
  0x15   : > { %v251_v36 = vrot.slane %v219_v23, 1  ;;  %v252_v37 = vrot.slane %v220_v24, 1  ;;  %v253_v38 = vrot.slane %v221_v28, 1  ;;  %v254_v39 = vrot.slane %v222_v29, 1  ;;  %v223_v50 = vld [vmem:[%s1186_s24 + $0x10] sm:$0x3] }
  0x16   : > { %v261_v40 = vrot.slane %v229_v30, 1  ;;  %v262_v41 = vrot.slane %v230_v31, 1  ;;  %v279_v42 = vmax.f32 %v215_v19, %v247_v32  ;;  %v280_v43 = vmax.f32 %v216_v20, %v248_v33  ;;  %v224_v55 = vld [vmem:[%s1186_s24 + $0x12] sm:$0x3]  ;;  %v225_v56 = vld [vmem:[%s1186_s24 + $0x14] sm:$0x3]  ;;  %997 = vmatpush3.bf16.msra.mxu0 %v994_v25 }
  0x17   : > { %v281_v46 = vmax.f32 %v217_v21, %v249_v34  ;;  %v282_v47 = vmax.f32 %v218_v22, %v250_v35  ;;  %v283_v48 = vmax.f32 %v219_v23, %v251_v36  ;;  %v284_v49 = vmax.f32 %v220_v24, %v252_v37  ;;  %v226_v57 = vld [vmem:[%s1186_s24 + $0x16] sm:$0x3]  ;;  %v227_v62 = vld [vmem:[%s1186_s24 + $0x18] sm:$0x3]  ;;  %v228_v3 = vld [vmem:[%s1186_s24 + $0x1a] sm:$0x3]  ;;  %999 = vmatprep.subr.bf16.mxu0 %v1194_v26 }
  0x18   : > { %v285_v51 = vmax.f32 %v221_v28, %v253_v38  ;;  %v286_v52 = vmax.f32 %v222_v29, %v254_v39  ;;  %v293_v53 = vmax.f32 %v229_v30, %v261_v40  ;;  %v294_v54 = vmax.f32 %v230_v31, %v262_v41  ;;  %v756_v25 = vld [vmem:[%s1367_s1 + $0x90] sm:$0xff]  ;;  %v757_v28 = vld [vmem:[%s1367_s1 + $0x98] sm:$0xff]  ;;  %v758_v32 = vld [vmem:[%s1367_s1 + $0xa0] sm:$0xff]  ;;  %s790_s24 = sshll.u32 %s1375_s12, 4 }
  0x19   : > { %v312_v58 = vrot.slane %v279_v42, 6  ;;  %v313_v59 = vrot.slane %v280_v43, 5  ;;  %v316_v60 = vrot.slane %v281_v46, 4  ;;  %v319_v61 = vrot.slane %v282_v47, 3  ;;  %v759_v33 = vld [vmem:[%s1367_s1 + $0xa8] sm:$0xff]  ;;  %v364_v34 = vld [vmem:[%s1367_s1 + $0x70] sm:$0xff]  ;;  %s208_s29 = scalar_lea.vmem %s1369_s3, %s790_s24 }
  0x1a   : > { %v322_v0 = vrot.slane %v283_v48, 2  ;;  %v328_v1 = vrot.slane %v286_v52, 7  ;;  %v344_v2 = vrot.slane %v294_v54, 7  ;;  %v325_v5 = vrot.slane %v284_v49, 1  ;;  %1001 = vmatpush3.bf16.msra.mxu0 %v1194_v26  ;;  %v365_v35 = vld [vmem:[%s1367_s1 + $0x78] sm:$0xff]  ;;  %v760_v43 = vld [vmem:[%s1367_s1 + $0xb0] sm:$0xff] }
  0x1b   : > { %v315_v4 = vsel %vm314_vm0, %v313_v59, %v312_v58  ;;  %v255_v6 = vrot.slane %v223_v50, 1  ;;  %v256_v7 = vrot.slane %v224_v55, 1  ;;  %v257_v12 = vrot.slane %v225_v56, 1  ;;  %1003 = vmatprep.subr.bf16.mxu0 %v1196_v27  ;;  %v771_v47 = vld [vmem:[%s1367_s1 + $0x108] sm:$0xff]  ;;  %v772_v59 = vld [vmem:[%s1367_s1 + $0x110] sm:$0xff] }
  0x1c   : > { %v318_v9 = vsel %vm317_vm1, %v316_v60, %v315_v4  ;;  %v330_v10 = vsel %vm329_vm2, %v328_v1, %v285_v51  ;;  %v1221_v11 = vsel %vm329_vm2, %v344_v2, %v293_v53  ;;  %v258_v14 = vrot.slane %v226_v57, 1  ;;  %v762_v53 = vld [vmem:[%s1367_s1 + $0xc0] sm:$0xff]  ;;  %v763_v54 = vld [vmem:[%s1367_s1 + $0xc8] sm:$0xff]  ;;  %v773_v60 = vld [vmem:[%s1367_s1 + $0x118] sm:$0xff] }
  0x1d   : > { %v321_v13 = vsel %vm320_vm3, %v319_v61, %v318_v9  ;;  %645 = vst [vmem:[#allocation2] sm:$0x3] %v1221_v11  ;;  %v259_v15 = vrot.slane %v227_v62, 1  ;;  %v260_v16 = vrot.slane %v228_v3, 1  ;;  %v287_v18 = vmax.f32 %v223_v50, %v255_v6  ;;  %v775_v4 = vld [vmem:[%s1367_s1 + $0x128] sm:$0xff]  ;;  %v766_v6 = vld [vmem:[%s1367_s1 + $0xe0] sm:$0xff] }
  0x1e   : > { %v324_v17 = vsel %vm323_vm4, %v322_v0, %v321_v13  ;;  %v288_v19 = vmax.f32 %v224_v55, %v256_v7  ;;  %v289_v20 = vmax.f32 %v225_v56, %v257_v12  ;;  %v290_v22 = vmax.f32 %v226_v57, %v258_v14  ;;  %1005 = vmatpush3.bf16.msra.mxu0 %v1196_v27  ;;  %v770_v27 = vld [vmem:[%s1367_s1 + $0x100] sm:$0xff]  ;;  %v765_v0 = vld [vmem:[%s1367_s1 + $0xd8] sm:$0xff]  ;;  %v767_v7 = vld [vmem:[%s1367_s1 + $0xe8] sm:$0xff] }
  0x1f   : > { %v327_v21 = vsel %vm326_vm5, %v325_v5, %v324_v17  ;;  %v291_v23 = vmax.f32 %v227_v62, %v259_v15  ;;  %v292_v24 = vmax.f32 %v228_v3, %v260_v16  ;;  %v331_v30 = vrot.slane %v287_v18, 6  ;;  %1007 = vmatprep.subr.bf16.mxu0 %v1213_v63  ;;  %v774_v3 = vld [vmem:[%s1367_s1 + $0x120] sm:$0xff]  ;;  %v776_v9 = vld [vmem:[%s1367_s1 + $0x130] sm:$0xff]  ;;  %v769_v14 = vld [vmem:[%s1367_s1 + $0xf8] sm:$0xff] }
  0x20   : > { %v349_v29 = vsel %vm348_vm6, %v295_v8, %v327_v21  ;;  %v334_v31 = vrot.slane %v288_v19, 5  ;;  %v336_v26 = vrot.slane %v289_v20, 4  ;;  %v338_v36 = vrot.slane %v290_v22, 3  ;;  %v768_v13 = vld [vmem:[%s1367_s1 + $0xf0] sm:$0xff]  ;;  %v778_v16 = vld [vmem:[%s1367_s1 + $0x140] sm:$0xff]  ;;  %v779_v17 = vld [vmem:[%s1367_s1 + $0x148] sm:$0xff] }
  0x21   : > { %912 = vmatprep.mubr.f32.mxu0 %v349_v29  ;;  %v333_v37 = vsel %vm332_vm7, %v331_v30, %v330_v10  ;;  %v340_v38 = vrot.slane %v291_v23, 2  ;;  %v954_v39 = vpack.c.bf16 %v757_v28, %v756_v25  ;;  %v342_v41 = vrot.slane %v292_v24, 1  ;;  %v777_v10 = vld [vmem:[%s1367_s1 + $0x138] sm:$0xff]  ;;  %v780_v20 = vld [vmem:[%s1367_s1 + $0x150] sm:$0xff]  ;;  %v782_v24 = vld [vmem:[%s1367_s1 + $0x160] sm:$0xff] }
  0x22   : > { %v335_v40 = vsel %vm314_vm0, %v334_v31, %v333_v37  ;;  %v958_v42 = vpack.c.bf16 %v759_v33, %v758_v32  ;;  %v1010_v45 = vpack.c.bf16 %v365_v35, %v364_v34  ;;  %v385_v49 = vrot.slane %v349_v29, 1  ;;  %1009 = vmatpush3.bf16.msra.mxu0 %v1213_v63  ;;  %v764_v63 = vld [vmem:[%s1367_s1 + $0xd0] sm:$0xff]  ;;  %v781_v21 = vld [vmem:[%s1367_s1 + $0x158] sm:$0xff]  ;;  %v783_v25 = vld [vmem:[%s1367_s1 + $0x168] sm:$0xff] }
  0x23   : > { %v337_v46 = vsel %vm317_vm1, %v336_v26, %v335_v40  ;;  %955 = vmatprep.subr.bf16.mxu1 %v954_v39  ;;  %v962_v51 = vpack.c.bf16 %v761_v44, %v760_v43  ;;  %v560_v55 = vrot.slane %v349_v29, 2  ;;  %v1014_v56 = vpack.c.bf16 %v771_v47, %v770_v27  ;;  %v784_v30 = vld [vmem:[%s1367_s1 + $0x170] sm:$0xff]  ;;  %v785_v31 = vld [vmem:[%s1367_s1 + $0x178] sm:$0xff]  ;;  %v786_v37 = vld [vmem:[%s1368_s2] ss:$0 sm:$0xff] }
  0x24   : > { %v339_v48 = vsel %vm320_vm3, %v338_v36, %v337_v46  ;;  %957 = vmatpush3.bf16.msra.mxu1 %v954_v39  ;;  %1011 = vmatprep.subr.bf16.mxu0 %v1010_v45  ;;  %v966_v61 = vpack.c.bf16 %v763_v54, %v762_v53  ;;  %v1018_v1 = vpack.c.bf16 %v773_v60, %v772_v59  ;;  %v388_v22 = vrot.slane %v1221_v11, 1 }
  0x25   : > { %v341_v50 = vsel %vm323_vm4, %v340_v38, %v339_v48  ;;  %959 = vmatprep.subr.bf16.mxu1 %v958_v42  ;;  %v970_v5 = vpack.c.bf16 %v765_v0, %v764_v63  ;;  %v1022_v8 = vpack.c.bf16 %v775_v4, %v774_v3  ;;  %v974_v12 = vpack.c.bf16 %v767_v7, %v766_v6 }
  0x26   : > { %v1269_v52 = vsel %vm326_vm5, %v342_v41, %v341_v50  ;;  %1013 = vmatpush3.bf16.msra.mxu0 %v1010_v45  ;;  %v1026_v15 = vpack.c.bf16 %v777_v10, %v776_v9  ;;  %v978_v18 = vpack.c.bf16 %v769_v14, %v768_v13  ;;  %v1030_v19 = vpack.c.bf16 %v779_v17, %v778_v16 }
  0x27   : > { %v386_v57 = vrot.slane %v1269_v52, 1  ;;  %v561_v58 = vrot.slane %v1269_v52, 2  ;;  %1015 = vmatprep.subr.bf16.mxu0 %v1014_v56  ;;  %v1034_v23 = vpack.c.bf16 %v781_v21, %v780_v20  ;;  %v1038_v29 = vpack.c.bf16 %v783_v25, %v782_v24 }
  0x28   : > { %961 = vmatpush3.bf16.msra.mxu1 %v958_v42  ;;  %v1042_v26 = vpack.c.bf16 %v785_v31, %v784_v30  ;;  %v563_v32 = vrot.slane %v1221_v11, 2 }
  0x29   : > { %963 = vmatprep.subr.bf16.mxu1 %v962_v51  ;;  %v387_v62 = vsel %vm384_vm8, %v385_v49, %v386_v57  ;;  %v562_v2 = vsel %vm559_vm9, %v560_v55, %v561_v58  ;;  %913 = vmatmul.mubr.f32.vlgmr.msra.gmra.mrb[0].mxu0 %v1269_v52  ;;  %v389_v28 = vsel %vm384_vm8, %v386_v57, %v388_v22 }
  0x2a   : > { %877 = vmatprep.mubr.f32.mxu1 %v387_v62  ;;  %1017 = vmatpush3.bf16.msra.mxu0 %v1014_v56  ;;  %v564_v33 = vsel %vm559_vm9, %v561_v58, %v563_v32 }
  0x2b   : > { %947 = vmatprep.mubr.f32.mxu0 %v562_v2  ;;  %1019 = vmatprep.subr.bf16.mxu0 %v1018_v1 }
  0x2c   : > { %965 = vmatpush3.bf16.msra.mxu1 %v962_v51 }
  0x2d   : > { %967 = vmatprep.subr.bf16.mxu1 %v966_v61 }
  0x2e   : > { %1021 = vmatpush3.bf16.msra.mxu0 %v1018_v1 }
  0x2f   : > { %1023 = vmatprep.subr.bf16.mxu0 %v1022_v8 }
  0x30   : > { %969 = vmatpush3.bf16.msra.mxu1 %v966_v61 }
  0x31   : > { %971 = vmatprep.subr.bf16.mxu1 %v970_v5 }
  0x32   : > { %1025 = vmatpush3.bf16.msra.mxu0 %v1022_v8 }
  0x33   : > { %1027 = vmatprep.subr.bf16.mxu0 %v1026_v15 }
  0x34   : > { %973 = vmatpush3.bf16.msra.mxu1 %v970_v5 }
  0x35   : > { %975 = vmatprep.subr.bf16.mxu1 %v974_v12 }
  0x36   : > { %1029 = vmatpush3.bf16.msra.mxu0 %v1026_v15 }
  0x37   : > { %1031 = vmatprep.subr.bf16.mxu0 %v1030_v19 }
  0x38   : > { %977 = vmatpush3.bf16.msra.mxu1 %v974_v12 }
  0x39   : > { %979 = vmatprep.subr.bf16.mxu1 %v978_v18 }
  0x3a   : > { %1033 = vmatpush3.bf16.msra.mxu0 %v1030_v19 }
  0x3b   : > { %1035 = vmatprep.subr.bf16.mxu0 %v1034_v23 }
  0x3c   : > { %981 = vmatpush3.bf16.msra.mxu1 %v978_v18 }
  0x3e   : > { %1037 = vmatpush3.bf16.msra.mxu0 %v1034_v23 }
  0x3f   : > { %878 = vmatmul.mubr.f32.vlgmr.msra.gmra.mrb[0].mxu1 %v389_v28  ;;  %1039 = vmatprep.subr.bf16.mxu0 %v1038_v29 }
  0x42   : > { %1041 = vmatpush3.bf16.msra.mxu0 %v1038_v29 }
  0x43   : > { %1043 = vmatprep.subr.bf16.mxu0 %v1042_v26 }
  0x46   : > { %1045 = vmatpush3.bf16.msra.mxu0 %v1042_v26 }
  0x49   : > { %948 = vmatmul.mubr.f32.vlgmr.msra.gmra.mrb[0].mxu0 %v564_v33 }
 0x112   : > { %v879_v34 = vpop.f32.mrb[0].mxu1 }
 0x113   : > { %v458_v35 = vpop.f32.mrb[1].mxu1 }
 0x11c   : > { %v949_v36 = vpop.f32.mrb[0].mxu0 }
 0x11d   : > { %v1046_v38 = vadd.f32 %v949_v36, %v879_v34  ;;  %v633_v39 = vpop.f32.mrb[1].mxu0 }
 0x11e   : > { %v1047_v11 = vadd.f32 %v633_v39, %v458_v35 }
 0x11f   : > { %v654_v40 = vadd.f32 %v1046_v38, %v786_v37 }
 0x120   : > { %v653_v41 = vadd.f32 %v1047_v11, %v786_v37 }
 0x121   : > { %657 = vst.msk [vmem:[%s208_s29 + $0x8] sm:$0xff] %vm655_vm10, %v654_v40 }
 0x122   : > { %656 = vst.msk [vmem:[%s208_s29] sm:$0xff] %vm655_vm10, %v653_v41 }
 0x123 PF: > { %s13_s14 = sadd.s32 1, %s1097_s14   ;;  %s1370_s12 = smov %s1093_s13 }
 0x124   : > { %p10_p5 = scmp.ge.s32.totalorder %s13_s14, 4   ;;  %s1371_s13 = smov %s1373_s15 }
 0x126   :  { %12 = sbr.rel (!%p10_p5) target bundleno = 2 (0x2), region = 68 }

// kernel: cnn_music_forward.16
= control target key start
LH: loop header
LB: loop body
LE: loop exit
PB: predicated region body
PF: predicated region fallthrough
CT: control target
= control target key end

     0   :  { %s849_s12 = smov 0   ;;  %s851_s13 = smov 0   ;;  %s992_s0 = inlined_call_operand.vmem [shape: f32[2,8,2,64], index: 0, kind: input, shape index: {}]   ;;  %s993_s1 = inlined_call_operand.vmem [shape: f32[3,64,64], index: 1, kind: input, shape index: {}]   ;;  %s994_s2 = inlined_call_operand.vmem [shape: f32[1,64], index: 2, kind: input, shape index: {}]   ;;  %s995_s3 = inlined_call_operand.vmem [shape: f32[2,8,64], index: 3, kind: output, shape index: {}]  }
   0x1   :  { %s853_s14 = smov 0  }
   0x2 LB: > { %s25_s15 = sadd.s32 1, %s820_s13  ;;  %p628_p0 = scmp.ge.s32.totalorder %s824_s14, 1  ;;  %s824_s14 = sphi %s853_s14, %s13_s14   ;;  %s820_s13 = sphi %s851_s13, %s997_s13   ;;  %s816_s12 = sphi %s849_s12, %s996_s12  }
   0x3   : > { %p27_p1 = scmp.ge.s32.totalorder %s25_s15, 2  ;;  %p158_p2 = scmp.lt.s32.totalorder %s824_s14, 3 }
   0x5   : > { %s999_s15 = smov (%p27_p1, %s25_s15), 0  ;;  %p159_p3 = pnand %p628_p0, %p158_p2 }
   0x6   : > { %v632_v0 = vld [vmem:[%s993_s1 + $0x40] sm:$0xff] (!%p159_p3)  ;;  %v633_v1 = vld [vmem:[%s993_s1 + $0x48] sm:$0xff] (!%p159_p3)  ;;  %vm209_vm0 = vcmask (!%p159_p3), 517120   ;;  %v826_v3 = vmov (!%p159_p3), 0.0|0.0   ;;  %v634_v6 = vld [vmem:[%s993_s1 + $0x50] sm:$0xff] (!%p159_p3)  ;;  %v827_v8 = vmov (!%p159_p3), 0.0  }
   0x7   : > { %162 = sbr.rel (%p159_p3) target bundleno = 267 (0x10b), region = 32  ;;  %v282_v2 = vld [vmem:[%s993_s1] sm:$0xff] (!%p159_p3)  ;;  %739 = vmatprep.subr.bf16.mxu0 (!%p159_p3), %v826_v3  ;;  %v740_v4 = vpack.c.bf16 (!%p159_p3), %v633_v1, %v632_v0  ;;  %751 = vmatprep.subr.bf16.mxu1 (!%p159_p3), %v826_v3  ;;  %v283_v5 = vld [vmem:[%s993_s1 + $0x8] sm:$0xff] (!%p159_p3)  ;;  %v635_v7 = vld [vmem:[%s993_s1 + $0x58] sm:$0xff] (!%p159_p3)  ;;  %210 = vst.msk [vmem:[#allocation2] sm:$0x3] (!%p159_p3), %vm209_vm0, %v827_v8 }
   0x8   : > { %p189_p4 = scmp.lt.s32.totalorder (!%p159_p3), %s816_s12, 1  ;;  %v752_v9 = vpack.c.bf16 (!%p159_p3), %v283_v5, %v282_v2  ;;  %v284_v10 = vld [vmem:[%s993_s1 + $0x10] sm:$0xff] (!%p159_p3)  ;;  %v285_v11 = vld [vmem:[%s993_s1 + $0x18] sm:$0xff] (!%p159_p3)  ;;  %vm828_vm1 = vmmov (!%p159_p3), 0   ;;  %v743_v12 = vpack.c.bf16 (!%p159_p3), %v635_v7, %v634_v6  ;;  %v636_v14 = vld [vmem:[%s993_s1 + $0x60] sm:$0xff] (!%p159_p3)  ;;  %vm262_vm2 = vcmask (!%p159_p3), 1043459  }
   0x9   : > { %698 = vmatprep.mubr.msk.f32.mxu0 (!%p159_p3), %vm828_vm1, %v827_v8  ;;  %717 = vmatprep.mubr.msk.f32.mxu1 (!%p159_p3), %vm828_vm1, %v827_v8  ;;  %v755_v13 = vpack.c.bf16 (!%p159_p3), %v285_v11, %v284_v10  ;;  %v637_v15 = vld [vmem:[%s993_s1 + $0x68] sm:$0xff] (!%p159_p3)  ;;  %v286_v16 = vld [vmem:[%s993_s1 + $0x20] sm:$0xff] (!%p159_p3)  ;;  %v638_v18 = vld [vmem:[%s993_s1 + $0x70] sm:$0xff] (!%p159_p3)  ;;  %vm265_vm3 = vcmask (!%p159_p3), 1044484   ;;  %vm277_vm4 = vcmask (!%p159_p3), 1041409   ;;  %vm268_vm5 = vcmask (!%p159_p3), 1045509  }
   0xa   : > { %741 = vmatpush3.bf16.msra.mxu0 (!%p159_p3), %v740_v4  ;;  %753 = vmatpush3.bf16.msra.mxu1 (!%p159_p3), %v752_v9  ;;  %v287_v17 = vld [vmem:[%s993_s1 + $0x28] sm:$0xff] (!%p159_p3)  ;;  %v639_v19 = vld [vmem:[%s993_s1 + $0x78] sm:$0xff] (!%p159_p3)  ;;  %v288_v20 = vld [vmem:[%s993_s1 + $0x30] sm:$0xff] (!%p159_p3)  ;;  %v746_v22 = vpack.c.bf16 (!%p159_p3), %v637_v15, %v636_v14  ;;  %vm271_vm6 = vcmask (!%p159_p3), 1046534   ;;  %vm274_vm7 = vcmask (!%p159_p3), 1047559   ;;  %vm280_vm8 = vcmask (!%p159_p3), 1041408  }
   0xb   : > { %742 = vmatprep.subr.bf16.mxu0 (!%p159_p3), %v826_v3  ;;  %754 = vmatprep.subr.bf16.mxu1 (!%p159_p3), %v826_v3  ;;  %v289_v21 = vld [vmem:[%s993_s1 + $0x38] sm:$0xff] (!%p159_p3)  ;;  %v758_v26 = vpack.c.bf16 (!%p159_p3), %v287_v17, %v286_v16  ;;  %v749_v30 = vpack.c.bf16 (!%p159_p3), %v639_v19, %v638_v18  ;;  %vm304_vm9 = vcmask (!%p159_p3), 523264   ;;  %v642_v63 = vld [vmem:[%s993_s1 + $0x80] sm:$0xff] (!%p159_p3)  ;;  %v643_v0 = vld [vmem:[%s993_s1 + $0x88] sm:$0xff] (!%p159_p3)  ;;  %vm300_vm10 = vcmask (!%p159_p3), 1046528  }
   0xc   : > { %v761_v31 = vpack.c.bf16 (!%p159_p3), %v289_v21, %v288_v20  ;;  %v764_v6 = vpack.c.bf16 (!%p159_p3), %v643_v0, %v642_v63  ;;  %v644_v7 = vld [vmem:[%s993_s1 + $0x90] sm:$0xff] (!%p159_p3)  ;;  %v645_v9 = vld [vmem:[%s993_s1 + $0x98] sm:$0xff] (!%p159_p3)  ;;  %vm458_vm11 = vcmask (!%p159_p3), 1045504  }
   0xd   : > { %v767_v11 = vpack.c.bf16 (!%p159_p3), %v645_v9, %v644_v7  ;;  %v648_v15 = vld [vmem:[%s993_s1 + $0xb0] sm:$0xff] (!%p159_p3) }
   0xe   : > { %s1001_s12 = smov (!%p189_p4, %s816_s12), 1  ;;  %744 = vmatpush3.bf16.msra.mxu0 %v743_v12  ;;  %756 = vmatpush3.bf16.msra.mxu1 %v755_v13  ;;  %v251_v58 = vld [vmem:[#allocation2] sm:$0x3]  ;;  %v647_v13 = vld [vmem:[%s993_s1 + $0xa8] sm:$0xff] }
   0xf   : > { %s654_s19 = sshll.u32 %s1001_s12, 4  ;;  %745 = vmatprep.subr.bf16.mxu0 %v826_v3  ;;  %757 = vmatprep.subr.bf16.mxu1 %v826_v3  ;;  %v646_v12 = vld [vmem:[%s993_s1 + $0xa0] sm:$0xff]  ;;  %s631_s22 = sshll.u32 %s1001_s12, 3 }
  0x10   : > { %s196_s28 = scalar_lea.vmem %s992_s0, %s654_s19  ;;  %v770_v14 = vpack.c.bf16 %v647_v13, %v646_v12  ;;  %s204_s27 = scalar_lea.vmem %s995_s3, %s631_s22 }
  0x11   : > { %v211_v23 = vld [vmem:[%s196_s28] sm:$0x3]  ;;  %v212_v24 = vld [vmem:[%s196_s28 + $0x2] sm:$0x3]  ;;  %v213_v25 = vld [vmem:[%s196_s28 + $0x4] sm:$0x3] }
  0x12   : > { %v214_v27 = vld [vmem:[%s196_s28 + $0x6] sm:$0x3]  ;;  %v215_v28 = vld [vmem:[%s196_s28 + $0x8] sm:$0x3]  ;;  %v216_v29 = vld [vmem:[%s196_s28 + $0xa] sm:$0x3]  ;;  %747 = vmatpush3.bf16.msra.mxu0 %v746_v22  ;;  %759 = vmatpush3.bf16.msra.mxu1 %v758_v26 }
  0x13   : > { %v217_v32 = vld [vmem:[%s196_s28 + $0xc] sm:$0x3]  ;;  %v218_v33 = vld [vmem:[%s196_s28 + $0xe] sm:$0x3]  ;;  %v227_v34 = vrot.slane %v211_v23, 1  ;;  %v228_v35 = vrot.slane %v212_v24, 1  ;;  %748 = vmatprep.subr.bf16.mxu0 %v826_v3  ;;  %760 = vmatprep.subr.bf16.mxu1 %v826_v3 }
  0x14   : > { %v229_v36 = vrot.slane %v213_v25, 1  ;;  %v230_v37 = vrot.slane %v214_v27, 1  ;;  %v231_v38 = vrot.slane %v215_v28, 1  ;;  %v232_v39 = vrot.slane %v216_v29, 1  ;;  %v651_v26 = vld [vmem:[%s994_s2] ss:$0 sm:$0xff] }
  0x15   : > { %v233_v40 = vrot.slane %v217_v32, 1  ;;  %v234_v41 = vrot.slane %v218_v33, 1  ;;  %v243_v42 = vmax.f32 %v211_v23, %v227_v34  ;;  %v244_v43 = vmax.f32 %v212_v24, %v228_v35 }
  0x16   : > { %v245_v44 = vmax.f32 %v213_v25, %v229_v36  ;;  %v246_v45 = vmax.f32 %v214_v27, %v230_v37  ;;  %v247_v46 = vmax.f32 %v215_v28, %v231_v38  ;;  %v248_v47 = vmax.f32 %v216_v29, %v232_v39  ;;  %750 = vmatpush3.bf16.msra.mxu0 %v749_v30 }
  0x17   : > { %v249_v48 = vmax.f32 %v217_v32, %v233_v40  ;;  %v250_v49 = vmax.f32 %v218_v33, %v234_v41  ;;  %v260_v50 = vrot.slane %v243_v42, 6  ;;  %v261_v51 = vrot.slane %v244_v43, 5  ;;  %762 = vmatpush3.bf16.msra.mxu1 %v761_v31  ;;  %763 = vmatprep.subr.bf16.mxu0 %v826_v3 }
  0x18   : > { %v264_v52 = vrot.slane %v245_v44, 4  ;;  %v267_v53 = vrot.slane %v246_v45, 3  ;;  %v270_v54 = vrot.slane %v247_v46, 2  ;;  %v273_v57 = vrot.slane %v248_v47, 1 }
  0x19   : > { %v276_v55 = vrot.slane %v250_v49, 7  ;;  %v263_v56 = vsel %vm262_vm2, %v261_v51, %v260_v50 }
  0x1a   : > { %v266_v59 = vsel %vm265_vm3, %v264_v52, %v263_v56 }
  0x1b   : > { %v278_v60 = vsel %vm277_vm4, %v276_v55, %v249_v48  ;;  %v269_v61 = vsel %vm268_vm5, %v267_v53, %v266_v59 }
  0x1c   : > { %537 = vst.msk [vmem:[#allocation2] sm:$0x3] %vm209_vm0, %v278_v60  ;;  %v272_v62 = vsel %vm271_vm6, %v270_v54, %v269_v61  ;;  %v302_v2 = vrot.slane %v278_v60, 1  ;;  %v460_v18 = vrot.slane %v278_v60, 2 }
  0x1d   : > { %v275_v1 = vsel %vm274_vm7, %v273_v57, %v272_v62 }
  0x1e   : > { %v281_v4 = vsel %vm280_vm8, %v251_v58, %v275_v1 }
  0x1f   : > { %v301_v5 = vrot.slane %v281_v4, 1  ;;  %718 = vmatmul.mubr.msk.f32.vlgmr.msra.gmra.mrb[0].mxu1 %vm304_vm9, %v281_v4  ;;  %v459_v17 = vrot.slane %v281_v4, 2 }
  0x21   : > { %v303_v10 = vsel %vm300_vm10, %v301_v5, %v302_v2  ;;  %v461_v19 = vsel %vm458_vm11, %v459_v17, %v460_v18 }
  0x22   : > { %699 = vmatmul.mubr.msk.f32.vlgmr.msra.gmra.mrb[0].mxu0 %vm304_vm9, %v303_v10 }
  0x23   : > { %765 = vmatpush3.bf16.msra.mxu0 %v764_v6  ;;  %736 = vmatprep.mubr.msk.f32.mxu0 %vm828_vm1, %v827_v8  ;;  %v649_v8 = vld [vmem:[%s993_s1 + $0xb8] sm:$0xff] }
  0x24   : > { %766 = vmatprep.subr.bf16.mxu0 %v826_v3  ;;  %v773_v16 = vpack.c.bf16 %v649_v8, %v648_v15 }
  0x27   : > { %768 = vmatpush3.bf16.msra.mxu0 %v767_v11 }
  0x28   : > { %769 = vmatprep.subr.bf16.mxu0 %v826_v3 }
  0x2b   : > { %771 = vmatpush3.bf16.msra.mxu0 %v770_v14 }
  0x2c   : > { %772 = vmatprep.subr.bf16.mxu0 %v826_v3 }
  0x2f   : > { %774 = vmatpush3.bf16.msra.mxu0 %v773_v16 }
  0x32   : > { %737 = vmatmul.mubr.msk.f32.vlgmr.msra.gmra.mrb[2].mxu0 %vm304_vm9, %v461_v19 }
  0xf2   : > { %v445_v20 = vpop.f32.mrb[0].mxu1 }
  0xf3   : > { %v719_v21 = vpop.f32.mrb[1].mxu1 }
  0xf5   : > { %v373_v22 = vpop.f32.mrb[0].mxu0 }
  0xf6   : > { %v446_v23 = vadd.f32 %v445_v20, %v373_v22  ;;  %v700_v24 = vpop.f32.mrb[1].mxu0 }
 0x105   : > { %v530_v25 = vpop.f32.mrb[2].mxu0 }
 0x106   : > { %v534_v27 = vadd.f32 %v530_v25, %v446_v23  ;;  %v738_v28 = vpop.f32.mrb[3].mxu0 }
 0x108   : > { %v545_v3 = vadd.f32 %v651_v26, %v534_v27 }
 0x10a   : > { %546 = vst.msk [vmem:[%s204_s27] sm:$0xff] %vm304_vm9, %v545_v3 }
 0x10b PF: > { %s13_s14 = sadd.s32 1, %s824_s14   ;;  %s996_s12 = smov %s820_s13 }
 0x10c   : > { %p10_p5 = scmp.ge.s32.totalorder %s13_s14, 4   ;;  %s997_s13 = smov %s999_s15 }
 0x10e   :  { %12 = sbr.rel (!%p10_p5) target bundleno = 2 (0x2), region = 68 }

// kernel: cnn_music_forward.18
= control target key start
LH: loop header
LB: loop body
LE: loop exit
PB: predicated region body
PF: predicated region fallthrough
CT: control target
= control target key end

     0   :  { %s864_s15 = smov 0   ;;  %s866_s16 = smov 0   ;;  %s1002_s0 = inlined_call_operand.vmem [shape: f32[2,4,64], index: 0, kind: input, shape index: {}, may-alias: {0,1}]   ;;  %s1003_s1 = inlined_call_operand.vmem [shape: f32[2,4,64], index: 1, kind: input, shape index: {}, may-alias: {0,1}]   ;;  %s1004_s2 = inlined_call_operand.vmem [shape: f32[3,64,64], index: 2, kind: input, shape index: {}]   ;;  %s1005_s3 = inlined_call_operand.vmem [shape: f32[1,64], index: 3, kind: input, shape index: {}]   ;;  %s1006_s4 = inlined_call_operand.vmem [shape: f32[2,4,128], index: 4, kind: output, shape index: {}]  }
   0x1   :  { %s868_s17 = smov 0  }
   0x2 LB: > { %s26_s1 = sadd.s32 1, %s829_s16  ;;  %p637_p0 = scmp.ge.s32.totalorder %s833_s17, 1  ;;  %s833_s17 = sphi %s868_s17, %s14_s17   ;;  %s829_s16 = sphi %s866_s16, %s1008_s16   ;;  %s825_s15 = sphi %s864_s15, %s1007_s15  }
   0x3   : > { %p28_p1 = scmp.ge.s32.totalorder %s26_s1, 2  ;;  %p206_p2 = scmp.lt.s32.totalorder %s833_s17, 3 }
   0x5   : > { %s1010_s1 = smov (%p28_p1, %s26_s1), 0  ;;  %p207_p3 = pnand %p637_p0, %p206_p2 }
   0x6   : > { %v641_v0 = vld [vmem:[%s1004_s2 + $0x40] sm:$0xff] (!%p207_p3)  ;;  %v642_v1 = vld [vmem:[%s1004_s2 + $0x48] sm:$0xff] (!%p207_p3)  ;;  %v643_v2 = vld [vmem:[%s1004_s2 + $0x50] sm:$0xff] (!%p207_p3)  ;;  %v835_v3 = vmov (!%p207_p3), 0.0|0.0   ;;  %vm836_vm0 = vmmov (!%p207_p3), 0   ;;  %v837_v6 = vmov (!%p207_p3), 0.0  }
   0x7   : > { %210 = sbr.rel (%p207_p3) target bundleno = 373 (0x175), region = 36  ;;  %747 = vmatprep.subr.bf16.mxu0 (!%p207_p3), %v835_v3  ;;  %v748_v4 = vpack.c.bf16 (!%p207_p3), %v642_v1, %v641_v0  ;;  %v644_v5 = vld [vmem:[%s1004_s2 + $0x58] sm:$0xff] (!%p207_p3)  ;;  %706 = vmatprep.mubr.msk.f32.mxu0 (!%p207_p3), %vm836_vm0, %v837_v6  ;;  %p246_p4 = scmp.lt.s32.totalorder (!%p207_p3), %s825_s15, 1  ;;  %v651_v7 = vld [vmem:[%s1004_s2 + $0x80] sm:$0xff] (!%p207_p3)  ;;  %v652_v10 = vld [vmem:[%s1004_s2 + $0x88] sm:$0xff] (!%p207_p3)  ;;  %vm304_vm1 = vcmask (!%p207_p3), 523264  }
   0x8   : > { %759 = vmatprep.subr.bf16.mxu1 (!%p207_p3), %v835_v3  ;;  %725 = vmatprep.mubr.msk.f32.mxu1 (!%p207_p3), %vm836_vm0, %v837_v6  ;;  %v751_v8 = vpack.c.bf16 (!%p207_p3), %v644_v5, %v643_v2  ;;  %v645_v9 = vld [vmem:[%s1004_s2 + $0x60] sm:$0xff] (!%p207_p3)  ;;  %v646_v11 = vld [vmem:[%s1004_s2 + $0x68] sm:$0xff] (!%p207_p3)  ;;  %v760_v12 = vpack.c.bf16 (!%p207_p3), %v652_v10, %v651_v7  ;;  %v653_v13 = vld [vmem:[%s1004_s2 + $0x90] sm:$0xff] (!%p207_p3)  ;;  %v284_v38 = vrot.slane (!%p207_p3), %v837_v6, 5  ;;  %vm286_vm2 = vcmask (!%p207_p3), 1042432   ;;  %s838_s27 = smov (!%p207_p3), 64  }
   0x9   : > { %749 = vmatpush3.bf16.msra.mxu0 (!%p207_p3), %v748_v4  ;;  %v654_v14 = vld [vmem:[%s1004_s2 + $0x98] sm:$0xff] (!%p207_p3)  ;;  %v754_v16 = vpack.c.bf16 (!%p207_p3), %v646_v11, %v645_v9  ;;  %v655_v17 = vld [vmem:[%s1004_s2 + $0xa0] sm:$0xff] (!%p207_p3)  ;;  %v656_v18 = vld [vmem:[%s1004_s2 + $0xa8] sm:$0xff] (!%p207_p3) }
   0xa   : > { %750 = vmatprep.subr.bf16.mxu0 (!%p207_p3), %v835_v3  ;;  %761 = vmatpush3.bf16.msra.mxu1 (!%p207_p3), %v760_v12  ;;  %v763_v15 = vpack.c.bf16 (!%p207_p3), %v654_v14, %v653_v13  ;;  %v647_v19 = vld [vmem:[%s1004_s2 + $0x70] sm:$0xff] (!%p207_p3)  ;;  %v648_v20 = vld [vmem:[%s1004_s2 + $0x78] sm:$0xff] (!%p207_p3)  ;;  %v766_v21 = vpack.c.bf16 (!%p207_p3), %v656_v18, %v655_v17  ;;  %v377_v25 = vld [vmem:[%s1004_s2] sm:$0xff] (!%p207_p3) }
   0xb   : > { %762 = vmatprep.subr.bf16.mxu1 (!%p207_p3), %v835_v3  ;;  %v757_v22 = vpack.c.bf16 (!%p207_p3), %v648_v20, %v647_v19  ;;  %v657_v23 = vld [vmem:[%s1004_s2 + $0xb0] sm:$0xff] (!%p207_p3)  ;;  %v658_v24 = vld [vmem:[%s1004_s2 + $0xb8] sm:$0xff] (!%p207_p3)  ;;  %v378_v26 = vld [vmem:[%s1004_s2 + $0x8] sm:$0xff] (!%p207_p3) }
   0xc   : > { %v769_v27 = vpack.c.bf16 (!%p207_p3), %v658_v24, %v657_v23  ;;  %v772_v29 = vpack.c.bf16 (!%p207_p3), %v378_v26, %v377_v25  ;;  %v379_v30 = vld [vmem:[%s1004_s2 + $0x10] sm:$0xff] (!%p207_p3)  ;;  %v380_v31 = vld [vmem:[%s1004_s2 + $0x18] sm:$0xff] (!%p207_p3)  ;;  %v381_v33 = vld [vmem:[%s1004_s2 + $0x20] sm:$0xff] (!%p207_p3) }
   0xd   : > { %752 = vmatpush3.bf16.msra.mxu0 (!%p207_p3), %v751_v8  ;;  %v775_v32 = vpack.c.bf16 (!%p207_p3), %v380_v31, %v379_v30  ;;  %v382_v34 = vld [vmem:[%s1004_s2 + $0x28] sm:$0xff] (!%p207_p3)  ;;  %v383_v36 = vld [vmem:[%s1004_s2 + $0x30] sm:$0xff] (!%p207_p3)  ;;  %v384_v37 = vld [vmem:[%s1004_s2 + $0x38] sm:$0xff] (!%p207_p3) }
   0xe   : > { %s1012_s15 = smov (!%p246_p4, %s825_s15), 1  ;;  %753 = vmatprep.subr.bf16.mxu0 %v835_v3  ;;  %764 = vmatpush3.bf16.msra.mxu1 %v763_v15  ;;  %v778_v35 = vpack.c.bf16 %v382_v34, %v381_v33  ;;  %v781_v40 = vpack.c.bf16 %v384_v37, %v383_v36  ;;  %v649_v42 = vld [vmem:[%s1005_s3] ss:$0 sm:$0xff] }
   0xf   : > { %s638_s23 = sshll.u32 %s1012_s15, 2  ;;  %765 = vmatprep.subr.bf16.mxu1 %v835_v3 }
  0x10   : > { %s252_s30 = scalar_lea.vmem %s1002_s0, %s638_s23 }
  0x11   : > { %755 = vmatpush3.bf16.msra.mxu0 %v754_v16  ;;  %v273_v28 = vld [vmem:[%s252_s30] sm:$0xf]  ;;  %s272_s30 = scalar_lea.vmem %s1006_s4, %s638_s23 }
  0x12   : > { %756 = vmatprep.subr.bf16.mxu0 %v835_v3  ;;  %767 = vmatpush3.bf16.msra.mxu1 %v766_v21  ;;  %v281_v39 = vrot.slane %v273_v28, 1 }
  0x13   : > { %768 = vmatprep.subr.bf16.mxu1 %v835_v3 }
  0x14   : > { %v287_v41 = vsel %vm286_vm2, %v281_v39, %v284_v38 }
  0x15   : > { %758 = vmatpush3.bf16.msra.mxu0 %v757_v22 }
  0x16   : > { %771 = vmatprep.subr.bf16.mxu0 %v835_v3  ;;  %770 = vmatpush3.bf16.msra.mxu1 %v769_v27 }
  0x18   : > { %707 = vmatmul.mubr.msk.f32.vlgmr.msra.gmra.mrb[0].mxu0 %vm304_vm1, %v273_v28 }
  0x19   : > { %773 = vmatpush3.bf16.msra.mxu0 %v772_v29  ;;  %744 = vmatprep.mubr.msk.f32.mxu0 %vm836_vm0, %v837_v6 }
  0x1a   : > { %774 = vmatprep.subr.bf16.mxu0 %v835_v3  ;;  %726 = vmatmul.mubr.msk.f32.vlgmr.msra.gmra.mrb[0].mxu1 %vm304_vm1, %v273_v28 }
  0x1d   : > { %776 = vmatpush3.bf16.msra.mxu0 %v775_v32 }
  0x1e   : > { %777 = vmatprep.subr.bf16.mxu0 %v835_v3 }
  0x21   : > { %779 = vmatpush3.bf16.msra.mxu0 %v778_v35 }
  0x22   : > { %780 = vmatprep.subr.bf16.mxu0 %v835_v3 }
  0x25   : > { %782 = vmatpush3.bf16.msra.mxu0 %v781_v40 }
  0x28   : > { %745 = vmatmul.mubr.msk.f32.vlgmr.msra.gmra.mrb[2].mxu0 %vm304_vm1, %v287_v41 }
  0xeb   : > { %v373_v43 = vpop.f32.mrb[0].mxu0 }
  0xec   : > { %v374_v44 = vadd.f32 %v649_v42, %v373_v43  ;;  %v708_v45 = vpop.f32.mrb[1].mxu0 }
  0xed   : > { %v460_v46 = vpop.f32.mrb[0].mxu1 }
  0xee   : > { %v727_v47 = vpop.f32.mrb[1].mxu1 }
  0xfb   : > { %v533_v48 = vpop.f32.mrb[2].mxu0 }
  0xfc   : > { %v534_v49 = vadd.f32 %v533_v48, %v460_v46  ;;  %v746_v50 = vpop.f32.mrb[3].mxu0 }
  0xfe   : > { %v537_v51 = vadd.f32 %v649_v42, %v534_v49 }
 0x100   : > { %539 = vrot.lane.b32.xlu0 %v537_v51, %s838_s27 }
 0x172   : > { %v540_v52 = vpop.permute.xlu0 %539 }
 0x173   : > { %v542_v53 = vsel %vm304_vm1, %v374_v44, %v540_v52 }
 0x174   : > { %543 = vst [vmem:[%s272_s30] sm:$0xf] %v542_v53 }
 0x175 PF: > { %s14_s17 = sadd.s32 1, %s833_s17   ;;  %s1007_s15 = smov %s829_s16 }
 0x176   : > { %p11_p5 = scmp.ge.s32.totalorder %s14_s17, 4   ;;  %s1008_s16 = smov %s1010_s1 }
 0x178   :  { %13 = sbr.rel (!%p11_p5) target bundleno = 2 (0x2), region = 71 }

// kernel: cnn_music_forward.17
= control target key start
LH: loop header
LB: loop body
LE: loop exit
PB: predicated region body
PF: predicated region fallthrough
CT: control target
= control target key end

     0   :  { %s814_s12 = smov 0   ;;  %s816_s13 = smov 0   ;;  %s952_s0 = inlined_call_operand.vmem [shape: f32[2,4,2,64], index: 0, kind: input, shape index: {}]   ;;  %s953_s1 = inlined_call_operand.vmem [shape: f32[3,64,64], index: 1, kind: input, shape index: {}]   ;;  %s954_s2 = inlined_call_operand.vmem [shape: f32[1,64], index: 2, kind: input, shape index: {}]   ;;  %s955_s3 = inlined_call_operand.vmem [shape: f32[2,4,64], index: 3, kind: output, shape index: {}]  }
   0x1   :  { %s818_s14 = smov 0  }
   0x2 LB: > { %s25_s15 = sadd.s32 1, %s785_s13  ;;  %p593_p0 = scmp.ge.s32.totalorder %s789_s14, 1  ;;  %s789_s14 = sphi %s818_s14, %s13_s14   ;;  %s785_s13 = sphi %s816_s13, %s957_s13   ;;  %s781_s12 = sphi %s814_s12, %s956_s12  }
   0x3   : > { %p27_p1 = scmp.ge.s32.totalorder %s25_s15, 2  ;;  %p158_p2 = scmp.lt.s32.totalorder %s789_s14, 3 }
   0x5   : > { %s959_s15 = smov (%p27_p1, %s25_s15), 0  ;;  %p159_p3 = pnand %p593_p0, %p158_p2 }
   0x6   : > { %v597_v0 = vld [vmem:[%s953_s1 + $0x40] sm:$0xff] (!%p159_p3)  ;;  %v598_v1 = vld [vmem:[%s953_s1 + $0x48] sm:$0xff] (!%p159_p3)  ;;  %p189_p4 = scmp.lt.s32.totalorder (!%p159_p3), %s781_s12, 1  ;;  %vm209_vm0 = vcmask (!%p159_p3), 517120   ;;  %v791_v3 = vmov (!%p159_p3), 0.0|0.0   ;;  %v599_v6 = vld [vmem:[%s953_s1 + $0x50] sm:$0xff] (!%p159_p3) }
   0x7   : > { %162 = sbr.rel (%p159_p3) target bundleno = 264 (0x108), region = 32  ;;  %v249_v2 = vld [vmem:[%s953_s1] sm:$0xff] (!%p159_p3)  ;;  %704 = vmatprep.subr.bf16.mxu0 (!%p159_p3), %v791_v3  ;;  %v705_v4 = vpack.c.bf16 (!%p159_p3), %v598_v1, %v597_v0  ;;  %716 = vmatprep.subr.bf16.mxu1 (!%p159_p3), %v791_v3  ;;  %v250_v5 = vld [vmem:[%s953_s1 + $0x8] sm:$0xff] (!%p159_p3)  ;;  %v600_v7 = vld [vmem:[%s953_s1 + $0x58] sm:$0xff] (!%p159_p3)  ;;  %v792_v11 = vmov (!%p159_p3), 0.0   ;;  %vm793_vm1 = vmmov (!%p159_p3), 0  }
   0x8   : > { %v717_v8 = vpack.c.bf16 (!%p159_p3), %v250_v5, %v249_v2  ;;  %v251_v9 = vld [vmem:[%s953_s1 + $0x10] sm:$0xff] (!%p159_p3)  ;;  %v252_v10 = vld [vmem:[%s953_s1 + $0x18] sm:$0xff] (!%p159_p3)  ;;  %210 = vst.msk [vmem:[#allocation2] sm:$0x3] (!%p159_p3), %vm209_vm0, %v792_v11  ;;  %663 = vmatprep.mubr.msk.f32.mxu0 (!%p159_p3), %vm793_vm1, %v792_v11  ;;  %682 = vmatprep.mubr.msk.f32.mxu1 (!%p159_p3), %vm793_vm1, %v792_v11  ;;  %v708_v12 = vpack.c.bf16 (!%p159_p3), %v600_v7, %v599_v6  ;;  %v601_v14 = vld [vmem:[%s953_s1 + $0x60] sm:$0xff] (!%p159_p3)  ;;  %vm497_vm2 = vcmask (!%p159_p3), 1041409  }
   0x9   : > { %706 = vmatpush3.bf16.msra.mxu0 (!%p159_p3), %v705_v4  ;;  %v720_v13 = vpack.c.bf16 (!%p159_p3), %v252_v10, %v251_v9  ;;  %v602_v15 = vld [vmem:[%s953_s1 + $0x68] sm:$0xff] (!%p159_p3)  ;;  %v253_v16 = vld [vmem:[%s953_s1 + $0x20] sm:$0xff] (!%p159_p3)  ;;  %v603_v27 = vld [vmem:[%s953_s1 + $0x70] sm:$0xff] (!%p159_p3)  ;;  %vm238_vm3 = vcmask (!%p159_p3), 1043459   ;;  %vm241_vm4 = vcmask (!%p159_p3), 1044484   ;;  %vm244_vm5 = vcmask (!%p159_p3), 1045509  }
   0xa   : > { %718 = vmatpush3.bf16.msra.mxu1 (!%p159_p3), %v717_v8  ;;  %707 = vmatprep.subr.bf16.mxu0 (!%p159_p3), %v791_v3  ;;  %v254_v17 = vld [vmem:[%s953_s1 + $0x28] sm:$0xff] (!%p159_p3)  ;;  %v711_v21 = vpack.c.bf16 (!%p159_p3), %v602_v15, %v601_v14  ;;  %v604_v28 = vld [vmem:[%s953_s1 + $0x78] sm:$0xff] (!%p159_p3)  ;;  %v255_v30 = vld [vmem:[%s953_s1 + $0x30] sm:$0xff] (!%p159_p3)  ;;  %vm247_vm6 = vcmask (!%p159_p3), 1041408   ;;  %vm268_vm7 = vcmask (!%p159_p3), 523264   ;;  %vm510_vm8 = vcmask (!%p159_p3), 519168  }
   0xb   : > { %719 = vmatprep.subr.bf16.mxu1 (!%p159_p3), %v791_v3  ;;  %v723_v26 = vpack.c.bf16 (!%p159_p3), %v254_v17, %v253_v16  ;;  %v256_v31 = vld [vmem:[%s953_s1 + $0x38] sm:$0xff] (!%p159_p3)  ;;  %v714_v36 = vpack.c.bf16 (!%p159_p3), %v604_v28, %v603_v27  ;;  %v607_v46 = vld [vmem:[%s953_s1 + $0x80] sm:$0xff] (!%p159_p3)  ;;  %v608_v47 = vld [vmem:[%s953_s1 + $0x88] sm:$0xff] (!%p159_p3) }
   0xc   : > { %v726_v40 = vpack.c.bf16 (!%p159_p3), %v256_v31, %v255_v30  ;;  %v729_v51 = vpack.c.bf16 (!%p159_p3), %v608_v47, %v607_v46  ;;  %v609_v53 = vld [vmem:[%s953_s1 + $0x90] sm:$0xff] (!%p159_p3)  ;;  %v610_v54 = vld [vmem:[%s953_s1 + $0x98] sm:$0xff] (!%p159_p3)  ;;  %v611_v56 = vld [vmem:[%s953_s1 + $0xa0] sm:$0xff] (!%p159_p3) }
   0xd   : > { %709 = vmatpush3.bf16.msra.mxu0 (!%p159_p3), %v708_v12  ;;  %v732_v55 = vpack.c.bf16 (!%p159_p3), %v610_v54, %v609_v53  ;;  %v612_v57 = vld [vmem:[%s953_s1 + $0xa8] sm:$0xff] (!%p159_p3)  ;;  %v613_v59 = vld [vmem:[%s953_s1 + $0xb0] sm:$0xff] (!%p159_p3)  ;;  %v614_v60 = vld [vmem:[%s953_s1 + $0xb8] sm:$0xff] (!%p159_p3) }
   0xe   : > { %s961_s12 = smov (!%p189_p4, %s781_s12), 1  ;;  %721 = vmatpush3.bf16.msra.mxu1 %v720_v13  ;;  %710 = vmatprep.subr.bf16.mxu0 %v791_v3  ;;  %v735_v58 = vpack.c.bf16 %v612_v57, %v611_v56  ;;  %v738_v61 = vpack.c.bf16 %v614_v60, %v613_v59  ;;  %v616_v6 = vld [vmem:[%s954_s2] ss:$0 sm:$0xff] }
   0xf   : > { %s619_s9 = sshll.u32 %s961_s12, 3  ;;  %722 = vmatprep.subr.bf16.mxu1 %v791_v3  ;;  %v231_v43 = vld [vmem:[#allocation2] sm:$0x3]  ;;  %s596_s22 = sshll.u32 %s961_s12, 2 }
  0x10   : > { %s196_s20 = scalar_lea.vmem %s952_s0, %s619_s9  ;;  %s204_s27 = scalar_lea.vmem %s955_s3, %s596_s22 }
  0x11   : > { %v213_v18 = vld [vmem:[%s196_s20 + $0x4] sm:$0x3]  ;;  %v214_v19 = vld [vmem:[%s196_s20 + $0x6] sm:$0x3]  ;;  %v211_v20 = vld [vmem:[%s196_s20] sm:$0x3]  ;;  %712 = vmatpush3.bf16.msra.mxu0 %v711_v21 }
  0x12   : > { %v221_v22 = vrot.slane %v213_v18, 1  ;;  %v222_v23 = vrot.slane %v214_v19, 1  ;;  %v212_v24 = vld [vmem:[%s196_s20 + $0x2] sm:$0x3]  ;;  %v219_v25 = vrot.slane %v211_v20, 1  ;;  %724 = vmatpush3.bf16.msra.mxu1 %v723_v26  ;;  %713 = vmatprep.subr.bf16.mxu0 %v791_v3 }
  0x13   : > { %v220_v29 = vrot.slane %v212_v24, 1  ;;  %725 = vmatprep.subr.bf16.mxu1 %v791_v3 }
  0x14   : > { %v229_v32 = vmax.f32 %v213_v18, %v221_v22  ;;  %v230_v33 = vmax.f32 %v214_v19, %v222_v23  ;;  %v227_v34 = vmax.f32 %v211_v20, %v219_v25 }
  0x15   : > { %v228_v35 = vmax.f32 %v212_v24, %v220_v29  ;;  %715 = vmatpush3.bf16.msra.mxu0 %v714_v36 }
  0x16   : > { %v496_v37 = vrot.slane %v230_v33, 7  ;;  %v236_v38 = vrot.slane %v227_v34, 6  ;;  %v240_v39 = vrot.slane %v229_v32, 4  ;;  %v243_v42 = vrot.slane %v230_v33, 3  ;;  %727 = vmatpush3.bf16.msra.mxu1 %v726_v40  ;;  %728 = vmatprep.subr.bf16.mxu0 %v791_v3 }
  0x17   : > { %v237_v41 = vrot.slane %v228_v35, 5 }
  0x18   : > { %v498_v44 = vsel %vm497_vm2, %v496_v37, %v229_v32 }
  0x19   : > { %501 = vst.msk [vmem:[#allocation2] sm:$0x3] %vm209_vm0, %v498_v44  ;;  %v239_v45 = vsel %vm238_vm3, %v237_v41, %v236_v38 }
  0x1a   : > { %v242_v48 = vsel %vm241_vm4, %v240_v39, %v239_v45 }
  0x1b   : > { %v245_v49 = vsel %vm244_vm5, %v243_v42, %v242_v48 }
  0x1c   : > { %v248_v50 = vsel %vm247_vm6, %v231_v43, %v245_v49 }
  0x1d   : > { %v267_v52 = vrot.slane %v248_v50, 1  ;;  %683 = vmatmul.mubr.msk.f32.vlgmr.msra.gmra.mrb[0].mxu1 %vm268_vm7, %v248_v50  ;;  %v422_v62 = vrot.slane %v248_v50, 2 }
  0x1f   : > { %664 = vmatmul.mubr.msk.f32.vlgmr.msra.gmra.mrb[0].mxu0 %vm268_vm7, %v267_v52 }
  0x20   : > { %730 = vmatpush3.bf16.msra.mxu0 %v729_v51  ;;  %701 = vmatprep.mubr.msk.f32.mxu0 %vm793_vm1, %v792_v11 }
  0x21   : > { %731 = vmatprep.subr.bf16.mxu0 %v791_v3 }
  0x24   : > { %733 = vmatpush3.bf16.msra.mxu0 %v732_v55 }
  0x25   : > { %734 = vmatprep.subr.bf16.mxu0 %v791_v3 }
  0x28   : > { %736 = vmatpush3.bf16.msra.mxu0 %v735_v58 }
  0x29   : > { %737 = vmatprep.subr.bf16.mxu0 %v791_v3 }
  0x2c   : > { %739 = vmatpush3.bf16.msra.mxu0 %v738_v61 }
  0x2f   : > { %702 = vmatmul.mubr.msk.f32.vlgmr.msra.gmra.mrb[2].mxu0 %vm268_vm7, %v422_v62 }
  0xf0   : > { %v409_v63 = vpop.f32.mrb[0].mxu1 }
  0xf1   : > { %v684_v1 = vpop.f32.mrb[1].mxu1 }
  0xf2   : > { %v337_v0 = vpop.f32.mrb[0].mxu0 }
  0xf3   : > { %v410_v2 = vadd.f32 %v409_v63, %v337_v0  ;;  %v665_v4 = vpop.f32.mrb[1].mxu0 }
 0x102   : > { %v491_v5 = vpop.f32.mrb[2].mxu0 }
 0x103   : > { %v495_v7 = vadd.f32 %v491_v5, %v410_v2  ;;  %v703_v8 = vpop.f32.mrb[3].mxu0 }
 0x105   : > { %v509_v3 = vadd.f32 %v616_v6, %v495_v7 }
 0x107   : > { %511 = vst.msk [vmem:[%s204_s27] sm:$0xf] %vm510_vm8, %v509_v3 }
 0x108 PF: > { %s13_s14 = sadd.s32 1, %s789_s14   ;;  %s956_s12 = smov %s785_s13 }
 0x109   : > { %p10_p5 = scmp.ge.s32.totalorder %s13_s14, 4   ;;  %s957_s13 = smov %s959_s15 }
 0x10b   :  { %12 = sbr.rel (!%p10_p5) target bundleno = 2 (0x2), region = 68 }

// kernel: cnn_music_forward.20
= control target key start
LH: loop header
LB: loop body
LE: loop exit
PB: predicated region body
PF: predicated region fallthrough
CT: control target
= control target key end

     0   :  { %s864_s15 = smov 0   ;;  %s866_s16 = smov 0   ;;  %s1002_s0 = inlined_call_operand.vmem [shape: f32[2,8,64], index: 0, kind: input, shape index: {}, may-alias: {0,1}]   ;;  %s1003_s1 = inlined_call_operand.vmem [shape: f32[2,8,64], index: 1, kind: input, shape index: {}, may-alias: {0,1}]   ;;  %s1004_s2 = inlined_call_operand.vmem [shape: f32[3,64,64], index: 2, kind: input, shape index: {}]   ;;  %s1005_s3 = inlined_call_operand.vmem [shape: f32[1,64], index: 3, kind: input, shape index: {}]   ;;  %s1006_s4 = inlined_call_operand.vmem [shape: f32[2,8,128], index: 4, kind: output, shape index: {}]  }
   0x1   :  { %s868_s17 = smov 0  }
   0x2 LB: > { %s26_s1 = sadd.s32 1, %s829_s16  ;;  %p637_p0 = scmp.ge.s32.totalorder %s833_s17, 1  ;;  %s833_s17 = sphi %s868_s17, %s14_s17   ;;  %s829_s16 = sphi %s866_s16, %s1008_s16   ;;  %s825_s15 = sphi %s864_s15, %s1007_s15  }
   0x3   : > { %p28_p1 = scmp.ge.s32.totalorder %s26_s1, 2  ;;  %p206_p2 = scmp.lt.s32.totalorder %s833_s17, 3 }
   0x5   : > { %s1010_s1 = smov (%p28_p1, %s26_s1), 0  ;;  %p207_p3 = pnand %p637_p0, %p206_p2 }
   0x6   : > { %v641_v0 = vld [vmem:[%s1004_s2 + $0x40] sm:$0xff] (!%p207_p3)  ;;  %v642_v1 = vld [vmem:[%s1004_s2 + $0x48] sm:$0xff] (!%p207_p3)  ;;  %v643_v2 = vld [vmem:[%s1004_s2 + $0x50] sm:$0xff] (!%p207_p3)  ;;  %v835_v3 = vmov (!%p207_p3), 0.0|0.0   ;;  %vm836_vm0 = vmmov (!%p207_p3), 0   ;;  %v837_v6 = vmov (!%p207_p3), 0.0  }
   0x7   : > { %210 = sbr.rel (%p207_p3) target bundleno = 373 (0x175), region = 36  ;;  %747 = vmatprep.subr.bf16.mxu0 (!%p207_p3), %v835_v3  ;;  %v748_v4 = vpack.c.bf16 (!%p207_p3), %v642_v1, %v641_v0  ;;  %v644_v5 = vld [vmem:[%s1004_s2 + $0x58] sm:$0xff] (!%p207_p3)  ;;  %706 = vmatprep.mubr.msk.f32.mxu0 (!%p207_p3), %vm836_vm0, %v837_v6  ;;  %p246_p4 = scmp.lt.s32.totalorder (!%p207_p3), %s825_s15, 1  ;;  %v651_v7 = vld [vmem:[%s1004_s2 + $0x80] sm:$0xff] (!%p207_p3)  ;;  %v652_v10 = vld [vmem:[%s1004_s2 + $0x88] sm:$0xff] (!%p207_p3)  ;;  %vm304_vm1 = vcmask (!%p207_p3), 523264  }
   0x8   : > { %759 = vmatprep.subr.bf16.mxu1 (!%p207_p3), %v835_v3  ;;  %725 = vmatprep.mubr.msk.f32.mxu1 (!%p207_p3), %vm836_vm0, %v837_v6  ;;  %v751_v8 = vpack.c.bf16 (!%p207_p3), %v644_v5, %v643_v2  ;;  %v645_v9 = vld [vmem:[%s1004_s2 + $0x60] sm:$0xff] (!%p207_p3)  ;;  %v646_v11 = vld [vmem:[%s1004_s2 + $0x68] sm:$0xff] (!%p207_p3)  ;;  %v760_v12 = vpack.c.bf16 (!%p207_p3), %v652_v10, %v651_v7  ;;  %v653_v13 = vld [vmem:[%s1004_s2 + $0x90] sm:$0xff] (!%p207_p3)  ;;  %v284_v38 = vrot.slane (!%p207_p3), %v837_v6, 1  ;;  %vm286_vm2 = vcmask (!%p207_p3), 1046528   ;;  %s838_s27 = smov (!%p207_p3), 64  }
   0x9   : > { %749 = vmatpush3.bf16.msra.mxu0 (!%p207_p3), %v748_v4  ;;  %v654_v14 = vld [vmem:[%s1004_s2 + $0x98] sm:$0xff] (!%p207_p3)  ;;  %v754_v16 = vpack.c.bf16 (!%p207_p3), %v646_v11, %v645_v9  ;;  %v655_v17 = vld [vmem:[%s1004_s2 + $0xa0] sm:$0xff] (!%p207_p3)  ;;  %v656_v18 = vld [vmem:[%s1004_s2 + $0xa8] sm:$0xff] (!%p207_p3) }
   0xa   : > { %750 = vmatprep.subr.bf16.mxu0 (!%p207_p3), %v835_v3  ;;  %761 = vmatpush3.bf16.msra.mxu1 (!%p207_p3), %v760_v12  ;;  %v763_v15 = vpack.c.bf16 (!%p207_p3), %v654_v14, %v653_v13  ;;  %v647_v19 = vld [vmem:[%s1004_s2 + $0x70] sm:$0xff] (!%p207_p3)  ;;  %v648_v20 = vld [vmem:[%s1004_s2 + $0x78] sm:$0xff] (!%p207_p3)  ;;  %v766_v21 = vpack.c.bf16 (!%p207_p3), %v656_v18, %v655_v17  ;;  %v377_v25 = vld [vmem:[%s1004_s2] sm:$0xff] (!%p207_p3) }
   0xb   : > { %762 = vmatprep.subr.bf16.mxu1 (!%p207_p3), %v835_v3  ;;  %v757_v22 = vpack.c.bf16 (!%p207_p3), %v648_v20, %v647_v19  ;;  %v657_v23 = vld [vmem:[%s1004_s2 + $0xb0] sm:$0xff] (!%p207_p3)  ;;  %v658_v24 = vld [vmem:[%s1004_s2 + $0xb8] sm:$0xff] (!%p207_p3)  ;;  %v378_v26 = vld [vmem:[%s1004_s2 + $0x8] sm:$0xff] (!%p207_p3) }
   0xc   : > { %v769_v27 = vpack.c.bf16 (!%p207_p3), %v658_v24, %v657_v23  ;;  %v772_v29 = vpack.c.bf16 (!%p207_p3), %v378_v26, %v377_v25  ;;  %v379_v30 = vld [vmem:[%s1004_s2 + $0x10] sm:$0xff] (!%p207_p3)  ;;  %v380_v31 = vld [vmem:[%s1004_s2 + $0x18] sm:$0xff] (!%p207_p3)  ;;  %v381_v33 = vld [vmem:[%s1004_s2 + $0x20] sm:$0xff] (!%p207_p3) }
   0xd   : > { %752 = vmatpush3.bf16.msra.mxu0 (!%p207_p3), %v751_v8  ;;  %v775_v32 = vpack.c.bf16 (!%p207_p3), %v380_v31, %v379_v30  ;;  %v382_v34 = vld [vmem:[%s1004_s2 + $0x28] sm:$0xff] (!%p207_p3)  ;;  %v383_v36 = vld [vmem:[%s1004_s2 + $0x30] sm:$0xff] (!%p207_p3)  ;;  %v384_v37 = vld [vmem:[%s1004_s2 + $0x38] sm:$0xff] (!%p207_p3) }
   0xe   : > { %s1012_s15 = smov (!%p246_p4, %s825_s15), 1  ;;  %753 = vmatprep.subr.bf16.mxu0 %v835_v3  ;;  %764 = vmatpush3.bf16.msra.mxu1 %v763_v15  ;;  %v778_v35 = vpack.c.bf16 %v382_v34, %v381_v33  ;;  %v781_v40 = vpack.c.bf16 %v384_v37, %v383_v36  ;;  %v649_v42 = vld [vmem:[%s1005_s3] ss:$0 sm:$0xff] }
   0xf   : > { %s638_s23 = sshll.u32 %s1012_s15, 3  ;;  %765 = vmatprep.subr.bf16.mxu1 %v835_v3 }
  0x10   : > { %s252_s30 = scalar_lea.vmem %s1002_s0, %s638_s23 }
  0x11   : > { %755 = vmatpush3.bf16.msra.mxu0 %v754_v16  ;;  %v273_v28 = vld [vmem:[%s252_s30] sm:$0xff]  ;;  %s272_s30 = scalar_lea.vmem %s1006_s4, %s638_s23 }
  0x12   : > { %756 = vmatprep.subr.bf16.mxu0 %v835_v3  ;;  %767 = vmatpush3.bf16.msra.mxu1 %v766_v21  ;;  %v281_v39 = vrot.slane %v273_v28, 1 }
  0x13   : > { %768 = vmatprep.subr.bf16.mxu1 %v835_v3 }
  0x14   : > { %v287_v41 = vsel %vm286_vm2, %v281_v39, %v284_v38 }
  0x15   : > { %758 = vmatpush3.bf16.msra.mxu0 %v757_v22 }
  0x16   : > { %771 = vmatprep.subr.bf16.mxu0 %v835_v3  ;;  %770 = vmatpush3.bf16.msra.mxu1 %v769_v27 }
  0x18   : > { %707 = vmatmul.mubr.msk.f32.vlgmr.msra.gmra.mrb[0].mxu0 %vm304_vm1, %v273_v28 }
  0x19   : > { %773 = vmatpush3.bf16.msra.mxu0 %v772_v29  ;;  %744 = vmatprep.mubr.msk.f32.mxu0 %vm836_vm0, %v837_v6 }
  0x1a   : > { %774 = vmatprep.subr.bf16.mxu0 %v835_v3  ;;  %726 = vmatmul.mubr.msk.f32.vlgmr.msra.gmra.mrb[0].mxu1 %vm304_vm1, %v273_v28 }
  0x1d   : > { %776 = vmatpush3.bf16.msra.mxu0 %v775_v32 }
  0x1e   : > { %777 = vmatprep.subr.bf16.mxu0 %v835_v3 }
  0x21   : > { %779 = vmatpush3.bf16.msra.mxu0 %v778_v35 }
  0x22   : > { %780 = vmatprep.subr.bf16.mxu0 %v835_v3 }
  0x25   : > { %782 = vmatpush3.bf16.msra.mxu0 %v781_v40 }
  0x28   : > { %745 = vmatmul.mubr.msk.f32.vlgmr.msra.gmra.mrb[2].mxu0 %vm304_vm1, %v287_v41 }
  0xeb   : > { %v373_v43 = vpop.f32.mrb[0].mxu0 }
  0xec   : > { %v374_v44 = vadd.f32 %v649_v42, %v373_v43  ;;  %v708_v45 = vpop.f32.mrb[1].mxu0 }
  0xed   : > { %v460_v46 = vpop.f32.mrb[0].mxu1 }
  0xee   : > { %v727_v47 = vpop.f32.mrb[1].mxu1 }
  0xfb   : > { %v533_v48 = vpop.f32.mrb[2].mxu0 }
  0xfc   : > { %v534_v49 = vadd.f32 %v533_v48, %v460_v46  ;;  %v746_v50 = vpop.f32.mrb[3].mxu0 }
  0xfe   : > { %v537_v51 = vadd.f32 %v649_v42, %v534_v49 }
 0x100   : > { %539 = vrot.lane.b32.xlu0 %v537_v51, %s838_s27 }
 0x172   : > { %v540_v52 = vpop.permute.xlu0 %539 }
 0x173   : > { %v542_v53 = vsel %vm304_vm1, %v374_v44, %v540_v52 }
 0x174   : > { %543 = vst [vmem:[%s272_s30] sm:$0xff] %v542_v53 }
 0x175 PF: > { %s14_s17 = sadd.s32 1, %s833_s17   ;;  %s1007_s15 = smov %s829_s16 }
 0x176   : > { %p11_p5 = scmp.ge.s32.totalorder %s14_s17, 4   ;;  %s1008_s16 = smov %s1010_s1 }
 0x178   :  { %13 = sbr.rel (!%p11_p5) target bundleno = 2 (0x2), region = 71 }

// kernel: cnn_music_forward.19
= control target key start
LH: loop header
LB: loop body
LE: loop exit
PB: predicated region body
PF: predicated region fallthrough
CT: control target
= control target key end

     0   :  { %s1278_s18 = smov 0   ;;  %s1280_s19 = smov 0   ;;  %s1533_s0 = inlined_call_operand.vmem [shape: f32[2,8,64], index: 0, kind: input, shape index: {}]   ;;  %s1534_s1 = inlined_call_operand.vmem [shape: f32[2,8,64], index: 1, kind: input, shape index: {}]   ;;  %s1535_s2 = inlined_call_operand.vmem [shape: f32[3,64,64], index: 2, kind: input, shape index: {}]   ;;  %s1536_s3 = inlined_call_operand.vmem [shape: f32[3,64,64], index: 3, kind: input, shape index: {}]   ;;  %s1537_s4 = inlined_call_operand.vmem [shape: f32[1,64], index: 4, kind: input, shape index: {}]   ;;  %s1538_s5 = inlined_call_operand.vmem [shape: f32[2,8,64], index: 5, kind: output, shape index: {}]  }
   0x1   :  { %s1282_s20 = smov 0  }
   0x2 LB: > { %s27_s21 = sadd.s32 1, %s1239_s19  ;;  %p909_p0 = scmp.ge.s32.totalorder %s1243_s20, 1  ;;  %s1243_s20 = sphi %s1282_s20, %s15_s20   ;;  %s1239_s19 = sphi %s1280_s19, %s1540_s19   ;;  %s1235_s18 = sphi %s1278_s18, %s1539_s18  }
   0x3   : > { %p29_p1 = scmp.ge.s32.totalorder %s27_s21, 2  ;;  %p219_p2 = scmp.lt.s32.totalorder %s1243_s20, 3 }
   0x5   : > { %s1542_s21 = smov (%p29_p1, %s27_s21), 0  ;;  %p220_p3 = pnand %p909_p0, %p219_p2 }
   0x6   : > { %v913_v0 = vld [vmem:[%s1535_s2 + $0x40] sm:$0xff] (!%p220_p3)  ;;  %v914_v1 = vld [vmem:[%s1535_s2 + $0x48] sm:$0xff] (!%p220_p3)  ;;  %vm283_vm0 = vcmask (!%p220_p3), 517120   ;;  %v1245_v3 = vmov (!%p220_p3), 0.0|0.0   ;;  %v915_v6 = vld [vmem:[%s1535_s2 + $0x50] sm:$0xff] (!%p220_p3)  ;;  %v1246_v8 = vmov (!%p220_p3), 0.0  }
   0x7   : > { %223 = sbr.rel (%p220_p3) target bundleno = 276 (0x114), region = 40  ;;  %v293_v2 = vld [vmem:[%s1535_s2] sm:$0xff] (!%p220_p3)  ;;  %1122 = vmatprep.subr.bf16.mxu0 (!%p220_p3), %v1245_v3  ;;  %v1123_v4 = vpack.c.bf16 (!%p220_p3), %v914_v1, %v913_v0  ;;  %1134 = vmatprep.subr.bf16.mxu1 (!%p220_p3), %v1245_v3  ;;  %v294_v5 = vld [vmem:[%s1535_s2 + $0x8] sm:$0xff] (!%p220_p3)  ;;  %v916_v7 = vld [vmem:[%s1535_s2 + $0x58] sm:$0xff] (!%p220_p3)  ;;  %284 = vst.msk [vmem:[#allocation2] sm:$0x3] (!%p220_p3), %vm283_vm0, %v1246_v8 }
   0x8   : > { %285 = vst.msk [vmem:[#allocation3] sm:$0x3] (!%p220_p3), %vm283_vm0, %v1246_v8  ;;  %p258_p4 = scmp.lt.s32.totalorder (!%p220_p3), %s1235_s18, 1  ;;  %v1135_v9 = vpack.c.bf16 (!%p220_p3), %v294_v5, %v293_v2  ;;  %v295_v10 = vld [vmem:[%s1535_s2 + $0x10] sm:$0xff] (!%p220_p3)  ;;  %v296_v11 = vld [vmem:[%s1535_s2 + $0x18] sm:$0xff] (!%p220_p3)  ;;  %vm1247_vm1 = vmmov (!%p220_p3), 0   ;;  %v1126_v12 = vpack.c.bf16 (!%p220_p3), %v916_v7, %v915_v6 }
   0x9   : > { %1024 = vmatprep.mubr.msk.f32.mxu0 (!%p220_p3), %vm1247_vm1, %v1246_v8  ;;  %1043 = vmatprep.mubr.msk.f32.mxu1 (!%p220_p3), %vm1247_vm1, %v1246_v8  ;;  %v1138_v13 = vpack.c.bf16 (!%p220_p3), %v296_v11, %v295_v10  ;;  %v917_v14 = vld [vmem:[%s1535_s2 + $0x60] sm:$0xff] (!%p220_p3)  ;;  %v918_v15 = vld [vmem:[%s1535_s2 + $0x68] sm:$0xff] (!%p220_p3)  ;;  %vm804_vm2 = vcmask (!%p220_p3), 523270   ;;  %vm291_vm3 = vcmask (!%p220_p3), 1041408   ;;  %v919_v21 = vld [vmem:[%s1535_s2 + $0x70] sm:$0xff] (!%p220_p3)  ;;  %vm311_vm4 = vcmask (!%p220_p3), 1046528  }
   0xa   : > { %1124 = vmatpush3.bf16.msra.mxu0 (!%p220_p3), %v1123_v4  ;;  %1136 = vmatpush3.bf16.msra.mxu1 (!%p220_p3), %v1135_v9  ;;  %v297_v16 = vld [vmem:[%s1535_s2 + $0x20] sm:$0xff] (!%p220_p3)  ;;  %v298_v17 = vld [vmem:[%s1535_s2 + $0x28] sm:$0xff] (!%p220_p3)  ;;  %v1129_v18 = vpack.c.bf16 (!%p220_p3), %v918_v15, %v917_v14  ;;  %v920_v22 = vld [vmem:[%s1535_s2 + $0x78] sm:$0xff] (!%p220_p3)  ;;  %vm315_vm5 = vcmask (!%p220_p3), 523264   ;;  %vm469_vm6 = vcmask (!%p220_p3), 1045504  }
   0xb   : > { %1125 = vmatprep.subr.bf16.mxu0 (!%p220_p3), %v1245_v3  ;;  %1137 = vmatprep.subr.bf16.mxu1 (!%p220_p3), %v1245_v3  ;;  %v1141_v20 = vpack.c.bf16 (!%p220_p3), %v298_v17, %v297_v16  ;;  %v299_v25 = vld [vmem:[%s1535_s2 + $0x30] sm:$0xff] (!%p220_p3)  ;;  %v300_v26 = vld [vmem:[%s1535_s2 + $0x38] sm:$0xff] (!%p220_p3)  ;;  %v1132_v28 = vpack.c.bf16 (!%p220_p3), %v920_v22, %v919_v21  ;;  %v923_v31 = vld [vmem:[%s1535_s2 + $0x80] sm:$0xff] (!%p220_p3) }
   0xc   : > { %v1144_v32 = vpack.c.bf16 (!%p220_p3), %v300_v26, %v299_v25  ;;  %v924_v33 = vld [vmem:[%s1535_s2 + $0x88] sm:$0xff] (!%p220_p3)  ;;  %v552_v36 = vld [vmem:[%s1536_s3] sm:$0xff] (!%p220_p3)  ;;  %v925_v41 = vld [vmem:[%s1535_s2 + $0x90] sm:$0xff] (!%p220_p3) }
   0xd   : > { %v553_v37 = vld [vmem:[%s1536_s3 + $0x8] sm:$0xff] (!%p220_p3)  ;;  %v1147_v39 = vpack.c.bf16 (!%p220_p3), %v924_v33, %v923_v31  ;;  %v926_v42 = vld [vmem:[%s1535_s2 + $0x98] sm:$0xff] (!%p220_p3)  ;;  %v554_v43 = vld [vmem:[%s1536_s3 + $0x10] sm:$0xff] (!%p220_p3) }
   0xe   : > { %s1544_s18 = smov (!%p258_p4, %s1235_s18), 1  ;;  %1127 = vmatpush3.bf16.msra.mxu0 %v1126_v12  ;;  %1139 = vmatpush3.bf16.msra.mxu1 %v1138_v13  ;;  %v287_v23 = vld [vmem:[#allocation2] sm:$0x3]  ;;  %v1159_v40 = vpack.c.bf16 %v553_v37, %v552_v36  ;;  %v555_v44 = vld [vmem:[%s1536_s3 + $0x18] sm:$0xff]  ;;  %v1150_v45 = vpack.c.bf16 %v926_v42, %v925_v41  ;;  %v928_v48 = vld [vmem:[%s1535_s2 + $0xa8] sm:$0xff] }
   0xf   : > { %s1346_s25 = sshll.u32 %s1544_s18, 3  ;;  %1128 = vmatprep.subr.bf16.mxu0 %v1245_v3  ;;  %1140 = vmatprep.subr.bf16.mxu1 %v1245_v3  ;;  %v547_v35 = vld [vmem:[#allocation3] sm:$0x3]  ;;  %v1162_v46 = vpack.c.bf16 %v555_v44, %v554_v43  ;;  %v557_v50 = vld [vmem:[%s1536_s3 + $0x28] sm:$0xff]  ;;  %v929_v53 = vld [vmem:[%s1535_s2 + $0xb0] sm:$0xff] }
  0x10   : > { %s264_s28 = scalar_lea.vmem %s1533_s0, %s1346_s25  ;;  %s271_s13 = scalar_lea.vmem %s1534_s1, %s1346_s25  ;;  %v927_v47 = vld [vmem:[%s1535_s2 + $0xa0] sm:$0xff]  ;;  %v930_v54 = vld [vmem:[%s1535_s2 + $0xb8] sm:$0xff]  ;;  %v558_v55 = vld [vmem:[%s1536_s3 + $0x30] sm:$0xff] }
  0x11   : > { %v286_v19 = vld [vmem:[%s264_s28] sm:$0xff]  ;;  %v1153_v51 = vpack.c.bf16 %v928_v48, %v927_v47  ;;  %v559_v56 = vld [vmem:[%s1536_s3 + $0x38] sm:$0xff]  ;;  %v1156_v57 = vpack.c.bf16 %v930_v54, %v929_v53  ;;  %v934_v62 = vld [vmem:[%s1536_s3 + $0x48] sm:$0xff]  ;;  %s278_s23 = scalar_lea.vmem %s1538_s5, %s1346_s25 }
  0x12   : > { %v1359_v24 = vrot.slane %v286_v19, 6  ;;  %806 = vst.msk [vmem:[#allocation2 - $0x6] sm:$0xc0] %vm804_vm2, %v286_v19  ;;  %1130 = vmatpush3.bf16.msra.mxu0 %v1129_v18  ;;  %1142 = vmatpush3.bf16.msra.mxu1 %v1141_v20  ;;  %v546_v34 = vld [vmem:[%s271_s13] sm:$0xff]  ;;  %v1168_v60 = vpack.c.bf16 %v559_v56, %v558_v55  ;;  %v943_v1 = vld [vmem:[%s1536_s3 + $0x88] sm:$0xff]  ;;  %v935_v7 = vld [vmem:[%s1536_s3 + $0x50] sm:$0xff] }
  0x13   : > { %1131 = vmatprep.subr.bf16.mxu0 %v1245_v3  ;;  %1143 = vmatprep.subr.bf16.mxu1 %v1245_v3  ;;  %805 = vst.msk [vmem:[#allocation3 - $0x6] sm:$0xc0] %vm804_vm2, %v546_v34  ;;  %v556_v49 = vld [vmem:[%s1536_s3 + $0x20] sm:$0xff]  ;;  %v549_v63 = vrot.slane %v546_v34, 6  ;;  %v936_v9 = vld [vmem:[%s1536_s3 + $0x58] sm:$0xff]  ;;  %v944_v10 = vld [vmem:[%s1536_s3 + $0x90] sm:$0xff] }
  0x14   : > { %v1375_v27 = vsel %vm291_vm3, %v287_v23, %v1359_v24  ;;  %v313_v30 = vrot.slane %v1359_v24, 1  ;;  %v1165_v52 = vpack.c.bf16 %v557_v50, %v556_v49  ;;  %v471_v59 = vrot.slane %v1359_v24, 2  ;;  %v933_v61 = vld [vmem:[%s1536_s3 + $0x40] sm:$0xff]  ;;  %v945_v11 = vld [vmem:[%s1536_s3 + $0x98] sm:$0xff]  ;;  %v938_v15 = vld [vmem:[%s1536_s3 + $0x68] sm:$0xff] }
  0x15   : > { %v312_v29 = vrot.slane %v1375_v27, 1  ;;  %v470_v58 = vrot.slane %v1375_v27, 2  ;;  %v942_v0 = vld [vmem:[%s1536_s3 + $0x80] sm:$0xff]  ;;  %v1171_v4 = vpack.c.bf16 %v934_v62, %v933_v61  ;;  %v551_v5 = vsel %vm291_vm3, %v547_v35, %v549_v63  ;;  %v947_v17 = vld [vmem:[%s1536_s3 + $0xa8] sm:$0xff]  ;;  %v939_v20 = vld [vmem:[%s1536_s3 + $0x70] sm:$0xff] }
  0x16   : > { %1133 = vmatpush3.bf16.msra.mxu0 %v1132_v28  ;;  %1145 = vmatpush3.bf16.msra.mxu1 %v1144_v32  ;;  %v1183_v6 = vpack.c.bf16 %v943_v1, %v942_v0  ;;  %v1174_v12 = vpack.c.bf16 %v936_v9, %v935_v7  ;;  %v1186_v13 = vpack.c.bf16 %v945_v11, %v944_v10  ;;  %v937_v14 = vld [vmem:[%s1536_s3 + $0x60] sm:$0xff]  ;;  %v940_v21 = vld [vmem:[%s1536_s3 + $0x78] sm:$0xff]  ;;  %v643_v23 = vrot.slane %v551_v5, 1 }
  0x17   : > { %v314_v38 = vsel %vm311_vm4, %v312_v29, %v313_v30  ;;  %1146 = vmatprep.subr.bf16.mxu0 %v1245_v3  ;;  %1158 = vmatprep.subr.bf16.mxu1 %v1245_v3  ;;  %v472_v2 = vsel %vm469_vm6, %v470_v58, %v471_v59  ;;  %v946_v16 = vld [vmem:[%s1536_s3 + $0xa0] sm:$0xff]  ;;  %v1177_v18 = vpack.c.bf16 %v938_v15, %v937_v14  ;;  %v949_v22 = vld [vmem:[%s1536_s3 + $0xb8] sm:$0xff]  ;;  %v644_v25 = vrot.slane %v549_v63, 1 }
  0x18   : > { %v1189_v19 = vpack.c.bf16 %v947_v17, %v946_v16  ;;  %v1180_v24 = vpack.c.bf16 %v940_v21, %v939_v20  ;;  %v728_v26 = vrot.slane %v551_v5, 2  ;;  %v729_v28 = vrot.slane %v549_v63, 2 }
  0x19   : > { %1025 = vmatmul.mubr.msk.f32.vlgmr.msra.gmra.mrb[0].mxu0 %vm315_vm5, %v314_v38  ;;  %1044 = vmatmul.mubr.msk.f32.vlgmr.msra.gmra.mrb[0].mxu1 %vm315_vm5, %v1375_v27  ;;  %v645_v29 = vsel %vm311_vm4, %v643_v23, %v644_v25 }
  0x1a   : > { %1148 = vmatpush3.bf16.msra.mxu0 %v1147_v39  ;;  %1160 = vmatpush3.bf16.msra.mxu1 %v1159_v40  ;;  %v730_v30 = vsel %vm469_vm6, %v728_v26, %v729_v28 }
  0x1b   : > { %1149 = vmatprep.subr.bf16.mxu0 %v1245_v3  ;;  %1161 = vmatprep.subr.bf16.mxu1 %v1245_v3 }
  0x1c   : > { %1062 = vmatprep.mubr.msk.f32.mxu0 %vm1247_vm1, %v1246_v8  ;;  %1081 = vmatprep.mubr.msk.f32.mxu1 %vm1247_vm1, %v1246_v8 }
  0x1e   : > { %1151 = vmatpush3.bf16.msra.mxu0 %v1150_v45  ;;  %1163 = vmatpush3.bf16.msra.mxu1 %v1162_v46  ;;  %v951_v45 = vld [vmem:[%s1537_s4] ss:$0 sm:$0xff] }
  0x1f   : > { %1152 = vmatprep.subr.bf16.mxu0 %v1245_v3  ;;  %1164 = vmatprep.subr.bf16.mxu1 %v1245_v3 }
  0x22   : > { %1154 = vmatpush3.bf16.msra.mxu0 %v1153_v51  ;;  %1166 = vmatpush3.bf16.msra.mxu1 %v1165_v52 }
  0x23   : > { %1155 = vmatprep.subr.bf16.mxu0 %v1245_v3  ;;  %1167 = vmatprep.subr.bf16.mxu1 %v1245_v3 }
  0x26   : > { %1157 = vmatpush3.bf16.msra.mxu0 %v1156_v57  ;;  %1169 = vmatpush3.bf16.msra.mxu1 %v1168_v60 }
  0x27   : > { %1170 = vmatprep.subr.bf16.mxu0 %v1245_v3  ;;  %1182 = vmatprep.subr.bf16.mxu1 %v1245_v3 }
  0x29   : > { %1063 = vmatmul.mubr.msk.f32.vlgmr.msra.gmra.mrb[2].mxu0 %vm315_vm5, %v472_v2  ;;  %1082 = vmatmul.mubr.msk.f32.vlgmr.msra.gmra.mrb[2].mxu1 %vm315_vm5, %v551_v5 }
  0x2a   : > { %1172 = vmatpush3.bf16.msra.mxu0 %v1171_v4  ;;  %1184 = vmatpush3.bf16.msra.mxu1 %v1183_v6 }
  0x2b   : > { %1173 = vmatprep.subr.bf16.mxu0 %v1245_v3  ;;  %1185 = vmatprep.subr.bf16.mxu1 %v1245_v3 }
  0x2c   : > { %1100 = vmatprep.mubr.msk.f32.mxu0 %vm1247_vm1, %v1246_v8  ;;  %1119 = vmatprep.mubr.msk.f32.mxu1 %vm1247_vm1, %v1246_v8  ;;  %v948_v8 = vld [vmem:[%s1536_s3 + $0xb0] sm:$0xff] }
  0x2d   : > { %v1192_v27 = vpack.c.bf16 %v949_v22, %v948_v8 }
  0x2e   : > { %1175 = vmatpush3.bf16.msra.mxu0 %v1174_v12  ;;  %1187 = vmatpush3.bf16.msra.mxu1 %v1186_v13 }
  0x2f   : > { %1176 = vmatprep.subr.bf16.mxu0 %v1245_v3  ;;  %1188 = vmatprep.subr.bf16.mxu1 %v1245_v3 }
  0x32   : > { %1178 = vmatpush3.bf16.msra.mxu0 %v1177_v18  ;;  %1190 = vmatpush3.bf16.msra.mxu1 %v1189_v19 }
  0x33   : > { %1179 = vmatprep.subr.bf16.mxu0 %v1245_v3  ;;  %1191 = vmatprep.subr.bf16.mxu1 %v1245_v3 }
  0x36   : > { %1181 = vmatpush3.bf16.msra.mxu0 %v1180_v24  ;;  %1193 = vmatpush3.bf16.msra.mxu1 %v1192_v27 }
  0x39   : > { %1101 = vmatmul.mubr.msk.f32.vlgmr.msra.gmra.mrb[4].mxu0 %vm315_vm5, %v645_v29  ;;  %1120 = vmatmul.mubr.msk.f32.vlgmr.msra.gmra.mrb[4].mxu1 %vm315_vm5, %v730_v30 }
  0xec   : > { %v384_v31 = vpop.f32.mrb[0].mxu0  ;;  %v456_v33 = vpop.f32.mrb[0].mxu1 }
  0xed   : > { %v1026_v32 = vpop.f32.mrb[1].mxu0  ;;  %v457_v34 = vadd.f32 %v456_v33, %v384_v31  ;;  %v1045_v35 = vpop.f32.mrb[1].mxu1 }
  0xfc   : > { %v541_v36 = vpop.f32.mrb[2].mxu0  ;;  %v629_v3 = vpop.f32.mrb[2].mxu1 }
  0xfd   : > { %v545_v37 = vadd.f32 %v541_v36, %v457_v34  ;;  %v1064_v38 = vpop.f32.mrb[3].mxu0  ;;  %v1083_v39 = vpop.f32.mrb[3].mxu1 }
  0xff   : > { %v633_v40 = vadd.f32 %v629_v3, %v545_v37 }
 0x10c   : > { %v714_v41 = vpop.f32.mrb[4].mxu0  ;;  %v799_v44 = vpop.f32.mrb[4].mxu1 }
 0x10d   : > { %v718_v42 = vadd.f32 %v714_v41, %v633_v40  ;;  %v1102_v43 = vpop.f32.mrb[5].mxu0  ;;  %v1121_v46 = vpop.f32.mrb[5].mxu1 }
 0x10f   : > { %v803_v47 = vadd.f32 %v799_v44, %v718_v42 }
 0x111   : > { %v814_v48 = vadd.f32 %v951_v45, %v803_v47 }
 0x113   : > { %815 = vst.msk [vmem:[%s278_s23] sm:$0xff] %vm315_vm5, %v814_v48 }
 0x114 PF: > { %s15_s20 = sadd.s32 1, %s1243_s20   ;;  %s1539_s18 = smov %s1239_s19 }
 0x115   : > { %p12_p5 = scmp.ge.s32.totalorder %s15_s20, 4   ;;  %s1540_s19 = smov %s1542_s21 }
 0x117   :  { %14 = sbr.rel (!%p12_p5) target bundleno = 2 (0x2), region = 81 }

// kernel: cnn_music_forward.22
= control target key start
LH: loop header
LB: loop body
LE: loop exit
PB: predicated region body
PF: predicated region fallthrough
CT: control target
= control target key end

     0   :  { %s1096_s15 = smov 0   ;;  %s1098_s16 = smov 0   ;;  %s1291_s0 = inlined_call_operand.vmem [shape: f32[2,16,128], index: 0, kind: input, shape index: {}, may-alias: {0,1}]   ;;  %s1292_s1 = inlined_call_operand.vmem [shape: f32[2,16,128], index: 1, kind: input, shape index: {}, may-alias: {0,1}]   ;;  %s1293_s2 = inlined_call_operand.vmem [shape: f32[3,128,128], index: 2, kind: input, shape index: {}]   ;;  %s1294_s3 = inlined_call_operand.vmem [shape: f32[1,128], index: 3, kind: input, shape index: {}]   ;;  %s1295_s4 = inlined_call_operand.vmem [shape: f32[2,16,256], index: 4, kind: output, shape index: {}]  }
   0x1   :  { %s1100_s17 = smov 0  }
   0x2 LB: > { %s26_s1 = sadd.s32 1, %s1064_s16  ;;  %p719_p0 = scmp.ge.s32.totalorder %s1068_s17, 1  ;;  %s1068_s17 = sphi %s1100_s17, %s14_s17   ;;  %s1064_s16 = sphi %s1098_s16, %s1297_s16   ;;  %s1060_s15 = sphi %s1096_s15, %s1296_s15  }
   0x3   : > { %p28_p1 = scmp.ge.s32.totalorder %s26_s1, 2  ;;  %p212_p2 = scmp.lt.s32.totalorder %s1068_s17, 3 }
   0x5   : > { %s1299_s1 = smov (%p28_p1, %s26_s1), 0  ;;  %p213_p3 = pnand %p719_p0, %p212_p2 }
   0x6   : > { %v743_v0 = vld [vmem:[%s1293_s2 + $0x100] sm:$0xff] (!%p213_p3)  ;;  %v744_v1 = vld [vmem:[%s1293_s2 + $0x108] sm:$0xff] (!%p213_p3)  ;;  %v745_v2 = vld [vmem:[%s1293_s2 + $0x110] sm:$0xff] (!%p213_p3)  ;;  %p260_p4 = scmp.lt.s32.totalorder (!%p213_p3), %s1060_s15, 1  ;;  %vm306_vm0 = vcmask (!%p213_p3), 1046528  }
   0x7   : > { %216 = sbr.rel (%p213_p3) target bundleno = 290 (0x122), region = 36  ;;  %v955_v3 = vpack.c.bf16 (!%p213_p3), %v744_v1, %v743_v0  ;;  %v746_v4 = vld [vmem:[%s1293_s2 + $0x118] sm:$0xff] (!%p213_p3)  ;;  %v747_v6 = vld [vmem:[%s1293_s2 + $0x120] sm:$0xff] (!%p213_p3)  ;;  %v748_v7 = vld [vmem:[%s1293_s2 + $0x128] sm:$0xff] (!%p213_p3) }
   0x8   : > { %v959_v5 = vpack.c.bf16 (!%p213_p3), %v746_v4, %v745_v2  ;;  %v963_v8 = vpack.c.bf16 (!%p213_p3), %v748_v7, %v747_v6  ;;  %v726_v9 = vld [vmem:[%s1293_s2 + $0x80] sm:$0xff] (!%p213_p3)  ;;  %v727_v10 = vld [vmem:[%s1293_s2 + $0x88] sm:$0xff] (!%p213_p3)  ;;  %v749_v11 = vld [vmem:[%s1293_s2 + $0x130] sm:$0xff] (!%p213_p3) }
   0x9   : > { %956 = vmatprep.subr.bf16.mxu1 (!%p213_p3), %v955_v3  ;;  %v750_v12 = vld [vmem:[%s1293_s2 + $0x138] sm:$0xff] (!%p213_p3)  ;;  %v923_v13 = vpack.c.bf16 (!%p213_p3), %v727_v10, %v726_v9  ;;  %v728_v15 = vld [vmem:[%s1293_s2 + $0x90] sm:$0xff] (!%p213_p3)  ;;  %v730_v18 = vld [vmem:[%s1293_s2 + $0xa0] sm:$0xff] (!%p213_p3) }
   0xa   : > { %958 = vmatpush3.bf16.msra.mxu1 (!%p213_p3), %v955_v3  ;;  %v729_v16 = vld [vmem:[%s1293_s2 + $0x98] sm:$0xff] (!%p213_p3)  ;;  %v967_v19 = vpack.c.bf16 (!%p213_p3), %v750_v12, %v749_v11  ;;  %v731_v20 = vld [vmem:[%s1293_s2 + $0xa8] sm:$0xff] (!%p213_p3)  ;;  %v751_v21 = vld [vmem:[%s1293_s2 + $0x140] sm:$0xff] (!%p213_p3) }
   0xb   : > { %960 = vmatprep.subr.bf16.mxu1 (!%p213_p3), %v959_v5  ;;  %924 = vmatprep.subr.bf16.mxu0 (!%p213_p3), %v923_v13  ;;  %v927_v17 = vpack.c.bf16 (!%p213_p3), %v729_v16, %v728_v15  ;;  %v752_v22 = vld [vmem:[%s1293_s2 + $0x148] sm:$0xff] (!%p213_p3)  ;;  %v931_v23 = vpack.c.bf16 (!%p213_p3), %v731_v20, %v730_v18  ;;  %v732_v24 = vld [vmem:[%s1293_s2 + $0xb0] sm:$0xff] (!%p213_p3)  ;;  %v733_v25 = vld [vmem:[%s1293_s2 + $0xb8] sm:$0xff] (!%p213_p3) }
   0xc   : > { %926 = vmatpush3.bf16.msra.mxu0 (!%p213_p3), %v923_v13  ;;  %v971_v26 = vpack.c.bf16 (!%p213_p3), %v752_v22, %v751_v21  ;;  %v753_v27 = vld [vmem:[%s1293_s2 + $0x150] sm:$0xff] (!%p213_p3)  ;;  %v754_v28 = vld [vmem:[%s1293_s2 + $0x158] sm:$0xff] (!%p213_p3)  ;;  %v935_v29 = vpack.c.bf16 (!%p213_p3), %v733_v25, %v732_v24  ;;  %v734_v30 = vld [vmem:[%s1293_s2 + $0xc0] sm:$0xff] (!%p213_p3)  ;;  %v1070_v13 = vmov (!%p213_p3), 0.0  }
   0xd   : > { %928 = vmatprep.subr.bf16.mxu0 (!%p213_p3), %v927_v17  ;;  %v735_v31 = vld [vmem:[%s1293_s2 + $0xc8] sm:$0xff] (!%p213_p3)  ;;  %v975_v32 = vpack.c.bf16 (!%p213_p3), %v754_v28, %v753_v27  ;;  %v755_v33 = vld [vmem:[%s1293_s2 + $0x160] sm:$0xff] (!%p213_p3)  ;;  %v736_v36 = vld [vmem:[%s1293_s2 + $0xd0] sm:$0xff] (!%p213_p3) }
   0xe   : > { %s1301_s15 = smov (!%p260_p4, %s1060_s15), 1  ;;  %962 = vmatpush3.bf16.msra.mxu1 %v959_v5  ;;  %v756_v34 = vld [vmem:[%s1293_s2 + $0x168] sm:$0xff]  ;;  %v939_v35 = vpack.c.bf16 %v735_v31, %v734_v30  ;;  %v737_v37 = vld [vmem:[%s1293_s2 + $0xd8] sm:$0xff]  ;;  %v757_v39 = vld [vmem:[%s1293_s2 + $0x170] sm:$0xff] }
   0xf   : > { %s761_s30 = sshll.u32 %s1301_s15, 4  ;;  %964 = vmatprep.subr.bf16.mxu1 %v963_v8  ;;  %v979_v38 = vpack.c.bf16 %v756_v34, %v755_v33  ;;  %v758_v40 = vld [vmem:[%s1293_s2 + $0x178] sm:$0xff]  ;;  %v943_v41 = vpack.c.bf16 %v737_v37, %v736_v36  ;;  %v738_v42 = vld [vmem:[%s1293_s2 + $0xe0] sm:$0xff]  ;;  %v739_v43 = vld [vmem:[%s1293_s2 + $0xe8] sm:$0xff]  ;;  %s763_s27 = sshll.u32 %s1301_s15, 5 }
  0x10   : > { %s1144_s11 = scalar_lea.vmem %s1291_s0, %s761_s30  ;;  %930 = vmatpush3.bf16.msra.mxu0 %v927_v17  ;;  %v983_v44 = vpack.c.bf16 %v758_v40, %v757_v39  ;;  %v415_v45 = vld [vmem:[%s1293_s2] sm:$0xff]  ;;  %v416_v46 = vld [vmem:[%s1293_s2 + $0x8] sm:$0xff]  ;;  %v947_v47 = vpack.c.bf16 %v739_v43, %v738_v42  ;;  %v740_v48 = vld [vmem:[%s1293_s2 + $0xf0] sm:$0xff]  ;;  %s294_s6 = scalar_lea.vmem %s1295_s4, %s763_s27 }
  0x11   : > { %v1153_v14 = vld [vmem:[%s1144_s11] sm:$0xff]  ;;  %932 = vmatprep.subr.bf16.mxu0 %v931_v23  ;;  %v741_v49 = vld [vmem:[%s1293_s2 + $0xf8] sm:$0xff]  ;;  %v297_v50 = vld [vmem:[%s1144_s11 + $0x8] sm:$0xff]  ;;  %v987_v52 = vpack.c.bf16 %v416_v46, %v415_v45 }
  0x12   : > { %885 = vmatprep.mubr.f32.mxu1 %v1153_v14  ;;  %850 = vmatprep.mubr.f32.mxu0 %v1153_v14  ;;  %v307_v51 = vrot.slane %v1153_v14, 1  ;;  %v308_v53 = vrot.slane %v297_v50, 1  ;;  %v417_v54 = vld [vmem:[%s1293_s2 + $0x10] sm:$0xff]  ;;  %v418_v55 = vld [vmem:[%s1293_s2 + $0x18] sm:$0xff]  ;;  %v951_v56 = vpack.c.bf16 %v741_v49, %v740_v48  ;;  %v419_v59 = vld [vmem:[%s1293_s2 + $0x20] sm:$0xff]  ;;  %v313_v14 = vrot.slane %v1070_v13, 1 }
  0x13   : > { %966 = vmatpush3.bf16.msra.mxu1 %v963_v8  ;;  %v991_v57 = vpack.c.bf16 %v418_v55, %v417_v54  ;;  %v420_v60 = vld [vmem:[%s1293_s2 + $0x28] sm:$0xff]  ;;  %v421_v62 = vld [vmem:[%s1293_s2 + $0x30] sm:$0xff]  ;;  %v422_v63 = vld [vmem:[%s1293_s2 + $0x38] sm:$0xff] }
  0x14   : > { %968 = vmatprep.subr.bf16.mxu1 %v967_v19  ;;  %934 = vmatpush3.bf16.msra.mxu0 %v931_v23  ;;  %v309_v58 = vsel %vm306_vm0, %v307_v51, %v308_v53  ;;  %v995_v61 = vpack.c.bf16 %v420_v60, %v419_v59  ;;  %v999_v0 = vpack.c.bf16 %v422_v63, %v421_v62  ;;  %v423_v1 = vld [vmem:[%s1293_s2 + $0x40] sm:$0xff]  ;;  %v424_v2 = vld [vmem:[%s1293_s2 + $0x48] sm:$0xff]  ;;  %v425_v4 = vld [vmem:[%s1293_s2 + $0x50] sm:$0xff] }
  0x15   : > { %936 = vmatprep.subr.bf16.mxu0 %v935_v29  ;;  %v1003_v3 = vpack.c.bf16 %v424_v2, %v423_v1  ;;  %v426_v5 = vld [vmem:[%s1293_s2 + $0x58] sm:$0xff]  ;;  %v427_v7 = vld [vmem:[%s1293_s2 + $0x60] sm:$0xff]  ;;  %v428_v8 = vld [vmem:[%s1293_s2 + $0x68] sm:$0xff]  ;;  %v315_v15 = vsel %vm306_vm0, %v308_v53, %v313_v14 }
  0x16   : > { %v1007_v6 = vpack.c.bf16 %v426_v5, %v425_v4  ;;  %v1011_v9 = vpack.c.bf16 %v428_v8, %v427_v7  ;;  %v429_v10 = vld [vmem:[%s1293_s2 + $0x70] sm:$0xff]  ;;  %v430_v11 = vld [vmem:[%s1293_s2 + $0x78] sm:$0xff]  ;;  %v742_v16 = vld [vmem:[%s1294_s3] ss:$0 sm:$0xff] }
  0x17   : > { %970 = vmatpush3.bf16.msra.mxu1 %v967_v19  ;;  %v1015_v12 = vpack.c.bf16 %v430_v11, %v429_v10 }
  0x18   : > { %972 = vmatprep.subr.bf16.mxu1 %v971_v26  ;;  %938 = vmatpush3.bf16.msra.mxu0 %v935_v29 }
  0x19   : > { %940 = vmatprep.subr.bf16.mxu0 %v939_v35 }
  0x1b   : > { %974 = vmatpush3.bf16.msra.mxu1 %v971_v26 }
  0x1c   : > { %976 = vmatprep.subr.bf16.mxu1 %v975_v32  ;;  %942 = vmatpush3.bf16.msra.mxu0 %v939_v35 }
  0x1d   : > { %944 = vmatprep.subr.bf16.mxu0 %v943_v41 }
  0x1f   : > { %978 = vmatpush3.bf16.msra.mxu1 %v975_v32 }
  0x20   : > { %980 = vmatprep.subr.bf16.mxu1 %v979_v38  ;;  %946 = vmatpush3.bf16.msra.mxu0 %v943_v41 }
  0x21   : > { %948 = vmatprep.subr.bf16.mxu0 %v947_v47 }
  0x23   : > { %982 = vmatpush3.bf16.msra.mxu1 %v979_v38 }
  0x24   : > { %984 = vmatprep.subr.bf16.mxu1 %v983_v44  ;;  %950 = vmatpush3.bf16.msra.mxu0 %v947_v47 }
  0x25   : > { %952 = vmatprep.subr.bf16.mxu0 %v951_v56 }
  0x27   : > { %986 = vmatpush3.bf16.msra.mxu1 %v983_v44 }
  0x28   : > { %988 = vmatprep.subr.bf16.mxu1 %v987_v52  ;;  %954 = vmatpush3.bf16.msra.mxu0 %v951_v56 }
  0x2a   : > { %886 = vmatmul.mubr.f32.vlgmr.msra.gmra.mrb[0].mxu1 %v297_v50 }
  0x2b   : > { %990 = vmatpush3.bf16.msra.mxu1 %v987_v52  ;;  %920 = vmatprep.mubr.f32.mxu1 %v309_v58 }
  0x2c   : > { %992 = vmatprep.subr.bf16.mxu1 %v991_v57  ;;  %851 = vmatmul.mubr.f32.vlgmr.msra.gmra.mrb[0].mxu0 %v297_v50 }
  0x2f   : > { %994 = vmatpush3.bf16.msra.mxu1 %v991_v57 }
  0x30   : > { %996 = vmatprep.subr.bf16.mxu1 %v995_v61 }
  0x33   : > { %998 = vmatpush3.bf16.msra.mxu1 %v995_v61 }
  0x34   : > { %1000 = vmatprep.subr.bf16.mxu1 %v999_v0 }
  0x37   : > { %1002 = vmatpush3.bf16.msra.mxu1 %v999_v0 }
  0x38   : > { %1004 = vmatprep.subr.bf16.mxu1 %v1003_v3 }
  0x3b   : > { %1006 = vmatpush3.bf16.msra.mxu1 %v1003_v3 }
  0x3c   : > { %1008 = vmatprep.subr.bf16.mxu1 %v1007_v6 }
  0x3f   : > { %1010 = vmatpush3.bf16.msra.mxu1 %v1007_v6 }
  0x40   : > { %1012 = vmatprep.subr.bf16.mxu1 %v1011_v9 }
  0x43   : > { %1014 = vmatpush3.bf16.msra.mxu1 %v1011_v9 }
  0x44   : > { %1016 = vmatprep.subr.bf16.mxu1 %v1015_v12 }
  0x47   : > { %1018 = vmatpush3.bf16.msra.mxu1 %v1015_v12 }
  0x4a   : > { %921 = vmatmul.mubr.f32.vlgmr.msra.gmra.mrb[0].mxu1 %v315_v15 }
  0xff   : > { %v852_v17 = vpop.f32.mrb[0].mxu0 }
 0x100   : > { %v412_v18 = vadd.f32 %v852_v17, %v742_v16  ;;  %v406_v19 = vpop.f32.mrb[1].mxu0 }
 0x101   : > { %v407_v20 = vadd.f32 %v742_v16, %v406_v19 }
 0x102   : > { %602 = vst [vmem:[%s294_s6 + $0x10] sm:$0xff] %v412_v18 }
 0x103   : > { %600 = vst [vmem:[%s294_s6] sm:$0xff] %v407_v20 }
 0x11d   : > { %v922_v21 = vpop.f32.mrb[0].mxu1 }
 0x11e   : > { %v599_v22 = vadd.f32 %v922_v21, %v742_v16  ;;  %v589_v23 = vpop.f32.mrb[1].mxu1 }
 0x11f   : > { %v598_v24 = vadd.f32 %v742_v16, %v589_v23 }
 0x120   : > { %603 = vst [vmem:[%s294_s6 + $0x18] sm:$0xff] %v599_v22 }
 0x121   : > { %601 = vst [vmem:[%s294_s6 + $0x8] sm:$0xff] %v598_v24 }
 0x122 PF: > { %s14_s17 = sadd.s32 1, %s1068_s17   ;;  %s1296_s15 = smov %s1064_s16 }
 0x123   : > { %p11_p5 = scmp.ge.s32.totalorder %s14_s17, 4   ;;  %s1297_s16 = smov %s1299_s1 }
 0x125   :  { %13 = sbr.rel (!%p11_p5) target bundleno = 2 (0x2), region = 71 }

// kernel: cnn_music_forward.21
= control target key start
LH: loop header
LB: loop body
LE: loop exit
PB: predicated region body
PF: predicated region fallthrough
CT: control target
= control target key end

     0   :  { %s1427_s18 = smov 0   ;;  %s1429_s19 = smov 0   ;;  %s1672_s0 = inlined_call_operand.vmem [shape: f32[2,16,64], index: 0, kind: input, shape index: {}]   ;;  %s1673_s1 = inlined_call_operand.vmem [shape: f32[2,16,64], index: 1, kind: input, shape index: {}]   ;;  %s1674_s2 = inlined_call_operand.vmem [shape: f32[3,64,128], index: 2, kind: input, shape index: {}]   ;;  %s1675_s3 = inlined_call_operand.vmem [shape: f32[3,64,128], index: 3, kind: input, shape index: {}]   ;;  %s1676_s4 = inlined_call_operand.vmem [shape: f32[1,128], index: 4, kind: input, shape index: {}]   ;;  %s1677_s5 = inlined_call_operand.vmem [shape: f32[2,16,128], index: 5, kind: output, shape index: {}]  }
   0x1   :  { %s1431_s20 = smov 0  }
   0x2 LB: > { %s27_s21 = sadd.s32 1, %s1390_s19  ;;  %p1010_p0 = scmp.ge.s32.totalorder %s1394_s20, 1  ;;  %s1394_s20 = sphi %s1431_s20, %s15_s20   ;;  %s1390_s19 = sphi %s1429_s19, %s1679_s19   ;;  %s1386_s18 = sphi %s1427_s18, %s1678_s18  }
   0x3   : > { %p29_p1 = scmp.ge.s32.totalorder %s27_s21, 2  ;;  %p225_p2 = scmp.lt.s32.totalorder %s1394_s20, 3 }
   0x5   : > { %s1681_s21 = smov (%p29_p1, %s27_s21), 0  ;;  %p226_p3 = pnand %p1010_p0, %p225_p2 }
   0x6   : > { %v1017_v0 = vld [vmem:[%s1674_s2 + $0x40] sm:$0xff] (!%p226_p3)  ;;  %v1018_v1 = vld [vmem:[%s1674_s2 + $0x48] sm:$0xff] (!%p226_p3)  ;;  %p271_p4 = scmp.lt.s32.totalorder (!%p226_p3), %s1386_s18, 1  ;;  %vm304_vm0 = vcmask (!%p226_p3), 517120   ;;  %v1019_v5 = vld [vmem:[%s1674_s2 + $0x50] sm:$0xff] (!%p226_p3)  ;;  %v1396_v7 = vmov (!%p226_p3), 0.0  }
   0x7   : > { %229 = sbr.rel (%p226_p3) target bundleno = 276 (0x114), region = 40  ;;  %v607_v2 = vld [vmem:[%s1675_s3] sm:$0xff] (!%p226_p3)  ;;  %v1241_v3 = vpack.c.bf16 (!%p226_p3), %v1018_v1, %v1017_v0  ;;  %v608_v4 = vld [vmem:[%s1675_s3 + $0x8] sm:$0xff] (!%p226_p3)  ;;  %v1020_v6 = vld [vmem:[%s1674_s2 + $0x58] sm:$0xff] (!%p226_p3)  ;;  %305 = vst.msk [vmem:[#allocation2] sm:$0x3] (!%p226_p3), %vm304_vm0, %v1396_v7 }
   0x8   : > { %306 = vst.msk [vmem:[#allocation3] sm:$0x3] (!%p226_p3), %vm304_vm0, %v1396_v7  ;;  %v1289_v8 = vpack.c.bf16 (!%p226_p3), %v608_v4, %v607_v2  ;;  %v1245_v9 = vpack.c.bf16 (!%p226_p3), %v1020_v6, %v1019_v5  ;;  %v609_v10 = vld [vmem:[%s1675_s3 + $0x10] sm:$0xff] (!%p226_p3)  ;;  %v610_v11 = vld [vmem:[%s1675_s3 + $0x18] sm:$0xff] (!%p226_p3)  ;;  %v1021_v12 = vld [vmem:[%s1674_s2 + $0x60] sm:$0xff] (!%p226_p3)  ;;  %vm312_vm1 = vcmask (!%p226_p3), 1041408  }
   0x9   : > { %1242 = vmatprep.subr.bf16.mxu1 (!%p226_p3), %v1241_v3  ;;  %v1293_v13 = vpack.c.bf16 (!%p226_p3), %v610_v11, %v609_v10  ;;  %v1022_v14 = vld [vmem:[%s1674_s2 + $0x68] sm:$0xff] (!%p226_p3)  ;;  %v611_v15 = vld [vmem:[%s1675_s3 + $0x20] sm:$0xff] (!%p226_p3)  ;;  %v1023_v18 = vld [vmem:[%s1674_s2 + $0x70] sm:$0xff] (!%p226_p3)  ;;  %vm887_vm2 = vcmask (!%p226_p3), 523270   ;;  %vm342_vm3 = vcmask (!%p226_p3), 523264   ;;  %vm336_vm4 = vcmask (!%p226_p3), 1046528  }
   0xa   : > { %v612_v16 = vld [vmem:[%s1675_s3 + $0x28] sm:$0xff] (!%p226_p3)  ;;  %1290 = vmatprep.subr.bf16.mxu0 (!%p226_p3), %v1289_v8  ;;  %1244 = vmatpush3.bf16.msra.mxu1 (!%p226_p3), %v1241_v3  ;;  %v1249_v17 = vpack.c.bf16 (!%p226_p3), %v1022_v14, %v1021_v12  ;;  %v1024_v19 = vld [vmem:[%s1674_s2 + $0x78] sm:$0xff] (!%p226_p3)  ;;  %v613_v24 = vld [vmem:[%s1675_s3 + $0x30] sm:$0xff] (!%p226_p3)  ;;  %vm510_vm5 = vcmask (!%p226_p3), 1045504  }
   0xb   : > { %1292 = vmatpush3.bf16.msra.mxu0 (!%p226_p3), %v1289_v8  ;;  %1246 = vmatprep.subr.bf16.mxu1 (!%p226_p3), %v1245_v9  ;;  %v1297_v20 = vpack.c.bf16 (!%p226_p3), %v612_v16, %v611_v15  ;;  %v614_v25 = vld [vmem:[%s1675_s3 + $0x38] sm:$0xff] (!%p226_p3)  ;;  %v1253_v29 = vpack.c.bf16 (!%p226_p3), %v1024_v19, %v1023_v18  ;;  %v318_v39 = vld [vmem:[%s1674_s2] sm:$0xff] (!%p226_p3)  ;;  %v319_v40 = vld [vmem:[%s1674_s2 + $0x8] sm:$0xff] (!%p226_p3) }
   0xc   : > { %1294 = vmatprep.subr.bf16.mxu0 (!%p226_p3), %v1293_v13  ;;  %v1301_v36 = vpack.c.bf16 (!%p226_p3), %v614_v25, %v613_v24  ;;  %v1041_v41 = vld [vmem:[%s1675_s3 + $0x40] sm:$0xff] (!%p226_p3)  ;;  %v1042_v42 = vld [vmem:[%s1675_s3 + $0x48] sm:$0xff] (!%p226_p3)  ;;  %v1257_v46 = vpack.c.bf16 (!%p226_p3), %v319_v40, %v318_v39  ;;  %v320_v48 = vld [vmem:[%s1674_s2 + $0x10] sm:$0xff] (!%p226_p3) }
   0xd   : > { %v1305_v47 = vpack.c.bf16 (!%p226_p3), %v1042_v42, %v1041_v41  ;;  %v321_v49 = vld [vmem:[%s1674_s2 + $0x18] sm:$0xff] (!%p226_p3)  ;;  %v1043_v51 = vld [vmem:[%s1675_s3 + $0x50] sm:$0xff] (!%p226_p3)  ;;  %v322_v58 = vld [vmem:[%s1674_s2 + $0x20] sm:$0xff] (!%p226_p3) }
   0xe   : > { %s1683_s18 = smov (!%p271_p4, %s1386_s18), 1  ;;  %1248 = vmatpush3.bf16.msra.mxu1 %v1245_v9  ;;  %v309_v30 = vld [vmem:[#allocation2] sm:$0x3]  ;;  %v1044_v52 = vld [vmem:[%s1675_s3 + $0x58] sm:$0xff]  ;;  %v1261_v56 = vpack.c.bf16 %v321_v49, %v320_v48  ;;  %v323_v59 = vld [vmem:[%s1674_s2 + $0x28] sm:$0xff] }
   0xf   : > { %s1482_s25 = sshll.u32 %s1683_s18, 4  ;;  %v599_v32 = vld [vmem:[#allocation3] sm:$0x3]  ;;  %1296 = vmatpush3.bf16.msra.mxu0 %v1293_v13  ;;  %1250 = vmatprep.subr.bf16.mxu1 %v1249_v17  ;;  %v1309_v57 = vpack.c.bf16 %v1044_v52, %v1043_v51  ;;  %v1046_v61 = vld [vmem:[%s1675_s3 + $0x68] sm:$0xff]  ;;  %v1265_v63 = vpack.c.bf16 %v323_v59, %v322_v58  ;;  %v324_v1 = vld [vmem:[%s1674_s2 + $0x30] sm:$0xff] }
  0x10   : > { %s278_s7 = scalar_lea.vmem %s1672_s0, %s1482_s25  ;;  %s288_s9 = scalar_lea.vmem %s1673_s1, %s1482_s25  ;;  %1298 = vmatprep.subr.bf16.mxu0 %v1297_v20  ;;  %v1045_v60 = vld [vmem:[%s1675_s3 + $0x60] sm:$0xff]  ;;  %v325_v2 = vld [vmem:[%s1674_s2 + $0x38] sm:$0xff]  ;;  %v1047_v3 = vld [vmem:[%s1675_s3 + $0x70] sm:$0xff] }
  0x11   : > { %v307_v21 = vld [vmem:[%s278_s7] sm:$0xff]  ;;  %v308_v22 = vld [vmem:[%s278_s7 + $0x8] sm:$0xff]  ;;  %v1313_v0 = vpack.c.bf16 %v1046_v61, %v1045_v60  ;;  %v1048_v4 = vld [vmem:[%s1675_s3 + $0x78] sm:$0xff]  ;;  %v1269_v5 = vpack.c.bf16 %v325_v2, %v324_v1  ;;  %s298_s23 = scalar_lea.vmem %s1677_s5, %s1482_s25 }
  0x12   : > { %v597_v23 = vld [vmem:[%s288_s9] sm:$0xff]  ;;  %v313_v26 = vrot.slane %v307_v21, 6  ;;  %v1504_v27 = vrot.slane %v308_v22, 6  ;;  %v598_v31 = vld [vmem:[%s288_s9 + $0x8] sm:$0xff]  ;;  %889 = vst.msk [vmem:[#allocation2 - $0x6] sm:$0xc0] %vm887_vm2, %v308_v22  ;;  %1252 = vmatpush3.bf16.msra.mxu1 %v1249_v17  ;;  %v1317_v6 = vpack.c.bf16 %v1048_v4, %v1047_v3 }
  0x13   : > { %v602_v28 = vrot.slane %v597_v23, 6  ;;  %888 = vst.msk [vmem:[#allocation3 - $0x6] sm:$0xc0] %vm887_vm2, %v598_v31  ;;  %v1534_v43 = vrot.slane %v598_v31, 6  ;;  %1300 = vmatpush3.bf16.msra.mxu0 %v1297_v20  ;;  %1254 = vmatprep.subr.bf16.mxu1 %v1253_v29  ;;  %v1029_v7 = vld [vmem:[%s1674_s2 + $0x80] sm:$0xff]  ;;  %v1030_v8 = vld [vmem:[%s1674_s2 + $0x88] sm:$0xff] }
  0x14   : > { %v1508_v33 = vsel %vm312_vm1, %v313_v26, %v1504_v27  ;;  %v1511_v34 = vsel %vm312_vm1, %v309_v30, %v313_v26  ;;  %v340_v45 = vrot.slane %v1504_v27, 1  ;;  %1302 = vmatprep.subr.bf16.mxu0 %v1301_v36  ;;  %v1051_v9 = vld [vmem:[%s1675_s3 + $0x80] sm:$0xff]  ;;  %v1052_v10 = vld [vmem:[%s1675_s3 + $0x88] sm:$0xff]  ;;  %v1273_v11 = vpack.c.bf16 %v1030_v8, %v1029_v7  ;;  %v1031_v14 = vld [vmem:[%s1674_s2 + $0x90] sm:$0xff] }
  0x15   : > { %v1514_v35 = vsel %vm312_vm1, %v599_v32, %v602_v28  ;;  %v337_v37 = vrot.slane %v1511_v34, 1  ;;  %v338_v38 = vrot.slane %v1508_v33, 1  ;;  %v1547_v50 = vsel %vm312_vm1, %v602_v28, %v1534_v43  ;;  %v1032_v15 = vld [vmem:[%s1674_s2 + $0x98] sm:$0xff]  ;;  %v1053_v16 = vld [vmem:[%s1675_s3 + $0x90] sm:$0xff]  ;;  %v1033_v25 = vld [vmem:[%s1674_s2 + $0xa0] sm:$0xff] }
  0x16   : > { %1200 = vmatprep.mubr.msk.f32.mxu0 %vm342_vm3, %v1514_v35  ;;  %1256 = vmatpush3.bf16.msra.mxu1 %v1253_v29  ;;  %v706_v53 = vrot.slane %v1514_v35, 1  ;;  %v707_v55 = vrot.slane %v1547_v50, 1  ;;  %v709_v12 = vrot.slane %v1534_v43, 1  ;;  %v1321_v13 = vpack.c.bf16 %v1052_v10, %v1051_v9  ;;  %v1054_v17 = vld [vmem:[%s1675_s3 + $0x98] sm:$0xff]  ;;  %v1034_v26 = vld [vmem:[%s1674_s2 + $0xa8] sm:$0xff]  ;;  %v1055_v28 = vld [vmem:[%s1675_s3 + $0xa0] sm:$0xff] }
  0x17   : > { %v339_v44 = vsel %vm336_vm4, %v337_v37, %v338_v38  ;;  %v341_v54 = vsel %vm336_vm4, %v338_v38, %v340_v45  ;;  %1304 = vmatpush3.bf16.msra.mxu0 %v1301_v36  ;;  %1258 = vmatprep.subr.bf16.mxu1 %v1257_v46  ;;  %v511_v18 = vrot.slane %v1511_v34, 2  ;;  %v512_v19 = vrot.slane %v1508_v33, 2  ;;  %v1056_v29 = vld [vmem:[%s1675_s3 + $0xa8] sm:$0xff]  ;;  %v1057_v36 = vld [vmem:[%s1675_s3 + $0xb0] sm:$0xff]  ;;  %v1058_v37 = vld [vmem:[%s1675_s3 + $0xb8] sm:$0xff] }
  0x18   : > { %1143 = vmatprep.mubr.msk.f32.mxu1 %vm342_vm3, %v339_v44  ;;  %1306 = vmatprep.subr.bf16.mxu0 %v1305_v47  ;;  %v708_v62 = vsel %vm336_vm4, %v706_v53, %v707_v55  ;;  %v801_v20 = vrot.slane %v1514_v35, 2  ;;  %v802_v21 = vrot.slane %v1547_v50, 2  ;;  %v710_v22 = vsel %vm336_vm4, %v707_v55, %v709_v12  ;;  %v1036_v35 = vld [vmem:[%s1674_s2 + $0xb8] sm:$0xff] }
  0x19   : > { %1144 = vmatmul.mubr.msk.f32.vlgmr.msra.gmra.mrb[0].mxu1 %vm342_vm3, %v341_v54  ;;  %v1277_v23 = vpack.c.bf16 %v1032_v15, %v1031_v14  ;;  %v1325_v24 = vpack.c.bf16 %v1054_v17, %v1053_v16  ;;  %v513_v30 = vsel %vm510_vm5, %v511_v18, %v512_v19  ;;  %v1281_v32 = vpack.c.bf16 %v1034_v26, %v1033_v25 }
  0x1a   : > { %1260 = vmatpush3.bf16.msra.mxu1 %v1257_v46  ;;  %1201 = vmatmul.mubr.msk.f32.vlgmr.msra.gmra.mrb[0].mxu0 %vm342_vm3, %v1547_v50  ;;  %v803_v31 = vsel %vm510_vm5, %v801_v20, %v802_v21  ;;  %v1333_v39 = vpack.c.bf16 %v1058_v37, %v1057_v36  ;;  %v514_v40 = vrot.slane %v1504_v27, 2  ;;  %v804_v41 = vrot.slane %v1534_v43, 2  ;;  %v1061_v27 = vld [vmem:[%s1676_s4] ss:$0 sm:$0xff] }
  0x1b   : > { %1308 = vmatpush3.bf16.msra.mxu0 %v1305_v47  ;;  %1262 = vmatprep.subr.bf16.mxu1 %v1261_v56 }
  0x1c   : > { %1310 = vmatprep.subr.bf16.mxu0 %v1309_v57  ;;  %1162 = vmatprep.mubr.msk.f32.mxu1 %vm342_vm3, %v1511_v34  ;;  %v1035_v34 = vld [vmem:[%s1674_s2 + $0xb0] sm:$0xff]  ;;  %v515_v42 = vsel %vm510_vm5, %v512_v19, %v514_v40  ;;  %v805_v44 = vsel %vm510_vm5, %v802_v21, %v804_v41 }
  0x1d   : > { %1219 = vmatprep.mubr.msk.f32.mxu0 %vm342_vm3, %v708_v62  ;;  %v1285_v38 = vpack.c.bf16 %v1036_v35, %v1035_v34 }
  0x1e   : > { %1264 = vmatpush3.bf16.msra.mxu1 %v1261_v56 }
  0x1f   : > { %1312 = vmatpush3.bf16.msra.mxu0 %v1309_v57  ;;  %1266 = vmatprep.subr.bf16.mxu1 %v1265_v63 }
  0x20   : > { %1314 = vmatprep.subr.bf16.mxu0 %v1313_v0 }
  0x22   : > { %1268 = vmatpush3.bf16.msra.mxu1 %v1265_v63 }
  0x23   : > { %1316 = vmatpush3.bf16.msra.mxu0 %v1313_v0  ;;  %1270 = vmatprep.subr.bf16.mxu1 %v1269_v5 }
  0x24   : > { %1318 = vmatprep.subr.bf16.mxu0 %v1317_v6 }
  0x26   : > { %1272 = vmatpush3.bf16.msra.mxu1 %v1269_v5 }
  0x27   : > { %1320 = vmatpush3.bf16.msra.mxu0 %v1317_v6  ;;  %1274 = vmatprep.subr.bf16.mxu1 %v1273_v11 }
  0x28   : > { %1322 = vmatprep.subr.bf16.mxu0 %v1321_v13 }
  0x29   : > { %1163 = vmatmul.mubr.msk.f32.vlgmr.msra.gmra.mrb[0].mxu1 %vm342_vm3, %v1508_v33  ;;  %v1329_v33 = vpack.c.bf16 %v1056_v29, %v1055_v28 }
  0x2a   : > { %1276 = vmatpush3.bf16.msra.mxu1 %v1273_v11  ;;  %1220 = vmatmul.mubr.msk.f32.vlgmr.msra.gmra.mrb[0].mxu0 %vm342_vm3, %v710_v22 }
  0x2b   : > { %1324 = vmatpush3.bf16.msra.mxu0 %v1321_v13  ;;  %1278 = vmatprep.subr.bf16.mxu1 %v1277_v23 }
  0x2c   : > { %1326 = vmatprep.subr.bf16.mxu0 %v1325_v24  ;;  %1181 = vmatprep.mubr.msk.f32.mxu1 %vm342_vm3, %v513_v30 }
  0x2d   : > { %1238 = vmatprep.mubr.msk.f32.mxu0 %vm342_vm3, %v803_v31 }
  0x2e   : > { %1280 = vmatpush3.bf16.msra.mxu1 %v1277_v23 }
  0x2f   : > { %1328 = vmatpush3.bf16.msra.mxu0 %v1325_v24  ;;  %1282 = vmatprep.subr.bf16.mxu1 %v1281_v32 }
  0x30   : > { %1330 = vmatprep.subr.bf16.mxu0 %v1329_v33 }
  0x32   : > { %1284 = vmatpush3.bf16.msra.mxu1 %v1281_v32 }
  0x33   : > { %1332 = vmatpush3.bf16.msra.mxu0 %v1329_v33  ;;  %1286 = vmatprep.subr.bf16.mxu1 %v1285_v38 }
  0x34   : > { %1334 = vmatprep.subr.bf16.mxu0 %v1333_v39 }
  0x36   : > { %1288 = vmatpush3.bf16.msra.mxu1 %v1285_v38 }
  0x37   : > { %1336 = vmatpush3.bf16.msra.mxu0 %v1333_v39 }
  0x39   : > { %1182 = vmatmul.mubr.msk.f32.vlgmr.msra.gmra.mrb[0].mxu1 %vm342_vm3, %v515_v42 }
  0x3a   : > { %1239 = vmatmul.mubr.msk.f32.vlgmr.msra.gmra.mrb[0].mxu0 %vm342_vm3, %v805_v44 }
 0x10c   : > { %v1183_v45 = vpop.f32.mrb[0].mxu1 }
 0x10d   : > { %v1240_v46 = vpop.f32.mrb[0].mxu0  ;;  %v586_v47 = vpop.f32.mrb[1].mxu1 }
 0x10e   : > { %v1337_v48 = vadd.f32 %v1240_v46, %v1183_v45  ;;  %v876_v43 = vpop.f32.mrb[1].mxu0 }
 0x10f   : > { %v1338_v49 = vadd.f32 %v876_v43, %v586_v47 }
 0x110   : > { %v898_v50 = vadd.f32 %v1337_v48, %v1061_v27 }
 0x111   : > { %v897_v51 = vadd.f32 %v1338_v49, %v1061_v27 }
 0x112   : > { %900 = vst [vmem:[%s298_s23 + $0x8] sm:$0xff] %v898_v50 }
 0x113   : > { %899 = vst [vmem:[%s298_s23] sm:$0xff] %v897_v51 }
 0x114 PF: > { %s15_s20 = sadd.s32 1, %s1394_s20   ;;  %s1678_s18 = smov %s1390_s19 }
 0x115   : > { %p12_p5 = scmp.ge.s32.totalorder %s15_s20, 4   ;;  %s1679_s19 = smov %s1681_s21 }
 0x117   :  { %14 = sbr.rel (!%p12_p5) target bundleno = 2 (0x2), region = 81 }

// kernel: cnn_music_forward.24
= control target key start
LH: loop header
LB: loop body
LE: loop exit
PB: predicated region body
PF: predicated region fallthrough
CT: control target
= control target key end

     0   :  { %s1175_s15 = smov 0   ;;  %s1177_s16 = smov 0   ;;  %s1389_s0 = inlined_call_operand.vmem [shape: f32[2,32,128], index: 0, kind: input, shape index: {}, may-alias: {0,1}]   ;;  %s1390_s1 = inlined_call_operand.vmem [shape: f32[2,32,128], index: 1, kind: input, shape index: {}, may-alias: {0,1}]   ;;  %s1391_s2 = inlined_call_operand.vmem [shape: f32[3,128,128], index: 2, kind: input, shape index: {}]   ;;  %s1392_s3 = inlined_call_operand.vmem [shape: f32[1,128], index: 3, kind: input, shape index: {}]   ;;  %s1393_s4 = inlined_call_operand.vmem [shape: f32[2,32,256], index: 4, kind: output, shape index: {}]  }
   0x1   :  { %s1179_s17 = smov 0  }
   0x2 LB: > { %s26_s1 = sadd.s32 1, %s1143_s16  ;;  %p765_p0 = scmp.ge.s32.totalorder %s1147_s17, 1  ;;  %s1147_s17 = sphi %s1179_s17, %s14_s17   ;;  %s1143_s16 = sphi %s1177_s16, %s1395_s16   ;;  %s1139_s15 = sphi %s1175_s15, %s1394_s15  }
   0x3   : > { %p28_p1 = scmp.ge.s32.totalorder %s26_s1, 2  ;;  %p212_p2 = scmp.lt.s32.totalorder %s1147_s17, 3 }
   0x5   : > { %s1397_s1 = smov (%p28_p1, %s26_s1), 0  ;;  %p213_p3 = pnand %p765_p0, %p212_p2 }
   0x6   : > { %v772_v0 = vld [vmem:[%s1391_s2 + $0x80] sm:$0xff] (!%p213_p3)  ;;  %v773_v1 = vld [vmem:[%s1391_s2 + $0x88] sm:$0xff] (!%p213_p3)  ;;  %p260_p4 = scmp.lt.s32.totalorder (!%p213_p3), %s1139_s15, 1  ;;  %v774_v5 = vld [vmem:[%s1391_s2 + $0x90] sm:$0xff] (!%p213_p3)  ;;  %vm310_vm0 = vcmask (!%p213_p3), 1046528  }
   0x7   : > { %216 = sbr.rel (%p213_p3) target bundleno = 292 (0x124), region = 36  ;;  %v789_v2 = vld [vmem:[%s1391_s2 + $0x100] sm:$0xff] (!%p213_p3)  ;;  %v984_v3 = vpack.c.bf16 (!%p213_p3), %v773_v1, %v772_v0  ;;  %v790_v4 = vld [vmem:[%s1391_s2 + $0x108] sm:$0xff] (!%p213_p3)  ;;  %v775_v6 = vld [vmem:[%s1391_s2 + $0x98] sm:$0xff] (!%p213_p3) }
   0x8   : > { %v1016_v7 = vpack.c.bf16 (!%p213_p3), %v790_v4, %v789_v2  ;;  %v988_v8 = vpack.c.bf16 (!%p213_p3), %v775_v6, %v774_v5  ;;  %v791_v9 = vld [vmem:[%s1391_s2 + $0x110] sm:$0xff] (!%p213_p3)  ;;  %v792_v10 = vld [vmem:[%s1391_s2 + $0x118] sm:$0xff] (!%p213_p3)  ;;  %v776_v11 = vld [vmem:[%s1391_s2 + $0xa0] sm:$0xff] (!%p213_p3) }
   0x9   : > { %985 = vmatprep.subr.bf16.mxu0 (!%p213_p3), %v984_v3  ;;  %v1020_v12 = vpack.c.bf16 (!%p213_p3), %v792_v10, %v791_v9  ;;  %v777_v13 = vld [vmem:[%s1391_s2 + $0xa8] sm:$0xff] (!%p213_p3)  ;;  %v793_v14 = vld [vmem:[%s1391_s2 + $0x120] sm:$0xff] (!%p213_p3)  ;;  %v778_v18 = vld [vmem:[%s1391_s2 + $0xb0] sm:$0xff] (!%p213_p3) }
   0xa   : > { %v794_v15 = vld [vmem:[%s1391_s2 + $0x128] sm:$0xff] (!%p213_p3)  ;;  %1017 = vmatprep.subr.bf16.mxu1 (!%p213_p3), %v1016_v7  ;;  %987 = vmatpush3.bf16.msra.mxu0 (!%p213_p3), %v984_v3  ;;  %v992_v16 = vpack.c.bf16 (!%p213_p3), %v777_v13, %v776_v11  ;;  %v779_v19 = vld [vmem:[%s1391_s2 + $0xb8] sm:$0xff] (!%p213_p3)  ;;  %v795_v20 = vld [vmem:[%s1391_s2 + $0x130] sm:$0xff] (!%p213_p3) }
   0xb   : > { %1019 = vmatpush3.bf16.msra.mxu1 (!%p213_p3), %v1016_v7  ;;  %989 = vmatprep.subr.bf16.mxu0 (!%p213_p3), %v988_v8  ;;  %v1024_v17 = vpack.c.bf16 (!%p213_p3), %v794_v15, %v793_v14  ;;  %v796_v21 = vld [vmem:[%s1391_s2 + $0x138] sm:$0xff] (!%p213_p3)  ;;  %v996_v22 = vpack.c.bf16 (!%p213_p3), %v779_v19, %v778_v18  ;;  %v780_v24 = vld [vmem:[%s1391_s2 + $0xc0] sm:$0xff] (!%p213_p3)  ;;  %v781_v25 = vld [vmem:[%s1391_s2 + $0xc8] sm:$0xff] (!%p213_p3)  ;;  %v1149_v18 = vmov (!%p213_p3), 0.0  }
   0xc   : > { %1021 = vmatprep.subr.bf16.mxu1 (!%p213_p3), %v1020_v12  ;;  %v1028_v23 = vpack.c.bf16 (!%p213_p3), %v796_v21, %v795_v20  ;;  %v797_v27 = vld [vmem:[%s1391_s2 + $0x140] sm:$0xff] (!%p213_p3)  ;;  %v798_v28 = vld [vmem:[%s1391_s2 + $0x148] sm:$0xff] (!%p213_p3)  ;;  %v1000_v29 = vpack.c.bf16 (!%p213_p3), %v781_v25, %v780_v24  ;;  %v782_v31 = vld [vmem:[%s1391_s2 + $0xd0] sm:$0xff] (!%p213_p3)  ;;  %v323_v19 = vrot.slane (!%p213_p3), %v1149_v18, 1 }
   0xd   : > { %v1032_v30 = vpack.c.bf16 (!%p213_p3), %v798_v28, %v797_v27  ;;  %v783_v32 = vld [vmem:[%s1391_s2 + $0xd8] sm:$0xff] (!%p213_p3)  ;;  %v799_v33 = vld [vmem:[%s1391_s2 + $0x150] sm:$0xff] (!%p213_p3)  ;;  %v784_v37 = vld [vmem:[%s1391_s2 + $0xe0] sm:$0xff] (!%p213_p3) }
   0xe   : > { %s1399_s15 = smov (!%p260_p4, %s1139_s15), 1  ;;  %991 = vmatpush3.bf16.msra.mxu0 %v988_v8  ;;  %v800_v34 = vld [vmem:[%s1391_s2 + $0x158] sm:$0xff]  ;;  %v1004_v35 = vpack.c.bf16 %v783_v32, %v782_v31  ;;  %v785_v38 = vld [vmem:[%s1391_s2 + $0xe8] sm:$0xff]  ;;  %v801_v39 = vld [vmem:[%s1391_s2 + $0x160] sm:$0xff] }
   0xf   : > { %s807_s19 = sshll.u32 %s1399_s15, 5  ;;  %1023 = vmatpush3.bf16.msra.mxu1 %v1020_v12  ;;  %993 = vmatprep.subr.bf16.mxu0 %v992_v16  ;;  %v1036_v36 = vpack.c.bf16 %v800_v34, %v799_v33  ;;  %v802_v40 = vld [vmem:[%s1391_s2 + $0x168] sm:$0xff]  ;;  %v1008_v41 = vpack.c.bf16 %v785_v38, %v784_v37  ;;  %v786_v43 = vld [vmem:[%s1391_s2 + $0xf0] sm:$0xff]  ;;  %v787_v44 = vld [vmem:[%s1391_s2 + $0xf8] sm:$0xff]  ;;  %s809_s27 = sshll.u32 %s1399_s15, 6 }
  0x10   : > { %s1247_s30 = scalar_lea.vmem %s1389_s0, %s807_s19  ;;  %1025 = vmatprep.subr.bf16.mxu1 %v1024_v17  ;;  %v1040_v42 = vpack.c.bf16 %v802_v40, %v801_v39  ;;  %v803_v45 = vld [vmem:[%s1391_s2 + $0x170] sm:$0xff]  ;;  %v804_v46 = vld [vmem:[%s1391_s2 + $0x178] sm:$0xff]  ;;  %v1012_v47 = vpack.c.bf16 %v787_v44, %v786_v43  ;;  %v435_v49 = vld [vmem:[%s1391_s2] sm:$0xff] }
  0x11   : > { %v1256_v26 = vld [vmem:[%s1247_s30] sm:$0xff]  ;;  %v1044_v48 = vpack.c.bf16 %v804_v46, %v803_v45  ;;  %v436_v50 = vld [vmem:[%s1391_s2 + $0x8] sm:$0xff]  ;;  %v437_v52 = vld [vmem:[%s1391_s2 + $0x10] sm:$0xff] }
  0x12   : > { %902 = vmatprep.mubr.f32.mxu0 %v1256_v26  ;;  %940 = vmatprep.mubr.f32.mxu1 %v1256_v26  ;;  %v1048_v51 = vpack.c.bf16 %v436_v50, %v435_v49  ;;  %v438_v53 = vld [vmem:[%s1391_s2 + $0x18] sm:$0xff]  ;;  %v1315_v54 = vld [vmem:[%s1247_s30 + $0x8] sm:$0xff]  ;;  %v439_v56 = vld [vmem:[%s1391_s2 + $0x20] sm:$0xff]  ;;  %v311_v60 = vrot.slane %v1256_v26, 1 }
  0x13   : > { %995 = vmatpush3.bf16.msra.mxu0 %v992_v16  ;;  %1027 = vmatpush3.bf16.msra.mxu1 %v1024_v17  ;;  %v1052_v55 = vpack.c.bf16 %v438_v53, %v437_v52  ;;  %v440_v57 = vld [vmem:[%s1391_s2 + $0x28] sm:$0xff]  ;;  %v1325_v58 = vld [vmem:[%s1247_s30 + $0x10] sm:$0xff]  ;;  %v1328_v59 = vld [vmem:[%s1247_s30 + $0x18] sm:$0xff]  ;;  %v312_v61 = vrot.slane %v1315_v54, 1  ;;  %s294_s30 = scalar_lea.vmem %s1393_s4, %s809_s27 }
  0x14   : > { %997 = vmatprep.subr.bf16.mxu0 %v996_v22  ;;  %1029 = vmatprep.subr.bf16.mxu1 %v1028_v23  ;;  %v314_v62 = vrot.slane %v1325_v58, 1  ;;  %v316_v63 = vrot.slane %v1328_v59, 1  ;;  %v1056_v0 = vpack.c.bf16 %v440_v57, %v439_v56  ;;  %v441_v1 = vld [vmem:[%s1391_s2 + $0x30] sm:$0xff]  ;;  %v442_v2 = vld [vmem:[%s1391_s2 + $0x38] sm:$0xff]  ;;  %v443_v6 = vld [vmem:[%s1391_s2 + $0x40] sm:$0xff] }
  0x15   : > { %v313_v3 = vsel %vm310_vm0, %v311_v60, %v312_v61  ;;  %v1060_v5 = vpack.c.bf16 %v442_v2, %v441_v1  ;;  %v444_v7 = vld [vmem:[%s1391_s2 + $0x48] sm:$0xff]  ;;  %v445_v9 = vld [vmem:[%s1391_s2 + $0x50] sm:$0xff]  ;;  %v446_v10 = vld [vmem:[%s1391_s2 + $0x58] sm:$0xff] }
  0x16   : > { %v317_v4 = vsel %vm310_vm0, %v314_v62, %v316_v63  ;;  %v1064_v8 = vpack.c.bf16 %v444_v7, %v443_v6  ;;  %v1068_v11 = vpack.c.bf16 %v446_v10, %v445_v9  ;;  %v447_v12 = vld [vmem:[%s1391_s2 + $0x60] sm:$0xff]  ;;  %v448_v13 = vld [vmem:[%s1391_s2 + $0x68] sm:$0xff]  ;;  %v449_v15 = vld [vmem:[%s1391_s2 + $0x70] sm:$0xff]  ;;  %v315_v20 = vsel %vm310_vm0, %v312_v61, %v314_v62 }
  0x17   : > { %999 = vmatpush3.bf16.msra.mxu0 %v996_v22  ;;  %1031 = vmatpush3.bf16.msra.mxu1 %v1028_v23  ;;  %v1072_v14 = vpack.c.bf16 %v448_v13, %v447_v12  ;;  %v450_v16 = vld [vmem:[%s1391_s2 + $0x78] sm:$0xff]  ;;  %v325_v21 = vsel %vm310_vm0, %v316_v63, %v323_v19  ;;  %v788_v22 = vld [vmem:[%s1392_s3] ss:$0 sm:$0xff] }
  0x18   : > { %1001 = vmatprep.subr.bf16.mxu0 %v1000_v29  ;;  %1033 = vmatprep.subr.bf16.mxu1 %v1032_v30  ;;  %v1076_v17 = vpack.c.bf16 %v450_v16, %v449_v15 }
  0x1b   : > { %1003 = vmatpush3.bf16.msra.mxu0 %v1000_v29  ;;  %1035 = vmatpush3.bf16.msra.mxu1 %v1032_v30 }
  0x1c   : > { %1005 = vmatprep.subr.bf16.mxu0 %v1004_v35  ;;  %1037 = vmatprep.subr.bf16.mxu1 %v1036_v36 }
  0x1f   : > { %1007 = vmatpush3.bf16.msra.mxu0 %v1004_v35  ;;  %1039 = vmatpush3.bf16.msra.mxu1 %v1036_v36 }
  0x20   : > { %1009 = vmatprep.subr.bf16.mxu0 %v1008_v41  ;;  %1041 = vmatprep.subr.bf16.mxu1 %v1040_v42 }
  0x23   : > { %1011 = vmatpush3.bf16.msra.mxu0 %v1008_v41  ;;  %1043 = vmatpush3.bf16.msra.mxu1 %v1040_v42 }
  0x24   : > { %1013 = vmatprep.subr.bf16.mxu0 %v1012_v47  ;;  %1045 = vmatprep.subr.bf16.mxu1 %v1044_v48 }
  0x27   : > { %1015 = vmatpush3.bf16.msra.mxu0 %v1012_v47  ;;  %1047 = vmatpush3.bf16.msra.mxu1 %v1044_v48 }
  0x28   : > { %1049 = vmatprep.subr.bf16.mxu0 %v1048_v51  ;;  %1080 = vmatprep.subr.bf16.mxu1 %v1048_v51 }
  0x2a   : > { %903 = vmatmul.mubr.f32.vlgmr.msra.gmra.mrb[0].mxu0 %v1315_v54  ;;  %941 = vmatmul.mubr.f32.vlgmr.msra.gmra.mrb[0].mxu1 %v1315_v54 }
  0x2b   : > { %1051 = vmatpush3.bf16.msra.mxu0 %v1048_v51  ;;  %1088 = vmatpush3.bf16.msra.mxu1 %v1048_v51 }
  0x2c   : > { %1053 = vmatprep.subr.bf16.mxu0 %v1052_v55  ;;  %1081 = vmatprep.subr.bf16.mxu1 %v1052_v55 }
  0x2d   : > { %943 = vmatprep.mubr.f32.mxu1 %v1325_v58  ;;  %905 = vmatprep.mubr.f32.mxu0 %v1325_v58 }
  0x2e   : > { %944 = vmatmul.mubr.f32.gmra.mrb[2].mxu1 %v1328_v59  ;;  %906 = vmatmul.mubr.f32.gmra.mrb[2].mxu0 %v1328_v59 }
  0x2f   : > { %1055 = vmatpush3.bf16.msra.mxu0 %v1052_v55  ;;  %1089 = vmatpush3.bf16.msra.mxu1 %v1052_v55 }
  0x30   : > { %1057 = vmatprep.subr.bf16.mxu0 %v1056_v0  ;;  %1082 = vmatprep.subr.bf16.mxu1 %v1056_v0 }
  0x31   : > { %978 = vmatprep.mubr.f32.mxu0 %v313_v3  ;;  %981 = vmatprep.mubr.f32.mxu1 %v317_v4 }
  0x33   : > { %1059 = vmatpush3.bf16.msra.mxu0 %v1056_v0  ;;  %1090 = vmatpush3.bf16.msra.mxu1 %v1056_v0 }
  0x34   : > { %1061 = vmatprep.subr.bf16.mxu0 %v1060_v5  ;;  %1083 = vmatprep.subr.bf16.mxu1 %v1060_v5 }
  0x37   : > { %1063 = vmatpush3.bf16.msra.mxu0 %v1060_v5  ;;  %1091 = vmatpush3.bf16.msra.mxu1 %v1060_v5 }
  0x38   : > { %1065 = vmatprep.subr.bf16.mxu0 %v1064_v8  ;;  %1084 = vmatprep.subr.bf16.mxu1 %v1064_v8 }
  0x3b   : > { %1067 = vmatpush3.bf16.msra.mxu0 %v1064_v8  ;;  %1092 = vmatpush3.bf16.msra.mxu1 %v1064_v8 }
  0x3c   : > { %1069 = vmatprep.subr.bf16.mxu0 %v1068_v11  ;;  %1085 = vmatprep.subr.bf16.mxu1 %v1068_v11 }
  0x3f   : > { %1071 = vmatpush3.bf16.msra.mxu0 %v1068_v11  ;;  %1093 = vmatpush3.bf16.msra.mxu1 %v1068_v11 }
  0x40   : > { %1073 = vmatprep.subr.bf16.mxu0 %v1072_v14  ;;  %1086 = vmatprep.subr.bf16.mxu1 %v1072_v14 }
  0x43   : > { %1075 = vmatpush3.bf16.msra.mxu0 %v1072_v14  ;;  %1094 = vmatpush3.bf16.msra.mxu1 %v1072_v14 }
  0x44   : > { %1077 = vmatprep.subr.bf16.mxu0 %v1076_v17  ;;  %1087 = vmatprep.subr.bf16.mxu1 %v1076_v17 }
  0x47   : > { %1079 = vmatpush3.bf16.msra.mxu0 %v1076_v17  ;;  %1095 = vmatpush3.bf16.msra.mxu1 %v1076_v17 }
  0x4a   : > { %979 = vmatmul.mubr.f32.vlgmr.msra.gmra.mrb[4].mxu0 %v315_v20  ;;  %982 = vmatmul.mubr.f32.vlgmr.msra.gmra.mrb[2].mxu1 %v325_v21 }
  0xfd   : > { %v904_v23 = vpop.f32.mrb[0].mxu0  ;;  %v942_v26 = vpop.f32.mrb[0].mxu1 }
  0xfe   : > { %v422_v24 = vadd.f32 %v904_v23, %v788_v22  ;;  %v416_v25 = vpop.f32.mrb[1].mxu0  ;;  %v534_v28 = vpop.f32.mrb[1].mxu1 }
  0xff   : > { %v417_v27 = vadd.f32 %v788_v22, %v416_v25 }
 0x100   : > { %644 = vst [vmem:[%s294_s30 + $0x10] sm:$0xff] %v422_v24 }
 0x101   : > { %642 = vst [vmem:[%s294_s30] sm:$0xff] %v417_v27  ;;  %v907_v29 = vpop.f32.mrb[2].mxu0 }
 0x102   : > { %v432_v30 = vadd.f32 %v907_v29, %v788_v22  ;;  %v426_v31 = vpop.f32.mrb[3].mxu0 }
 0x103   : > { %v427_v32 = vadd.f32 %v788_v22, %v426_v31 }
 0x104   : > { %648 = vst [vmem:[%s294_s30 + $0x30] sm:$0xff] %v432_v30 }
 0x105   : > { %646 = vst [vmem:[%s294_s30 + $0x20] sm:$0xff] %v427_v32 }
 0x11d   : > { %v980_v33 = vpop.f32.mrb[4].mxu0  ;;  %v983_v35 = vpop.f32.mrb[2].mxu1 }
 0x11e   : > { %v625_v34 = vadd.f32 %v980_v33, %v942_v26  ;;  %v619_v36 = vpop.f32.mrb[5].mxu0  ;;  %v641_v37 = vadd.f32 %v983_v35, %v788_v22  ;;  %v629_v39 = vpop.f32.mrb[3].mxu1 }
 0x11f   : > { %v620_v38 = vadd.f32 %v619_v36, %v534_v28  ;;  %v640_v41 = vadd.f32 %v788_v22, %v629_v39 }
 0x120   : > { %v639_v40 = vadd.f32 %v788_v22, %v625_v34  ;;  %649 = vst [vmem:[%s294_s30 + $0x38] sm:$0xff] %v641_v37 }
 0x121   : > { %v638_v42 = vadd.f32 %v788_v22, %v620_v38  ;;  %647 = vst [vmem:[%s294_s30 + $0x28] sm:$0xff] %v640_v41 }
 0x122   : > { %645 = vst [vmem:[%s294_s30 + $0x18] sm:$0xff] %v639_v40 }
 0x123   : > { %643 = vst [vmem:[%s294_s30 + $0x8] sm:$0xff] %v638_v42 }
 0x124 PF: > { %s14_s17 = sadd.s32 1, %s1147_s17   ;;  %s1394_s15 = smov %s1143_s16 }
 0x125   : > { %p11_p5 = scmp.ge.s32.totalorder %s14_s17, 4   ;;  %s1395_s16 = smov %s1397_s1 }
 0x127   :  { %13 = sbr.rel (!%p11_p5) target bundleno = 2 (0x2), region = 71 }

// kernel: cnn_music_forward.23
= control target key start
LH: loop header
LB: loop body
LE: loop exit
PB: predicated region body
PF: predicated region fallthrough
CT: control target
= control target key end

     0   :  { %s1874_s18 = smov 0   ;;  %s1876_s19 = smov 0   ;;  %s2315_s0 = inlined_call_operand.vmem [shape: f32[2,32,128], index: 0, kind: input, shape index: {}]   ;;  %s2316_s1 = inlined_call_operand.vmem [shape: f32[2,32,128], index: 1, kind: input, shape index: {}]   ;;  %s2317_s2 = inlined_call_operand.vmem [shape: f32[3,128,128], index: 2, kind: input, shape index: {}]   ;;  %s2318_s3 = inlined_call_operand.vmem [shape: f32[3,128,128], index: 3, kind: input, shape index: {}]   ;;  %s2319_s4 = inlined_call_operand.vmem [shape: f32[1,128], index: 4, kind: input, shape index: {}]   ;;  %s2320_s5 = inlined_call_operand.vmem [shape: f32[2,32,128], index: 5, kind: output, shape index: {}]  }
   0x1   :  { %s1878_s20 = smov 0  }
   0x2 LB: > { %s27_s21 = sadd.s32 1, %s1837_s19  ;;  %p1157_p0 = scmp.ge.s32.totalorder %s1841_s20, 1  ;;  %s1841_s20 = sphi %s1878_s20, %s15_s20   ;;  %s1837_s19 = sphi %s1876_s19, %s2322_s19   ;;  %s1833_s18 = sphi %s1874_s18, %s2321_s18  }
   0x3   : > { %p29_p1 = scmp.ge.s32.totalorder %s27_s21, 2  ;;  %p225_p2 = scmp.lt.s32.totalorder %s1841_s20, 3 }
   0x5   : > { %s2324_s21 = smov (%p29_p1, %s27_s21), 0  ;;  %p226_p3 = pnand %p1157_p0, %p225_p2 }
   0x6   : > { %v1164_v0 = vld [vmem:[%s2317_s2 + $0x80] sm:$0xff] (!%p226_p3)  ;;  %v1165_v1 = vld [vmem:[%s2317_s2 + $0x88] sm:$0xff] (!%p226_p3)  ;;  %p271_p4 = scmp.lt.s32.totalorder (!%p226_p3), %s1833_s18, 1  ;;  %v1166_v5 = vld [vmem:[%s2317_s2 + $0x90] sm:$0xff] (!%p226_p3)  ;;  %v1843_v7 = vmov (!%p226_p3), 0.0   ;;  %vm315_vm0 = vcmask (!%p226_p3), 1041408  }
   0x7   : > { %229 = sbr.rel (%p226_p3) target bundleno = 328 (0x148), region = 40  ;;  %v687_v2 = vld [vmem:[%s2318_s3] sm:$0xff] (!%p226_p3)  ;;  %v1582_v3 = vpack.c.bf16 (!%p226_p3), %v1165_v1, %v1164_v0  ;;  %v688_v4 = vld [vmem:[%s2318_s3 + $0x8] sm:$0xff] (!%p226_p3)  ;;  %v1167_v6 = vld [vmem:[%s2317_s2 + $0x98] sm:$0xff] (!%p226_p3)  ;;  %304 = vst [vmem:[#allocation2] sm:$0x3] (!%p226_p3), %v1843_v7 }
   0x8   : > { %305 = vst [vmem:[#allocation3] sm:$0x3] (!%p226_p3), %v1843_v7  ;;  %v1678_v8 = vpack.c.bf16 (!%p226_p3), %v688_v4, %v687_v2  ;;  %v1586_v9 = vpack.c.bf16 (!%p226_p3), %v1167_v6, %v1166_v5  ;;  %v689_v10 = vld [vmem:[%s2318_s3 + $0x10] sm:$0xff] (!%p226_p3)  ;;  %v690_v11 = vld [vmem:[%s2318_s3 + $0x18] sm:$0xff] (!%p226_p3)  ;;  %v1168_v12 = vld [vmem:[%s2317_s2 + $0xa0] sm:$0xff] (!%p226_p3)  ;;  %vm362_vm1 = vcmask (!%p226_p3), 1046528  }
   0x9   : > { %1583 = vmatprep.subr.bf16.mxu1 (!%p226_p3), %v1582_v3  ;;  %v1682_v13 = vpack.c.bf16 (!%p226_p3), %v690_v11, %v689_v10  ;;  %v1169_v14 = vld [vmem:[%s2317_s2 + $0xa8] sm:$0xff] (!%p226_p3)  ;;  %v691_v15 = vld [vmem:[%s2318_s3 + $0x20] sm:$0xff] (!%p226_p3)  ;;  %v1170_v19 = vld [vmem:[%s2317_s2 + $0xb0] sm:$0xff] (!%p226_p3)  ;;  %vm563_vm2 = vcmask (!%p226_p3), 1045504  }
   0xa   : > { %v692_v16 = vld [vmem:[%s2318_s3 + $0x28] sm:$0xff] (!%p226_p3)  ;;  %1679 = vmatprep.subr.bf16.mxu0 (!%p226_p3), %v1678_v8  ;;  %1585 = vmatpush3.bf16.msra.mxu1 (!%p226_p3), %v1582_v3  ;;  %v1590_v17 = vpack.c.bf16 (!%p226_p3), %v1169_v14, %v1168_v12  ;;  %v1171_v20 = vld [vmem:[%s2317_s2 + $0xb8] sm:$0xff] (!%p226_p3)  ;;  %v693_v21 = vld [vmem:[%s2318_s3 + $0x30] sm:$0xff] (!%p226_p3) }
   0xb   : > { %1681 = vmatpush3.bf16.msra.mxu0 (!%p226_p3), %v1678_v8  ;;  %1587 = vmatprep.subr.bf16.mxu1 (!%p226_p3), %v1586_v9  ;;  %v1686_v18 = vpack.c.bf16 (!%p226_p3), %v692_v16, %v691_v15  ;;  %v694_v22 = vld [vmem:[%s2318_s3 + $0x38] sm:$0xff] (!%p226_p3)  ;;  %v1594_v23 = vpack.c.bf16 (!%p226_p3), %v1171_v20, %v1170_v19  ;;  %v1172_v24 = vld [vmem:[%s2317_s2 + $0xc0] sm:$0xff] (!%p226_p3)  ;;  %v1173_v25 = vld [vmem:[%s2317_s2 + $0xc8] sm:$0xff] (!%p226_p3) }
   0xc   : > { %1683 = vmatprep.subr.bf16.mxu0 (!%p226_p3), %v1682_v13  ;;  %v1690_v26 = vpack.c.bf16 (!%p226_p3), %v694_v22, %v693_v21  ;;  %v695_v27 = vld [vmem:[%s2318_s3 + $0x40] sm:$0xff] (!%p226_p3)  ;;  %v696_v28 = vld [vmem:[%s2318_s3 + $0x48] sm:$0xff] (!%p226_p3)  ;;  %v1598_v36 = vpack.c.bf16 (!%p226_p3), %v1173_v25, %v1172_v24  ;;  %v1174_v42 = vld [vmem:[%s2317_s2 + $0xd0] sm:$0xff] (!%p226_p3) }
   0xd   : > { %v1694_v41 = vpack.c.bf16 (!%p226_p3), %v696_v28, %v695_v27  ;;  %v1175_v43 = vld [vmem:[%s2317_s2 + $0xd8] sm:$0xff] (!%p226_p3)  ;;  %v697_v46 = vld [vmem:[%s2318_s3 + $0x50] sm:$0xff] (!%p226_p3)  ;;  %v1176_v53 = vld [vmem:[%s2317_s2 + $0xe0] sm:$0xff] (!%p226_p3) }
   0xe   : > { %s2326_s18 = smov (!%p271_p4, %s1833_s18), 1  ;;  %1589 = vmatpush3.bf16.msra.mxu1 %v1586_v9  ;;  %v310_v32 = vld [vmem:[#allocation2] sm:$0x3]  ;;  %v698_v47 = vld [vmem:[%s2318_s3 + $0x58] sm:$0xff]  ;;  %v1602_v50 = vpack.c.bf16 %v1175_v43, %v1174_v42  ;;  %v1177_v54 = vld [vmem:[%s2317_s2 + $0xe8] sm:$0xff] }
   0xf   : > { %s1928_s25 = sshll.u32 %s2326_s18, 5  ;;  %1685 = vmatpush3.bf16.msra.mxu0 %v1682_v13  ;;  %1591 = vmatprep.subr.bf16.mxu1 %v1590_v17  ;;  %v670_v39 = vld [vmem:[#allocation3] sm:$0x3]  ;;  %v1698_v52 = vpack.c.bf16 %v698_v47, %v697_v46  ;;  %v700_v57 = vld [vmem:[%s2318_s3 + $0x68] sm:$0xff]  ;;  %v1606_v58 = vpack.c.bf16 %v1177_v54, %v1176_v53  ;;  %v1178_v61 = vld [vmem:[%s2317_s2 + $0xf0] sm:$0xff] }
  0x10   : > { %s1946_s10 = scalar_lea.vmem %s2315_s0, %s1928_s25  ;;  %s1958_s17 = scalar_lea.vmem %s2316_s1, %s1928_s25  ;;  %1687 = vmatprep.subr.bf16.mxu0 %v1686_v18  ;;  %v699_v56 = vld [vmem:[%s2318_s3 + $0x60] sm:$0xff]  ;;  %v1179_v62 = vld [vmem:[%s2317_s2 + $0xf8] sm:$0xff]  ;;  %v701_v63 = vld [vmem:[%s2318_s3 + $0x70] sm:$0xff] }
  0x11   : > { %v306_v29 = vld [vmem:[%s1946_s10] sm:$0xff]  ;;  %v307_v30 = vld [vmem:[%s1946_s10 + $0x8] sm:$0xff]  ;;  %v309_v31 = vld [vmem:[%s1946_s10 + $0x18] sm:$0xff]  ;;  %v1702_v60 = vpack.c.bf16 %v700_v57, %v699_v56  ;;  %v1610_v2 = vpack.c.bf16 %v1179_v62, %v1178_v61  ;;  %s298_s12 = scalar_lea.vmem %s2320_s5, %s1928_s25 }
  0x12   : > { %v316_v33 = vrot.slane %v306_v29, 6  ;;  %1593 = vmatpush3.bf16.msra.mxu1 %v1590_v17  ;;  %v317_v34 = vrot.slane %v307_v30, 6  ;;  %1032 = vst [vmem:[#allocation2 - $0x6] sm:$0xc0] %v309_v31  ;;  %v1970_v35 = vld [vmem:[%s1958_s17] sm:$0xff]  ;;  %v1976_v38 = vld [vmem:[%s1958_s17 + $0x18] sm:$0xff] }
  0x13   : > { %1689 = vmatpush3.bf16.msra.mxu0 %v1686_v18  ;;  %1595 = vmatprep.subr.bf16.mxu1 %v1594_v23  ;;  %v675_v40 = vrot.slane %v1970_v35, 6  ;;  %1031 = vst [vmem:[#allocation3 - $0x6] sm:$0xc0] %v1976_v38  ;;  %v308_v55 = vld [vmem:[%s1946_s10 + $0x10] sm:$0xff]  ;;  %v702_v0 = vld [vmem:[%s2318_s3 + $0x78] sm:$0xff]  ;;  %v2029_v1 = vrot.slane %v309_v31, 6 }
  0x14   : > { %v1973_v37 = vsel %vm315_vm0, %v310_v32, %v316_v33  ;;  %1691 = vmatprep.subr.bf16.mxu0 %v1690_v26  ;;  %v1986_v44 = vsel %vm315_vm0, %v316_v33, %v317_v34  ;;  %v319_v59 = vrot.slane %v308_v55, 6  ;;  %v1706_v4 = vpack.c.bf16 %v702_v0, %v701_v63  ;;  %v328_v5 = vld [vmem:[%s2317_s2] sm:$0xff]  ;;  %v329_v6 = vld [vmem:[%s2317_s2 + $0x8] sm:$0xff]  ;;  %v668_v14 = vld [vmem:[%s1958_s17 + $0x10] sm:$0xff] }
  0x15   : > { %v363_v45 = vrot.slane %v1973_v37, 1  ;;  %v364_v48 = vrot.slane %v1986_v44, 1  ;;  %v2000_v49 = vsel %vm315_vm0, %v670_v39, %v675_v40  ;;  %v667_v7 = vld [vmem:[%s1958_s17 + $0x8] sm:$0xff]  ;;  %v1196_v8 = vld [vmem:[%s2318_s3 + $0x80] sm:$0xff]  ;;  %v1614_v12 = vpack.c.bf16 %v329_v6, %v328_v5  ;;  %v330_v16 = vld [vmem:[%s2317_s2 + $0x10] sm:$0xff] }
  0x16   : > { %1597 = vmatpush3.bf16.msra.mxu1 %v1594_v23  ;;  %1500 = vmatprep.mubr.f32.mxu0 %v2000_v49  ;;  %v2032_v3 = vsel %vm315_vm0, %v317_v34, %v319_v59  ;;  %v1197_v9 = vld [vmem:[%s2318_s3 + $0x88] sm:$0xff]  ;;  %v2050_v11 = vsel %vm315_vm0, %v319_v59, %v2029_v1  ;;  %v676_v13 = vrot.slane %v667_v7, 6  ;;  %v331_v17 = vld [vmem:[%s2317_s2 + $0x18] sm:$0xff]  ;;  %v1198_v18 = vld [vmem:[%s2318_s3 + $0x90] sm:$0xff]  ;;  %v678_v22 = vrot.slane %v668_v14, 6 }
  0x17   : > { %1693 = vmatpush3.bf16.msra.mxu0 %v1690_v26  ;;  %1599 = vmatprep.subr.bf16.mxu1 %v1598_v36  ;;  %v365_v51 = vsel %vm362_vm1, %v363_v45, %v364_v48  ;;  %v366_v10 = vrot.slane %v2032_v3, 1  ;;  %v1710_v15 = vpack.c.bf16 %v1197_v9, %v1196_v8  ;;  %v1199_v19 = vld [vmem:[%s2318_s3 + $0x98] sm:$0xff]  ;;  %v368_v20 = vrot.slane %v2050_v11, 1  ;;  %v332_v28 = vld [vmem:[%s2317_s2 + $0x20] sm:$0xff]  ;;  %v333_v29 = vld [vmem:[%s2317_s2 + $0x28] sm:$0xff] }
  0x18   : > { %1695 = vmatprep.subr.bf16.mxu0 %v1694_v41  ;;  %1386 = vmatprep.mubr.f32.mxu1 %v365_v51  ;;  %v370_v23 = vrot.slane %v2029_v1, 1  ;;  %v2071_v24 = vsel %vm315_vm0, %v675_v40, %v676_v13  ;;  %v1618_v25 = vpack.c.bf16 %v331_v17, %v330_v16  ;;  %v2074_v26 = vrot.slane %v1976_v38, 6  ;;  %v1200_v30 = vld [vmem:[%s2318_s3 + $0xa0] sm:$0xff]  ;;  %v1201_v31 = vld [vmem:[%s2318_s3 + $0xa8] sm:$0xff]  ;;  %v335_v42 = vld [vmem:[%s2317_s2 + $0x38] sm:$0xff] }
  0x19   : > { %v367_v21 = vsel %vm362_vm1, %v364_v48, %v366_v10  ;;  %v1714_v27 = vpack.c.bf16 %v1199_v19, %v1198_v18  ;;  %v369_v32 = vsel %vm362_vm1, %v366_v10, %v368_v20  ;;  %v810_v33 = vrot.slane %v2000_v49, 1  ;;  %v1202_v43 = vld [vmem:[%s2318_s3 + $0xb0] sm:$0xff]  ;;  %v1203_v45 = vld [vmem:[%s2318_s3 + $0xb8] sm:$0xff]  ;;  %v337_v51 = vld [vmem:[%s2317_s2 + $0x48] sm:$0xff] }
  0x1a   : > { %1601 = vmatpush3.bf16.msra.mxu1 %v1598_v36  ;;  %v811_v34 = vrot.slane %v2071_v24, 1  ;;  %v2093_v35 = vsel %vm315_vm0, %v676_v13, %v678_v22  ;;  %v371_v36 = vsel %vm362_vm1, %v368_v20, %v370_v23  ;;  %v1622_v38 = vpack.c.bf16 %v333_v29, %v332_v28  ;;  %v1205_v53 = vld [vmem:[%s2318_s3 + $0xc8] sm:$0xff]  ;;  %v338_v56 = vld [vmem:[%s2317_s2 + $0x50] sm:$0xff]  ;;  %v339_v57 = vld [vmem:[%s2317_s2 + $0x58] sm:$0xff] }
  0x1b   : > { %1697 = vmatpush3.bf16.msra.mxu0 %v1694_v41  ;;  %1603 = vmatprep.subr.bf16.mxu1 %v1602_v50  ;;  %v2098_v39 = vsel %vm315_vm0, %v678_v22, %v2074_v26  ;;  %v1718_v40 = vpack.c.bf16 %v1201_v31, %v1200_v30  ;;  %v334_v41 = vld [vmem:[%s2317_s2 + $0x30] sm:$0xff]  ;;  %v1722_v48 = vpack.c.bf16 %v1203_v45, %v1202_v43  ;;  %v1207_v59 = vld [vmem:[%s2318_s3 + $0xd8] sm:$0xff]  ;;  %v340_v62 = vld [vmem:[%s2317_s2 + $0x60] sm:$0xff]  ;;  %v813_v17 = vrot.slane %v2093_v35, 1 }
  0x1c   : > { %1699 = vmatprep.subr.bf16.mxu0 %v1698_v52  ;;  %v812_v46 = vsel %vm362_vm1, %v810_v33, %v811_v34  ;;  %v1626_v47 = vpack.c.bf16 %v335_v42, %v334_v41  ;;  %v341_v63 = vld [vmem:[%s2317_s2 + $0x68] sm:$0xff]  ;;  %v1208_v0 = vld [vmem:[%s2318_s3 + $0xe0] sm:$0xff]  ;;  %v342_v6 = vld [vmem:[%s2317_s2 + $0x70] sm:$0xff]  ;;  %v817_v29 = vrot.slane %v2074_v26, 1  ;;  %v930_v41 = vrot.slane %v2071_v24, 2 }
  0x1d   : > { %v343_v7 = vld [vmem:[%s2317_s2 + $0x78] sm:$0xff]  ;;  %v1210_v8 = vld [vmem:[%s2318_s3 + $0xf0] sm:$0xff]  ;;  %v1180_v13 = vld [vmem:[%s2317_s2 + $0x100] sm:$0xff] }
  0x1e   : > { %1605 = vmatpush3.bf16.msra.mxu1 %v1602_v50  ;;  %v336_v50 = vld [vmem:[%s2317_s2 + $0x40] sm:$0xff]  ;;  %v1211_v9 = vld [vmem:[%s2318_s3 + $0xf8] sm:$0xff]  ;;  %v1642_v10 = vpack.c.bf16 %v343_v7, %v342_v6  ;;  %v1181_v14 = vld [vmem:[%s2317_s2 + $0x108] sm:$0xff] }
  0x1f   : > { %1701 = vmatpush3.bf16.msra.mxu0 %v1698_v52  ;;  %1607 = vmatprep.subr.bf16.mxu1 %v1606_v58  ;;  %v1204_v52 = vld [vmem:[%s2318_s3 + $0xc0] sm:$0xff]  ;;  %v1630_v54 = vpack.c.bf16 %v337_v51, %v336_v50  ;;  %v1213_v16 = vld [vmem:[%s2318_s3 + $0x108] sm:$0xff]  ;;  %v1646_v18 = vpack.c.bf16 %v1181_v14, %v1180_v13  ;;  %v1182_v20 = vld [vmem:[%s2317_s2 + $0x110] sm:$0xff] }
  0x20   : > { %1703 = vmatprep.subr.bf16.mxu0 %v1702_v60  ;;  %v1726_v55 = vpack.c.bf16 %v1205_v53, %v1204_v52  ;;  %v1214_v22 = vld [vmem:[%s2318_s3 + $0x110] sm:$0xff]  ;;  %v1215_v23 = vld [vmem:[%s2318_s3 + $0x118] sm:$0xff]  ;;  %v1184_v31 = vld [vmem:[%s2317_s2 + $0x120] sm:$0xff] }
  0x21   : > { %v1746_v30 = vpack.c.bf16 %v1215_v23, %v1214_v22  ;;  %v1216_v33 = vld [vmem:[%s2318_s3 + $0x120] sm:$0xff]  ;;  %v1225_v7 = vld [vmem:[%s2318_s3 + $0x168] sm:$0xff]  ;;  %v1226_v13 = vld [vmem:[%s2318_s3 + $0x170] sm:$0xff]  ;;  %v571_v22 = vrot.slane %v2029_v1, 2  ;;  %v936_v23 = vrot.slane %v2074_v26, 2 }
  0x22   : > { %1609 = vmatpush3.bf16.msra.mxu1 %v1606_v58  ;;  %v1206_v58 = vld [vmem:[%s2318_s3 + $0xd0] sm:$0xff]  ;;  %v1224_v6 = vld [vmem:[%s2318_s3 + $0x160] sm:$0xff]  ;;  %v1227_v14 = vld [vmem:[%s2318_s3 + $0x178] sm:$0xff] }
  0x23   : > { %1705 = vmatpush3.bf16.msra.mxu0 %v1702_v60  ;;  %1611 = vmatprep.subr.bf16.mxu1 %v1610_v2  ;;  %v1634_v60 = vpack.c.bf16 %v339_v57, %v338_v56  ;;  %v1730_v61 = vpack.c.bf16 %v1207_v59, %v1206_v58  ;;  %v1220_v56 = vld [vmem:[%s2318_s3 + $0x140] sm:$0xff]  ;;  %v1221_v57 = vld [vmem:[%s2318_s3 + $0x148] sm:$0xff] }
  0x24   : > { %1707 = vmatprep.subr.bf16.mxu0 %v1706_v4  ;;  %v1758_v59 = vpack.c.bf16 %v1221_v57, %v1220_v56 }
  0x26   : > { %1613 = vmatpush3.bf16.msra.mxu1 %v1610_v2  ;;  %v1209_v2 = vld [vmem:[%s2318_s3 + $0xe8] sm:$0xff] }
  0x27   : > { %1709 = vmatpush3.bf16.msra.mxu0 %v1706_v4  ;;  %1615 = vmatprep.subr.bf16.mxu1 %v1614_v12  ;;  %v1638_v4 = vpack.c.bf16 %v341_v63, %v340_v62  ;;  %v1734_v5 = vpack.c.bf16 %v1209_v2, %v1208_v0  ;;  %v1222_v62 = vld [vmem:[%s2318_s3 + $0x150] sm:$0xff]  ;;  %v1223_v63 = vld [vmem:[%s2318_s3 + $0x158] sm:$0xff] }
  0x28   : > { %1711 = vmatprep.subr.bf16.mxu0 %v1710_v15  ;;  %v1762_v2 = vpack.c.bf16 %v1223_v63, %v1222_v62 }
  0x29   : > { %1387 = vmatmul.mubr.f32.vlgmr.msra.gmra.mrb[0].mxu1 %v367_v21  ;;  %v1183_v21 = vld [vmem:[%s2317_s2 + $0x118] sm:$0xff] }
  0x2a   : > { %1617 = vmatpush3.bf16.msra.mxu1 %v1614_v12  ;;  %1501 = vmatmul.mubr.f32.vlgmr.msra.gmra.mrb[0].mxu0 %v2071_v24  ;;  %v1738_v12 = vpack.c.bf16 %v1211_v9, %v1210_v8  ;;  %v1650_v28 = vpack.c.bf16 %v1183_v21, %v1182_v20  ;;  %v1766_v9 = vpack.c.bf16 %v1225_v7, %v1224_v6  ;;  %v934_v20 = vrot.slane %v2098_v39, 2 }
  0x2b   : > { %1713 = vmatpush3.bf16.msra.mxu0 %v1710_v15  ;;  %1619 = vmatprep.subr.bf16.mxu1 %v1618_v25  ;;  %v1212_v15 = vld [vmem:[%s2318_s3 + $0x100] sm:$0xff] }
  0x2c   : > { %1715 = vmatprep.subr.bf16.mxu0 %v1714_v27  ;;  %1389 = vmatprep.mubr.f32.mxu1 %v369_v32  ;;  %v1742_v19 = vpack.c.bf16 %v1213_v16, %v1212_v15  ;;  %v1185_v32 = vld [vmem:[%s2317_s2 + $0x128] sm:$0xff]  ;;  %v1770_v16 = vpack.c.bf16 %v1227_v14, %v1226_v13  ;;  %v937_v1 = vsel %vm563_vm2, %v934_v20, %v936_v23 }
  0x2d   : > { %1503 = vmatprep.mubr.f32.mxu0 %v2093_v35  ;;  %1390 = vmatmul.mubr.f32.gmra.mrb[2].mxu1 %v371_v36  ;;  %v564_v36 = vrot.slane %v1973_v37, 2  ;;  %v1654_v43 = vpack.c.bf16 %v1185_v32, %v1184_v31 }
  0x2e   : > { %1621 = vmatpush3.bf16.msra.mxu1 %v1618_v25  ;;  %1504 = vmatmul.mubr.f32.gmra.mrb[2].mxu0 %v2098_v39  ;;  %v815_v25 = vrot.slane %v2098_v39, 1 }
  0x2f   : > { %1717 = vmatpush3.bf16.msra.mxu0 %v1714_v27  ;;  %1623 = vmatprep.subr.bf16.mxu1 %v1622_v38  ;;  %v814_v27 = vsel %vm362_vm1, %v811_v34, %v813_v17  ;;  %v1217_v34 = vld [vmem:[%s2318_s3 + $0x128] sm:$0xff] }
  0x30   : > { %1719 = vmatprep.subr.bf16.mxu0 %v1718_v40  ;;  %1424 = vmatprep.mubr.f32.mxu1 %v1973_v37  ;;  %v816_v42 = vsel %vm362_vm1, %v813_v17, %v815_v25  ;;  %v818_v45 = vsel %vm362_vm1, %v815_v25, %v817_v29  ;;  %v1186_v37 = vld [vmem:[%s2317_s2 + $0x130] sm:$0xff]  ;;  %v567_v17 = vrot.slane %v2032_v3, 2  ;;  %v1228_v25 = vld [vmem:[%s2319_s4] ss:$0 sm:$0xff] }
  0x31   : > { %1538 = vmatprep.mubr.f32.mxu0 %v812_v46  ;;  %v1750_v46 = vpack.c.bf16 %v1217_v34, %v1216_v33 }
  0x32   : > { %1625 = vmatpush3.bf16.msra.mxu1 %v1622_v38  ;;  %v565_v38 = vrot.slane %v1986_v44, 2 }
  0x33   : > { %1721 = vmatpush3.bf16.msra.mxu0 %v1718_v40  ;;  %1627 = vmatprep.subr.bf16.mxu1 %v1626_v47  ;;  %v929_v40 = vrot.slane %v2000_v49, 2  ;;  %v1187_v49 = vld [vmem:[%s2317_s2 + $0x138] sm:$0xff] }
  0x34   : > { %1723 = vmatprep.subr.bf16.mxu0 %v1722_v48  ;;  %v566_v50 = vsel %vm563_vm2, %v564_v36, %v565_v38  ;;  %v1658_v52 = vpack.c.bf16 %v1187_v49, %v1186_v37  ;;  %v568_v21 = vsel %vm563_vm2, %v565_v38, %v567_v17 }
  0x35   : > { %v931_v51 = vsel %vm563_vm2, %v929_v40, %v930_v41 }
  0x36   : > { %1629 = vmatpush3.bf16.msra.mxu1 %v1626_v47  ;;  %v1218_v47 = vld [vmem:[%s2318_s3 + $0x130] sm:$0xff] }
  0x37   : > { %1725 = vmatpush3.bf16.msra.mxu0 %v1722_v48  ;;  %1631 = vmatprep.subr.bf16.mxu1 %v1630_v54  ;;  %v1219_v48 = vld [vmem:[%s2318_s3 + $0x138] sm:$0xff] }
  0x38   : > { %1727 = vmatprep.subr.bf16.mxu0 %v1726_v55  ;;  %v1754_v53 = vpack.c.bf16 %v1219_v48, %v1218_v47 }
  0x3a   : > { %1633 = vmatpush3.bf16.msra.mxu1 %v1630_v54  ;;  %v1188_v54 = vld [vmem:[%s2317_s2 + $0x140] sm:$0xff] }
  0x3b   : > { %1729 = vmatpush3.bf16.msra.mxu0 %v1726_v55  ;;  %1635 = vmatprep.subr.bf16.mxu1 %v1634_v60  ;;  %v1189_v55 = vld [vmem:[%s2317_s2 + $0x148] sm:$0xff] }
  0x3c   : > { %1731 = vmatprep.subr.bf16.mxu0 %v1730_v61  ;;  %v1662_v58 = vpack.c.bf16 %v1189_v55, %v1188_v54 }
  0x3e   : > { %1637 = vmatpush3.bf16.msra.mxu1 %v1634_v60  ;;  %v1190_v60 = vld [vmem:[%s2317_s2 + $0x150] sm:$0xff] }
  0x3f   : > { %1733 = vmatpush3.bf16.msra.mxu0 %v1730_v61  ;;  %1639 = vmatprep.subr.bf16.mxu1 %v1638_v4  ;;  %v1191_v61 = vld [vmem:[%s2317_s2 + $0x158] sm:$0xff] }
  0x40   : > { %1735 = vmatprep.subr.bf16.mxu0 %v1734_v5  ;;  %v1666_v0 = vpack.c.bf16 %v1191_v61, %v1190_v60 }
  0x42   : > { %1641 = vmatpush3.bf16.msra.mxu1 %v1638_v4  ;;  %v1192_v4 = vld [vmem:[%s2317_s2 + $0x160] sm:$0xff] }
  0x43   : > { %1737 = vmatpush3.bf16.msra.mxu0 %v1734_v5  ;;  %1643 = vmatprep.subr.bf16.mxu1 %v1642_v10  ;;  %v1193_v5 = vld [vmem:[%s2317_s2 + $0x168] sm:$0xff] }
  0x44   : > { %1739 = vmatprep.subr.bf16.mxu0 %v1738_v12  ;;  %v1670_v8 = vpack.c.bf16 %v1193_v5, %v1192_v4 }
  0x46   : > { %1645 = vmatpush3.bf16.msra.mxu1 %v1642_v10  ;;  %v1194_v10 = vld [vmem:[%s2317_s2 + $0x170] sm:$0xff] }
  0x47   : > { %1741 = vmatpush3.bf16.msra.mxu0 %v1738_v12  ;;  %1647 = vmatprep.subr.bf16.mxu1 %v1646_v18  ;;  %v1195_v12 = vld [vmem:[%s2317_s2 + $0x178] sm:$0xff] }
  0x48   : > { %1743 = vmatprep.subr.bf16.mxu0 %v1742_v19  ;;  %v1674_v15 = vpack.c.bf16 %v1195_v12, %v1194_v10 }
  0x49   : > { %1425 = vmatmul.mubr.f32.vlgmr.msra.gmra.mrb[0].mxu1 %v1986_v44 }
  0x4a   : > { %1649 = vmatpush3.bf16.msra.mxu1 %v1646_v18  ;;  %1539 = vmatmul.mubr.f32.vlgmr.msra.gmra.mrb[0].mxu0 %v814_v27  ;;  %v932_v18 = vrot.slane %v2093_v35, 2 }
  0x4b   : > { %1745 = vmatpush3.bf16.msra.mxu0 %v1742_v19  ;;  %1651 = vmatprep.subr.bf16.mxu1 %v1650_v28  ;;  %v569_v19 = vrot.slane %v2050_v11, 2 }
  0x4c   : > { %1747 = vmatprep.subr.bf16.mxu0 %v1746_v30  ;;  %1427 = vmatprep.mubr.f32.mxu1 %v2032_v3  ;;  %v933_v3 = vsel %vm563_vm2, %v930_v41, %v932_v18 }
  0x4d   : > { %1541 = vmatprep.mubr.f32.mxu0 %v816_v42  ;;  %1428 = vmatmul.mubr.f32.gmra.mrb[2].mxu1 %v2050_v11  ;;  %v570_v35 = vsel %vm563_vm2, %v567_v17, %v569_v19  ;;  %v935_v11 = vsel %vm563_vm2, %v932_v18, %v934_v20  ;;  %v572_v44 = vsel %vm563_vm2, %v569_v19, %v571_v22 }
  0x4e   : > { %1653 = vmatpush3.bf16.msra.mxu1 %v1650_v28  ;;  %1542 = vmatmul.mubr.f32.gmra.mrb[2].mxu0 %v818_v45 }
  0x4f   : > { %1749 = vmatpush3.bf16.msra.mxu0 %v1746_v30  ;;  %1655 = vmatprep.subr.bf16.mxu1 %v1654_v43 }
  0x50   : > { %1751 = vmatprep.subr.bf16.mxu0 %v1750_v46  ;;  %1462 = vmatprep.mubr.f32.mxu1 %v566_v50 }
  0x51   : > { %1576 = vmatprep.mubr.f32.mxu0 %v931_v51 }
  0x52   : > { %1657 = vmatpush3.bf16.msra.mxu1 %v1654_v43 }
  0x53   : > { %1753 = vmatpush3.bf16.msra.mxu0 %v1750_v46  ;;  %1659 = vmatprep.subr.bf16.mxu1 %v1658_v52 }
  0x54   : > { %1755 = vmatprep.subr.bf16.mxu0 %v1754_v53 }
  0x56   : > { %1661 = vmatpush3.bf16.msra.mxu1 %v1658_v52 }
  0x57   : > { %1757 = vmatpush3.bf16.msra.mxu0 %v1754_v53  ;;  %1663 = vmatprep.subr.bf16.mxu1 %v1662_v58 }
  0x58   : > { %1759 = vmatprep.subr.bf16.mxu0 %v1758_v59 }
  0x5a   : > { %1665 = vmatpush3.bf16.msra.mxu1 %v1662_v58 }
  0x5b   : > { %1761 = vmatpush3.bf16.msra.mxu0 %v1758_v59  ;;  %1667 = vmatprep.subr.bf16.mxu1 %v1666_v0 }
  0x5c   : > { %1763 = vmatprep.subr.bf16.mxu0 %v1762_v2 }
  0x5e   : > { %1669 = vmatpush3.bf16.msra.mxu1 %v1666_v0 }
  0x5f   : > { %1765 = vmatpush3.bf16.msra.mxu0 %v1762_v2  ;;  %1671 = vmatprep.subr.bf16.mxu1 %v1670_v8 }
  0x60   : > { %1767 = vmatprep.subr.bf16.mxu0 %v1766_v9 }
  0x62   : > { %1673 = vmatpush3.bf16.msra.mxu1 %v1670_v8 }
  0x63   : > { %1769 = vmatpush3.bf16.msra.mxu0 %v1766_v9  ;;  %1675 = vmatprep.subr.bf16.mxu1 %v1674_v15 }
  0x64   : > { %1771 = vmatprep.subr.bf16.mxu0 %v1770_v16 }
  0x66   : > { %1677 = vmatpush3.bf16.msra.mxu1 %v1674_v15 }
  0x67   : > { %1773 = vmatpush3.bf16.msra.mxu0 %v1770_v16 }
  0x69   : > { %1463 = vmatmul.mubr.f32.vlgmr.msra.gmra.mrb[0].mxu1 %v568_v21 }
  0x6a   : > { %1577 = vmatmul.mubr.f32.vlgmr.msra.gmra.mrb[0].mxu0 %v933_v3  ;;  %1465 = vmatprep.mubr.f32.mxu1 %v570_v35 }
  0x6b   : > { %1579 = vmatprep.mubr.f32.mxu0 %v935_v11 }
  0x6d   : > { %1466 = vmatmul.mubr.f32.gmra.mrb[2].mxu1 %v572_v44 }
  0x6e   : > { %1580 = vmatmul.mubr.f32.gmra.mrb[2].mxu0 %v937_v1 }
 0x13c   : > { %v1464_v24 = vpop.f32.mrb[0].mxu1 }
 0x13d   : > { %v1578_v39 = vpop.f32.mrb[0].mxu0  ;;  %v643_v26 = vpop.f32.mrb[1].mxu1 }
 0x13e   : > { %v1774_v27 = vadd.f32 %v1578_v39, %v1464_v24  ;;  %v1008_v28 = vpop.f32.mrb[1].mxu0 }
 0x13f   : > { %v1775_v29 = vadd.f32 %v1008_v28, %v643_v26 }
 0x140   : > { %v1041_v30 = vadd.f32 %v1774_v27, %v1228_v25  ;;  %v1467_v31 = vpop.f32.mrb[2].mxu1 }
 0x141   : > { %v1040_v32 = vadd.f32 %v1775_v29, %v1228_v25  ;;  %v1581_v33 = vpop.f32.mrb[2].mxu0  ;;  %v653_v34 = vpop.f32.mrb[3].mxu1 }
 0x142   : > { %1045 = vst [vmem:[%s298_s12 + $0x8] sm:$0xff] %v1041_v30  ;;  %v1776_v36 = vadd.f32 %v1581_v33, %v1467_v31  ;;  %v1018_v38 = vpop.f32.mrb[3].mxu0 }
 0x143   : > { %1044 = vst [vmem:[%s298_s12] sm:$0xff] %v1040_v32  ;;  %v1777_v40 = vadd.f32 %v1018_v38, %v653_v34 }
 0x144   : > { %v1043_v41 = vadd.f32 %v1776_v36, %v1228_v25 }
 0x145   : > { %v1042_v42 = vadd.f32 %v1777_v40, %v1228_v25 }
 0x146   : > { %1047 = vst [vmem:[%s298_s12 + $0x18] sm:$0xff] %v1043_v41 }
 0x147   : > { %1046 = vst [vmem:[%s298_s12 + $0x10] sm:$0xff] %v1042_v42 }
 0x148 PF: > { %s15_s20 = sadd.s32 1, %s1841_s20   ;;  %s2321_s18 = smov %s1837_s19 }
 0x149   : > { %p12_p5 = scmp.ge.s32.totalorder %s15_s20, 4   ;;  %s2322_s19 = smov %s2324_s21 }
 0x14b   :  { %14 = sbr.rel (!%p12_p5) target bundleno = 2 (0x2), region = 81 }

// kernel: cnn_music_forward.25
= control target key start
LH: loop header
LB: loop body
LE: loop exit
PB: predicated region body
PF: predicated region fallthrough
CT: control target
= control target key end

     0   :  { %s2003_s18 = smov 0   ;;  %s2005_s19 = smov 0   ;;  %s2456_s0 = inlined_call_operand.vmem [shape: f32[2,64,128], index: 0, kind: input, shape index: {}]   ;;  %s2457_s1 = inlined_call_operand.vmem [shape: f32[2,64,32], index: 1, kind: input, shape index: {}]   ;;  %s2458_s2 = inlined_call_operand.vmem [shape: f32[3,128,2], index: 2, kind: input, shape index: {}]   ;;  %s2459_s3 = inlined_call_operand.vmem [shape: f32[3,32,2], index: 3, kind: input, shape index: {}]   ;;  %s2460_s4 = inlined_call_operand.vmem [shape: f32[1,2], index: 4, kind: input, shape index: {}]   ;;  %s2461_s5 = inlined_call_operand.vmem [shape: f32[2,64,2], index: 5, kind: output, shape index: {}]  }
   0x1   :  { %s2007_s20 = smov 0  }
   0x2 LB: > { %s27_s21 = sadd.s32 1, %s1966_s19  ;;  %p1382_p0 = scmp.ge.s32.totalorder %s1970_s20, 1  ;;  %s1970_s20 = sphi %s2007_s20, %s15_s20   ;;  %s1966_s19 = sphi %s2005_s19, %s2463_s19   ;;  %s1962_s18 = sphi %s2003_s18, %s2462_s18  }
   0x3   : > { %p29_p1 = scmp.ge.s32.totalorder %s27_s21, 2  ;;  %p225_p2 = scmp.lt.s32.totalorder %s1970_s20, 3 }
   0x5   : > { %s2465_s21 = smov (%p29_p1, %s27_s21), 0  ;;  %p226_p3 = pnand %p1382_p0, %p225_p2 }
   0x6   : > { %v1389_v0 = vld [vmem:[%s2458_s2 + $0x80] sm:$0xff] (!%p226_p3)  ;;  %v1390_v1 = vld [vmem:[%s2458_s2 + $0x88] sm:$0xff] (!%p226_p3)  ;;  %p271_p4 = scmp.lt.s32.totalorder (!%p226_p3), %s1962_s18, 1  ;;  %v1391_v5 = vld [vmem:[%s2458_s2 + $0x90] sm:$0xff] (!%p226_p3)  ;;  %v1972_v7 = vmov (!%p226_p3), 0.0   ;;  %vm305_vm0 = vcmask (!%p226_p3), 254976  }
   0x7   : > { %229 = sbr.rel (%p226_p3) target bundleno = 313 (0x139), region = 40  ;;  %v1405_v2 = vld [vmem:[%s2458_s2 + $0x100] sm:$0xff] (!%p226_p3)  ;;  %v1759_v3 = vpack.c.bf16 (!%p226_p3), %v1390_v1, %v1389_v0  ;;  %v1406_v4 = vld [vmem:[%s2458_s2 + $0x108] sm:$0xff] (!%p226_p3)  ;;  %v1392_v6 = vld [vmem:[%s2458_s2 + $0x98] sm:$0xff] (!%p226_p3)  ;;  %304 = vst [vmem:[#allocation2] sm:$0x3] (!%p226_p3), %v1972_v7 }
   0x8   : > { %v1823_v8 = vpack.c.bf16 (!%p226_p3), %v1406_v4, %v1405_v2  ;;  %v1763_v9 = vpack.c.bf16 (!%p226_p3), %v1392_v6, %v1391_v5  ;;  %v1407_v10 = vld [vmem:[%s2458_s2 + $0x110] sm:$0xff] (!%p226_p3)  ;;  %v1408_v11 = vld [vmem:[%s2458_s2 + $0x118] sm:$0xff] (!%p226_p3)  ;;  %v1393_v12 = vld [vmem:[%s2458_s2 + $0xa0] sm:$0xff] (!%p226_p3)  ;;  %306 = vst.msk [vmem:[#allocation3] sm:$0x3] (!%p226_p3), %vm305_vm0, %v1972_v7  ;;  %vm324_vm1 = vcmask (!%p226_p3), 1041408  }
   0x9   : > { %1760 = vmatprep.subr.bf16.mxu1 (!%p226_p3), %v1759_v3  ;;  %v1827_v13 = vpack.c.bf16 (!%p226_p3), %v1408_v11, %v1407_v10  ;;  %v1394_v14 = vld [vmem:[%s2458_s2 + $0xa8] sm:$0xff] (!%p226_p3)  ;;  %v1409_v15 = vld [vmem:[%s2458_s2 + $0x120] sm:$0xff] (!%p226_p3)  ;;  %v1395_v19 = vld [vmem:[%s2458_s2 + $0xb0] sm:$0xff] (!%p226_p3)  ;;  %vm636_vm2 = vcmask (!%p226_p3), 1045504   ;;  %vm383_vm3 = vcmask (!%p226_p3), 1046528   ;;  %vm1246_vm4 = vcmask (!%p226_p3), 261126  }
   0xa   : > { %v1410_v16 = vld [vmem:[%s2458_s2 + $0x128] sm:$0xff] (!%p226_p3)  ;;  %1824 = vmatprep.subr.bf16.mxu0 (!%p226_p3), %v1823_v8  ;;  %1762 = vmatpush3.bf16.msra.mxu1 (!%p226_p3), %v1759_v3  ;;  %v1767_v17 = vpack.c.bf16 (!%p226_p3), %v1394_v14, %v1393_v12  ;;  %v1396_v20 = vld [vmem:[%s2458_s2 + $0xb8] sm:$0xff] (!%p226_p3)  ;;  %v1411_v21 = vld [vmem:[%s2458_s2 + $0x130] sm:$0xff] (!%p226_p3)  ;;  %vm813_vm5 = vcmask (!%p226_p3), 261120   ;;  %vm1264_vm6 = vcmask (!%p226_p3), 15360  }
   0xb   : > { %1826 = vmatpush3.bf16.msra.mxu0 (!%p226_p3), %v1823_v8  ;;  %1764 = vmatprep.subr.bf16.mxu1 (!%p226_p3), %v1763_v9  ;;  %v1831_v18 = vpack.c.bf16 (!%p226_p3), %v1410_v16, %v1409_v15  ;;  %v1412_v22 = vld [vmem:[%s2458_s2 + $0x138] sm:$0xff] (!%p226_p3)  ;;  %v1771_v23 = vpack.c.bf16 (!%p226_p3), %v1396_v20, %v1395_v19  ;;  %v1397_v24 = vld [vmem:[%s2458_s2 + $0xc0] sm:$0xff] (!%p226_p3)  ;;  %v1398_v25 = vld [vmem:[%s2458_s2 + $0xc8] sm:$0xff] (!%p226_p3) }
   0xc   : > { %1828 = vmatprep.subr.bf16.mxu0 (!%p226_p3), %v1827_v13  ;;  %v1835_v26 = vpack.c.bf16 (!%p226_p3), %v1412_v22, %v1411_v21  ;;  %v1413_v27 = vld [vmem:[%s2458_s2 + $0x140] sm:$0xff] (!%p226_p3)  ;;  %v1414_v28 = vld [vmem:[%s2458_s2 + $0x148] sm:$0xff] (!%p226_p3)  ;;  %v1775_v35 = vpack.c.bf16 (!%p226_p3), %v1398_v25, %v1397_v24  ;;  %v1399_v38 = vld [vmem:[%s2458_s2 + $0xd0] sm:$0xff] (!%p226_p3) }
   0xd   : > { %v1839_v37 = vpack.c.bf16 (!%p226_p3), %v1414_v28, %v1413_v27  ;;  %v1400_v39 = vld [vmem:[%s2458_s2 + $0xd8] sm:$0xff] (!%p226_p3)  ;;  %v1415_v43 = vld [vmem:[%s2458_s2 + $0x150] sm:$0xff] (!%p226_p3)  ;;  %v1401_v48 = vld [vmem:[%s2458_s2 + $0xe0] sm:$0xff] (!%p226_p3) }
   0xe   : > { %s2467_s18 = smov (!%p271_p4, %s1962_s18), 1  ;;  %1766 = vmatpush3.bf16.msra.mxu1 %v1763_v9  ;;  %v315_v32 = vld [vmem:[#allocation2] sm:$0x3]  ;;  %v1416_v44 = vld [vmem:[%s2458_s2 + $0x158] sm:$0xff]  ;;  %v1779_v47 = vpack.c.bf16 %v1400_v39, %v1399_v38  ;;  %v1402_v49 = vld [vmem:[%s2458_s2 + $0xe8] sm:$0xff] }
   0xf   : > { %s2057_s25 = sshll.u32 %s2467_s18, 6  ;;  %1830 = vmatpush3.bf16.msra.mxu0 %v1827_v13  ;;  %1768 = vmatprep.subr.bf16.mxu1 %v1767_v17  ;;  %v1843_v52 = vpack.c.bf16 %v1416_v44, %v1415_v43  ;;  %v2142_v55 = vld [vmem:[#allocation3] sm:$0x3]  ;;  %v1418_v57 = vld [vmem:[%s2458_s2 + $0x168] sm:$0xff]  ;;  %v1783_v59 = vpack.c.bf16 %v1402_v49, %v1401_v48  ;;  %v1403_v62 = vld [vmem:[%s2458_s2 + $0xf0] sm:$0xff] }
  0x10   : > { %s2075_s10 = scalar_lea.vmem %s2456_s0, %s2057_s25  ;;  %1832 = vmatprep.subr.bf16.mxu0 %v1831_v18  ;;  %s2136_s13 = scalar_lea.vmem %s2457_s1, %s2057_s25  ;;  %v1417_v56 = vld [vmem:[%s2458_s2 + $0x160] sm:$0xff]  ;;  %v1404_v63 = vld [vmem:[%s2458_s2 + $0xf8] sm:$0xff]  ;;  %v1419_v0 = vld [vmem:[%s2458_s2 + $0x170] sm:$0xff] }
  0x11   : > { %v307_v29 = vld [vmem:[%s2075_s10] sm:$0xff]  ;;  %v2091_v30 = vld [vmem:[%s2075_s10 + $0x8] sm:$0xff]  ;;  %v2094_v31 = vld [vmem:[%s2075_s10 + $0x38] sm:$0xff]  ;;  %v1847_v61 = vpack.c.bf16 %v1418_v57, %v1417_v56  ;;  %v1787_v5 = vpack.c.bf16 %v1404_v63, %v1403_v62  ;;  %s2429_s30 = scalar_lea.vmem %s2461_s5, %s2057_s25 }
  0x12   : > { %v325_v33 = vrot.slane %v307_v29, 6  ;;  %1770 = vmatpush3.bf16.msra.mxu1 %v1767_v17  ;;  %v326_v34 = vrot.slane %v2091_v30, 6  ;;  %1248 = vst [vmem:[#allocation2 - $0x6] sm:$0xc0] %v2094_v31  ;;  %v309_v53 = vld [vmem:[%s2075_s10 + $0x10] sm:$0xff]  ;;  %v2140_v54 = vld [vmem:[%s2136_s13 + $0x38] sm:$0xff] }
  0x13   : > { %1834 = vmatpush3.bf16.msra.mxu0 %v1831_v18  ;;  %1772 = vmatprep.subr.bf16.mxu1 %v1771_v23  ;;  %1247 = vst.msk [vmem:[#allocation3 - $0x6] sm:$0xc0] %vm1246_vm4, %v2140_v54  ;;  %v310_v58 = vld [vmem:[%s2075_s10 + $0x18] sm:$0xff]  ;;  %v328_v60 = vrot.slane %v309_v53, 6  ;;  %v311_v3 = vld [vmem:[%s2075_s10 + $0x20] sm:$0xff]  ;;  %v312_v4 = vld [vmem:[%s2075_s10 + $0x28] sm:$0xff] }
  0x14   : > { %v2099_v36 = vsel %vm324_vm1, %v315_v32, %v325_v33  ;;  %1836 = vmatprep.subr.bf16.mxu0 %v1835_v26  ;;  %v2108_v40 = vsel %vm324_vm1, %v325_v33, %v326_v34  ;;  %v1420_v1 = vld [vmem:[%s2458_s2 + $0x178] sm:$0xff]  ;;  %v330_v2 = vrot.slane %v310_v58, 6  ;;  %v349_v8 = vld [vmem:[%s2458_s2] sm:$0xff]  ;;  %v350_v9 = vld [vmem:[%s2458_s2 + $0x8] sm:$0xff]  ;;  %v332_v10 = vrot.slane %v311_v3, 6 }
  0x15   : > { %v637_v41 = vrot.slane %v2099_v36, 2  ;;  %v384_v42 = vrot.slane %v2099_v36, 1  ;;  %v638_v45 = vrot.slane %v2108_v40, 2  ;;  %v385_v46 = vrot.slane %v2108_v40, 1  ;;  %v809_v11 = vld [vmem:[%s2459_s3] sm:$0xff]  ;;  %v810_v12 = vld [vmem:[%s2459_s3 + $0x8] sm:$0xff] }
  0x16   : > { %1774 = vmatpush3.bf16.msra.mxu1 %v1771_v23  ;;  %v2168_v6 = vsel %vm324_vm1, %v326_v34, %v328_v60  ;;  %v1851_v7 = vpack.c.bf16 %v1420_v1, %v1419_v0  ;;  %v2183_v13 = vsel %vm324_vm1, %v328_v60, %v330_v2  ;;  %v334_v14 = vrot.slane %v312_v4, 6  ;;  %v313_v15 = vld [vmem:[%s2075_s10 + $0x30] sm:$0xff]  ;;  %v352_v22 = vld [vmem:[%s2458_s2 + $0x18] sm:$0xff]  ;;  %v354_v38 = vld [vmem:[%s2458_s2 + $0x28] sm:$0xff] }
  0x17   : > { %1838 = vmatpush3.bf16.msra.mxu0 %v1835_v26  ;;  %1776 = vmatprep.subr.bf16.mxu1 %v1775_v35  ;;  %v639_v50 = vsel %vm636_vm2, %v637_v41, %v638_v45  ;;  %v386_v51 = vsel %vm383_vm3, %v384_v42, %v385_v46  ;;  %v387_v16 = vrot.slane %v2168_v6, 1  ;;  %v1791_v17 = vpack.c.bf16 %v350_v9, %v349_v8  ;;  %v351_v21 = vld [vmem:[%s2458_s2 + $0x10] sm:$0xff]  ;;  %v812_v27 = vld [vmem:[%s2459_s3 + $0x18] sm:$0xff]  ;;  %v1429_v44 = vld [vmem:[%s2459_s3 + $0x20] sm:$0xff] }
  0x18   : > { %1840 = vmatprep.subr.bf16.mxu0 %v1839_v37  ;;  %1687 = vmatprep.mubr.f32.mxu0 %v639_v50  ;;  %v640_v18 = vrot.slane %v2168_v6, 2  ;;  %v2188_v19 = vpack.c.bf16 %v810_v12, %v809_v11  ;;  %v642_v20 = vrot.slane %v2183_v13, 2  ;;  %v2198_v23 = vsel %vm324_vm1, %v330_v2, %v332_v10  ;;  %v811_v26 = vld [vmem:[%s2459_s3 + $0x10] sm:$0xff]  ;;  %v356_v56 = vld [vmem:[%s2458_s2 + $0x38] sm:$0xff]  ;;  %v775_v57 = vld [vmem:[%s2136_s13] sm:$0xff] }
  0x19   : > { %1599 = vmatprep.mubr.f32.mxu1 %v386_v51  ;;  %v336_v24 = vrot.slane %v313_v15, 6  ;;  %v2201_v25 = vsel %vm324_vm1, %v332_v10, %v334_v14  ;;  %v2210_v28 = vrot.slane %v2094_v31, 6  ;;  %v388_v29 = vsel %vm383_vm3, %v385_v46, %v387_v16  ;;  %v355_v53 = vld [vmem:[%s2458_s2 + $0x30] sm:$0xff]  ;;  %v357_v4 = vld [vmem:[%s2458_s2 + $0x40] sm:$0xff] }
  0x1a   : > { %1778 = vmatpush3.bf16.msra.mxu1 %v1775_v35  ;;  %v389_v30 = vrot.slane %v2183_v13, 1  ;;  %v641_v32 = vsel %vm636_vm2, %v638_v45, %v640_v18  ;;  %v1795_v33 = vpack.c.bf16 %v352_v22, %v351_v21  ;;  %v644_v34 = vrot.slane %v2198_v23, 2  ;;  %v1430_v45 = vld [vmem:[%s2459_s3 + $0x28] sm:$0xff]  ;;  %v777_v8 = vld [vmem:[%s2136_s13 + $0x10] sm:$0xff]  ;;  %v360_v21 = vld [vmem:[%s2458_s2 + $0x58] sm:$0xff] }
  0x1b   : > { %1842 = vmatpush3.bf16.msra.mxu0 %v1839_v37  ;;  %1780 = vmatprep.subr.bf16.mxu1 %v1779_v47  ;;  %v643_v31 = vsel %vm636_vm2, %v640_v18, %v642_v20  ;;  %v646_v35 = vrot.slane %v2201_v25, 2  ;;  %v353_v37 = vld [vmem:[%s2458_s2 + $0x20] sm:$0xff]  ;;  %v2230_v39 = vsel %vm324_vm1, %v334_v14, %v336_v24  ;;  %v2232_v41 = vpack.c.bf16 %v812_v27, %v811_v26  ;;  %v1431_v22 = vld [vmem:[%s2459_s3 + $0x30] sm:$0xff] }
  0x1c   : > { %1844 = vmatprep.subr.bf16.mxu0 %v1843_v52  ;;  %v2236_v42 = vsel %vm324_vm1, %v336_v24, %v2210_v28  ;;  %v391_v43 = vrot.slane %v2198_v23, 1  ;;  %v390_v46 = vsel %vm383_vm3, %v387_v16, %v389_v30  ;;  %v645_v48 = vsel %vm636_vm2, %v642_v20, %v644_v34  ;;  %v778_v16 = vld [vmem:[%s2136_s13 + $0x18] sm:$0xff]  ;;  %v359_v20 = vld [vmem:[%s2458_s2 + $0x50] sm:$0xff]  ;;  %v779_v26 = vld [vmem:[%s2136_s13 + $0x20] sm:$0xff] }
  0x1d   : > { %v1799_v49 = vpack.c.bf16 %v354_v38, %v353_v37  ;;  %v648_v50 = vrot.slane %v2230_v39, 2  ;;  %v647_v51 = vsel %vm636_vm2, %v644_v34, %v646_v35  ;;  %v2260_v58 = vpack.c.bf16 %v1430_v45, %v1429_v44  ;;  %v362_v37 = vld [vmem:[%s2458_s2 + $0x68] sm:$0xff] }
  0x1e   : > { %1782 = vmatpush3.bf16.msra.mxu1 %v1779_v47  ;;  %v393_v47 = vrot.slane %v2201_v25, 1  ;;  %v395_v60 = vrot.slane %v2230_v39, 1  ;;  %v397_v62 = vrot.slane %v2236_v42, 1  ;;  %v1803_v0 = vpack.c.bf16 %v356_v56, %v355_v53  ;;  %v1442_v44 = vld [vmem:[%s2459_s3 + $0x48] sm:$0xff] }
  0x1f   : > { %1846 = vmatpush3.bf16.msra.mxu0 %v1843_v52  ;;  %1784 = vmatprep.subr.bf16.mxu1 %v1783_v59  ;;  %v650_v52 = vrot.slane %v2236_v42, 2  ;;  %v649_v63 = vsel %vm636_vm2, %v646_v35, %v648_v50  ;;  %v652_v1 = vrot.slane %v2210_v28, 2  ;;  %v792_v3 = vrot.slane %v775_v57, 6  ;;  %v361_v35 = vld [vmem:[%s2458_s2 + $0x60] sm:$0xff]  ;;  %v364_v57 = vld [vmem:[%s2458_s2 + $0x78] sm:$0xff] }
  0x20   : > { %1848 = vmatprep.subr.bf16.mxu0 %v1847_v61  ;;  %v396_v9 = vsel %vm383_vm3, %v393_v47, %v395_v60  ;;  %v399_v10 = vrot.slane %v2210_v28, 1  ;;  %v398_v11 = vsel %vm383_vm3, %v395_v60, %v397_v62  ;;  %v795_v18 = vrot.slane %v777_v8, 6  ;;  %v780_v28 = vld [vmem:[%s2136_s13 + $0x28] sm:$0xff]  ;;  %v1444_v60 = vld [vmem:[%s2459_s3 + $0x58] sm:$0xff] }
  0x21   : > { %v651_v2 = vsel %vm636_vm2, %v648_v50, %v650_v52  ;;  %v653_v12 = vsel %vm636_vm2, %v650_v52, %v652_v1  ;;  %v797_v27 = vrot.slane %v778_v16, 6  ;;  %v799_v38 = vrot.slane %v779_v26, 6  ;;  %v363_v52 = vld [vmem:[%s2458_s2 + $0x70] sm:$0xff] }
  0x22   : > { %1786 = vmatpush3.bf16.msra.mxu1 %v1783_v59  ;;  %v392_v59 = vsel %vm383_vm3, %v389_v30, %v391_v43  ;;  %v400_v24 = vsel %vm383_vm3, %v397_v62, %v399_v10  ;;  %v801_v45 = vrot.slane %v780_v28, 6  ;;  %v1815_v50 = vpack.c.bf16 %v362_v37, %v361_v35  ;;  %v1453_v37 = vld [vmem:[%s2460_s4] ss:$0 sm:$0xff] }
  0x23   : > { %1850 = vmatpush3.bf16.msra.mxu0 %v1847_v61  ;;  %1788 = vmatprep.subr.bf16.mxu1 %v1787_v5  ;;  %v394_v61 = vsel %vm383_vm3, %v391_v43, %v393_v47  ;;  %v1441_v43 = vld [vmem:[%s2459_s3 + $0x40] sm:$0xff]  ;;  %v2330_v47 = vsel %vm324_vm1, %v795_v18, %v797_v27  ;;  %v2342_v53 = vsel %vm324_vm1, %v797_v27, %v799_v38 }
  0x24   : > { %1852 = vmatprep.subr.bf16.mxu0 %v1851_v7  ;;  %v1819_v1 = vpack.c.bf16 %v364_v57, %v363_v52 }
  0x26   : > { %1790 = vmatpush3.bf16.msra.mxu1 %v1787_v5  ;;  %v358_v5 = vld [vmem:[%s2458_s2 + $0x48] sm:$0xff] }
  0x27   : > { %1854 = vmatpush3.bf16.msra.mxu0 %v1851_v7  ;;  %1792 = vmatprep.subr.bf16.mxu1 %v1791_v17  ;;  %v776_v7 = vld [vmem:[%s2136_s13 + $0x8] sm:$0xff]  ;;  %v1807_v14 = vpack.c.bf16 %v358_v5, %v357_v4 }
  0x28   : > { %1856 = vmatprep.subr.bf16.mxu0 %v2188_v19  ;;  %v793_v15 = vrot.slane %v776_v7, 6 }
  0x29   : > { %1600 = vmatmul.mubr.f32.vlgmr.msra.gmra.mrb[0].mxu1 %v388_v29 }
  0x2a   : > { %1688 = vmatmul.mubr.f32.vlgmr.msra.gmra.mrb[0].mxu0 %v641_v32  ;;  %1794 = vmatpush3.bf16.msra.mxu1 %v1791_v17  ;;  %v2286_v17 = vsel %vm324_vm1, %v2142_v55, %v792_v3  ;;  %v1432_v55 = vld [vmem:[%s2459_s3 + $0x38] sm:$0xff]  ;;  %v2307_v30 = vsel %vm324_vm1, %v792_v3, %v793_v15  ;;  %v1811_v32 = vpack.c.bf16 %v360_v21, %v359_v20 }
  0x2b   : > { %1690 = vmatprep.mubr.f32.mxu0 %v643_v31  ;;  %1858 = vmatpush3.bf16.msra.mxu0 %v2188_v19  ;;  %v949_v29 = vrot.slane %v2286_v17, 1  ;;  %v1867_v34 = vpack.c.bf16 %v1432_v55, %v1431_v22  ;;  %v950_v31 = vrot.slane %v2307_v30, 1 }
  0x2c   : > { %1796 = vmatprep.subr.bf16.mxu1 %v1795_v33  ;;  %1860 = vmatprep.subr.bf16.mxu0 %v2232_v41 }
  0x2d   : > { %1602 = vmatprep.mubr.f32.mxu1 %v390_v46  ;;  %v781_v46 = vld [vmem:[%s2136_s13 + $0x30] sm:$0xff] }
  0x2e   : > { %1691 = vmatmul.mubr.f32.gmra.mrb[2].mxu0 %v645_v48  ;;  %1798 = vmatpush3.bf16.msra.mxu1 %v1795_v33  ;;  %v2310_v33 = vsel %vm324_vm1, %v793_v15, %v795_v18  ;;  %v803_v56 = vrot.slane %v781_v46, 6  ;;  %v1101_v15 = vrot.slane %v2307_v30, 2 }
  0x2f   : > { %1693 = vmatprep.mubr.f32.mxu0 %v647_v51  ;;  %1800 = vmatprep.subr.bf16.mxu1 %v1799_v49  ;;  %v952_v48 = vrot.slane %v2310_v33, 1  ;;  %v1871_v51 = vpack.c.bf16 %v1442_v44, %v1441_v43  ;;  %v1103_v16 = vrot.slane %v2310_v33, 2 }
  0x30   : > { %1862 = vmatpush3.bf16.msra.mxu0 %v2232_v41  ;;  %1603 = vmatmul.mubr.f32.gmra.mrb[2].mxu1 %v392_v59  ;;  %v1443_v59 = vld [vmem:[%s2459_s3 + $0x50] sm:$0xff] }
  0x31   : > { %1864 = vmatprep.subr.bf16.mxu0 %v2260_v58  ;;  %1605 = vmatprep.mubr.f32.mxu1 %v394_v61  ;;  %v2357_v61 = vrot.slane %v2140_v54, 6  ;;  %v953_v62 = vsel %vm383_vm3, %v950_v31, %v952_v48  ;;  %v804_v54 = vsel %vm324_vm1, %v801_v45, %v803_v56  ;;  %v1875_v3 = vpack.c.bf16 %v1444_v60, %v1443_v59 }
  0x32   : > { %1694 = vmatmul.mubr.f32.gmra.mrb[4].mxu0 %v649_v63  ;;  %1802 = vmatpush3.bf16.msra.mxu1 %v1799_v49  ;;  %v954_v49 = vrot.slane %v2330_v47, 1  ;;  %v960_v7 = vrot.slane %v804_v54, 1 }
  0x33   : > { %1696 = vmatprep.mubr.f32.mxu0 %v651_v2  ;;  %1804 = vmatprep.subr.bf16.mxu1 %v1803_v0  ;;  %v806_v4 = vsel %vm324_vm1, %v803_v56, %v2357_v61 }
  0x34   : > { %1606 = vmatmul.mubr.f32.gmra.mrb[4].mxu1 %v396_v9  ;;  %v955_v63 = vsel %vm383_vm3, %v952_v48, %v954_v49  ;;  %v962_v9 = vrot.slane %v806_v4, 1 }
  0x35   : > { %1608 = vmatprep.mubr.f32.mxu1 %v398_v11  ;;  %v964_v11 = vrot.slane %v2357_v61, 1 }
  0x36   : > { %1697 = vmatmul.mubr.f32.gmra.mrb[6].mxu0 %v653_v12  ;;  %1806 = vmatpush3.bf16.msra.mxu1 %v1803_v0  ;;  %v956_v0 = vrot.slane %v2342_v53, 1  ;;  %v1100_v12 = vrot.slane %v2286_v17, 2 }
  0x37   : > { %1707 = vmatprep.mubr.msk.f32.mxu0 %vm813_vm5, %v2286_v17  ;;  %1808 = vmatprep.subr.bf16.mxu1 %v1807_v14  ;;  %v965_v18 = vsel %vm383_vm3, %v962_v9, %v964_v11  ;;  %v1105_v17 = vrot.slane %v2330_v47, 2 }
  0x38   : > { %1609 = vmatmul.mubr.f32.gmra.mrb[6].mxu1 %v400_v24  ;;  %v957_v5 = vsel %vm383_vm3, %v954_v49, %v956_v0  ;;  %v1102_v20 = vsel %vm636_vm2, %v1100_v12, %v1101_v15 }
  0x39   : > { %1643 = vmatprep.mubr.f32.mxu1 %v2099_v36  ;;  %v951_v36 = vsel %vm383_vm3, %v949_v29, %v950_v31 }
  0x3a   : > { %1708 = vmatmul.mubr.msk.f32.vlgmr.msra.gmra.mrb[0].mxu0 %vm813_vm5, %v2307_v30  ;;  %1810 = vmatpush3.bf16.msra.mxu1 %v1807_v14  ;;  %v963_v14 = vsel %vm383_vm3, %v960_v7, %v962_v9 }
  0x3b   : > { %1866 = vmatpush3.bf16.msra.mxu0 %v2260_v58  ;;  %1710 = vmatprep.mubr.msk.f32.mxu0 %vm813_vm5, %v2310_v33  ;;  %v2348_v58 = vsel %vm324_vm1, %v799_v38, %v801_v45 }
  0x3c   : > { %1812 = vmatprep.subr.bf16.mxu1 %v1811_v32  ;;  %1868 = vmatprep.subr.bf16.mxu0 %v1867_v34  ;;  %v958_v2 = vrot.slane %v2348_v58, 1  ;;  %v1109_v21 = vrot.slane %v2348_v58, 2 }
  0x3e   : > { %1711 = vmatmul.mubr.msk.f32.gmra.mrb[2].mxu0 %vm813_vm5, %v2330_v47  ;;  %1814 = vmatpush3.bf16.msra.mxu1 %v1811_v32  ;;  %v959_v8 = vsel %vm383_vm3, %v956_v0, %v958_v2  ;;  %v961_v10 = vsel %vm383_vm3, %v958_v2, %v960_v7 }
  0x3f   : > { %1870 = vmatpush3.bf16.msra.mxu0 %v1867_v34  ;;  %1727 = vmatprep.mubr.msk.f32.mxu0 %vm813_vm5, %v951_v36 }
  0x40   : > { %1816 = vmatprep.subr.bf16.mxu1 %v1815_v50  ;;  %1872 = vmatprep.subr.bf16.mxu0 %v1871_v51 }
  0x42   : > { %1728 = vmatmul.mubr.msk.f32.vlgmr.msra.gmra.mrb[0].mxu0 %vm813_vm5, %v953_v62  ;;  %1818 = vmatpush3.bf16.msra.mxu1 %v1815_v50 }
  0x43   : > { %1730 = vmatprep.mubr.msk.f32.mxu0 %vm813_vm5, %v955_v63  ;;  %1874 = vmatpush3.bf16.msra.mxu0 %v1871_v51 }
  0x44   : > { %1820 = vmatprep.subr.bf16.mxu1 %v1819_v1  ;;  %1876 = vmatprep.subr.bf16.mxu0 %v1875_v3 }
  0x46   : > { %1731 = vmatmul.mubr.msk.f32.gmra.mrb[2].mxu0 %vm813_vm5, %v957_v5  ;;  %1822 = vmatpush3.bf16.msra.mxu1 %v1819_v1 }
  0x47   : > { %1733 = vmatprep.mubr.msk.f32.mxu0 %vm813_vm5, %v959_v8  ;;  %1879 = vmatprep.subr.bf16.mxu1 %v2188_v19 }
  0x48   : > { %1878 = vmatpush3.bf16.msra.mxu0 %v1875_v3 }
  0x49   : > { %1644 = vmatmul.mubr.f32.vlgmr.msra.gmra.mrb[0].mxu1 %v2108_v40  ;;  %v1104_v40 = vsel %vm636_vm2, %v1101_v15, %v1103_v16 }
  0x4a   : > { %1734 = vmatmul.mubr.msk.f32.gmra.mrb[8].mxu0 %vm813_vm5, %v961_v10  ;;  %1881 = vmatpush3.bf16.msra.mxu1 %v2188_v19  ;;  %v1106_v19 = vsel %vm636_vm2, %v1103_v16, %v1105_v17 }
  0x4b   : > { %1646 = vmatprep.mubr.f32.mxu1 %v2168_v6  ;;  %1736 = vmatprep.mubr.msk.f32.mxu0 %vm813_vm5, %v963_v14  ;;  %v1107_v6 = vrot.slane %v2342_v53, 2 }
  0x4c   : > { %1880 = vmatprep.subr.bf16.mxu1 %v2232_v41 }
  0x4d   : > { %1647 = vmatmul.mubr.f32.gmra.mrb[2].mxu1 %v2183_v13  ;;  %v1108_v13 = vsel %vm636_vm2, %v1105_v17, %v1107_v6  ;;  %v1110_v22 = vsel %vm636_vm2, %v1107_v6, %v1109_v21 }
  0x4e   : > { %1737 = vmatmul.mubr.msk.f32.gmra.mrb[10].mxu0 %vm813_vm5, %v965_v18  ;;  %1649 = vmatprep.mubr.f32.mxu1 %v2198_v23  ;;  %v1111_v23 = vrot.slane %v804_v54, 2 }
  0x4f   : > { %1747 = vmatprep.mubr.msk.f32.mxu0 %vm813_vm5, %v1102_v20  ;;  %1882 = vmatpush3.bf16.msra.mxu1 %v2232_v41  ;;  %v1113_v41 = vrot.slane %v806_v4, 2 }
  0x51   : > { %1650 = vmatmul.mubr.f32.gmra.mrb[4].mxu1 %v2201_v25  ;;  %v1112_v25 = vsel %vm636_vm2, %v1109_v21, %v1111_v23  ;;  %v1114_v55 = vsel %vm636_vm2, %v1111_v23, %v1113_v41 }
  0x52   : > { %1748 = vmatmul.mubr.msk.f32.vlgmr.msra.gmra.mrb[0].mxu0 %vm813_vm5, %v1104_v40  ;;  %1652 = vmatprep.mubr.f32.mxu1 %v2230_v39  ;;  %v1115_v39 = vrot.slane %v2357_v61, 2 }
  0x53   : > { %1750 = vmatprep.mubr.msk.f32.mxu0 %vm813_vm5, %v1106_v19 }
  0x55   : > { %1653 = vmatmul.mubr.f32.gmra.mrb[6].mxu1 %v2236_v42  ;;  %v1116_v42 = vsel %vm636_vm2, %v1113_v41, %v1115_v39 }
  0x56   : > { %1751 = vmatmul.mubr.msk.f32.gmra.mrb[2].mxu0 %vm813_vm5, %v1108_v13  ;;  %1713 = vmatprep.mubr.msk.f32.mxu1 %vm813_vm5, %v2342_v53 }
  0x57   : > { %1753 = vmatprep.mubr.msk.f32.mxu0 %vm813_vm5, %v1110_v22 }
  0x59   : > { %1714 = vmatmul.mubr.msk.f32.vlgmr.msra.gmra.mrb[8].mxu1 %vm813_vm5, %v2348_v58 }
  0x5a   : > { %1754 = vmatmul.mubr.msk.f32.gmra.mrb[8].mxu0 %vm813_vm5, %v1112_v25  ;;  %1716 = vmatprep.mubr.msk.f32.mxu1 %vm813_vm5, %v804_v54 }
  0x5b   : > { %1756 = vmatprep.mubr.msk.f32.mxu0 %vm813_vm5, %v1114_v55 }
  0x5d   : > { %1717 = vmatmul.mubr.msk.f32.gmra.mrb[10].mxu1 %vm813_vm5, %v806_v4 }
  0x5e   : > { %1757 = vmatmul.mubr.msk.f32.gmra.mrb[10].mxu0 %vm813_vm5, %v1116_v42 }
 0x105   : > { %v1695_v24 = vpop.f32.mrb[4].mxu0 }
 0x106   : > { %v748_v26 = vpop.f32.mrb[5].mxu0 }
 0x109   : > { %v1698_v27 = vpop.f32.mrb[6].mxu0 }
 0x10a   : > { %v758_v28 = vpop.f32.mrb[7].mxu0 }
 0x11c   : > { %v1645_v29 = vpop.f32.mrb[0].mxu1 }
 0x11d   : > { %v580_v30 = vpop.f32.mrb[1].mxu1 }
 0x120   : > { %v1648_v32 = vpop.f32.mrb[2].mxu1 }
 0x121   : > { %v590_v33 = vpop.f32.mrb[3].mxu1 }
 0x124   : > { %v1651_v34 = vpop.f32.mrb[4].mxu1 }
 0x125   : > { %v1887_v31 = vadd.f32 %v1695_v24, %v1651_v34  ;;  %v1749_v35 = vpop.f32.mrb[0].mxu0  ;;  %v600_v38 = vpop.f32.mrb[5].mxu1 }
 0x126   : > { %v1883_v43 = vadd.f32 %v1749_v35, %v1645_v29  ;;  %v1890_v44 = vadd.f32 %v748_v26, %v600_v38  ;;  %v1199_v45 = vpop.f32.mrb[1].mxu0 }
 0x127   : > { %v1884_v46 = vadd.f32 %v1199_v45, %v580_v30 }
 0x128   : > { %v1257_v47 = vadd.f32 %v1883_v43, %v1453_v37  ;;  %v1654_v48 = vpop.f32.mrb[6].mxu1 }
 0x129   : > { %v1256_v49 = vadd.f32 %v1884_v46, %v1453_v37  ;;  %v1893_v50 = vadd.f32 %v1698_v27, %v1654_v48  ;;  %v1752_v36 = vpop.f32.mrb[2].mxu0  ;;  %v610_v51 = vpop.f32.mrb[7].mxu1 }
 0x12a   : > { %1266 = vst.msk [vmem:[%s2429_s30 + $0x8] sm:$0xff] %vm1264_vm6, %v1257_v47  ;;  %v1885_v52 = vadd.f32 %v1752_v36, %v1648_v32  ;;  %v1896_v53 = vadd.f32 %v758_v28, %v610_v51  ;;  %v1209_v56 = vpop.f32.mrb[3].mxu0 }
 0x12b   : > { %1265 = vst.msk [vmem:[%s2429_s30] sm:$0xff] %vm1264_vm6, %v1256_v49  ;;  %v1886_v57 = vadd.f32 %v1209_v56, %v590_v33 }
 0x12c   : > { %v1259_v58 = vadd.f32 %v1885_v52, %v1453_v37  ;;  %v1715_v59 = vpop.f32.mrb[8].mxu1 }
 0x12d   : > { %v1258_v60 = vadd.f32 %v1886_v57, %v1453_v37  ;;  %v1888_v61 = vadd.f32 %v1887_v31, %v1715_v59  ;;  %v1755_v62 = vpop.f32.mrb[8].mxu0  ;;  %v917_v63 = vpop.f32.mrb[9].mxu1 }
 0x12e   : > { %1268 = vst.msk [vmem:[%s2429_s30 + $0x18] sm:$0xff] %vm1264_vm6, %v1259_v58  ;;  %v1891_v0 = vadd.f32 %v1890_v44, %v917_v63  ;;  %v1219_v1 = vpop.f32.mrb[9].mxu0 }
 0x12f   : > { %1267 = vst.msk [vmem:[%s2429_s30 + $0x10] sm:$0xff] %vm1264_vm6, %v1258_v60  ;;  %v1889_v2 = vadd.f32 %v1888_v61, %v1755_v62 }
 0x130   : > { %v1892_v54 = vadd.f32 %v1891_v0, %v1219_v1  ;;  %v1718_v3 = vpop.f32.mrb[10].mxu1 }
 0x131   : > { %v1261_v4 = vadd.f32 %v1889_v2, %v1453_v37  ;;  %v1894_v5 = vadd.f32 %v1893_v50, %v1718_v3  ;;  %v1758_v7 = vpop.f32.mrb[10].mxu0  ;;  %v927_v8 = vpop.f32.mrb[11].mxu1 }
 0x132   : > { %v1260_v9 = vadd.f32 %v1892_v54, %v1453_v37  ;;  %v1897_v10 = vadd.f32 %v1896_v53, %v927_v8  ;;  %v1229_v11 = vpop.f32.mrb[11].mxu0 }
 0x133   : > { %1270 = vst.msk [vmem:[%s2429_s30 + $0x28] sm:$0xff] %vm1264_vm6, %v1261_v4  ;;  %v1895_v12 = vadd.f32 %v1894_v5, %v1758_v7 }
 0x134   : > { %1269 = vst.msk [vmem:[%s2429_s30 + $0x20] sm:$0xff] %vm1264_vm6, %v1260_v9  ;;  %v1898_v14 = vadd.f32 %v1897_v10, %v1229_v11 }
 0x135   : > { %v1263_v15 = vadd.f32 %v1895_v12, %v1453_v37 }
 0x136   : > { %v1262_v16 = vadd.f32 %v1898_v14, %v1453_v37 }
 0x137   : > { %1272 = vst.msk [vmem:[%s2429_s30 + $0x38] sm:$0xff] %vm1264_vm6, %v1263_v15 }
 0x138   : > { %1271 = vst.msk [vmem:[%s2429_s30 + $0x30] sm:$0xff] %vm1264_vm6, %v1262_v16 }
 0x139 PF: > { %s15_s20 = sadd.s32 1, %s1970_s20   ;;  %s2462_s18 = smov %s1966_s19 }
 0x13a   : > { %p12_p5 = scmp.ge.s32.totalorder %s15_s20, 4   ;;  %s2463_s19 = smov %s2465_s21 }
 0x13c   :  { %14 = sbr.rel (!%p12_p5) target bundleno = 2 (0x2), region = 81 }

</bundles_post_ra>
